<compile_context>
chip_gen: v5e
topology: v5e:2x2
jax: 0.10.0
libtpu: 0.0.40
codegen_flags: <defaults>
</compile_context>

<pallas_src>
import functools
import math

import jax
import jax.numpy as jnp
from jax import lax
from jax.experimental import pallas as pl
from jax.experimental.pallas import tpu as pltpu


# ----------------------------------------------------------------------------
# Fused Pallas kernel: whole ConditionNet forward for ONE image per grid step
# ----------------------------------------------------------------------------
def _condition_net_kernel(x_ref,
                          w1_ref, b1_ref, w2_ref, b2_ref,
                          w3_ref, b3_ref, w4_ref, b4_ref,
                          o_ref,
                          s1_ref, sa2_ref, shs_ref, s2_ref, s3_ref,
                          *, H, W, PAD1, PAD2):
    M1 = H * W
    Ph, Pw = H // 2, W // 2
    M2 = Ph * Pw

    # w-boundary masks only (h-boundaries are handled by the zero guard rows
    # around each per-image activation).  Built once per step, reused by both
    # convs at each resolution.
    ww1 = lax.broadcasted_iota(jnp.int32, (M1, 1), 0) % W
    m1_l = (ww1 >= 1).astype(jnp.bfloat16)
    m1_r = (ww1 <= W - 2).astype(jnp.bfloat16)
    ww2 = lax.broadcasted_iota(jnp.int32, (M2, 1), 0) % Pw
    m2_l = (ww2 >= 1).astype(jnp.bfloat16)
    m2_r = (ww2 <= Pw - 2).astype(jnp.bfloat16)

    def conv3x3_relu(src_ref, pad, M, Wc, m_l, m_r, w_ref, b_ref):
        """3x3 'same' conv = in-VMEM im2col ([M, 9*Cin]) + ONE bf16 MXU dot."""
        wins = []
        for dh in (-1, 0, 1):
            for dw in (-1, 0, 1):
                win = src_ref[pl.ds(pad + dh * Wc + dw, M), :]   # [M, Cin] bf16
                if dw == -1:
                    win = win * m_l      # zero taps that wrapped from w = W-1
                elif dw == 1:
                    win = win * m_r      # zero taps that wrapped to w = 0
                wins.append(win)
        col = jnp.concatenate(wins, axis=-1)                     # [M, 9*Cin] bf16
        acc = jnp.dot(col, w_ref[...],
                      preferred_element_type=jnp.float32)        # [M, Cout] f32
        return jnp.maximum(acc + b_ref[...], 0.0)

    def zero_guards(s_ref, pad, M):
        c = s_ref.shape[1]
        s_ref[pl.ds(0, pad), :] = jnp.zeros((pad, c), s_ref.dtype)
        s_ref[pl.ds(pad + M, pad), :] = jnp.zeros((pad, c), s_ref.dtype)

    # Guard rows only (data region is fully overwritten below).
    zero_guards(s1_ref, PAD1, M1)
    zero_guards(s2_ref, PAD2, M2)
    zero_guards(s3_ref, PAD2, M2)

    # conv1 + ReLU (input already guard-row padded + bf16 in the wrapper)
    a1 = conv3x3_relu(x_ref, PAD1, M1, W, m1_l, m1_r, w1_ref, b1_ref)
    s1_ref[pl.ds(PAD1, M1), :] = a1.astype(s1_ref.dtype)

    # conv2 + ReLU
    a2 = conv3x3_relu(s1_ref, PAD1, M1, W, m1_l, m1_r, w2_ref, b2_ref)
    sa2_ref[...] = a2                                            # f32, for pooling

    # 2x2 average pool (stride 2): horizontal pairs via stride-2 row reads,
    # vertical pairs via per-row-block adds, written straight into the
    # guard-padded staging buffer for conv3.
    hsum = (sa2_ref[pl.ds(0, M1 // 2, stride=2), :]
            + sa2_ref[pl.ds(1, M1 // 2, stride=2), :])           # [H*Pw, C] f32
    shs_ref[...] = hsum
    for hp in range(Ph):
        blk = (shs_ref[pl.ds((2 * hp) * Pw, Pw), :]
               + shs_ref[pl.ds((2 * hp + 1) * Pw, Pw), :]) * 0.25
        s2_ref[pl.ds(PAD2 + hp * Pw, Pw), :] = blk.astype(s2_ref.dtype)

    # conv3 + ReLU
    a3 = conv3x3_relu(s2_ref, PAD2, M2, Pw, m2_l, m2_r, w3_ref, b3_ref)
    s3_ref[pl.ds(PAD2, M2), :] = a3.astype(s3_ref.dtype)

    # conv4 + ReLU
    a4 = conv3x3_relu(s3_ref, PAD2, M2, Pw, m2_l, m2_r, w4_ref, b4_ref)

    # Global average pool over the image -> [1, 128] (lane-dense output)
    o_ref[...] = (jnp.sum(a4, axis=0, keepdims=True) * (1.0 / M2)).astype(o_ref.dtype)


# ----------------------------------------------------------------------------
# Wrapper
# ----------------------------------------------------------------------------
def condition_net_forward(params, support_x):
    """support_x: [task_size, support_size*3, h, w] -> [task_size, 128, 1, 1]."""
    B, Cin, H, W = support_x.shape
    assert H % 2 == 0 and W % 2 == 0 and H >= 4 and W >= 4
    Ph, Pw = H // 2, W // 2
    M1, M2 = H * W, Ph * Pw
    PAD1 = ((W + 1 + 7) // 8) * 8        # >= W+1 zero guard rows, 8-aligned
    PAD2 = ((Pw + 1 + 7) // 8) * 8
    cin_p = ((Cin + 7) // 8) * 8

    # NCHW -> per-image flat NHWC rows, zero guard rows, channel pad, bf16
    x = jnp.transpose(support_x, (0, 2, 3, 1)).astype(jnp.float32).reshape(B, M1, Cin)
    x = jnp.pad(x, ((0, 0), (PAD1, PAD1), (0, cin_p - Cin))).astype(jnp.bfloat16)

    def prep_w(w_hwio, cin_pad=None):
        # [3,3,Cin,Cout] -> [9*Cin(_p), Cout] bf16, tap-major / channel-minor
        # (matches the in-kernel im2col concatenation order).
        if cin_pad is not None:
            w_hwio = jnp.pad(w_hwio,
                             ((0, 0), (0, 0), (0, cin_pad - w_hwio.shape[2]), (0, 0)))
        kh, kw, ci, co = w_hwio.shape
        return w_hwio.reshape(kh * kw * ci, co).astype(jnp.bfloat16)

    (w1, b1), (w2, b2) = params["conv1"], params["conv2"]
    (w3, b3), (w4, b4) = params["conv3"], params["conv4"]
    w1p, w2p, w3p, w4p = prep_w(w1, cin_p), prep_w(w2), prep_w(w3), prep_w(w4)
    c1, c2, c3, n_feat = w1p.shape[-1], w2p.shape[-1], w3p.shape[-1], w4p.shape[-1]

    kernel = functools.partial(_condition_net_kernel, H=H, W=W, PAD1=PAD1, PAD2=PAD2)
    operands = (x, w1p, b1, w2p, b2, w3p, b3, w4p, b4)

    def full2d(a):
        return pl.BlockSpec(a.shape, lambda b: (0, 0))   # resident across steps

    out = pl.pallas_call(
        kernel,
        out_shape=jax.ShapeDtypeStruct((B, 1, n_feat), jnp.float32),
        grid=(B,),
        in_specs=[
            pl.BlockSpec((None, M1 + 2 * PAD1, cin_p), lambda b: (b, 0, 0)),
            full2d(w1p), full2d(b1),
            full2d(w2p), full2d(b2),
            full2d(w3p), full2d(b3),
            full2d(w4p), full2d(b4),
        ],
        out_specs=pl.BlockSpec((None, 1, n_feat), lambda b: (b, 0, 0)),
        scratch_shapes=[
            pltpu.VMEM((M1 + 2 * PAD1, c1), jnp.bfloat16),   # a1 staging (guarded)
            pltpu.VMEM((M1, c2), jnp.float32),               # a2 (pool source)
            pltpu.VMEM((M1 // 2, c2), jnp.float32),          # horizontal sums
            pltpu.VMEM((M2 + 2 * PAD2, c2), jnp.bfloat16),   # pooled staging (guarded)
            pltpu.VMEM((M2 + 2 * PAD2, c3), jnp.bfloat16),   # a3 staging (guarded)
        ],
        compiler_params=pltpu.CompilerParams(
            dimension_semantics=("parallel",),
            vmem_limit_bytes=32 * 1024 * 1024,
        ),
    )(*operands)
    return out.reshape(B, n_feat, 1, 1)


# ----------------------------------------------------------------------------
# Parameter init (mirrors get_VGG_condition(conv_index='22') + initialize_weights(0.1):
# kaiming_normal fan_in * 0.1 on conv weights, zero biases).
# ----------------------------------------------------------------------------
def init_params(key, in_channels):
    def conv_init(k, cin, cout):
        std = 0.1 * math.sqrt(2.0 / (cin * 9))
        w = jax.random.normal(k, (3, 3, cin, cout), jnp.float32) * std   # HWIO
        b = jnp.zeros((1, cout), jnp.float32)
        return w, b

    k1, k2, k3, k4 = jax.random.split(key, 4)
    return {"conv1": conv_init(k1, in_channels, 64),
            "conv2": conv_init(k2, 64, 64),
            "conv3": conv_init(k3, 64, 128),
            "conv4": conv_init(k4, 128, 128)}


# ----------------------------------------------------------------------------
# Pure-JAX reference (f32) for a tolerance check of the fused bf16 kernel
# ----------------------------------------------------------------------------
def _reference_forward(params, support_x):
    x = support_x.astype(jnp.float32)

    def conv_relu(x, w, b):
        y = lax.conv_general_dilated(x, w, (1, 1), "SAME",
                                     dimension_numbers=("NCHW", "HWIO", "NCHW"))
        return jax.nn.relu(y + b.reshape(1, -1, 1, 1))

    x = conv_relu(x, *params["conv1"])
    x = conv_relu(x, *params["conv2"])
    B, C, H, W = x.shape
    x = x.reshape(B, C, H // 2, 2, W // 2, 2).mean(axis=(3, 5))   # AvgPool2d(2, 2)
    x = conv_relu(x, *params["conv3"])
    x = conv_relu(x, *params["conv4"])
    return x.mean(axis=(2, 3), keepdims=True)                     # global avg pool


# ----------------------------------------------------------------------------
if __name__ == "__main__":
    key = jax.random.PRNGKey(0)
    kp, kx = jax.random.split(key)

    task_size, support_size, H, W = 2, 2, 16, 16     # small shapes; Cin = 3*support
    in_channels = 3 * support_size
    params = init_params(kp, in_channels)
    support_x = jax.random.normal(kx, (task_size, in_channels, H, W), jnp.float32)

    fwd = jax.jit(functools.partial(condition_net_forward, params))
    out = fwd(support_x)
    jax.block_until_ready(out)
    assert out.shape == (task_size, 128, 1, 1), out.shape
    assert bool(jnp.all(jnp.isfinite(out)))

    ref = _reference_forward(params, support_x)
    rel_err = float(jnp.max(jnp.abs(out - ref)) / (jnp.max(jnp.abs(ref)) + 1e-12))
    assert rel_err < 5e-2, rel_err
    print("KERNEL_OK")
</pallas_src>

<mosaic_0001>
module attributes {stable_mosaic.version = 11 : i64} {
  func.func @_condition_net_kernel(%arg0: i32, %arg1: memref<1x304x8xbf16, #tpu.memory_space<vmem>>, %arg2: memref<72x64xbf16, #tpu.memory_space<vmem>>, %arg3: memref<1x64xf32, #tpu.memory_space<vmem>>, %arg4: memref<576x64xbf16, #tpu.memory_space<vmem>>, %arg5: memref<1x64xf32, #tpu.memory_space<vmem>>, %arg6: memref<576x128xbf16, #tpu.memory_space<vmem>>, %arg7: memref<1x128xf32, #tpu.memory_space<vmem>>, %arg8: memref<1152x128xbf16, #tpu.memory_space<vmem>>, %arg9: memref<1x128xf32, #tpu.memory_space<vmem>>, %arg10: memref<1x1x128xf32, #tpu.memory_space<vmem>>, %arg11: memref<304x64xbf16, #tpu.memory_space<vmem>>, %arg12: memref<256x64xf32, #tpu.memory_space<vmem>>, %arg13: memref<128x64xf32, #tpu.memory_space<vmem>>, %arg14: memref<96x64xbf16, #tpu.memory_space<vmem>>, %arg15: memref<96x128xbf16, #tpu.memory_space<vmem>>) attributes {dimension_semantics = [#tpu.dimension_semantics<parallel>], iteration_bounds = array<i64: 2>, scalar_prefetch = 0 : i64, scratch_operands = 5 : i64, tpu.core_type = #tpu.core_type<tc>, window_params = [{transform_indices = @transform_0, window_bounds = array<i64: 1, 304, 8>}, {pipeline_mode = #tpu.pipeline_mode<synchronous>, transform_indices = @transform_1, window_bounds = array<i64: 72, 64>}, {pipeline_mode = #tpu.pipeline_mode<synchronous>, transform_indices = @transform_2, window_bounds = array<i64: 1, 64>}, {pipeline_mode = #tpu.pipeline_mode<synchronous>, transform_indices = @transform_3, window_bounds = array<i64: 576, 64>}, {pipeline_mode = #tpu.pipeline_mode<synchronous>, transform_indices = @transform_4, window_bounds = array<i64: 1, 64>}, {pipeline_mode = #tpu.pipeline_mode<synchronous>, transform_indices = @transform_5, window_bounds = array<i64: 576, 128>}, {pipeline_mode = #tpu.pipeline_mode<synchronous>, transform_indices = @transform_6, window_bounds = array<i64: 1, 128>}, {pipeline_mode = #tpu.pipeline_mode<synchronous>, transform_indices = @transform_7, window_bounds = array<i64: 1152, 128>}, {pipeline_mode = #tpu.pipeline_mode<synchronous>, transform_indices = @transform_8, window_bounds = array<i64: 1, 128>}, {transform_indices = @transform_9, window_bounds = array<i64: 1, 1, 128>}]} {
    %0 = tpu.iota {dimensions = array<i32: 0>} : vector<256x1xi32>
    %c16_i32 = arith.constant 16 : i32
    %c0_i32 = arith.constant 0 : i32
    %1 = arith.cmpi eq, %c16_i32, %c0_i32 : i32
    %c1_i32 = arith.constant 1 : i32
    %2 = arith.select %1, %c1_i32, %c16_i32 : i32
    %3 = vector.broadcast %2 : i32 to vector<256x1xi32>
    %4 = arith.remsi %0, %3 : vector<256x1xi32>
    %c0_i32_0 = arith.constant 0 : i32
    %5 = vector.broadcast %c0_i32_0 : i32 to vector<256x1xi32>
    %6 = arith.cmpi ne, %4, %5 : vector<256x1xi32>
    %c0_i32_1 = arith.constant 0 : i32
    %7 = vector.broadcast %c0_i32_1 : i32 to vector<256x1xi32>
    %8 = arith.cmpi slt, %4, %7 : vector<256x1xi32>
    %c0_i32_2 = arith.constant 0 : i32
    %9 = arith.cmpi slt, %2, %c0_i32_2 : i32
    %10 = vector.broadcast %9 : i1 to vector<256x1xi1>
    %11 = vector.broadcast %10 : vector<256x1xi1> to vector<256x1xi1>
    %12 = arith.xori %8, %11 : vector<256x1xi1>
    %13 = arith.andi %12, %6 : vector<256x1xi1>
    %14 = vector.broadcast %2 : i32 to vector<256x1xi32>
    %15 = arith.addi %4, %14 : vector<256x1xi32>
    %16 = arith.select %13, %15, %4 : vector<256x1xi1>, vector<256x1xi32>
    %c1_i32_3 = arith.constant 1 : i32
    %17 = vector.broadcast %c1_i32_3 : i32 to vector<256x1xi32>
    %18 = arith.cmpi sge, %16, %17 : vector<256x1xi32>
    %19 = arith.extui %18 : vector<256x1xi1> to vector<256x1xi32>
    %20 = arith.sitofp %19 : vector<256x1xi32> to vector<256x1xf32>
    %21 = arith.truncf %20 : vector<256x1xf32> to vector<256x1xbf16>
    %c14_i32 = arith.constant 14 : i32
    %22 = vector.broadcast %c14_i32 : i32 to vector<256x1xi32>
    %23 = arith.cmpi sle, %16, %22 : vector<256x1xi32>
    %24 = arith.extui %23 : vector<256x1xi1> to vector<256x1xi32>
    %25 = arith.sitofp %24 : vector<256x1xi32> to vector<256x1xf32>
    %26 = arith.truncf %25 : vector<256x1xf32> to vector<256x1xbf16>
    %27 = tpu.iota {dimensions = array<i32: 0>} : vector<64x1xi32>
    %c8_i32 = arith.constant 8 : i32
    %c0_i32_4 = arith.constant 0 : i32
    %28 = arith.cmpi eq, %c8_i32, %c0_i32_4 : i32
    %c1_i32_5 = arith.constant 1 : i32
    %29 = arith.select %28, %c1_i32_5, %c8_i32 : i32
    %30 = vector.broadcast %29 : i32 to vector<64x1xi32>
    %31 = arith.remsi %27, %30 : vector<64x1xi32>
    %c0_i32_6 = arith.constant 0 : i32
    %32 = vector.broadcast %c0_i32_6 : i32 to vector<64x1xi32>
    %33 = arith.cmpi ne, %31, %32 : vector<64x1xi32>
    %c0_i32_7 = arith.constant 0 : i32
    %34 = vector.broadcast %c0_i32_7 : i32 to vector<64x1xi32>
    %35 = arith.cmpi slt, %31, %34 : vector<64x1xi32>
    %c0_i32_8 = arith.constant 0 : i32
    %36 = arith.cmpi slt, %29, %c0_i32_8 : i32
    %37 = vector.broadcast %36 : i1 to vector<64x1xi1>
    %38 = vector.broadcast %37 : vector<64x1xi1> to vector<64x1xi1>
    %39 = arith.xori %35, %38 : vector<64x1xi1>
    %40 = arith.andi %39, %33 : vector<64x1xi1>
    %41 = vector.broadcast %29 : i32 to vector<64x1xi32>
    %42 = arith.addi %31, %41 : vector<64x1xi32>
    %43 = arith.select %40, %42, %31 : vector<64x1xi1>, vector<64x1xi32>
    %c1_i32_9 = arith.constant 1 : i32
    %44 = vector.broadcast %c1_i32_9 : i32 to vector<64x1xi32>
    %45 = arith.cmpi sge, %43, %44 : vector<64x1xi32>
    %46 = arith.extui %45 : vector<64x1xi1> to vector<64x1xi32>
    %47 = arith.sitofp %46 : vector<64x1xi32> to vector<64x1xf32>
    %48 = arith.truncf %47 : vector<64x1xf32> to vector<64x1xbf16>
    %c6_i32 = arith.constant 6 : i32
    %49 = vector.broadcast %c6_i32 : i32 to vector<64x1xi32>
    %50 = arith.cmpi sle, %43, %49 : vector<64x1xi32>
    %51 = arith.extui %50 : vector<64x1xi1> to vector<64x1xi32>
    %52 = arith.sitofp %51 : vector<64x1xi32> to vector<64x1xf32>
    %53 = arith.truncf %52 : vector<64x1xf32> to vector<64x1xbf16>
    %cst = arith.constant 0.000000e+00 : bf16
    %54 = vector.broadcast %cst : bf16 to vector<24x64xbf16>
    %c0 = arith.constant 0 : index
    %c0_10 = arith.constant 0 : index
    %55 = vector.load %arg11[%c0, %c0_10] : memref<304x64xbf16, #tpu.memory_space<vmem>>, vector<24x64xbf16>
    tpu.vector_store %arg11[%c0, %c0_10], %54 {strides = array<i32>} : memref<304x64xbf16, #tpu.memory_space<vmem>>, vector<24x64xbf16>,
    %cst_11 = arith.constant 0.000000e+00 : bf16
    %56 = vector.broadcast %cst_11 : bf16 to vector<24x64xbf16>
    %c280 = arith.constant 280 : index
    %c0_12 = arith.constant 0 : index
    %57 = vector.load %arg11[%c280, %c0_12] : memref<304x64xbf16, #tpu.memory_space<vmem>>, vector<24x64xbf16>
    tpu.vector_store %arg11[%c280, %c0_12], %56 {strides = array<i32>} : memref<304x64xbf16, #tpu.memory_space<vmem>>, vector<24x64xbf16>,
    %cst_13 = arith.constant 0.000000e+00 : bf16
    %58 = vector.broadcast %cst_13 : bf16 to vector<16x64xbf16>
    %c0_14 = arith.constant 0 : index
    %c0_15 = arith.constant 0 : index
    %59 = vector.load %arg14[%c0_14, %c0_15] : memref<96x64xbf16, #tpu.memory_space<vmem>>, vector<16x64xbf16>
    tpu.vector_store %arg14[%c0_14, %c0_15], %58 {strides = array<i32>} : memref<96x64xbf16, #tpu.memory_space<vmem>>, vector<16x64xbf16>,
    %cst_16 = arith.constant 0.000000e+00 : bf16
    %60 = vector.broadcast %cst_16 : bf16 to vector<16x64xbf16>
    %c80 = arith.constant 80 : index
    %c0_17 = arith.constant 0 : index
    %61 = vector.load %arg14[%c80, %c0_17] : memref<96x64xbf16, #tpu.memory_space<vmem>>, vector<16x64xbf16>
    tpu.vector_store %arg14[%c80, %c0_17], %60 {strides = array<i32>} : memref<96x64xbf16, #tpu.memory_space<vmem>>, vector<16x64xbf16>,
    %cst_18 = arith.constant 0.000000e+00 : bf16
    %62 = vector.broadcast %cst_18 : bf16 to vector<16x128xbf16>
    %c0_19 = arith.constant 0 : index
    %c0_20 = arith.constant 0 : index
    %63 = vector.load %arg15[%c0_19, %c0_20] : memref<96x128xbf16, #tpu.memory_space<vmem>>, vector<16x128xbf16>
    tpu.vector_store %arg15[%c0_19, %c0_20], %62 {strides = array<i32>} : memref<96x128xbf16, #tpu.memory_space<vmem>>, vector<16x128xbf16>,
    %cst_21 = arith.constant 0.000000e+00 : bf16
    %64 = vector.broadcast %cst_21 : bf16 to vector<16x128xbf16>
    %c80_22 = arith.constant 80 : index
    %c0_23 = arith.constant 0 : index
    %65 = vector.load %arg15[%c80_22, %c0_23] : memref<96x128xbf16, #tpu.memory_space<vmem>>, vector<16x128xbf16>
    tpu.vector_store %arg15[%c80_22, %c0_23], %64 {strides = array<i32>} : memref<96x128xbf16, #tpu.memory_space<vmem>>, vector<16x128xbf16>,
    %c0_24 = arith.constant 0 : index
    %c7 = arith.constant 7 : index
    %c0_25 = arith.constant 0 : index
    %66 = vector.load %arg1[%c0_24, %c7, %c0_25] : memref<1x304x8xbf16, #tpu.memory_space<vmem>>, vector<1x256x8xbf16>
    %67 = vector.shape_cast %66 : vector<1x256x8xbf16> to vector<256x8xbf16>
    %68 = vector.broadcast %21 : vector<256x1xbf16> to vector<256x8xbf16>
    %69 = arith.mulf %67, %68 : vector<256x8xbf16>
    %c0_26 = arith.constant 0 : index
    %c8 = arith.constant 8 : index
    %c0_27 = arith.constant 0 : index
    %70 = vector.load %arg1[%c0_26, %c8, %c0_27] : memref<1x304x8xbf16, #tpu.memory_space<vmem>>, vector<1x256x8xbf16>
    %71 = vector.shape_cast %70 : vector<1x256x8xbf16> to vector<256x8xbf16>
    %c0_28 = arith.constant 0 : index
    %c9 = arith.constant 9 : index
    %c0_29 = arith.constant 0 : index
    %72 = vector.load %arg1[%c0_28, %c9, %c0_29] : memref<1x304x8xbf16, #tpu.memory_space<vmem>>, vector<1x256x8xbf16>
    %73 = vector.shape_cast %72 : vector<1x256x8xbf16> to vector<256x8xbf16>
    %74 = vector.broadcast %26 : vector<256x1xbf16> to vector<256x8xbf16>
    %75 = arith.mulf %73, %74 : vector<256x8xbf16>
    %c0_30 = arith.constant 0 : index
    %c23 = arith.constant 23 : index
    %c0_31 = arith.constant 0 : index
    %76 = vector.load %arg1[%c0_30, %c23, %c0_31] : memref<1x304x8xbf16, #tpu.memory_space<vmem>>, vector<1x256x8xbf16>
    %77 = vector.shape_cast %76 : vector<1x256x8xbf16> to vector<256x8xbf16>
    %78 = vector.broadcast %21 : vector<256x1xbf16> to vector<256x8xbf16>
    %79 = arith.mulf %77, %78 : vector<256x8xbf16>
    %c0_32 = arith.constant 0 : index
    %c24 = arith.constant 24 : index
    %c0_33 = arith.constant 0 : index
    %80 = vector.load %arg1[%c0_32, %c24, %c0_33] : memref<1x304x8xbf16, #tpu.memory_space<vmem>>, vector<1x256x8xbf16>
    %81 = vector.shape_cast %80 : vector<1x256x8xbf16> to vector<256x8xbf16>
    %c0_34 = arith.constant 0 : index
    %c25 = arith.constant 25 : index
    %c0_35 = arith.constant 0 : index
    %82 = vector.load %arg1[%c0_34, %c25, %c0_35] : memref<1x304x8xbf16, #tpu.memory_space<vmem>>, vector<1x256x8xbf16>
    %83 = vector.shape_cast %82 : vector<1x256x8xbf16> to vector<256x8xbf16>
    %84 = vector.broadcast %26 : vector<256x1xbf16> to vector<256x8xbf16>
    %85 = arith.mulf %83, %84 : vector<256x8xbf16>
    %c0_36 = arith.constant 0 : index
    %c39 = arith.constant 39 : index
    %c0_37 = arith.constant 0 : index
    %86 = vector.load %arg1[%c0_36, %c39, %c0_37] : memref<1x304x8xbf16, #tpu.memory_space<vmem>>, vector<1x256x8xbf16>
    %87 = vector.shape_cast %86 : vector<1x256x8xbf16> to vector<256x8xbf16>
    %88 = vector.broadcast %21 : vector<256x1xbf16> to vector<256x8xbf16>
    %89 = arith.mulf %87, %88 : vector<256x8xbf16>
    %c0_38 = arith.constant 0 : index
    %c40 = arith.constant 40 : index
    %c0_39 = arith.constant 0 : index
    %90 = vector.load %arg1[%c0_38, %c40, %c0_39] : memref<1x304x8xbf16, #tpu.memory_space<vmem>>, vector<1x256x8xbf16>
    %91 = vector.shape_cast %90 : vector<1x256x8xbf16> to vector<256x8xbf16>
    %c0_40 = arith.constant 0 : index
    %c41 = arith.constant 41 : index
    %c0_41 = arith.constant 0 : index
    %92 = vector.load %arg1[%c0_40, %c41, %c0_41] : memref<1x304x8xbf16, #tpu.memory_space<vmem>>, vector<1x256x8xbf16>
    %93 = vector.shape_cast %92 : vector<1x256x8xbf16> to vector<256x8xbf16>
    %94 = vector.broadcast %26 : vector<256x1xbf16> to vector<256x8xbf16>
    %95 = arith.mulf %93, %94 : vector<256x8xbf16>
    %96 = tpu.concatenate %69, %71, %75, %79, %81, %85, %89, %91, %95 in 1 : vector<256x8xbf16>, vector<256x8xbf16>, vector<256x8xbf16>, vector<256x8xbf16>, vector<256x8xbf16>, vector<256x8xbf16>, vector<256x8xbf16>, vector<256x8xbf16>, vector<256x8xbf16> -> vector<256x72xbf16>
    %c0_42 = arith.constant 0 : index
    %c0_43 = arith.constant 0 : index
    %97 = vector.load %arg2[%c0_42, %c0_43] : memref<72x64xbf16, #tpu.memory_space<vmem>>, vector<72x64xbf16>
    %cst_44 = arith.constant dense<0.000000e+00> : vector<256x64xf32>
    %98 = tpu.matmul %96, %97, %cst_44 {dimension_numbers = #tpu.dot_dimension_numbers<[1], [0], [0], [1], [0, 0, 1, 1], [], []>} : vector<256x72xbf16>, vector<72x64xbf16>, vector<256x64xf32> -> vector<256x64xf32>
    %c0_45 = arith.constant 0 : index
    %c0_46 = arith.constant 0 : index
    %99 = vector.load %arg3[%c0_45, %c0_46] : memref<1x64xf32, #tpu.memory_space<vmem>>, vector<1x64xf32>
    %100 = vector.broadcast %99 : vector<1x64xf32> to vector<256x64xf32>
    %101 = arith.addf %98, %100 : vector<256x64xf32>
    %cst_47 = arith.constant 0.000000e+00 : f32
    %102 = vector.broadcast %cst_47 : f32 to vector<256x64xf32>
    %103 = arith.maximumf %101, %102 : vector<256x64xf32>
    %104 = arith.truncf %103 : vector<256x64xf32> to vector<256x64xbf16>
    %c24_48 = arith.constant 24 : index
    %c0_49 = arith.constant 0 : index
    %105 = vector.load %arg11[%c24_48, %c0_49] : memref<304x64xbf16, #tpu.memory_space<vmem>>, vector<256x64xbf16>
    tpu.vector_store %arg11[%c24_48, %c0_49], %104 {strides = array<i32>} : memref<304x64xbf16, #tpu.memory_space<vmem>>, vector<256x64xbf16>,
    %c7_50 = arith.constant 7 : index
    %c0_51 = arith.constant 0 : index
    %106 = vector.load %arg11[%c7_50, %c0_51] : memref<304x64xbf16, #tpu.memory_space<vmem>>, vector<256x64xbf16>
    %107 = vector.broadcast %21 : vector<256x1xbf16> to vector<256x64xbf16>
    %108 = arith.mulf %106, %107 : vector<256x64xbf16>
    %c8_52 = arith.constant 8 : index
    %c0_53 = arith.constant 0 : index
    %109 = vector.load %arg11[%c8_52, %c0_53] : memref<304x64xbf16, #tpu.memory_space<vmem>>, vector<256x64xbf16>
    %c9_54 = arith.constant 9 : index
    %c0_55 = arith.constant 0 : index
    %110 = vector.load %arg11[%c9_54, %c0_55] : memref<304x64xbf16, #tpu.memory_space<vmem>>, vector<256x64xbf16>
    %111 = vector.broadcast %26 : vector<256x1xbf16> to vector<256x64xbf16>
    %112 = arith.mulf %110, %111 : vector<256x64xbf16>
    %c23_56 = arith.constant 23 : index
    %c0_57 = arith.constant 0 : index
    %113 = vector.load %arg11[%c23_56, %c0_57] : memref<304x64xbf16, #tpu.memory_space<vmem>>, vector<256x64xbf16>
    %114 = vector.broadcast %21 : vector<256x1xbf16> to vector<256x64xbf16>
    %115 = arith.mulf %113, %114 : vector<256x64xbf16>
    %c24_58 = arith.constant 24 : index
    %c0_59 = arith.constant 0 : index
    %116 = vector.load %arg11[%c24_58, %c0_59] : memref<304x64xbf16, #tpu.memory_space<vmem>>, vector<256x64xbf16>
    %c25_60 = arith.constant 25 : index
    %c0_61 = arith.constant 0 : index
    %117 = vector.load %arg11[%c25_60, %c0_61] : memref<304x64xbf16, #tpu.memory_space<vmem>>, vector<256x64xbf16>
    %118 = vector.broadcast %26 : vector<256x1xbf16> to vector<256x64xbf16>
    %119 = arith.mulf %117, %118 : vector<256x64xbf16>
    %c39_62 = arith.constant 39 : index
    %c0_63 = arith.constant 0 : index
    %120 = vector.load %arg11[%c39_62, %c0_63] : memref<304x64xbf16, #tpu.memory_space<vmem>>, vector<256x64xbf16>
    %121 = vector.broadcast %21 : vector<256x1xbf16> to vector<256x64xbf16>
    %122 = arith.mulf %120, %121 : vector<256x64xbf16>
    %c40_64 = arith.constant 40 : index
    %c0_65 = arith.constant 0 : index
    %123 = vector.load %arg11[%c40_64, %c0_65] : memref<304x64xbf16, #tpu.memory_space<vmem>>, vector<256x64xbf16>
    %c41_66 = arith.constant 41 : index
    %c0_67 = arith.constant 0 : index
    %124 = vector.load %arg11[%c41_66, %c0_67] : memref<304x64xbf16, #tpu.memory_space<vmem>>, vector<256x64xbf16>
    %125 = vector.broadcast %26 : vector<256x1xbf16> to vector<256x64xbf16>
    %126 = arith.mulf %124, %125 : vector<256x64xbf16>
    %127 = tpu.concatenate %108, %109, %112, %115, %116, %119, %122, %123, %126 in 1 : vector<256x64xbf16>, vector<256x64xbf16>, vector<256x64xbf16>, vector<256x64xbf16>, vector<256x64xbf16>, vector<256x64xbf16>, vector<256x64xbf16>, vector<256x64xbf16>, vector<256x64xbf16> -> vector<256x576xbf16>
    %c0_68 = arith.constant 0 : index
    %c0_69 = arith.constant 0 : index
    %128 = vector.load %arg4[%c0_68, %c0_69] : memref<576x64xbf16, #tpu.memory_space<vmem>>, vector<576x64xbf16>
    %cst_70 = arith.constant dense<0.000000e+00> : vector<256x64xf32>
    %129 = tpu.matmul %127, %128, %cst_70 {dimension_numbers = #tpu.dot_dimension_numbers<[1], [0], [0], [1], [0, 0, 1, 1], [], []>} : vector<256x576xbf16>, vector<576x64xbf16>, vector<256x64xf32> -> vector<256x64xf32>
    %c0_71 = arith.constant 0 : index
    %c0_72 = arith.constant 0 : index
    %130 = vector.load %arg5[%c0_71, %c0_72] : memref<1x64xf32, #tpu.memory_space<vmem>>, vector<1x64xf32>
    %131 = vector.broadcast %130 : vector<1x64xf32> to vector<256x64xf32>
    %132 = arith.addf %129, %131 : vector<256x64xf32>
    %cst_73 = arith.constant 0.000000e+00 : f32
    %133 = vector.broadcast %cst_73 : f32 to vector<256x64xf32>
    %134 = arith.maximumf %132, %133 : vector<256x64xf32>
    %c0_74 = arith.constant 0 : index
    %c0_75 = arith.constant 0 : index
    %135 = vector.load %arg12[%c0_74, %c0_75] : memref<256x64xf32, #tpu.memory_space<vmem>>, vector<256x64xf32>
    tpu.vector_store %arg12[%c0_74, %c0_75], %134 {strides = array<i32>} : memref<256x64xf32, #tpu.memory_space<vmem>>, vector<256x64xf32>,
    %c0_76 = arith.constant 0 : index
    %c0_77 = arith.constant 0 : index
    %136 = tpu.strided_load %arg12[%c0_76, %c0_77] {strides = array<i32: 2, 1>} : memref<256x64xf32, #tpu.memory_space<vmem>>, vector<128x64xf32>
    %c1 = arith.constant 1 : index
    %c0_78 = arith.constant 0 : index
    %137 = tpu.strided_load %arg12[%c1, %c0_78] {strides = array<i32: 2, 1>} : memref<256x64xf32, #tpu.memory_space<vmem>>, vector<128x64xf32>
    %138 = arith.addf %136, %137 : vector<128x64xf32>
    %c0_79 = arith.constant 0 : index
    %c0_80 = arith.constant 0 : index
    %139 = vector.load %arg13[%c0_79, %c0_80] : memref<128x64xf32, #tpu.memory_space<vmem>>, vector<128x64xf32>
    tpu.vector_store %arg13[%c0_79, %c0_80], %138 {strides = array<i32>} : memref<128x64xf32, #tpu.memory_space<vmem>>, vector<128x64xf32>,
    %c0_81 = arith.constant 0 : index
    %c0_82 = arith.constant 0 : index
    %140 = vector.load %arg13[%c0_81, %c0_82] : memref<128x64xf32, #tpu.memory_space<vmem>>, vector<8x64xf32>
    %c8_83 = arith.constant 8 : index
    %c0_84 = arith.constant 0 : index
    %141 = vector.load %arg13[%c8_83, %c0_84] : memref<128x64xf32, #tpu.memory_space<vmem>>, vector<8x64xf32>
    %142 = arith.addf %140, %141 : vector<8x64xf32>
    %cst_85 = arith.constant 2.500000e-01 : f32
    %143 = vector.broadcast %cst_85 : f32 to vector<8x64xf32>
    %144 = arith.mulf %142, %143 : vector<8x64xf32>
    %145 = arith.truncf %144 : vector<8x64xf32> to vector<8x64xbf16>
    %c16 = arith.constant 16 : index
    %c0_86 = arith.constant 0 : index
    %146 = vector.load %arg14[%c16, %c0_86] : memref<96x64xbf16, #tpu.memory_space<vmem>>, vector<8x64xbf16>
    tpu.vector_store %arg14[%c16, %c0_86], %145 {strides = array<i32>} : memref<96x64xbf16, #tpu.memory_space<vmem>>, vector<8x64xbf16>,
    %c16_87 = arith.constant 16 : index
    %c0_88 = arith.constant 0 : index
    %147 = vector.load %arg13[%c16_87, %c0_88] : memref<128x64xf32, #tpu.memory_space<vmem>>, vector<8x64xf32>
    %c24_89 = arith.constant 24 : index
    %c0_90 = arith.constant 0 : index
    %148 = vector.load %arg13[%c24_89, %c0_90] : memref<128x64xf32, #tpu.memory_space<vmem>>, vector<8x64xf32>
    %149 = arith.addf %147, %148 : vector<8x64xf32>
    %cst_91 = arith.constant 2.500000e-01 : f32
    %150 = vector.broadcast %cst_91 : f32 to vector<8x64xf32>
    %151 = arith.mulf %149, %150 : vector<8x64xf32>
    %152 = arith.truncf %151 : vector<8x64xf32> to vector<8x64xbf16>
    %c24_92 = arith.constant 24 : index
    %c0_93 = arith.constant 0 : index
    %153 = vector.load %arg14[%c24_92, %c0_93] : memref<96x64xbf16, #tpu.memory_space<vmem>>, vector<8x64xbf16>
    tpu.vector_store %arg14[%c24_92, %c0_93], %152 {strides = array<i32>} : memref<96x64xbf16, #tpu.memory_space<vmem>>, vector<8x64xbf16>,
    %c32 = arith.constant 32 : index
    %c0_94 = arith.constant 0 : index
    %154 = vector.load %arg13[%c32, %c0_94] : memref<128x64xf32, #tpu.memory_space<vmem>>, vector<8x64xf32>
    %c40_95 = arith.constant 40 : index
    %c0_96 = arith.constant 0 : index
    %155 = vector.load %arg13[%c40_95, %c0_96] : memref<128x64xf32, #tpu.memory_space<vmem>>, vector<8x64xf32>
    %156 = arith.addf %154, %155 : vector<8x64xf32>
    %cst_97 = arith.constant 2.500000e-01 : f32
    %157 = vector.broadcast %cst_97 : f32 to vector<8x64xf32>
    %158 = arith.mulf %156, %157 : vector<8x64xf32>
    %159 = arith.truncf %158 : vector<8x64xf32> to vector<8x64xbf16>
    %c32_98 = arith.constant 32 : index
    %c0_99 = arith.constant 0 : index
    %160 = vector.load %arg14[%c32_98, %c0_99] : memref<96x64xbf16, #tpu.memory_space<vmem>>, vector<8x64xbf16>
    tpu.vector_store %arg14[%c32_98, %c0_99], %159 {strides = array<i32>} : memref<96x64xbf16, #tpu.memory_space<vmem>>, vector<8x64xbf16>,
    %c48 = arith.constant 48 : index
    %c0_100 = arith.constant 0 : index
    %161 = vector.load %arg13[%c48, %c0_100] : memref<128x64xf32, #tpu.memory_space<vmem>>, vector<8x64xf32>
    %c56 = arith.constant 56 : index
    %c0_101 = arith.constant 0 : index
    %162 = vector.load %arg13[%c56, %c0_101] : memref<128x64xf32, #tpu.memory_space<vmem>>, vector<8x64xf32>
    %163 = arith.addf %161, %162 : vector<8x64xf32>
    %cst_102 = arith.constant 2.500000e-01 : f32
    %164 = vector.broadcast %cst_102 : f32 to vector<8x64xf32>
    %165 = arith.mulf %163, %164 : vector<8x64xf32>
    %166 = arith.truncf %165 : vector<8x64xf32> to vector<8x64xbf16>
    %c40_103 = arith.constant 40 : index
    %c0_104 = arith.constant 0 : index
    %167 = vector.load %arg14[%c40_103, %c0_104] : memref<96x64xbf16, #tpu.memory_space<vmem>>, vector<8x64xbf16>
    tpu.vector_store %arg14[%c40_103, %c0_104], %166 {strides = array<i32>} : memref<96x64xbf16, #tpu.memory_space<vmem>>, vector<8x64xbf16>,
    %c64 = arith.constant 64 : index
    %c0_105 = arith.constant 0 : index
    %168 = vector.load %arg13[%c64, %c0_105] : memref<128x64xf32, #tpu.memory_space<vmem>>, vector<8x64xf32>
    %c72 = arith.constant 72 : index
    %c0_106 = arith.constant 0 : index
    %169 = vector.load %arg13[%c72, %c0_106] : memref<128x64xf32, #tpu.memory_space<vmem>>, vector<8x64xf32>
    %170 = arith.addf %168, %169 : vector<8x64xf32>
    %cst_107 = arith.constant 2.500000e-01 : f32
    %171 = vector.broadcast %cst_107 : f32 to vector<8x64xf32>
    %172 = arith.mulf %170, %171 : vector<8x64xf32>
    %173 = arith.truncf %172 : vector<8x64xf32> to vector<8x64xbf16>
    %c48_108 = arith.constant 48 : index
    %c0_109 = arith.constant 0 : index
    %174 = vector.load %arg14[%c48_108, %c0_109] : memref<96x64xbf16, #tpu.memory_space<vmem>>, vector<8x64xbf16>
    tpu.vector_store %arg14[%c48_108, %c0_109], %173 {strides = array<i32>} : memref<96x64xbf16, #tpu.memory_space<vmem>>, vector<8x64xbf16>,
    %c80_110 = arith.constant 80 : index
    %c0_111 = arith.constant 0 : index
    %175 = vector.load %arg13[%c80_110, %c0_111] : memref<128x64xf32, #tpu.memory_space<vmem>>, vector<8x64xf32>
    %c88 = arith.constant 88 : index
    %c0_112 = arith.constant 0 : index
    %176 = vector.load %arg13[%c88, %c0_112] : memref<128x64xf32, #tpu.memory_space<vmem>>, vector<8x64xf32>
    %177 = arith.addf %175, %176 : vector<8x64xf32>
    %cst_113 = arith.constant 2.500000e-01 : f32
    %178 = vector.broadcast %cst_113 : f32 to vector<8x64xf32>
    %179 = arith.mulf %177, %178 : vector<8x64xf32>
    %180 = arith.truncf %179 : vector<8x64xf32> to vector<8x64xbf16>
    %c56_114 = arith.constant 56 : index
    %c0_115 = arith.constant 0 : index
    %181 = vector.load %arg14[%c56_114, %c0_115] : memref<96x64xbf16, #tpu.memory_space<vmem>>, vector<8x64xbf16>
    tpu.vector_store %arg14[%c56_114, %c0_115], %180 {strides = array<i32>} : memref<96x64xbf16, #tpu.memory_space<vmem>>, vector<8x64xbf16>,
    %c96 = arith.constant 96 : index
    %c0_116 = arith.constant 0 : index
    %182 = vector.load %arg13[%c96, %c0_116] : memref<128x64xf32, #tpu.memory_space<vmem>>, vector<8x64xf32>
    %c104 = arith.constant 104 : index
    %c0_117 = arith.constant 0 : index
    %183 = vector.load %arg13[%c104, %c0_117] : memref<128x64xf32, #tpu.memory_space<vmem>>, vector<8x64xf32>
    %184 = arith.addf %182, %183 : vector<8x64xf32>
    %cst_118 = arith.constant 2.500000e-01 : f32
    %185 = vector.broadcast %cst_118 : f32 to vector<8x64xf32>
    %186 = arith.mulf %184, %185 : vector<8x64xf32>
    %187 = arith.truncf %186 : vector<8x64xf32> to vector<8x64xbf16>
    %c64_119 = arith.constant 64 : index
    %c0_120 = arith.constant 0 : index
    %188 = vector.load %arg14[%c64_119, %c0_120] : memref<96x64xbf16, #tpu.memory_space<vmem>>, vector<8x64xbf16>
    tpu.vector_store %arg14[%c64_119, %c0_120], %187 {strides = array<i32>} : memref<96x64xbf16, #tpu.memory_space<vmem>>, vector<8x64xbf16>,
    %c112 = arith.constant 112 : index
    %c0_121 = arith.constant 0 : index
    %189 = vector.load %arg13[%c112, %c0_121] : memref<128x64xf32, #tpu.memory_space<vmem>>, vector<8x64xf32>
    %c120 = arith.constant 120 : index
    %c0_122 = arith.constant 0 : index
    %190 = vector.load %arg13[%c120, %c0_122] : memref<128x64xf32, #tpu.memory_space<vmem>>, vector<8x64xf32>
    %191 = arith.addf %189, %190 : vector<8x64xf32>
    %cst_123 = arith.constant 2.500000e-01 : f32
    %192 = vector.broadcast %cst_123 : f32 to vector<8x64xf32>
    %193 = arith.mulf %191, %192 : vector<8x64xf32>
    %194 = arith.truncf %193 : vector<8x64xf32> to vector<8x64xbf16>
    %c72_124 = arith.constant 72 : index
    %c0_125 = arith.constant 0 : index
    %195 = vector.load %arg14[%c72_124, %c0_125] : memref<96x64xbf16, #tpu.memory_space<vmem>>, vector<8x64xbf16>
    tpu.vector_store %arg14[%c72_124, %c0_125], %194 {strides = array<i32>} : memref<96x64xbf16, #tpu.memory_space<vmem>>, vector<8x64xbf16>,
    %c7_126 = arith.constant 7 : index
    %c0_127 = arith.constant 0 : index
    %196 = vector.load %arg14[%c7_126, %c0_127] : memref<96x64xbf16, #tpu.memory_space<vmem>>, vector<64x64xbf16>
    %197 = vector.broadcast %48 : vector<64x1xbf16> to vector<64x64xbf16>
    %198 = arith.mulf %196, %197 : vector<64x64xbf16>
    %c8_128 = arith.constant 8 : index
    %c0_129 = arith.constant 0 : index
    %199 = vector.load %arg14[%c8_128, %c0_129] : memref<96x64xbf16, #tpu.memory_space<vmem>>, vector<64x64xbf16>
    %c9_130 = arith.constant 9 : index
    %c0_131 = arith.constant 0 : index
    %200 = vector.load %arg14[%c9_130, %c0_131] : memref<96x64xbf16, #tpu.memory_space<vmem>>, vector<64x64xbf16>
    %201 = vector.broadcast %53 : vector<64x1xbf16> to vector<64x64xbf16>
    %202 = arith.mulf %200, %201 : vector<64x64xbf16>
    %c15 = arith.constant 15 : index
    %c0_132 = arith.constant 0 : index
    %203 = vector.load %arg14[%c15, %c0_132] : memref<96x64xbf16, #tpu.memory_space<vmem>>, vector<64x64xbf16>
    %204 = vector.broadcast %48 : vector<64x1xbf16> to vector<64x64xbf16>
    %205 = arith.mulf %203, %204 : vector<64x64xbf16>
    %c16_133 = arith.constant 16 : index
    %c0_134 = arith.constant 0 : index
    %206 = vector.load %arg14[%c16_133, %c0_134] : memref<96x64xbf16, #tpu.memory_space<vmem>>, vector<64x64xbf16>
    %c17 = arith.constant 17 : index
    %c0_135 = arith.constant 0 : index
    %207 = vector.load %arg14[%c17, %c0_135] : memref<96x64xbf16, #tpu.memory_space<vmem>>, vector<64x64xbf16>
    %208 = vector.broadcast %53 : vector<64x1xbf16> to vector<64x64xbf16>
    %209 = arith.mulf %207, %208 : vector<64x64xbf16>
    %c23_136 = arith.constant 23 : index
    %c0_137 = arith.constant 0 : index
    %210 = vector.load %arg14[%c23_136, %c0_137] : memref<96x64xbf16, #tpu.memory_space<vmem>>, vector<64x64xbf16>
    %211 = vector.broadcast %48 : vector<64x1xbf16> to vector<64x64xbf16>
    %212 = arith.mulf %210, %211 : vector<64x64xbf16>
    %c24_138 = arith.constant 24 : index
    %c0_139 = arith.constant 0 : index
    %213 = vector.load %arg14[%c24_138, %c0_139] : memref<96x64xbf16, #tpu.memory_space<vmem>>, vector<64x64xbf16>
    %c25_140 = arith.constant 25 : index
    %c0_141 = arith.constant 0 : index
    %214 = vector.load %arg14[%c25_140, %c0_141] : memref<96x64xbf16, #tpu.memory_space<vmem>>, vector<64x64xbf16>
    %215 = vector.broadcast %53 : vector<64x1xbf16> to vector<64x64xbf16>
    %216 = arith.mulf %214, %215 : vector<64x64xbf16>
    %217 = tpu.concatenate %198, %199, %202, %205, %206, %209, %212, %213, %216 in 1 : vector<64x64xbf16>, vector<64x64xbf16>, vector<64x64xbf16>, vector<64x64xbf16>, vector<64x64xbf16>, vector<64x64xbf16>, vector<64x64xbf16>, vector<64x64xbf16>, vector<64x64xbf16> -> vector<64x576xbf16>
    %c0_142 = arith.constant 0 : index
    %c0_143 = arith.constant 0 : index
    %218 = vector.load %arg6[%c0_142, %c0_143] : memref<576x128xbf16, #tpu.memory_space<vmem>>, vector<576x128xbf16>
    %cst_144 = arith.constant dense<0.000000e+00> : vector<64x128xf32>
    %219 = tpu.matmul %217, %218, %cst_144 {dimension_numbers = #tpu.dot_dimension_numbers<[1], [0], [0], [1], [0, 0, 1, 1], [], []>} : vector<64x576xbf16>, vector<576x128xbf16>, vector<64x128xf32> -> vector<64x128xf32>
    %c0_145 = arith.constant 0 : index
    %c0_146 = arith.constant 0 : index
    %220 = vector.load %arg7[%c0_145, %c0_146] : memref<1x128xf32, #tpu.memory_space<vmem>>, vector<1x128xf32>
    %221 = vector.broadcast %220 : vector<1x128xf32> to vector<64x128xf32>
    %222 = arith.addf %219, %221 : vector<64x128xf32>
    %cst_147 = arith.constant 0.000000e+00 : f32
    %223 = vector.broadcast %cst_147 : f32 to vector<64x128xf32>
    %224 = arith.maximumf %222, %223 : vector<64x128xf32>
    %225 = arith.truncf %224 : vector<64x128xf32> to vector<64x128xbf16>
    %c16_148 = arith.constant 16 : index
    %c0_149 = arith.constant 0 : index
    %226 = vector.load %arg15[%c16_148, %c0_149] : memref<96x128xbf16, #tpu.memory_space<vmem>>, vector<64x128xbf16>
    tpu.vector_store %arg15[%c16_148, %c0_149], %225 {strides = array<i32>} : memref<96x128xbf16, #tpu.memory_space<vmem>>, vector<64x128xbf16>,
    %c7_150 = arith.constant 7 : index
    %c0_151 = arith.constant 0 : index
    %227 = vector.load %arg15[%c7_150, %c0_151] : memref<96x128xbf16, #tpu.memory_space<vmem>>, vector<64x128xbf16>
    %228 = vector.broadcast %48 : vector<64x1xbf16> to vector<64x128xbf16>
    %229 = arith.mulf %227, %228 : vector<64x128xbf16>
    %c8_152 = arith.constant 8 : index
    %c0_153 = arith.constant 0 : index
    %230 = vector.load %arg15[%c8_152, %c0_153] : memref<96x128xbf16, #tpu.memory_space<vmem>>, vector<64x128xbf16>
    %c9_154 = arith.constant 9 : index
    %c0_155 = arith.constant 0 : index
    %231 = vector.load %arg15[%c9_154, %c0_155] : memref<96x128xbf16, #tpu.memory_space<vmem>>, vector<64x128xbf16>
    %232 = vector.broadcast %53 : vector<64x1xbf16> to vector<64x128xbf16>
    %233 = arith.mulf %231, %232 : vector<64x128xbf16>
    %c15_156 = arith.constant 15 : index
    %c0_157 = arith.constant 0 : index
    %234 = vector.load %arg15[%c15_156, %c0_157] : memref<96x128xbf16, #tpu.memory_space<vmem>>, vector<64x128xbf16>
    %235 = vector.broadcast %48 : vector<64x1xbf16> to vector<64x128xbf16>
    %236 = arith.mulf %234, %235 : vector<64x128xbf16>
    %c16_158 = arith.constant 16 : index
    %c0_159 = arith.constant 0 : index
    %237 = vector.load %arg15[%c16_158, %c0_159] : memref<96x128xbf16, #tpu.memory_space<vmem>>, vector<64x128xbf16>
    %c17_160 = arith.constant 17 : index
    %c0_161 = arith.constant 0 : index
    %238 = vector.load %arg15[%c17_160, %c0_161] : memref<96x128xbf16, #tpu.memory_space<vmem>>, vector<64x128xbf16>
    %239 = vector.broadcast %53 : vector<64x1xbf16> to vector<64x128xbf16>
    %240 = arith.mulf %238, %239 : vector<64x128xbf16>
    %c23_162 = arith.constant 23 : index
    %c0_163 = arith.constant 0 : index
    %241 = vector.load %arg15[%c23_162, %c0_163] : memref<96x128xbf16, #tpu.memory_space<vmem>>, vector<64x128xbf16>
    %242 = vector.broadcast %48 : vector<64x1xbf16> to vector<64x128xbf16>
    %243 = arith.mulf %241, %242 : vector<64x128xbf16>
    %c24_164 = arith.constant 24 : index
    %c0_165 = arith.constant 0 : index
    %244 = vector.load %arg15[%c24_164, %c0_165] : memref<96x128xbf16, #tpu.memory_space<vmem>>, vector<64x128xbf16>
    %c25_166 = arith.constant 25 : index
    %c0_167 = arith.constant 0 : index
    %245 = vector.load %arg15[%c25_166, %c0_167] : memref<96x128xbf16, #tpu.memory_space<vmem>>, vector<64x128xbf16>
    %246 = vector.broadcast %53 : vector<64x1xbf16> to vector<64x128xbf16>
    %247 = arith.mulf %245, %246 : vector<64x128xbf16>
    %248 = tpu.concatenate %229, %230, %233, %236, %237, %240, %243, %244, %247 in 1 : vector<64x128xbf16>, vector<64x128xbf16>, vector<64x128xbf16>, vector<64x128xbf16>, vector<64x128xbf16>, vector<64x128xbf16>, vector<64x128xbf16>, vector<64x128xbf16>, vector<64x128xbf16> -> vector<64x1152xbf16>
    %c0_168 = arith.constant 0 : index
    %c0_169 = arith.constant 0 : index
    %249 = vector.load %arg8[%c0_168, %c0_169] : memref<1152x128xbf16, #tpu.memory_space<vmem>>, vector<1152x128xbf16>
    %cst_170 = arith.constant dense<0.000000e+00> : vector<64x128xf32>
    %250 = tpu.matmul %248, %249, %cst_170 {dimension_numbers = #tpu.dot_dimension_numbers<[1], [0], [0], [1], [0, 0, 1, 1], [], []>} : vector<64x1152xbf16>, vector<1152x128xbf16>, vector<64x128xf32> -> vector<64x128xf32>
    %c0_171 = arith.constant 0 : index
    %c0_172 = arith.constant 0 : index
    %251 = vector.load %arg9[%c0_171, %c0_172] : memref<1x128xf32, #tpu.memory_space<vmem>>, vector<1x128xf32>
    %252 = vector.broadcast %251 : vector<1x128xf32> to vector<64x128xf32>
    %253 = arith.addf %250, %252 : vector<64x128xf32>
    %cst_173 = arith.constant 0.000000e+00 : f32
    %254 = vector.broadcast %cst_173 : f32 to vector<64x128xf32>
    %255 = arith.maximumf %253, %254 : vector<64x128xf32>
    %cst_174 = arith.constant dense<0.000000e+00> : vector<128xf32>
    %256 = vector.multi_reduction <add>, %255, %cst_174 [0] : vector<64x128xf32> to vector<128xf32>
    %257 = vector.shape_cast %256 : vector<128xf32> to vector<1x128xf32>
    %cst_175 = arith.constant 1.562500e-02 : f32
    %258 = vector.broadcast %cst_175 : f32 to vector<1x128xf32>
    %259 = arith.mulf %257, %258 : vector<1x128xf32>
    %c0_176 = arith.constant 0 : index
    %c0_177 = arith.constant 0 : index
    %c0_178 = arith.constant 0 : index
    %260 = vector.load %arg10[%c0_176, %c0_177, %c0_178] : memref<1x1x128xf32, #tpu.memory_space<vmem>>, vector<1x1x128xf32>
    %261 = vector.shape_cast %260 : vector<1x1x128xf32> to vector<1x128xf32>
    %262 = vector.shape_cast %259 : vector<1x128xf32> to vector<1x1x128xf32>
    tpu.vector_store %arg10[%c0_176, %c0_177, %c0_178], %262 {strides = array<i32>} : memref<1x1x128xf32, #tpu.memory_space<vmem>>, vector<1x1x128xf32>,
    return
  }
  func.func @transform_0(%arg0: i32) -> (i32, i32, i32) {
    %c0_i32 = arith.constant 0 : i32
    %c0_i32_0 = arith.constant 0 : i32
    %c0_i32_1 = arith.constant 0 : i32
    return %arg0, %c0_i32, %c0_i32_0 : i32, i32, i32
  }
  func.func @transform_1(%arg0: i32) -> (i32, i32) {
    %c0_i32 = arith.constant 0 : i32
    %c0_i32_0 = arith.constant 0 : i32
    %c0_i32_1 = arith.constant 0 : i32
    return %c0_i32, %c0_i32_0 : i32, i32
  }
  func.func @transform_2(%arg0: i32) -> (i32, i32) {
    %c0_i32 = arith.constant 0 : i32
    %c0_i32_0 = arith.constant 0 : i32
    %c0_i32_1 = arith.constant 0 : i32
    return %c0_i32, %c0_i32_0 : i32, i32
  }
  func.func @transform_3(%arg0: i32) -> (i32, i32) {
    %c0_i32 = arith.constant 0 : i32
    %c0_i32_0 = arith.constant 0 : i32
    %c0_i32_1 = arith.constant 0 : i32
    return %c0_i32, %c0_i32_0 : i32, i32
  }
  func.func @transform_4(%arg0: i32) -> (i32, i32) {
    %c0_i32 = arith.constant 0 : i32
    %c0_i32_0 = arith.constant 0 : i32
    %c0_i32_1 = arith.constant 0 : i32
    return %c0_i32, %c0_i32_0 : i32, i32
  }
  func.func @transform_5(%arg0: i32) -> (i32, i32) {
    %c0_i32 = arith.constant 0 : i32
    %c0_i32_0 = arith.constant 0 : i32
    %c0_i32_1 = arith.constant 0 : i32
    return %c0_i32, %c0_i32_0 : i32, i32
  }
  func.func @transform_6(%arg0: i32) -> (i32, i32) {
    %c0_i32 = arith.constant 0 : i32
    %c0_i32_0 = arith.constant 0 : i32
    %c0_i32_1 = arith.constant 0 : i32
    return %c0_i32, %c0_i32_0 : i32, i32
  }
  func.func @transform_7(%arg0: i32) -> (i32, i32) {
    %c0_i32 = arith.constant 0 : i32
    %c0_i32_0 = arith.constant 0 : i32
    %c0_i32_1 = arith.constant 0 : i32
    return %c0_i32, %c0_i32_0 : i32, i32
  }
  func.func @transform_8(%arg0: i32) -> (i32, i32) {
    %c0_i32 = arith.constant 0 : i32
    %c0_i32_0 = arith.constant 0 : i32
    %c0_i32_1 = arith.constant 0 : i32
    return %c0_i32, %c0_i32_0 : i32, i32
  }
  func.func @transform_9(%arg0: i32) -> (i32, i32, i32) {
    %c0_i32 = arith.constant 0 : i32
    %c0_i32_0 = arith.constant 0 : i32
    %c0_i32_1 = arith.constant 0 : i32
    return %arg0, %c0_i32, %c0_i32_0 : i32, i32, i32
  }
}

</mosaic_0001>

<bundles_post_ra>
// kernel: condition_net_forward.1
= control target key start
LH: loop header
LB: loop body
LE: loop exit
PB: predicated region body
PF: predicated region fallthrough
CT: control target
= control target key end

     0   :  { %14 = vsyncpa [#allocation8], 0  ;;  %s17492_s0 = inlined_call_operand.vmem [shape: bf16[2,304,8], index: 0, kind: input, shape index: {}]   ;;  %s17493_s1 = inlined_call_operand.vmem [shape: bf16[72,64], index: 1, kind: input, shape index: {}]   ;;  %s17494_s2 = inlined_call_operand.vmem [shape: f32[1,64], index: 2, kind: input, shape index: {}, may-alias: {2,4}]   ;;  %s17495_s3 = inlined_call_operand.vmem [shape: bf16[576,64], index: 3, kind: input, shape index: {}]   ;;  %s17496_s4 = inlined_call_operand.vmem [shape: f32[1,64], index: 4, kind: input, shape index: {}, may-alias: {2,4}]   ;;  %s17497_s5 = inlined_call_operand.vmem [shape: bf16[576,128], index: 5, kind: input, shape index: {}]   ;;  %s17498_s6 = inlined_call_operand.vmem [shape: f32[1,128], index: 6, kind: input, shape index: {}, may-alias: {6,8}]   ;;  %s17499_s7 = inlined_call_operand.vmem [shape: bf16[1152,128], index: 7, kind: input, shape index: {}]   ;;  %s17500_s8 = inlined_call_operand.vmem [shape: f32[1,128], index: 8, kind: input, shape index: {}, may-alias: {6,8}]   ;;  %s17501_s9 = inlined_call_operand.hbm [shape: f32[2,1,128], index: 9, kind: output, shape index: {}]  }
   0x1   :  { %16 = vsyncpa [#allocation8 + $0x1], 0  ;;  %s11643_s30 = smov 0   ;;  %s11645_s10 = smov 0  }
   0x2   :  { %s11647_s11 = smov 0   ;;  %s11649_s12 = smov 0  }
   0x3 LB: > { %s11664_s13 = sadd.s32 4294967295, %s11580_s12   ;;  %s10242_s14 = sadd.s32 4294967294, %s11580_s12   ;;  %s11580_s12 = sphi %s11649_s12, %s18334_s12   ;;  %s11576_s11 = sphi %s11647_s11, %s18333_s11   ;;  %s11572_s10 = sphi %s11645_s10, %s18332_s10   ;;  %s11568_s30 = sphi %s11643_s30, %s18331_s30  }
   0x4   : > { %s11668_s15 = sadd.s32 1, %s11580_s12   ;;  %s223_s16 = sadd.s32 1, %s11576_s11 }
   0x5   : > { %s220_s17 = ssub.s32 %s11580_s12, %s11668_s15  ;;  %p233_p0 = scmp.ne.s32.totalorder %s11576_s11, %s11572_s10 }
   0x6   : > { %p221_p1 = scmp.eq.s32.totalorder %s220_s17, 0  ;;  %p234_p2 = scmp.eq.s32.totalorder %s11664_s13, 1 }
   0x7   : > { %p239_p3 = scmp.ne.s32.totalorder %s11572_s10, %s11568_s30  ;;  %p240_p4 = scmp.eq.s32.totalorder %s10242_s14, 1 }
   0x8   : > { %s11679_s18 = scalar_select %p221_p1, %s11576_s11, %s223_s16  }
   0x9   : > { %p11681_p5 = por %p234_p2, %p233_p0  ;;  %p11685_p6 = por %p240_p4, %p239_p3 }
   0xa   : > { %p10245_p7 = scmp.ge.s32.totalorder %s11580_s12, 1  ;;  %p290_p8 = scmp.lt.s32.totalorder %s11580_s12, 3 }
   0xc   : > { %p291_p9 = pnand %p10245_p7, %p290_p8 }
   0xe   : > { %294 = sbr.rel (%p291_p9) target bundleno = 2012 (0x7dc), region = 56 }
  0x13   : > { %p325_p10 = scmp.lt.s32.totalorder %s11664_s13, 1  ;;  %v331_v0 = vlaneseq  ;;  %v11582_v2 = vmov 1.0|1.0   ;;  %vm2144_vm0 = vsmask.f32 3328  ;;  %v17505_v12 = vmov 0.0  }
  0x14   : > { %v1246_v3 = vunpack.c.l.bf16 %v11582_v2  ;;  %vm1309_vm2 = vcmask 1046528   ;;  %vm1538_vm4 = vcmask 1040384   ;;  %s11584_s26 = smov 8   ;;  %s11585_s27 = smov 32   ;;  %vm2405_vm7 = vcmask 1042432  }
  0x15   : > { %s326_s21 = scalar_select %p325_p10, %s11664_s13, 1  ;;  %v11693_v1 = vshrl.u32 %v331_v0, 7 }
  0x16   : > { %v11707_v7 = vrot.slane %v1246_v3, 1  ;;  %v11714_v14 = vrot.slane %v1246_v3, 7  ;;  %s11586_s28 = smov 24   ;;  %s11587_s29 = smov 48  }
  0x17   : > { %17773 = vst [vmem:[#allocation10_spill] sm:$0xff] %v11693_v1  ;;  %s11458_s22 = smul.u32 152, %s326_s21  ;;  %v368_v4 = vand.u32 15, %v11693_v1  ;;  %v11697_v5 = vadd.s32 8, %v11693_v1  ;;  %v11700_v6 = vadd.s32 24, %v11693_v1  ;;  %v11725_v19 = vadd.s32 16, %v11693_v1 }
  0x18   : > { %17776 = vst [vmem:[#allocation13_spill] sm:$0xff] %v11707_v7  ;;  %s11588_s14 = smov 16   ;;  %s11589_s16 = smov 40  }
  0x19   : > { %17774 = vst [vmem:[#allocation11_spill] sm:$0xff] %v11697_v5  ;;  %s11705_s25 = scalar_lea.vmem %s17492_s0, %s11458_s22  ;;  %vm748_vm1 = vcmp.ge.s32.totalorder %v368_v4, 1  ;;  %v375_v8 = vand.u32 15, %v11697_v5  ;;  %v389_v18 = vand.u32 15, %v11700_v6  ;;  %v382_v51 = vand.u32 15, %v11725_v19  ;;  %s11590_s17 = smov 56  }
  0x1a   : > { %17775 = vst [vmem:[#allocation12_spill] sm:$0xff] %v11700_v6  ;;  %v11069_v9 = vld [vmem:[%s11705_s25 + $0x4] sm:$0xff]  ;;  %v11070_v10 = vld [vmem:[%s11705_s25 + $0xc] sm:$0xff]  ;;  %v11071_v11 = vld [vmem:[%s11705_s25 + $0x14] sm:$0xff]  ;;  %v10247_v13 = vsel %vm748_vm1, 1.0, %v17505_v12  ;;  %s11591_s21 = smov 64  }
  0x1b   : > { %v11406_v15 = vld [vmem:[%s11705_s25 + $0x10] sm:$0xff]   ;;  %v11717_v16 = vrot.slane %v10247_v13, 1  ;;  %vm11719_vm3 = vcmp.le.s32.totalorder %v375_v8, 14  ;;  %17780 = vst [vmem:[#allocation15_spill] sm:$0xff] %v11725_v19  ;;  %v2146_v20 = vshrl.u32 %v11069_v9, 16  ;;  %v2149_v21 = vshll.u32 %v11069_v9, 16 }
  0x1c   : > { %v2154_v22 = vshrl.u32 %v11070_v10, 16  ;;  %v2157_v23 = vshll.u32 %v11070_v10, 16  ;;  %v1841_v24 = vld [vmem:[%s11705_s25 + $0x10] sm:$0x8]  ;;  %v2163_v25 = vshrl.u32 %v11071_v11, 16  ;;  %v2166_v26 = vshll.u32 %v11071_v11, 16 }
  0x1d   : > { %17777 = vst [vmem:[#allocation14_spill] sm:$0xff] %v11717_v16  ;;  %v11728_v27 = vunpack.c.h.bf16 %v11406_v15  ;;  %v11733_v28 = vsel %vm1309_vm2, %v11717_v16, %v11707_v7  ;;  %v11736_v29 = vld [vmem:[%s11705_s25 + $0x8] sm:$0xff]   ;;  %v2148_v31 = vrot.slane %v2146_v20, 4  ;;  %v2151_v32 = vrot.slane %v2149_v21, 5  ;;  %v11749_v43 = vld [vmem:[%s11705_s25 + $0x4] sm:$0xf] }
  0x1e   : > { %17781 = vst [vmem:[#allocation16_spill] sm:$0xff] %v11733_v28  ;;  %v1701_v30 = vld [vmem:[%s11705_s25 + $0x8] sm:$0x8]  ;;  %v2156_v33 = vrot.slane %v2154_v22, 4  ;;  %v2159_v34 = vrot.slane %v2157_v23, 5  ;;  %v2165_v35 = vrot.slane %v2163_v25, 4  ;;  %v1844_v37 = vunpack.c.l.bf16 %v1841_v24 }
  0x1f   : > { %v2168_v36 = vrot.slane %v2166_v26, 5  ;;  %v1848_v38 = vmul.f32 %v11728_v27, %v11733_v28  ;;  %v11741_v39 = vor.u32 %v2151_v32, %v2148_v31  ;;  %v11746_v41 = vunpack.c.h.bf16 %v11736_v29  ;;  %v11771_v56 = vld [vmem:[%s11705_s25 + $0x18] sm:$0xff]   ;;  %s323_s24 = sand.u32 1, %s11572_s10  }
  0x20   : > { %v11743_v40 = vor.u32 %v2159_v34, %v2156_v33  ;;  %v1704_v42 = vunpack.c.l.bf16 %v1701_v30  ;;  %v1847_v45 = vmul.f32 %v1844_v37, %v11717_v16  ;;  %v10263_v47 = vsel %vm11719_vm3, 1.0, %v17505_v12 }
  0x21   : > { %v11751_v44 = vor.u32 %v2168_v36, %v2165_v35  ;;  %v1881_v46 = vpack.c.bf16 %v1848_v38, %v1848_v38  ;;  %2288 = vrot.lane.b32.xlu0 %v11741_v39, %s11584_s26  ;;  %v1708_v49 = vmul.f32 %v11746_v41, %v11733_v28  ;;  %v17502_v50 = vunpack.c.l.bf16 %v11736_v29 }
  0x22   : > { %v1707_v48 = vmul.f32 %v1704_v42, %v11717_v16  ;;  %v1880_v53 = vpack.c.bf16 %v1847_v45, %v1847_v45  ;;  %v17503_v55 = vunpack.c.l.bf16 %v11749_v43  ;;  %v1540_v59 = vrot.slane %v10263_v47, 7 }
  0x23   : > { %v11767_v52 = vsel %vm2144_vm0, %v11743_v40, %v11751_v44  ;;  %v2822_v54 = vunpack.c.l.b16 %v1881_v46  ;;  %v1741_v58 = vpack.c.bf16 %v1708_v49, %v1708_v49  ;;  %vm879_vm5 = vcmp.le.s32.totalorder %v389_v18, 14 }
  0x24   : > { %2606 = vrot.lane.b32.xlu1 %v11767_v52, %s11585_s27  ;;  %v1740_v57 = vpack.c.bf16 %v1707_v48, %v1707_v48  ;;  %v2821_v60 = vunpack.c.l.b16 %v1880_v53  ;;  %v1635_v61 = vmul.f32 %v11714_v14, %v17503_v55  ;;  %v11779_v62 = vsel %vm879_vm5, 1.0, %v17505_v12 }
  0x25   : > { %v11781_v63 = vunpack.c.l.bf16 %v11406_v15  ;;  %v2507_v2 = vunpack.c.l.b16 %v1741_v58  ;;  %v11785_v3 = vsel %vm1538_vm4, %v11714_v14, %v1540_v59  ;;  %v11788_v4 = vunpack.c.l.bf16 %v11771_v56 }
  0x26   : > { %v2506_v0 = vunpack.c.l.b16 %v1740_v57  ;;  %17782 = vst [vmem:[#allocation17_spill] sm:$0xff] %v11785_v3  ;;  %v2854_v8 = vpack.c.b16 %v2822_v54, %v2821_v60  ;;  %v1636_v9 = vmul.f32 %v17502_v50, %v11785_v3  ;;  %v1668_v10 = vpack.c.bf16 %v1635_v61, %v1635_v61 }
  0x27   : > { %v11795_v11 = vsel %vm1538_vm4, %v1540_v59, %v11714_v14  ;;  %v1544_v15 = vrot.slane %v11779_v62, 7  ;;  %v1775_v17 = vmul.f32 %v11746_v41, %v11714_v14  ;;  %v1776_v18 = vmul.f32 %v11781_v63, %v11785_v3  ;;  %v11838_v59 = vld [vmem:[%s11705_s25 + $0x20] sm:$0xff]  }
  0x28   : > { %17783 = vst [vmem:[#allocation18_spill] sm:$0xff] %v11795_v11  ;;  %v2539_v13 = vpack.c.b16 %v2507_v2, %v2506_v0  ;;  %v1669_v20 = vpack.c.bf16 %v1636_v9, %v1636_v9  ;;  %v2355_v21 = vunpack.c.l.b16 %v1668_v10  ;;  %v1777_v22 = vmul.f32 %v11728_v27, %v11795_v11 }
  0x29   : > { %vm750_vm6 = vcmp.ge.s32.totalorder %v382_v51, 1  ;;  %2604 = vrot.lane.b32.xlu0 %v11743_v40, %s11585_s27  ;;  %v11811_v23 = vsel %vm1538_vm4, %v11714_v14, %v1544_v15  ;;  %v1808_v24 = vpack.c.bf16 %v1775_v17, %v1775_v17  ;;  %v1809_v25 = vpack.c.bf16 %v1776_v18, %v1776_v18  ;;  %v11072_v51 = vld [vmem:[%s11705_s25 + $0x1c] sm:$0xff] }
  0x2a   : > { %2556 = vrot.lane.b32.xlu2 %v2539_v13, %s11586_s28  ;;  %17784 = vst [vmem:[#allocation19_spill] sm:$0xff] %v11811_v23  ;;  %v10248_v26 = vsel %vm750_vm6, 1.0, %v17505_v12  ;;  %v2356_v30 = vunpack.c.l.b16 %v1669_v20  ;;  %v1778_v31 = vmul.f32 %v11788_v4, %v11811_v23  ;;  %v1810_v32 = vpack.c.bf16 %v1777_v22, %v1777_v22 }
  0x2b   : > { %v2671_v33 = vunpack.c.l.b16 %v1808_v24  ;;  %v2672_v34 = vunpack.c.l.b16 %v1809_v25  ;;  %v1313_v35 = vrot.slane %v10248_v26, 1  ;;  %v1637_v36 = vmul.f32 %v11746_v41, %v11795_v11 }
  0x2c   : > { %2871 = vrot.lane.b32.xlu1 %v2854_v8, %s11587_s29  ;;  %v2388_v37 = vpack.c.b16 %v2356_v30, %v2355_v21  ;;  %v1811_v38 = vpack.c.bf16 %v1778_v31, %v1778_v31  ;;  %v2673_v42 = vunpack.c.l.b16 %v1810_v32  ;;  %v1638_v45 = vmul.f32 %v11781_v63, %v11811_v23 }
  0x2d   : > { %v2704_v46 = vpack.c.b16 %v2672_v34, %v2671_v33  ;;  %v11823_v47 = vsel %vm1309_vm2, %v11707_v7, %v1313_v35  ;;  %v11827_v48 = vsel %vm1309_vm2, %v1313_v35, %v11707_v7  ;;  %v1670_v49 = vpack.c.bf16 %v1637_v36, %v1637_v36 }
  0x2e   : > { %17785 = vst [vmem:[#allocation20_spill] sm:$0xff] %v11823_v47  ;;  %v2161_v53 = vsel %vm2144_vm0, %v11741_v39, %v11743_v40  ;;  %v2674_v54 = vunpack.c.l.b16 %v1811_v38  ;;  %v1709_v57 = vmul.f32 %v11781_v63, %v11823_v47  ;;  %v1710_v58 = vmul.f32 %v11728_v27, %v11827_v48 }
  0x2f   : > { %17786 = vst [vmem:[#allocation21_spill] sm:$0xff] %v11827_v48  ;;  %v2406_v60 = vrot.slane %v2388_v37, 5  ;;  %v1671_v61 = vpack.c.bf16 %v1638_v45, %v1638_v45  ;;  %v2357_v0 = vunpack.c.l.b16 %v1670_v49  ;;  %v2721_v8 = vrot.slane %v2704_v46, 5 }
  0x30   : > { %v2705_v2 = vpack.c.b16 %v2674_v54, %v2673_v42  ;;  %v1742_v9 = vpack.c.bf16 %v1709_v57, %v1709_v57  ;;  %v1743_v10 = vpack.c.bf16 %v1710_v58, %v1710_v58  ;;  %v2172_v40 = vshrl.u32 %v11072_v51, 16 }
  0x31   : > { %2290 = vrot.lane.b32.xlu0 %v2161_v53, %s11584_s26  ;;  %v2358_v39 = vunpack.c.l.b16 %v1671_v61  ;;  %v11842_v13 = vunpack.c.h.bf16 %v11771_v56  ;;  %v11845_v17 = vunpack.c.l.bf16 %v11838_v59  ;;  %v2175_v22 = vshll.u32 %v11072_v51, 16 }
  0x32   : > { %v11847_v18 = vrot.slane %v2705_v2, 5  ;;  %v2508_v20 = vunpack.c.l.b16 %v1742_v9  ;;  %v2509_v21 = vunpack.c.l.b16 %v1743_v10  ;;  %v1915_v25 = vmul.f32 %v11728_v27, %v11714_v14 }
  0x33   : > { %17787 = vst [vmem:[#allocation22_spill] sm:$0xff] %v11845_v17  ;;  %v2389_v24 = vpack.c.b16 %v2358_v39, %v2357_v0  ;;  %v1916_v26 = vmul.f32 %v11788_v4, %v11785_v3  ;;  %v1917_v56 = vmul.f32 %v11842_v13, %v11795_v11  ;;  %v1918_v31 = vmul.f32 %v11845_v17, %v11811_v23  ;;  %v12232_v3 = vld [vmem:[%s11705_s25 + $0x48] sm:$0xff]  }
  0x34   : > { %2439 = vrot.lane.b32.xlu1 %v2406_v60, %s11588_s14  ;;  %v2540_v30 = vpack.c.b16 %v2509_v21, %v2508_v20  ;;  %v1948_v33 = vpack.c.bf16 %v1915_v25, %v1915_v25  ;;  %v2723_v36 = vsel %vm2405_vm7, %v2721_v8, %v11847_v18  ;;  %v1849_v38 = vmul.f32 %v11788_v4, %v11823_v47 }
  0x35   : > { %v11858_v32 = vrot.slane %v2389_v24, 5  ;;  %v1949_v34 = vpack.c.bf16 %v1916_v26, %v1916_v26  ;;  %v1950_v35 = vpack.c.bf16 %v1917_v56, %v1917_v56  ;;  %v1951_v37 = vpack.c.bf16 %v1918_v31, %v1918_v31 }
  0x36   : > { %2558 = vrot.lane.b32.xlu2 %v2540_v30, %s11586_s28  ;;  %v1850_v42 = vmul.f32 %v11842_v13, %v11827_v48  ;;  %v2174_v45 = vrot.slane %v2172_v40, 4  ;;  %v2177_v46 = vrot.slane %v2175_v22, 5  ;;  %v2986_v51 = vunpack.c.l.b16 %v1948_v33 }
  0x37   : > { %v2408_v49 = vsel %vm2405_vm7, %v2406_v60, %v11858_v32  ;;  %v2987_v53 = vunpack.c.l.b16 %v1949_v34  ;;  %v11870_v54 = vadd.s32 32, %v11693_v1  ;;  %v2988_v57 = vunpack.c.l.b16 %v1950_v35 }
  0x38   : > { %v2989_v58 = vunpack.c.l.b16 %v1951_v37  ;;  %v1882_v61 = vpack.c.bf16 %v1849_v38, %v1849_v38  ;;  %v11874_v0 = vadd.s32 40, %v11693_v1  ;;  %v1883_v2 = vpack.c.bf16 %v1850_v42, %v1850_v42 }
  0x39   : > { %17788 = vst [vmem:[#allocation23_spill] sm:$0xff] %v11870_v54  ;;  %2756 = vrot.lane.b32.xlu0 %v2723_v36, %s11589_s16  ;;  %v396_v9 = vand.u32 15, %v11870_v54  ;;  %v11883_v10 = vsel %vm1538_vm4, %v1544_v15, %v11714_v14  ;;  %v11885_v39 = vor.u32 %v2177_v46, %v2174_v45  ;;  %v3019_v40 = vpack.c.b16 %v2987_v53, %v2986_v51 }
  0x3a   : > { %17789 = vst [vmem:[#allocation24_spill] sm:$0xff] %v11874_v0  ;;  %v403_v60 = vand.u32 15, %v11874_v0  ;;  %v3020_v20 = vpack.c.b16 %v2989_v58, %v2988_v57  ;;  %v2823_v21 = vunpack.c.l.b16 %v1882_v61  ;;  %v2824_v24 = vunpack.c.l.b16 %v1883_v2  ;;  %v11935_v61 = vld [vmem:[%s11705_s25 + $0x28] sm:$0xff]  }
  0x3b   : > { %17790 = vst [vmem:[#allocation25_spill] sm:$0xff] %v11883_v10  ;;  %vm752_vm8 = vcmp.ge.s32.totalorder %v396_v9, 1  ;;  %v1639_v62 = vmul.f32 %v11728_v27, %v11883_v10  ;;  %v11893_v56 = vadd.s32 56, %v11693_v1  ;;  %v11898_v30 = vsel %vm2144_vm0, %v11751_v44, %v11885_v39 }
  0x3c   : > { %2441 = vrot.lane.b32.xlu1 %v2408_v49, %s11588_s14  ;;  %v10249_v22 = vsel %vm752_vm8, 1.0, %v17505_v12  ;;  %vm881_vm9 = vcmp.le.s32.totalorder %v403_v60, 14  ;;  %v3036_v33 = vrot.slane %v3019_v40, 5  ;;  %v11910_v34 = vrot.slane %v3020_v20, 5  ;;  %v11073_v60 = vld [vmem:[%s11705_s25 + $0x24] sm:$0xff] }
  0x3d   : > { %v1317_v25 = vrot.slane %v10249_v22, 1  ;;  %v10265_v26 = vsel %vm881_vm9, 1.0, %v17505_v12  ;;  %17791 = vst [vmem:[#allocation26_spill] sm:$0xff] %v11893_v56  ;;  %v2855_v37 = vpack.c.b16 %v2824_v24, %v2823_v21  ;;  %v1672_v42 = vpack.c.bf16 %v1639_v62, %v1639_v62 }
  0x3e   : > { %2754 = vrot.lane.b32.xlu2 %v2721_v8, %s11589_s16  ;;  %v1548_v15 = vrot.slane %v10265_v26, 7  ;;  %v417_v45 = vand.u32 15, %v11893_v56  ;;  %v1779_v46 = vmul.f32 %v11842_v13, %v11883_v10  ;;  %v3038_v53 = vsel %vm2405_vm7, %v3036_v33, %v11910_v34 }
  0x3f   : > { %v11902_v31 = vsel %vm1309_vm2, %v11707_v7, %v1317_v25  ;;  %v11906_v8 = vsel %vm1309_vm2, %v1317_v25, %v11707_v7  ;;  %v2359_v9 = vunpack.c.l.b16 %v1672_v42  ;;  %v11948_v26 = vunpack.c.l.bf16 %v11935_v61 }
  0x40   : > { %17792 = vst [vmem:[#allocation27_spill] sm:$0xff] %v11902_v31  ;;  %v1711_v35 = vmul.f32 %v11788_v4, %v11902_v31  ;;  %v1712_v36 = vmul.f32 %v11842_v13, %v11906_v8  ;;  %v11918_v38 = vsel %vm1538_vm4, %v11714_v14, %v1548_v15  ;;  %vm883_vm10 = vcmp.le.s32.totalorder %v417_v45, 14 }
  0x41   : > { %17793 = vst [vmem:[#allocation28_spill] sm:$0xff] %v11906_v8  ;;  %2919 = vrot.lane.b32.xlu0 %v11751_v44, %s11590_s17  ;;  %v11924_v44 = vunpack.c.h.bf16 %v11838_v59  ;;  %v1640_v49 = vmul.f32 %v11788_v4, %v11918_v38  ;;  %v1780_v51 = vmul.f32 %v11845_v17, %v11918_v38  ;;  %v1851_v59 = vmul.f32 %v11845_v17, %v11902_v31 }
  0x42   : > { %17794 = vst [vmem:[#allocation29_spill] sm:$0xff] %v11918_v38  ;;  %v1744_v57 = vpack.c.bf16 %v1711_v35, %v1711_v35  ;;  %v1745_v58 = vpack.c.bf16 %v1712_v36, %v1712_v36  ;;  %v11942_v40 = vsel %vm883_vm10, 1.0, %v17505_v12  ;;  %v1812_v21 = vpack.c.bf16 %v1779_v46, %v1779_v46 }
  0x43   : > { %17795 = vst [vmem:[#allocation30_spill] sm:$0xff] %v11924_v44  ;;  %v1673_v2 = vpack.c.bf16 %v1640_v49, %v1640_v49  ;;  %v1852_v20 = vmul.f32 %v11924_v44, %v11906_v8  ;;  %v1813_v22 = vpack.c.bf16 %v1780_v51, %v1780_v51  ;;  %v17504_v24 = vrot.slane %v11942_v40, 7 }
  0x44   : > { %2921 = vrot.lane.b32.xlu1 %v11898_v30, %s11590_s17  ;;  %17796 = vst [vmem:[#allocation31_spill] sm:$0xff] %v11948_v26  ;;  %v2510_v62 = vunpack.c.l.b16 %v1744_v57  ;;  %v2511_v35 = vunpack.c.l.b16 %v1745_v58  ;;  %v11953_v36 = vsel %vm1538_vm4, %v1548_v15, %v11714_v14  ;;  %v1884_v42 = vpack.c.bf16 %v1851_v59, %v1851_v59 }
  0x45   : > { %v2360_v25 = vunpack.c.l.b16 %v1673_v2  ;;  %17797 = vst [vmem:[#allocation32_spill] sm:$0xff] %v11953_v36  ;;  %v2181_v45 = vshrl.u32 %v11073_v60, 16  ;;  %v2184_v46 = vshll.u32 %v11073_v60, 16  ;;  %v1885_v49 = vpack.c.bf16 %v1852_v20, %v1852_v20 }
  0x46   : > { %2873 = vrot.lane.b32.xlu2 %v2855_v37, %s11587_s29  ;;  %v11959_v37 = vsel %vm1538_vm4, %v11714_v14, %v17504_v24  ;;  %v2676_v57 = vunpack.c.l.b16 %v1813_v22  ;;  %v1641_v15 = vmul.f32 %v11842_v13, %v11953_v36  ;;  %v2541_v2 = vpack.c.b16 %v2511_v35, %v2510_v62 }
  0x47   : > { %17798 = vst [vmem:[#allocation33_spill] sm:$0xff] %v11959_v37  ;;  %v2390_v51 = vpack.c.b16 %v2360_v25, %v2359_v9  ;;  %v1642_v58 = vmul.f32 %v11845_v17, %v11959_v37  ;;  %v1919_v50 = vmul.f32 %v11924_v44, %v11883_v10  ;;  %v1920_v59 = vmul.f32 %v11948_v26, %v11918_v38 }
  0x48   : > { %v2186_v60 = vrot.slane %v2184_v46, 5  ;;  %v2825_v9 = vunpack.c.l.b16 %v1884_v42  ;;  %v2826_v20 = vunpack.c.l.b16 %v1885_v49  ;;  %v1674_v25 = vpack.c.bf16 %v1641_v15, %v1641_v15 }
  0x49   : > { %3071 = vrot.lane.b32.xlu0 %v3038_v53, %s11591_s21  ;;  %v2675_v53 = vunpack.c.l.b16 %v1812_v21  ;;  %v2409_v21 = vrot.slane %v2390_v51, 5  ;;  %v1675_v55 = vpack.c.bf16 %v1642_v58, %v1642_v58  ;;  %v11973_v24 = vadd.s32 48, %v11693_v1 }
  0x4a   : > { %v1952_v62 = vpack.c.bf16 %v1919_v50, %v1919_v50  ;;  %v1953_v35 = vpack.c.bf16 %v1920_v59, %v1920_v59  ;;  %v1781_v12 = vmul.f32 %v11924_v44, %v11953_v36  ;;  %v11990_v50 = vld [vmem:[%s11705_s25 + $0x30] sm:$0xff]   ;;  %v341_v15 = vadd.s32 72, %v11693_v1 }
  0x4b   : > { %v2706_v22 = vpack.c.b16 %v2676_v57, %v2675_v53  ;;  %17799 = vst [vmem:[#allocation34_spill] sm:$0xff] %v11973_v24  ;;  %v410_v42 = vand.u32 15, %v11973_v24  ;;  %v2410_v46 = vsel %vm2405_vm7, %v11858_v32, %v2409_v21  ;;  %v2361_v53 = vunpack.c.l.b16 %v1674_v25 }
  0x4c   : > { %2292 = vrot.lane.b32.xlu1 %v11767_v52, %s11584_s26  ;;  %v2183_v52 = vrot.slane %v2181_v45, 4  ;;  %v2856_v45 = vpack.c.b16 %v2826_v20, %v2825_v9  ;;  %v2362_v57 = vunpack.c.l.b16 %v1675_v55  ;;  %v2990_v58 = vunpack.c.l.b16 %v1952_v62 }
  0x4d   : > { %v11987_v51 = vrot.slane %v2706_v22, 5  ;;  %vm754_vm11 = vcmp.ge.s32.totalorder %v410_v42, 1  ;;  %v1814_v59 = vpack.c.bf16 %v1781_v12, %v1781_v12  ;;  %v17800_v56 = vmov 0.0  }
  0x4e   : > { %3069 = vrot.lane.b32.xlu2 %v3036_v33, %s11591_s21  ;;  %v1782_v33 = vmul.f32 %v11948_v26, %v11959_v37  ;;  %v11985_v49 = vor.u32 %v2186_v60, %v2183_v52  ;;  %v10250_v24 = vsel %vm754_vm11, 1.0, %v17800_v56  ;;  %v11996_v32 = vunpack.c.h.bf16 %v11935_v61 }
  0x4f   : > { %v11999_v52 = vunpack.c.l.bf16 %v11990_v50  ;;  %v431_v60 = vand.u32 15, %v341_v15  ;;  %v1321_v20 = vrot.slane %v10250_v24, 1  ;;  %v340_v55 = vadd.s32 64, %v11693_v1  ;;  %v11074_v15 = vld [vmem:[%s11705_s25 + $0x2c] sm:$0xff] }
  0x50   : > { %v1815_v9 = vpack.c.bf16 %v1782_v33, %v1782_v33  ;;  %17801 = vst [vmem:[#allocation35_spill] sm:$0xff] %v11996_v32  ;;  %v12005_v22 = vsel %vm2144_vm0, %v11885_v39, %v11985_v49  ;;  %v2391_v12 = vpack.c.b16 %v2362_v57, %v2361_v53  ;;  %v2725_v61 = vsel %vm2405_vm7, %v11847_v18, %v11987_v51 }
  0x51   : > { %2560 = vrot.lane.b32.xlu0 %v2541_v2, %s11586_s28  ;;  %v2991_v2 = vunpack.c.l.b16 %v1953_v35  ;;  %17802 = vst [vmem:[#allocation36_spill] sm:$0xff] %v11999_v52  ;;  %vm885_vm12 = vcmp.le.s32.totalorder %v431_v60, 14  ;;  %v2677_v24 = vunpack.c.l.b16 %v1814_v59  ;;  %v1921_v33 = vmul.f32 %v11996_v32, %v11953_v36 }
  0x52   : > { %v12012_v62 = vsel %vm885_vm12, 1.0, %v17800_v56  ;;  %v2678_v35 = vunpack.c.l.b16 %v1815_v9  ;;  %v1922_v39 = vmul.f32 %v11999_v52, %v11959_v37  ;;  %v12022_v42 = vsel %vm1309_vm2, %v11707_v7, %v1321_v20 }
  0x53   : > { %v3021_v25 = vpack.c.b16 %v2991_v2, %v2990_v58  ;;  %17803 = vst [vmem:[#allocation37_spill] sm:$0xff] %v12022_v42  ;;  %v12026_v18 = vsel %vm1309_vm2, %v1321_v20, %v11707_v7  ;;  %v12029_v53 = vrot.slane %v2391_v12, 5  ;;  %v1713_v2 = vmul.f32 %v11845_v17, %v12022_v42 }
  0x54   : > { %2608 = vrot.lane.b32.xlu1 %v11898_v30, %s11585_s27  ;;  %17804 = vst [vmem:[#allocation38_spill] sm:$0xff] %v12026_v18  ;;  %v2707_v58 = vpack.c.b16 %v2678_v35, %v2677_v24  ;;  %v1714_v59 = vmul.f32 %v11924_v44, %v12026_v18  ;;  %v1954_v9 = vpack.c.bf16 %v1921_v33, %v1921_v33  ;;  %v17805_v20 = vrot.slane %v11942_v40, 7 }
  0x55   : > { %v12031_v57 = vrot.slane %v3021_v25, 5  ;;  %v1955_v60 = vpack.c.bf16 %v1922_v39, %v1922_v39  ;;  %v2190_v25 = vshrl.u32 %v11074_v15, 16  ;;  %v2193_v24 = vshll.u32 %v11074_v15, 16 }
  0x56   : > { %2443 = vrot.lane.b32.xlu2 %v2410_v46, %s11588_s14  ;;  %v424_v46 = vand.u32 15, %v340_v55  ;;  %v12043_v55 = vsel %vm1538_vm4, %v17805_v20, %v11714_v14  ;;  %v1746_v40 = vpack.c.bf16 %v1713_v2, %v1713_v2  ;;  %v1747_v33 = vpack.c.bf16 %v1714_v59, %v1714_v59 }
  0x57   : > { %17806 = vst [vmem:[#allocation39_spill] sm:$0xff] %v12043_v55  ;;  %v1643_v39 = vmul.f32 %v11924_v44, %v12043_v55  ;;  %v12064_v20 = vrot.slane %v2707_v58, 5  ;;  %v2993_v15 = vunpack.c.l.b16 %v1955_v60  ;;  %v2192_v2 = vrot.slane %v2190_v25, 4 }
  0x58   : > { %vm756_vm13 = vcmp.ge.s32.totalorder %v424_v46, 1  ;;  %v2195_v59 = vrot.slane %v2193_v24, 5  ;;  %v1853_v0 = vmul.f32 %v11948_v26, %v12022_v42  ;;  %v1854_v54 = vmul.f32 %v11996_v32, %v12026_v18 }
  0x59   : > { %2875 = vrot.lane.b32.xlu0 %v2856_v45, %s11587_s29  ;;  %v17511_v45 = vrot.slane %v12012_v62, 7  ;;  %v10251_v35 = vsel %vm756_vm13, 1.0, %v17800_v56  ;;  %v2513_v6 = vunpack.c.l.b16 %v1747_v33  ;;  %v1676_v19 = vpack.c.bf16 %v1643_v39, %v1643_v39 }
  0x5a   : > { %v2727_v58 = vsel %vm2405_vm7, %v11987_v51, %v12064_v20  ;;  %v1783_v60 = vmul.f32 %v11996_v32, %v12043_v55  ;;  %v342_v33 = vadd.s32 80, %v11693_v1  ;;  %v12092_v51 = vor.u32 %v2195_v59, %v2192_v2 }
  0x5b   : > { %v12049_v12 = vsel %vm1538_vm4, %v11714_v14, %v17511_v45  ;;  %v1325_v45 = vrot.slane %v10251_v35, 1  ;;  %v1886_v39 = vpack.c.bf16 %v1853_v0, %v1853_v0  ;;  %vm3625_vm5 = vcmask 1043456  }
  0x5c   : > { %2923 = vrot.lane.b32.xlu1 %v12005_v22, %s11590_s17  ;;  %17807 = vst [vmem:[#allocation40_spill] sm:$0xff] %v12049_v12  ;;  %v1644_v46 = vmul.f32 %v11948_v26, %v12049_v12  ;;  %v1784_v35 = vmul.f32 %v11999_v52, %v12049_v12  ;;  %v1816_v0 = vpack.c.bf16 %v1783_v60, %v1783_v60  ;;  %vm3103_vm8 = vcmask 64512  }
  0x5d   : > { %v12078_v25 = vsel %vm1309_vm2, %v11707_v7, %v1325_v45  ;;  %v12082_v24 = vsel %vm1309_vm2, %v1325_v45, %v11707_v7  ;;  %v1887_v45 = vpack.c.bf16 %v1854_v54, %v1854_v54  ;;  %v12111_v54 = vsel %vm2144_vm0, %v11985_v49, %v12092_v51 }
  0x5e   : > { %2758 = vrot.lane.b32.xlu2 %v2725_v61, %s11589_s16  ;;  %v2412_v61 = vsel %vm2405_vm7, %v2409_v21, %v12029_v53  ;;  %v3040_v21 = vsel %vm2405_vm7, %v11910_v34, %v12031_v57  ;;  %v1677_v34 = vpack.c.bf16 %v1644_v46, %v1644_v46  ;;  %17808 = vst [vmem:[#allocation41_spill] sm:$0xff] %v12078_v25  ;;  %v343_v46 = vadd.s32 88, %v11693_v1 }
  0x5f   : > { %17809 = vst [vmem:[#allocation42_spill] sm:$0xff] %v12082_v24  ;;  %v1715_v37 = vmul.f32 %v11948_v26, %v12078_v25  ;;  %v1716_v36 = vmul.f32 %v11996_v32, %v12082_v24  ;;  %v1817_v59 = vpack.c.bf16 %v1784_v35, %v1784_v35  ;;  %v2679_v49 = vunpack.c.l.b16 %v1816_v0 }
  0x60   : > { %vm3155_vm10 = vcmask 130048   ;;  %vm3190_vm11 = vcmask 195584   ;;  %vm3225_vm12 = vcmask 261120   ;;  %vm3260_vm13 = vcmask 326656  }
  0x61   : > { %2294 = vrot.lane.b32.xlu0 %v11898_v30, %s11584_s26  ;;  %v2992_v30 = vunpack.c.l.b16 %v1954_v9  ;;  %v1748_v60 = vpack.c.bf16 %v1715_v37, %v1715_v37  ;;  %v1749_v35 = vpack.c.bf16 %v1716_v36, %v1716_v36 }
  0x63   : > { %v3022_v9 = vpack.c.b16 %v2993_v15, %v2992_v30  ;;  %v2363_v30 = vunpack.c.l.b16 %v1676_v19  ;;  %v2364_v15 = vunpack.c.l.b16 %v1677_v34  ;;  %v438_v19 = vand.u32 15, %v342_v33 }
  0x64   : > { %2445 = vrot.lane.b32.xlu1 %v2412_v61, %s11588_s14  ;;  %v2512_v61 = vunpack.c.l.b16 %v1746_v40  ;;  %v12087_v40 = vld [vmem:[%s11705_s25 + $0x38] sm:$0xff]  }
  0x65   : > { %v12096_v5 = vrot.slane %v3022_v9, 5  ;;  %v12103_v2 = vunpack.c.l.bf16 %v12087_v40  ;;  %v2392_v34 = vpack.c.b16 %v2364_v15, %v2363_v30  ;;  %v2828_v9 = vunpack.c.l.b16 %v1887_v45 }
  0x66   : > { %3073 = vrot.lane.b32.xlu2 %v3040_v21, %s11591_s21  ;;  %v2542_v21 = vpack.c.b16 %v2513_v6, %v2512_v61  ;;  %v12106_v6 = vunpack.c.h.bf16 %v11990_v50  ;;  %v445_v61 = vand.u32 15, %v343_v46  ;;  %v2680_v46 = vunpack.c.l.b16 %v1817_v59 }
  0x67   : > { %17810 = vst [vmem:[#allocation43_spill] sm:$0xff] %v12103_v2  ;;  %v1924_v50 = vmul.f32 %v12103_v2, %v12049_v12  ;;  %v3042_v33 = vsel %vm2405_vm7, %v12031_v57, %v12096_v5  ;;  %vm758_vm14 = vcmp.ge.s32.totalorder %v438_v19, 1  ;;  %v12127_v37 = vrot.slane %v2392_v34, 5  ;;  %v11075_v19 = vld [vmem:[%s11705_s25 + $0x34] sm:$0xff] }
  0x68   : > { %17811 = vst [vmem:[#allocation44_spill] sm:$0xff] %v12106_v6  ;;  %v1923_v38 = vmul.f32 %v12106_v6, %v12043_v55  ;;  %v1856_v36 = vmul.f32 %v12106_v6, %v12082_v24  ;;  %vm887_vm15 = vcmp.le.s32.totalorder %v445_v61, 14  ;;  %v2514_v57 = vunpack.c.l.b16 %v1748_v60 }
  0x69   : > { %2610 = vrot.lane.b32.xlu0 %v12005_v22, %s11585_s27  ;;  %v2515_v15 = vunpack.c.l.b16 %v1749_v35  ;;  %v1957_v45 = vpack.c.bf16 %v1924_v50, %v1924_v50  ;;  %v10252_v0 = vsel %vm758_vm14, 1.0, %v17800_v56  ;;  %v2708_v59 = vpack.c.b16 %v2680_v46, %v2679_v49 }
  0x6a   : > { %v1956_v30 = vpack.c.bf16 %v1923_v38, %v1923_v38  ;;  %v12133_v12 = vsel %vm887_vm15, 1.0, %v17800_v56  ;;  %v1889_v10 = vpack.c.bf16 %v1856_v36, %v1856_v36  ;;  %v2414_v61 = vsel %vm2405_vm7, %v12029_v53, %v12127_v37 }
  0x6b   : > { %v1329_v38 = vrot.slane %v10252_v0, 1  ;;  %v2543_v34 = vpack.c.b16 %v2515_v15, %v2514_v57  ;;  %v1560_v60 = vrot.slane %v12133_v12, 7  ;;  %v12140_v35 = vrot.slane %v2708_v59, 5 }
  0x6c   : > { %2760 = vrot.lane.b32.xlu1 %v2727_v58, %s11589_s16  ;;  %v2827_v58 = vunpack.c.l.b16 %v1886_v39  ;;  %v1855_v39 = vmul.f32 %v11999_v52, %v12078_v25  ;;  %v2199_v50 = vshrl.u32 %v11075_v19, 16  ;;  %v345_v49 = vadd.s32 104, %v11693_v1 }
  0x6d   : > { %v2202_v36 = vshll.u32 %v11075_v19, 16  ;;  %v12147_v53 = vsel %vm1309_vm2, %v11707_v7, %v1329_v38  ;;  %v12154_v12 = vunpack.c.h.bf16 %v12087_v40  ;;  %v2729_v40 = vsel %vm2405_vm7, %v12064_v20, %v12140_v35 }
  0x6e   : > { %2562 = vrot.lane.b32.xlu2 %v2542_v21, %s11586_s28  ;;  %v2857_v21 = vpack.c.b16 %v2828_v9, %v2827_v58  ;;  %v1888_v55 = vpack.c.bf16 %v1855_v39, %v1855_v39  ;;  %v2994_v58 = vunpack.c.l.b16 %v1956_v30  ;;  %v2995_v9 = vunpack.c.l.b16 %v1957_v45  ;;  %17812 = vst [vmem:[#allocation45_spill] sm:$0xff] %v12147_v53 }
  0x6f   : > { %v2830_v39 = vunpack.c.l.b16 %v1889_v10  ;;  %17814 = vst [vmem:[#allocation47_spill] sm:$0xff] %v12154_v12  ;;  %v459_v30 = vand.u32 15, %v345_v49  ;;  %v17815_v10 = vrot.slane %v12012_v62, 7  ;;  %v12165_v45 = vsel %vm1538_vm4, %v11714_v14, %v1560_v60 }
  0x70   : > { %v2829_v46 = vunpack.c.l.b16 %v1888_v55  ;;  %v3023_v57 = vpack.c.b16 %v2995_v9, %v2994_v58  ;;  %17817 = vst [vmem:[#allocation49_spill] sm:$0xff] %v12165_v45  ;;  %v2201_v0 = vrot.slane %v2199_v50, 4  ;;  %v1717_v59 = vmul.f32 %v11999_v52, %v12147_v53 }
  0x71   : > { %2925 = vrot.lane.b32.xlu0 %v12111_v54, %s11590_s17  ;;  %v12161_v55 = vsel %vm1538_vm4, %v17815_v10, %v11714_v14  ;;  %v1857_v62 = vmul.f32 %v12103_v2, %v12147_v53  ;;  %vm889_vm1 = vcmp.le.s32.totalorder %v459_v30, 14  ;;  %v17818_v30 = vunpack.c.l.bf16 %v11749_v43 }
  0x72   : > { %17816 = vst [vmem:[#allocation48_spill] sm:$0xff] %v12161_v55  ;;  %v1645_v20 = vmul.f32 %v11996_v32, %v12161_v55  ;;  %v2858_v58 = vpack.c.b16 %v2830_v39, %v2829_v46  ;;  %v12184_v9 = vrot.slane %v3023_v57, 5  ;;  %v12189_v49 = vsel %vm889_vm1, 1.0, %v17800_v56 }
  0x73   : > { %v1407_v10 = vmul.f32 %v11733_v28, %v17818_v30  ;;  %v1890_v11 = vpack.c.bf16 %v1857_v62, %v1857_v62  ;;  %v344_v43 = vadd.s32 96, %v11693_v1  ;;  %v1786_v62 = vmul.f32 %v12103_v2, %v12165_v45 }
  0x74   : > { %3075 = vrot.lane.b32.xlu1 %v3042_v33, %s11591_s21  ;;  %v1179_v33 = vld [vmem:[%s11705_s25] sm:$0x8]  ;;  %v1678_v39 = vpack.c.bf16 %v1645_v20, %v1645_v20  ;;  %v12217_v30 = vsel %vm1538_vm4, %v1560_v60, %v11714_v14  ;;  %vm3295_vm15 = vcmask 392192   ;;  %vm3330_vm1 = vcmask 457728  }
  0x75   : > { %v1212_v15 = vunpack.c.l.bf16 %v1179_v33  ;;  %v11076_v33 = vld [vmem:[%s11705_s25 + $0x3c] sm:$0xff]  ;;  %v1440_v20 = vpack.c.bf16 %v1407_v10, %v1407_v10  ;;  %17819 = vst [vmem:[#allocation50_spill] sm:$0xff] %v12217_v30  ;;  %v452_v10 = vand.u32 15, %v344_v43  ;;  %v1819_v28 = vpack.c.bf16 %v1786_v62, %v1786_v62 }
  0x76   : > { %2877 = vrot.lane.b32.xlu2 %v2857_v21, %s11587_s29  ;;  %v12151_v21 = vsel %vm1309_vm2, %v1329_v38, %v11707_v7  ;;  %v347_v62 = vadd.s32 120, %v11693_v1 }
  0x77   : > { %17813 = vst [vmem:[#allocation46_spill] sm:$0xff] %v12151_v21  ;;  %v1718_v19 = vmul.f32 %v12106_v6, %v12151_v21  ;;  %v1858_v38 = vmul.f32 %v12154_v12, %v12151_v21  ;;  %v1406_v50 = vmul.f32 %v11717_v16, %v1212_v15  ;;  %v3044_v15 = vsel %vm2405_vm7, %v12096_v5, %v12184_v9 }
  0x78   : > { %vm12249_vm3 = vcmp.ge.s32.totalorder %v452_v10, 1  ;;  %v1787_v10 = vmul.f32 %v12154_v12, %v12217_v30  ;;  %v1409_v21 = vmul.f32 %v11746_v41, %v11827_v48 }
  0x79   : > { %2447 = vrot.lane.b32.xlu0 %v2414_v61, %s11588_s14  ;;  %v2204_v61 = vrot.slane %v2202_v36, 5  ;;  %v1751_v36 = vpack.c.bf16 %v1718_v19, %v1718_v19  ;;  %v1891_v46 = vpack.c.bf16 %v1858_v38, %v1858_v38  ;;  %v1439_v16 = vpack.c.bf16 %v1406_v50, %v1406_v50 }
  0x7a   : > { %v2211_v19 = vshll.u32 %v11076_v33, 16  ;;  %v2365_v50 = vunpack.c.l.b16 %v1678_v39 }
  0x7b   : > { %v12195_v23 = vor.u32 %v2204_v61, %v2201_v0  ;;  %v1785_v0 = vmul.f32 %v12106_v6, %v12161_v55  ;;  %v2517_v38 = vunpack.c.l.b16 %v1751_v36  ;;  %v12235_v60 = vunpack.c.l.b16 %v1439_v16 }
  0x7c   : > { %2564 = vrot.lane.b32.xlu1 %v2543_v34, %s11586_s28  ;;  %v1646_v34 = vmul.f32 %v11999_v52, %v12165_v45  ;;  %v2213_v39 = vrot.slane %v2211_v19, 5  ;;  %v12237_v52 = vunpack.c.l.b16 %v1440_v20  ;;  %v2682_v20 = vunpack.c.l.b16 %v1819_v28 }
  0x7e   : > { %2296 = vrot.lane.b32.xlu2 %v12005_v22, %s11584_s26  ;;  %v1750_v22 = vpack.c.bf16 %v1717_v59, %v1717_v59  ;;  %v1679_v57 = vpack.c.bf16 %v1646_v34, %v1646_v34  ;;  %v2208_v59 = vshrl.u32 %v11076_v33, 16  ;;  %v12207_v34 = vunpack.c.l.b16 %v1890_v11 }
  0x7f   : > { %v17820_v11 = vrot.slane %v12189_v49, 7 }
  0x80   : > { %v2516_v61 = vunpack.c.l.b16 %v1750_v22  ;;  %v2366_v33 = vunpack.c.l.b16 %v1679_v57  ;;  %v12223_v22 = vsel %vm2144_vm0, %v12092_v51, %v12195_v23  ;;  %v1818_v57 = vpack.c.bf16 %v1785_v0, %v1785_v0 }
  0x81   : > { %2762 = vrot.lane.b32.xlu0 %v2729_v40, %s11589_s16  ;;  %v11412_v40 = vld [vmem:[%s11705_s25 + $0x40] sm:$0xff]   ;;  %v12229_v36 = vsel %vm1538_vm4, %v11714_v14, %v17820_v11  ;;  %v1647_v51 = vmul.f32 %v12106_v6, %v12217_v30  ;;  %v12256_v0 = vunpack.c.l.bf16 %v12232_v3 }
  0x82   : > { %17821 = vst [vmem:[#allocation51_spill] sm:$0xff] %v12229_v36  ;;  %v12241_v32 = vunpack.c.l.bf16 %v11412_v40  ;;  %v2544_v11 = vpack.c.b16 %v2517_v38, %v2516_v61  ;;  %v1648_v19 = vmul.f32 %v12103_v2, %v12229_v36  ;;  %v2681_v38 = vunpack.c.l.b16 %v1818_v57 }
  0x83   : > { %v10253_v57 = vsel %vm12249_vm3, 1.0, %v17800_v56  ;;  %vm3365_vm3 = vcmask 523264  }
  0x84   : > { %2879 = vrot.lane.b32.xlu1 %v2858_v58, %s11587_s29  ;;  %v12211_v5 = vpop.permute.xlu2 %2556  ;;  %v12213_v58 = vunpack.c.l.b16 %v1891_v46  ;;  %v2210_v46 = vrot.slane %v2208_v59, 4  ;;  %17822 = vst [vmem:[#allocation52_spill] sm:$0xff] %v12241_v32  ;;  %v2393_v59 = vpack.c.b16 %v2366_v33, %v2365_v50  ;;  %v1925_v50 = vmul.f32 %v12154_v12, %v12161_v55 }
  0x85   : > { %v1680_v33 = vpack.c.bf16 %v1647_v51, %v1647_v51  ;;  %v1681_v28 = vpack.c.bf16 %v1648_v19, %v1648_v19  ;;  %v473_v55 = vand.u32 15, %v347_v62  ;;  %v1333_v53 = vrot.slane %v10253_v57, 1 }
  0x86   : > { %2612 = vrot.lane.b32.xlu2 %v12111_v54, %s11585_s27  ;;  %v12259_v61 = vor.u32 %v2213_v39, %v2210_v46  ;;  %v12272_v46 = vrot.slane %v2393_v59, 5  ;;  %v1788_v39 = vmul.f32 %v12241_v32, %v12229_v36  ;;  %v17825_v59 = vunpack.c.l.bf16 %v11736_v29  ;;  %v11077_v29 = vld [vmem:[%s11705_s25 + $0x44] sm:$0xff] }
  0x87   : > { %v1958_v16 = vpack.c.bf16 %v1925_v50, %v1925_v50  ;;  %v2367_v44 = vunpack.c.l.b16 %v1680_v33  ;;  %v2368_v50 = vunpack.c.l.b16 %v1681_v28  ;;  %vm12299_vm6 = vcmp.le.s32.totalorder %v473_v55, 14 }
  0x88   : > { %v1408_v19 = vmul.f32 %v17825_v59, %v11823_v47  ;;  %v2416_v62 = vsel %vm2405_vm7, %v12127_v37, %v12272_v46  ;;  %v1821_v24 = vpack.c.bf16 %v1788_v39, %v1788_v39  ;;  %v12315_v55 = vsel %vm1309_vm2, %v1333_v53, %v11707_v7 }
  0x89   : > { %3077 = vrot.lane.b32.xlu0 %v3044_v15, %s11591_s21  ;;  %v12253_v15 = vunpack.c.h.bf16 %v11412_v40  ;;  %v1926_v40 = vmul.f32 %v12241_v32, %v12165_v45  ;;  %v2996_v37 = vunpack.c.l.b16 %v1958_v16  ;;  %17829 = vst [vmem:[#allocation54_spill] sm:$0xff] %v12315_v55  ;;  %v2217_v28 = vshrl.u32 %v11077_v29, 16 }
  0x8a   : > { %v1441_v57 = vpack.c.bf16 %v1408_v19, %v1408_v19  ;;  %v12321_v59 = vsel %vm12299_vm6, 1.0, %v17800_v56  ;;  %v2394_v19 = vpack.c.b16 %v2368_v50, %v2367_v44  ;;  %vm3413_vm6 = vsmask.f32 4352 }
  0x8b   : > { %v1927_v45 = vmul.f32 %v12253_v15, %v12217_v30  ;;  %v1820_v30 = vpack.c.bf16 %v1787_v10, %v1787_v10 }
  0x8c   : > { %2298 = vrot.lane.b32.xlu1 %v12111_v54, %s11584_s26  ;;  %v3408_v54 = vld [vmem:[%s17493_s1 + $0x20] sm:$0xf] }
  0x8d   : > { %v3566_v43 = vunpack.c.l.b16 %v3408_v54  ;;  %v1928_v54 = vmul.f32 %v12256_v0, %v12229_v36  ;;  %v2709_v36 = vpack.c.b16 %v2682_v20, %v2681_v38  ;;  %v346_v38 = vadd.s32 112, %v11693_v1 }
  0x8e   : > { %2927 = vrot.lane.b32.xlu2 %v12223_v22, %s11590_s17  ;;  %v2683_v39 = vunpack.c.l.b16 %v1820_v30 }
  0x8f   : > { %v3571_v51 = vpack.c.b16 %v3566_v43, %v3566_v43  ;;  %v1959_v43 = vpack.c.bf16 %v1926_v40, %v1926_v40  ;;  %v1961_v40 = vpack.c.bf16 %v1928_v54, %v1928_v54  ;;  %v2220_v54 = vshll.u32 %v11077_v29, 16 }
  0x90   : > { %v12283_v6 = vpop.permute.xlu2 %2558  ;;  %v2730_v30 = vrot.slane %v2709_v36, 5  ;;  %v11089_v36 = vld [vmem:[%s17493_s1 + $0x10] sm:$0xff]  ;;  %v466_v44 = vand.u32 15, %v346_v38  ;;  %v17830_v29 = vpack.c.b16 %v12213_v58, %v12207_v34 }
  0x91   : > { %2566 = vrot.lane.b32.xlu0 %v2544_v11, %s11586_s28  ;;  %v3627_v26 = vsel %vm3625_vm5, %v3571_v51, 0  ;;  %v1960_v11 = vpack.c.bf16 %v1927_v45, %v1927_v45  ;;  %v1442_v51 = vpack.c.bf16 %v1409_v21, %v1409_v21  ;;  %v2997_v33 = vunpack.c.l.b16 %v1959_v43 }
  0x92   : > { %3632 = vmatpush.bf16.msra.mxu0 %v3627_v26  ;;  %v11090_v26 = vld [vmem:[%s17493_s1 + $0x18] sm:$0xff]  ;;  %v12311_v45 = vsel %vm1309_vm2, %v11707_v7, %v1333_v53  ;;  %v2684_v21 = vunpack.c.l.b16 %v1821_v24  ;;  %v2999_v43 = vunpack.c.l.b16 %v1961_v40  ;;  %v12326_v53 = vsel %vm2144_vm0, %v12195_v23, %v12259_v61 }
  0x93   : > { %v12297_v41 = vpop.permute.xlu0 %2288  ;;  %17828 = vst [vmem:[#allocation53_spill] sm:$0xff] %v12311_v45  ;;  %v2998_v16 = vunpack.c.l.b16 %v1960_v11  ;;  %v1719_v24 = vmul.f32 %v12103_v2, %v12311_v45  ;;  %v12341_v23 = vunpack.c.l.b16 %v1441_v57  ;;  %v12343_v50 = vunpack.c.l.b16 %v1442_v51 }
  0x94   : > { %2614 = vrot.lane.b32.xlu1 %v12223_v22, %s11585_s27  ;;  %v3024_v11 = vpack.c.b16 %v2997_v33, %v2996_v37  ;;  %v17567_v40 = vrot.slane %v12321_v59, 7  ;;  %v2710_v10 = vpack.c.b16 %v2684_v21, %v2683_v39  ;;  %v2222_v47 = vrot.slane %v2220_v54, 5 }
  0x95   : > { %v17831_v2 = vrot.slane %v12189_v49, 7  ;;  %v2731_v58 = vsel %vm2405_vm7, %v12140_v35, %v2730_v30  ;;  %v12358_v57 = vrot.slane %v2394_v19, 5  ;;  %v3025_v51 = vpack.c.b16 %v2999_v43, %v2998_v16 }
  0x96   : > { %v12307_v20 = vpop.permute.xlu1 %2606  ;;  %2449 = vrot.lane.b32.xlu2 %v2416_v62, %s11588_s14  ;;  %3633 = vmatpush.bf16.msra.mxu0 %v11090_v26  ;;  %v1720_v62 = vmul.f32 %v12154_v12, %v12315_v55  ;;  %v2219_v26 = vrot.slane %v2217_v28, 4  ;;  %v1752_v37 = vpack.c.bf16 %v1719_v24, %v1719_v24  ;;  %vm12360_vm9 = vcmp.ge.s32.totalorder %v466_v44, 1 }
  0x97   : > { %v12350_v38 = vsel %vm1538_vm4, %v17831_v2, %v11714_v14  ;;  %v11088_v2 = vld [vmem:[%s17493_s1 + $0x8] sm:$0xff]  ;;  %v2047_v49 = vpack.c.b16 %v12237_v52, %v12235_v60  ;;  %v3045_v35 = vrot.slane %v3024_v11, 5  ;;  %v12375_v28 = vsel %vm1538_vm4, %v11714_v14, %v17567_v40  ;;  %v12408_v11 = vld [vmem:[%s11705_s25 + $0x50] sm:$0xff]  }
  0x98   : > { %v12328_v48 = vpop.permute.xlu2 %2754  ;;  %17832 = vst [vmem:[#allocation55_spill] sm:$0xff] %v12350_v38  ;;  %v1753_v33 = vpack.c.bf16 %v1720_v62, %v1720_v62  ;;  %v1649_v54 = vmul.f32 %v12154_v12, %v12350_v38  ;;  %v12382_v52 = vrot.slane %v2710_v10, 5  ;;  %v12384_v60 = vor.u32 %v2222_v47, %v2219_v26 }
  0x99   : > { %2881 = vrot.lane.b32.xlu0 %v17830_v29, %s11587_s29  ;;  %17835 = vst [vmem:[#allocation56_spill] sm:$0xff] %v12375_v28  ;;  %v2418_v16 = vsel %vm2405_vm7, %v12272_v46, %v12358_v57  ;;  %v12389_v43 = vrot.slane %v3025_v51, 5  ;;  %v10254_v24 = vsel %vm12360_vm9, 1.0, %v17800_v56  ;;  %v1650_v47 = vmul.f32 %v12241_v32, %v12375_v28  ;;  %v11087_v46 = vld [vmem:[%s17493_s1] sm:$0xff] }
  0x9a   : > { %3634 = vmatpush.bf16.msra.mxu0 %v11089_v36  ;;  %17836 = vst [vmem:[#allocation57_spill] sm:$0xff] %v12384_v60  ;;  %v12396_v36 = vunpack.c.l.b16 %v1752_v37  ;;  %v12398_v44 = vunpack.c.l.b16 %v1753_v33  ;;  %v1859_v29 = vmul.f32 %v12241_v32, %v12311_v45  ;;  %v3046_v10 = vsel %vm2405_vm7, %v12184_v9, %v3045_v35 }
  0x9b   : > { %v12354_v34 = vpop.permute.xlu0 %2604  ;;  %v1682_v26 = vpack.c.bf16 %v1649_v54, %v1649_v54  ;;  %v1789_v51 = vmul.f32 %v12253_v15, %v12350_v38  ;;  %v2733_v37 = vsel %vm2405_vm7, %v2730_v30, %v12382_v52  ;;  %v12423_v33 = vsel %vm2144_vm0, %v12259_v61, %v12384_v60 }
  0x9c   : > { %2929 = vrot.lane.b32.xlu1 %v12326_v53, %s11590_s17  ;;  %v348_v9 = vadd.s32 128, %v11693_v1  ;;  %v3106_v39 = vsel %vm3103_vm8, %v2047_v49, %v12297_v41  ;;  %v12431_v54 = vsel %vm2405_vm7, %v3045_v35, %v12389_v43  ;;  %v1790_v30 = vmul.f32 %v12256_v0, %v12375_v28 }
  0x9d   : > { %v12436_v61 = vunpack.c.l.bf16 %v12408_v11  ;;  %v1892_v40 = vpack.c.bf16 %v1859_v29, %v1859_v29  ;;  %v2369_v49 = vunpack.c.l.b16 %v1682_v26  ;;  %v1822_v12 = vpack.c.bf16 %v1789_v51, %v1789_v51 }
  0x9e   : > { %v12369_v21 = vpop.permute.xlu1 %2871  ;;  %2764 = vrot.lane.b32.xlu2 %v2731_v58, %s11589_s16  ;;  %3635 = vmatpush.bf16.msra.mxu0 %v11088_v2  ;;  %v1860_v58 = vmul.f32 %v12253_v15, %v12315_v55  ;;  %v480_v19 = vand.u32 15, %v348_v9  ;;  %v12441_v35 = vunpack.c.h.bf16 %v12232_v3  ;;  %v1823_v3 = vpack.c.bf16 %v1790_v30, %v1790_v30 }
  0x9f   : > { %v1930_v26 = vmul.f32 %v12436_v61, %v12375_v28  ;;  %v1411_v9 = vmul.f32 %v11728_v27, %v11906_v8  ;;  %vm17636_vm9 = vcmask 588800  }
  0xa0   : > { %v12394_v62 = vpop.permute.xlu2 %2873  ;;  %vm12452_vm14 = vcmp.ge.s32.totalorder %v480_v19, 1  ;;  %v1410_v19 = vmul.f32 %v11781_v63, %v11902_v31  ;;  %v2686_v8 = vunpack.c.l.b16 %v1823_v3 }
  0xa1   : > { %2300 = vrot.lane.b32.xlu0 %v12223_v22, %s11584_s26  ;;  %v1337_v22 = vrot.slane %v10254_v24, 1  ;;  %v2545_v24 = vpack.c.b16 %v12398_v44, %v12396_v36  ;;  %v1444_v60 = vpack.c.bf16 %v1411_v9, %v1411_v9 }
  0xa2   : > { %3636 = vmatpush.bf16.msra.mxu0 %v11087_v46  ;;  %v1683_v46 = vpack.c.bf16 %v1650_v47, %v1650_v47  ;;  %v349_v47 = vadd.s32 136, %v11693_v1  ;;  %v1443_v45 = vpack.c.bf16 %v1410_v19, %v1410_v19 }
  0xa3   : > { %v2291_v2 = vpop.permute.xlu0 %2290  ;;  %v12446_v55 = vsel %vm1309_vm2, %v11707_v7, %v1337_v22  ;;  %v12450_v36 = vsel %vm1309_vm2, %v1337_v22, %v11707_v7  ;;  %v12464_v22 = vunpack.c.l.b16 %v1892_v40  ;;  %v10255_v40 = vsel %vm12452_vm14, 1.0, %v17800_v56 }
  0xa4   : > { %2451 = vrot.lane.b32.xlu1 %v2418_v16, %s11588_s14  ;;  %v1893_v16 = vpack.c.bf16 %v1860_v58, %v1860_v58  ;;  %17837 = vst [vmem:[#allocation58_spill] sm:$0xff] %v12446_v55  ;;  %v2370_v51 = vunpack.c.l.b16 %v1683_v46  ;;  %v1721_v30 = vmul.f32 %v12241_v32, %v12446_v55  ;;  %v1722_v46 = vmul.f32 %v12253_v15, %v12450_v36 }
  0xa5   : > { %17838 = vst [vmem:[#allocation59_spill] sm:$0xff] %v12450_v36  ;;  %v1861_v27 = vmul.f32 %v12256_v0, %v12446_v55  ;;  %v1963_v32 = vpack.c.bf16 %v1930_v26, %v1930_v26  ;;  %v1341_v17 = vrot.slane %v10255_v40, 1  ;;  %v12504_v19 = vunpack.c.l.b16 %v1444_v60 }
  0xa6   : > { %v2440_v41 = vpop.permute.xlu1 %2439  ;;  %3079 = vrot.lane.b32.xlu2 %v3046_v10, %s11591_s21  ;;  %v1929_v10 = vmul.f32 %v12441_v35, %v12350_v38  ;;  %v2685_v38 = vunpack.c.l.b16 %v1822_v12  ;;  %v2395_v44 = vpack.c.b16 %v2370_v51, %v2369_v49  ;;  %v1754_v55 = vpack.c.bf16 %v1721_v30, %v1721_v30 }
  0xa7   : > { %v3157_v29 = vsel %vm3155_vm10, %v3106_v39, %v2440_v41  ;;  %v12472_v39 = vunpack.c.l.b16 %v1893_v16  ;;  %v1862_v41 = vmul.f32 %v12441_v35, %v12450_v36  ;;  %v487_v16 = vand.u32 15, %v349_v47 }
  0xa8   : > { %v12462_v58 = vpop.permute.xlu2 %3069  ;;  %v3192_v63 = vsel %vm3190_vm11, %v3157_v29, %v12211_v5  ;;  %v1962_v31 = vpack.c.bf16 %v1929_v10, %v1929_v10  ;;  %v17841_v5 = vpack.c.b16 %v12343_v50, %v12341_v23  ;;  %v1894_v3 = vpack.c.bf16 %v1861_v27, %v1861_v27 }
  0xa9   : > { %2616 = vrot.lane.b32.xlu0 %v12326_v53, %s11585_s27  ;;  %v3227_v36 = vsel %vm3225_vm12, %v3192_v63, %v12354_v34  ;;  %v1895_v49 = vpack.c.bf16 %v1862_v41, %v1862_v41  ;;  %vm893_vm5 = vcmp.le.s32.totalorder %v487_v16, 14  ;;  %v2860_v10 = vpack.c.b16 %v12472_v39, %v12464_v22 }
  0xaa   : > { %v3109_v29 = vsel %vm3103_vm8, %v17841_v5, %v2291_v2  ;;  %v2711_v23 = vpack.c.b16 %v2686_v8, %v2685_v38  ;;  %v3000_v50 = vunpack.c.l.b16 %v1962_v31  ;;  %v3001_v2 = vunpack.c.l.b16 %v1963_v32 }
  0xab   : > { %v2757_v28 = vpop.permute.xlu0 %2756  ;;  %v3262_v34 = vsel %vm3260_vm13, %v3227_v36, %v12328_v48  ;;  %v12502_v51 = vunpack.c.l.b16 %v1443_v45  ;;  %v12514_v31 = vrot.slane %v2395_v44, 5  ;;  %v2520_v8 = vunpack.c.l.b16 %v1754_v55  ;;  %v11078_v48 = vld [vmem:[%s11705_s25 + $0x4c] sm:$0xff] }
  0xac   : > { %2766 = vrot.lane.b32.xlu1 %v2733_v37, %s11589_s16  ;;  %v1755_v37 = vpack.c.bf16 %v1722_v46, %v1722_v46  ;;  %v12518_v32 = vsel %vm893_vm5, 1.0, %v17800_v56  ;;  %v12520_v38 = vunpack.c.l.b16 %v1894_v3  ;;  %v12522_v60 = vunpack.c.l.b16 %v1895_v49 }
  0xad   : > { %v12526_v36 = vsel %vm1309_vm2, %v1341_v17, %v11707_v7  ;;  %v3297_v55 = vsel %vm3295_vm15, %v3262_v34, %v12369_v21  ;;  %v12532_v22 = vrot.slane %v2711_v23, 5  ;;  %v3026_v39 = vpack.c.b16 %v3001_v2, %v3000_v50 }
  0xae   : > { %v2442_v47 = vpop.permute.xlu1 %2441  ;;  %2568 = vrot.lane.b32.xlu2 %v2545_v24, %s11586_s28  ;;  %v12508_v24 = vsel %vm1309_vm2, %v11707_v7, %v1341_v17  ;;  %v2521_v45 = vunpack.c.l.b16 %v1755_v37  ;;  %17843 = vst [vmem:[#allocation61_spill] sm:$0xff] %v12526_v36  ;;  %v2049_v17 = vpack.c.b16 %v12504_v19, %v12502_v51  ;;  %v1724_v27 = vmul.f32 %v12441_v35, %v12526_v36 }
  0xaf   : > { %v3159_v12 = vsel %vm3155_vm10, %v3109_v29, %v2442_v47  ;;  %17842 = vst [vmem:[#allocation60_spill] sm:$0xff] %v12508_v24  ;;  %v1723_v30 = vmul.f32 %v12256_v0, %v12508_v24  ;;  %v2226_v41 = vshrl.u32 %v11078_v48, 16  ;;  %v351_v16 = vadd.s32 152, %v11693_v1 }
  0xb0   : > { %v12500_v26 = vpop.permute.xlu2 %2443  ;;  %v3194_v9 = vsel %vm3190_vm11, %v3159_v12, %v12283_v6  ;;  %v2546_v44 = vpack.c.b16 %v2521_v45, %v2520_v8  ;;  %v2861_v5 = vpack.c.b16 %v12522_v60, %v12520_v38  ;;  %v2229_v29 = vshll.u32 %v11078_v48, 16 }
  0xb1   : > { %2931 = vrot.lane.b32.xlu0 %v12423_v33, %s11590_s17  ;;  %v3229_v46 = vsel %vm3225_vm12, %v3194_v9, %v12307_v20  ;;  %v2420_v20 = vsel %vm2405_vm7, %v12358_v57, %v12514_v31  ;;  %v2735_v47 = vsel %vm2405_vm7, %v12382_v52, %v12532_v22  ;;  %v12557_v37 = vrot.slane %v3026_v39, 5  ;;  %v11079_v39 = vld [vmem:[%s11705_s25 + $0x54] sm:$0xff] }
  0xb2   : > { %v1756_v12 = vpack.c.bf16 %v1723_v30, %v1723_v30  ;;  %v12562_v57 = vunpack.c.h.bf16 %v12408_v11  ;;  %v1757_v50 = vpack.c.bf16 %v1724_v27, %v1724_v27  ;;  %v2228_v2 = vrot.slane %v2226_v41, 4 }
  0xb3   : > { %v2920_v6 = vpop.permute.xlu0 %2919  ;;  %v501_v11 = vand.u32 15, %v351_v16  ;;  %v2231_v34 = vrot.slane %v2229_v29, 5  ;;  %v1412_v9 = vmul.f32 %v11788_v4, %v12022_v42  ;;  %v1413_v8 = vmul.f32 %v11842_v13, %v12026_v18 }
  0xb4   : > { %3081 = vrot.lane.b32.xlu1 %v12431_v54, %s11591_s21  ;;  %v3332_v40 = vsel %vm3330_vm1, %v3297_v55, %v2920_v6  ;;  %v1572_v54 = vrot.slane %v12518_v32, 7  ;;  %17844 = vst [vmem:[#allocation62_spill] sm:$0xff] %v12562_v57  ;;  %v12585_v38 = vunpack.c.l.b16 %v1756_v12  ;;  %v1863_v4 = vmul.f32 %v12436_v61, %v12508_v24 }
  0xb5   : > { %v3367_v63 = vsel %vm3365_vm3, %v3332_v40, %v12462_v58  ;;  %v3264_v58 = vsel %vm3260_vm13, %v3229_v46, %v2757_v28  ;;  %v1864_v13 = vmul.f32 %v12562_v57, %v12526_v36  ;;  %vm895_vm14 = vcmp.le.s32.totalorder %v501_v11, 14 }
  0xb6   : > { %v2922_v21 = vpop.permute.xlu1 %2921  ;;  %2883 = vrot.lane.b32.xlu2 %v2860_v10, %s11587_s29  ;;  %v3414_v3 = vshrl.u32 %v3367_v63, 16  ;;  %v17845_v10 = vrot.slane %v12321_v59, 7  ;;  %v12574_v28 = vsel %vm1538_vm4, %v11714_v14, %v1572_v54  ;;  %v3417_v52 = vshll.u32 %v3367_v63, 16 }
  0xb7   : > { %17847 = vst [vmem:[#allocation64_spill] sm:$0xff] %v12574_v28  ;;  %v3299_v59 = vsel %vm3295_vm15, %v3264_v58, %v12394_v62  ;;  %v1652_v62 = vmul.f32 %v12256_v0, %v12574_v28  ;;  %v12601_v27 = vor.u32 %v2231_v34, %v2228_v2  ;;  %v1445_v41 = vpack.c.bf16 %v1412_v9, %v1412_v9 }
  0xb8   : > { %v12559_v49 = vpop.permute.xlu2 %2758  ;;  %v12568_v23 = vsel %vm1538_vm4, %v17845_v10, %v11714_v14  ;;  %v3334_v48 = vsel %vm3330_vm1, %v3299_v59, %v2922_v21  ;;  %v3416_v6 = vrot.slane %v3414_v3, 3  ;;  %v3419_v30 = vrot.slane %v3417_v52, 4 }
  0xb9   : > { %17846 = vst [vmem:[#allocation63_spill] sm:$0xff] %v12568_v23  ;;  %2453 = vrot.lane.b32.xlu0 %v2420_v20, %s11588_s14  ;;  %v1651_v60 = vmul.f32 %v12253_v15, %v12568_v23  ;;  %v12599_v21 = vunpack.c.l.b16 %v1757_v50  ;;  %v1446_v16 = vpack.c.bf16 %v1413_v8, %v1413_v8  ;;  %v1685_v58 = vpack.c.bf16 %v1652_v62, %v1652_v62 }
  0xba   : > { %v1896_v3 = vpack.c.bf16 %v1863_v4, %v1863_v4  ;;  %v2235_v10 = vshrl.u32 %v11079_v39, 16  ;;  %v2238_v52 = vshll.u32 %v11079_v39, 16  ;;  %v12606_v11 = vsel %vm895_vm14, 1.0, %v17800_v56 }
  0xbb   : > { %v3072_v45 = vpop.permute.xlu0 %3071  ;;  %v1684_v29 = vpack.c.bf16 %v1651_v60, %v1651_v60  ;;  %v3420_v50 = vor.u32 %v3419_v30, %v3416_v6  ;;  %v1897_v2 = vpack.c.bf16 %v1864_v13, %v1864_v13  ;;  %v12615_v34 = vunpack.c.l.b16 %v1445_v41 }
  0xbc   : > { %2570 = vrot.lane.b32.xlu1 %v2546_v44, %s11586_s28  ;;  %v3369_v55 = vsel %vm3365_vm3, %v3334_v48, %v3072_v45  ;;  %v1791_v9 = vmul.f32 %v12441_v35, %v12568_v23  ;;  %v1792_v8 = vmul.f32 %v12436_v61, %v12574_v28  ;;  %v17588_v48 = vrot.slane %v12606_v11, 7 }
  0xbd   : > { %v3421_v46 = vshrl.u32 %v3369_v55, 16  ;;  %v3424_v40 = vshll.u32 %v3369_v55, 16  ;;  %v2372_v45 = vunpack.c.l.b16 %v1685_v58  ;;  %v2237_v62 = vrot.slane %v2235_v10, 4  ;;  %v11415_v55 = vld [vmem:[%s11705_s25 + $0x58] sm:$0xff]  }
  0xbe   : > { %v2293_v63 = vpop.permute.xlu1 %2292  ;;  %2302 = vrot.lane.b32.xlu2 %v12326_v53, %s11584_s26  ;;  %v2240_v6 = vrot.slane %v2238_v52, 5  ;;  %v12638_v39 = vunpack.c.l.b16 %v1896_v3  ;;  %v12640_v30 = vunpack.c.l.b16 %v1897_v2  ;;  %v1824_v32 = vpack.c.bf16 %v1791_v9, %v1791_v9  ;;  %v17851_v58 = vld [vmem:[#allocation22_spill] sm:$0xff] }
  0xbf   : > { %v3423_v20 = vrot.slane %v3421_v46, 3  ;;  %v3426_v44 = vrot.slane %v3424_v40, 4  ;;  %v3112_v53 = vsel %vm3103_vm8, %v2049_v17, %v2293_v63  ;;  %v12625_v17 = vunpack.c.l.b16 %v1446_v16 }
  0xc0   : > { %v12603_v12 = vpop.permute.xlu2 %3073  ;;  %v3161_v60 = vsel %vm3155_vm10, %v3112_v53, %v12500_v26  ;;  %v350_v26 = vadd.s32 144, %v11693_v1  ;;  %v3050_v46 = vsel %vm2405_vm7, %v12389_v43, %v12557_v37  ;;  %v12652_v40 = vsel %vm1538_vm4, %v11714_v14, %v17588_v48 }
  0xc1   : > { %v12608_v59 = vor.u32 %v3426_v44, %v3423_v20  ;;  %2768 = vrot.lane.b32.xlu0 %v2735_v47, %s11589_s16  ;;  %v2371_v47 = vunpack.c.l.b16 %v1684_v29  ;;  %17849 = vst [vmem:[#allocation66_spill] sm:$0xff] %v12652_v40  ;;  %v2547_v63 = vpack.c.b16 %v12599_v21, %v12585_v38  ;;  %v12658_v20 = vunpack.c.l.bf16 %v11415_v55  ;;  %v17852_v38 = vld [vmem:[#allocation57_spill] sm:$0xff] }
  0xc2   : > { %v12663_v29 = vor.u32 %v2240_v6, %v2237_v62  ;;  %v12667_v3 = vmul.f32 %v17851_v58, %v12078_v25  ;;  %v494_v10 = vand.u32 15, %v350_v26  ;;  %v12673_v21 = vsel %vm2144_vm0, %v17852_v38, %v12601_v27  ;;  %v17856_v62 = vld [vmem:[#allocation30_spill] sm:$0xff] }
  0xc3   : > { %v2561_v51 = vpop.permute.xlu0 %2560  ;;  %v3428_v19 = vsel %vm3413_vm6, %v3420_v50, %v12608_v59  ;;  %v2396_v41 = vpack.c.b16 %v2372_v45, %v2371_v47  ;;  %17850 = vst [vmem:[#allocation67_spill] sm:$0xff] %v12658_v20  ;;  %v1654_v50 = vmul.f32 %v12436_v61, %v12652_v40  ;;  %v2687_v2 = vunpack.c.l.b16 %v1824_v32 }
  0xc4   : > { %2885 = vrot.lane.b32.xlu1 %v2861_v5, %s11587_s29  ;;  %10383 = vmatmul.msk.bf16.vlgmr.msra.gmra.mxu0 %vm17636_vm9, %v3428_v19  ;;  %v12634_v5 = vsel %vm1538_vm4, %v1572_v54, %v11714_v14  ;;  %v3196_v4 = vsel %vm3190_vm11, %v3161_v60, %v2561_v51  ;;  %v1825_v54 = vpack.c.bf16 %v1792_v8, %v1792_v8  ;;  %vm12683_vm5 = vcmp.ge.s32.totalorder %v494_v10, 1  ;;  %v17855_v60 = vld [vmem:[#allocation42_spill] sm:$0xff] }
  0xc5   : > { %17848 = vst [vmem:[#allocation65_spill] sm:$0xff] %v12634_v5  ;;  %v1653_v16 = vmul.f32 %v12441_v35, %v12634_v5  ;;  %v1931_v8 = vmul.f32 %v12562_v57, %v12568_v23  ;;  %v12691_v45 = vrot.slane %v2396_v41, 5  ;;  %v12695_v6 = vmul.f32 %v17856_v62, %v17855_v60 }
  0xc6   : > { %v2609_v13 = vpop.permute.xlu1 %2608  ;;  %2618 = vrot.lane.b32.xlu2 %v12423_v33, %s11585_s27  ;;  %v2688_v9 = vunpack.c.l.b16 %v1825_v54  ;;  %v12703_v26 = vsel %vm2144_vm0, %v12601_v27, %v12663_v29  ;;  %v1687_v54 = vpack.c.bf16 %v1654_v50, %v1654_v50  ;;  %v1793_v41 = vmul.f32 %v12562_v57, %v12634_v5 }
  0xc7   : > { %v3231_v43 = vsel %vm3225_vm12, %v3196_v4, %v2609_v13  ;;  %v1932_v4 = vmul.f32 %v12658_v20, %v12574_v28  ;;  %v10256_v58 = vsel %vm12683_vm5, 1.0, %v17800_v56  ;;  %v1964_v10 = vpack.c.bf16 %v1931_v8, %v1931_v8 }
  0xc8   : > { %v12661_v44 = vpop.permute.xlu2 %2562  ;;  %v3266_v47 = vsel %vm3260_vm13, %v3231_v43, %v12559_v49  ;;  %v1686_v49 = vpack.c.bf16 %v1653_v16, %v1653_v16  ;;  %v1794_v43 = vmul.f32 %v12658_v20, %v12652_v40  ;;  %v2712_v16 = vpack.c.b16 %v2688_v9, %v2687_v2 }
  0xc9   : > { %3083 = vrot.lane.b32.xlu0 %v3050_v46, %s11591_s21  ;;  %v12708_v46 = vld [vmem:[%s11705_s25 + $0x60] sm:$0xff]   ;;  %v353_v38 = vadd.s32 168, %v11693_v1  ;;  %v2422_v2 = vsel %vm2405_vm7, %v12514_v31, %v12691_v45  ;;  %v1345_v9 = vrot.slane %v10256_v58, 1  ;;  %v3002_v28 = vunpack.c.l.b16 %v1964_v10 }
  0xca   : > { %v12726_v62 = vunpack.c.l.bf16 %v12708_v46  ;;  %v2373_v8 = vunpack.c.l.b16 %v1686_v49  ;;  %v12735_v53 = vrot.slane %v2712_v16, 5 }
  0xcb   : > { %v2876_v19 = vpop.permute.xlu0 %2875  ;;  %v515_v52 = vand.u32 15, %v353_v38  ;;  %v17861_v38 = vpack.c.b16 %v12625_v17, %v12615_v34 }
  0xcc   : > { %2304 = vrot.lane.b32.xlu1 %v12423_v33, %s11584_s26  ;;  %v3301_v13 = vsel %vm3295_vm15, %v3266_v47, %v2876_v19  ;;  %v1965_v19 = vpack.c.bf16 %v1932_v4, %v1932_v4  ;;  %v12723_v47 = vunpack.c.h.bf16 %v11415_v55  ;;  %17858 = vst [vmem:[#allocation57_spill] sm:$0xff] %v12726_v62  ;;  %v1827_v4 = vpack.c.bf16 %v1794_v43, %v1794_v43  ;;  %v11080_v55 = vld [vmem:[%s11705_s25 + $0x5c] sm:$0xff] }
  0xcd   : > { %vm897_vm14 = vcmp.le.s32.totalorder %v515_v52, 14  ;;  %v2244_v10 = vshrl.u32 %v11080_v55, 16 }
  0xce   : > { %v2924_v32 = vpop.permute.xlu1 %2923  ;;  %2933 = vrot.lane.b32.xlu2 %v12673_v21, %s11590_s17  ;;  %17857 = vst [vmem:[#allocation22_spill] sm:$0xff] %v12723_v47  ;;  %v3003_v23 = vunpack.c.l.b16 %v1965_v19  ;;  %v1933_v31 = vmul.f32 %v12723_v47, %v12634_v5  ;;  %v2690_v16 = vunpack.c.l.b16 %v1827_v4  ;;  %v352_v4 = vadd.s32 160, %v11693_v1 }
  0xcf   : > { %v3336_v27 = vsel %vm3330_vm1, %v3301_v13, %v2924_v32  ;;  %v2374_v32 = vunpack.c.l.b16 %v1687_v54  ;;  %v12751_v54 = vsel %vm1309_vm2, %v1345_v9, %v11707_v7 }
  0xd0   : > { %v3371_v50 = vsel %vm3365_vm3, %v3336_v27, %v12603_v12  ;;  %v12728_v13 = vpop.permute.xlu2 %2877  ;;  %v1826_v12 = vpack.c.bf16 %v1793_v41, %v1793_v41  ;;  %17860 = vst [vmem:[#allocation68_spill] sm:$0xff] %v12751_v54  ;;  %v1726_v34 = vmul.f32 %v12562_v57, %v12751_v54  ;;  %v1966_v17 = vpack.c.bf16 %v1933_v31, %v1933_v31 }
  0xd1   : > { %v3429_v51 = vshrl.u32 %v3371_v50, 16  ;;  %v3432_v33 = vshll.u32 %v3371_v50, 16  ;;  %2572 = vrot.lane.b32.xlu0 %v2547_v63, %s11586_s28  ;;  %v1934_v63 = vmul.f32 %v12726_v62, %v12652_v40  ;;  %v2397_v43 = vpack.c.b16 %v2374_v32, %v2373_v8 }
  0xd2   : > { %v2689_v58 = vunpack.c.l.b16 %v1826_v12  ;;  %v1448_v32 = vpack.c.bf16 %v12695_v6, %v12695_v6  ;;  %v3027_v12 = vpack.c.b16 %v3003_v23, %v3002_v28  ;;  %v17863_v6 = vrot.slane %v12606_v11, 7 }
  0xd3   : > { %v3431_v27 = vrot.slane %v3429_v51, 3  ;;  %v3434_v48 = vrot.slane %v3432_v33, 4  ;;  %v2295_v50 = vpop.permute.xlu0 %2294  ;;  %v12747_v33 = vsel %vm1309_vm2, %v11707_v7, %v1345_v9  ;;  %v2247_v51 = vshll.u32 %v11080_v55, 16 }
  0xd4   : > { %2620 = vrot.lane.b32.xlu1 %v12673_v21, %s11585_s27  ;;  %17859 = vst [vmem:[#allocation30_spill] sm:$0xff] %v12747_v33  ;;  %v12762_v9 = vsel %vm897_vm14, 1.0, %v17800_v56  ;;  %v1725_v52 = vmul.f32 %v12436_v61, %v12747_v33  ;;  %v1967_v8 = vpack.c.bf16 %v1934_v63, %v1934_v63  ;;  %v12786_v31 = vsel %vm1538_vm4, %v17863_v6, %v11714_v14 }
  0xd5   : > { %v12743_v49 = vor.u32 %v3434_v48, %v3431_v27  ;;  %v3115_v48 = vsel %vm3103_vm8, %v17861_v38, %v2295_v50  ;;  %v17862_v27 = vpack.c.b16 %v12640_v30, %v12638_v39  ;;  %v2713_v50 = vpack.c.b16 %v2690_v16, %v2689_v58  ;;  %17864 = vst [vmem:[#allocation69_spill] sm:$0xff] %v12786_v31 }
  0xd6   : > { %v2446_v41 = vpop.permute.xlu1 %2445  ;;  %2455 = vrot.lane.b32.xlu2 %v2422_v2, %s11588_s14  ;;  %v2737_v2 = vsel %vm2405_vm7, %v12532_v22, %v12735_v53  ;;  %v17593_v63 = vrot.slane %v12762_v9, 7  ;;  %v12789_v22 = vrot.slane %v2397_v43, 5  ;;  %v2246_v23 = vrot.slane %v2244_v10, 4 }
  0xd7   : > { %v3436_v19 = vsel %vm3413_vm6, %v12608_v59, %v12743_v49  ;;  %v3163_v55 = vsel %vm3155_vm10, %v3115_v48, %v2446_v41  ;;  %v2249_v28 = vrot.slane %v2247_v51, 5  ;;  %v508_v38 = vand.u32 15, %v352_v4 }
  0xd8   : > { %10384 = vmatmul.msk.bf16.gmra.mxu0 %vm17636_vm9, %v3436_v19  ;;  %v12771_v59 = vpop.permute.xlu2 %2296  ;;  %v1758_v39 = vpack.c.bf16 %v1725_v52, %v1725_v52  ;;  %v1759_v30 = vpack.c.bf16 %v1726_v34, %v1726_v34  ;;  %v3004_v58 = vunpack.c.l.b16 %v1966_v17  ;;  %v3005_v16 = vunpack.c.l.b16 %v1967_v8 }
  0xd9   : > { %2887 = vrot.lane.b32.xlu0 %v17862_v27, %s11587_s29  ;;  %v3198_v11 = vsel %vm3190_vm11, %v3163_v55, %v12661_v44  ;;  %v1655_v48 = vmul.f32 %v12562_v57, %v12786_v31  ;;  %vm768_vm5 = vcmp.ge.s32.totalorder %v508_v38, 1  ;;  %v17865_v10 = vpack.c.bf16 %v12667_v3, %v12667_v3 }
  0xda   : > { %v12803_v51 = vunpack.c.l.b16 %v1448_v32  ;;  %v12809_v44 = vsel %vm1538_vm4, %v11714_v14, %v17593_v63  ;;  %v2424_v34 = vsel %vm2405_vm7, %v12691_v45, %v12789_v22  ;;  %v12815_v17 = vrot.slane %v3027_v12, 5 }
  0xdb   : > { %v2611_v41 = vpop.permute.xlu0 %2610  ;;  %v12801_v19 = vunpack.c.l.b16 %v17865_v10  ;;  %17866 = vst [vmem:[#allocation70_spill] sm:$0xff] %v12809_v44  ;;  %v12817_v3 = vrot.slane %v2713_v50, 5  ;;  %v12819_v8 = vor.u32 %v2249_v28, %v2246_v23  ;;  %v12821_v32 = vunpack.c.l.b16 %v1758_v39  ;;  %v12834_v23 = vld [vmem:[%s11705_s25 + $0x68] sm:$0xff]  }
  0xdc   : > { %2935 = vrot.lane.b32.xlu1 %v12703_v26, %s11590_s17  ;;  %v3233_v43 = vsel %vm3225_vm12, %v3198_v11, %v2611_v41  ;;  %v12823_v4 = vunpack.c.l.b16 %v1759_v30  ;;  %v3028_v55 = vpack.c.b16 %v3005_v16, %v3004_v58  ;;  %v10257_v27 = vsel %vm768_vm5, 1.0, %v17800_v56 }
  0xdd   : > { %v1656_v45 = vmul.f32 %v12658_v20, %v12809_v44  ;;  %v1688_v12 = vpack.c.bf16 %v1655_v48, %v1655_v48  ;;  %v1865_v50 = vmul.f32 %v12658_v20, %v12747_v33  ;;  %v2051_v28 = vpack.c.b16 %v12803_v51, %v12801_v19 }
  0xde   : > { %v2761_v52 = vpop.permute.xlu1 %2760  ;;  %2770 = vrot.lane.b32.xlu2 %v2737_v2, %s11589_s16  ;;  %v1866_v38 = vmul.f32 %v12723_v47, %v12751_v54  ;;  %v1795_v41 = vmul.f32 %v12723_v47, %v12786_v31  ;;  %v1796_v39 = vmul.f32 %v12726_v62, %v12809_v44  ;;  %v3052_v30 = vsel %vm2405_vm7, %v12557_v37, %v12815_v17 }
  0xdf   : > { %v3268_v6 = vsel %vm3260_vm13, %v3233_v43, %v2761_v52  ;;  %v2739_v58 = vsel %vm2405_vm7, %v12735_v53, %v12817_v3  ;;  %v1349_v16 = vrot.slane %v10257_v27, 1  ;;  %v2548_v43 = vpack.c.b16 %v12823_v4, %v12821_v32 }
  0xe0   : > { %v12827_v2 = vpop.permute.xlu2 %2612  ;;  %v3303_v48 = vsel %vm3295_vm15, %v3268_v6, %v12728_v13  ;;  %v12862_v37 = vrot.slane %v3028_v55, 5  ;;  %v12865_v10 = vunpack.c.l.bf16 %v12834_v23  ;;  %v1689_v19 = vpack.c.bf16 %v1656_v45, %v1656_v45  ;;  %v17869_v55 = vld [vmem:[#allocation45_spill] sm:$0xff]  ;;  %v17870_v6 = vld [vmem:[#allocation31_spill] sm:$0xff] }
  0xe1   : > { %2306 = vrot.lane.b32.xlu0 %v12673_v21, %s11584_s26  ;;  %v12855_v21 = vsel %vm2144_vm0, %v12663_v29, %v12819_v8  ;;  %v12868_v29 = vunpack.c.l.b16 %v1688_v12  ;;  %v1898_v51 = vpack.c.bf16 %v1865_v50, %v1865_v50  ;;  %v1828_v27 = vpack.c.bf16 %v1795_v41, %v1795_v41  ;;  %v17871_v12 = vld [vmem:[#allocation46_spill] sm:$0xff]  ;;  %v17872_v50 = vld [vmem:[#allocation35_spill] sm:$0xff] }
  0xe2   : > { %v1829_v63 = vpack.c.bf16 %v1796_v39, %v1796_v39  ;;  %v12871_v13 = vunpack.c.h.bf16 %v12708_v46  ;;  %v12877_v4 = vsel %vm1309_vm2, %v11707_v7, %v1349_v16  ;;  %v1416_v45 = vmul.f32 %v17870_v6, %v17869_v55 }
  0xe3   : > { %v2926_v11 = vpop.permute.xlu0 %2925  ;;  %17868 = vst [vmem:[#allocation72_spill] sm:$0xff] %v12877_v4  ;;  %v1936_v39 = vmul.f32 %v12865_v10, %v12809_v44  ;;  %v355_v6 = vadd.s32 184, %v11693_v1  ;;  %v3118_v44 = vsel %vm3103_vm8, %v2051_v28, %v12771_v59 }
  0xe4   : > { %2457 = vrot.lane.b32.xlu1 %v2424_v34, %s11588_s14  ;;  %v3338_v53 = vsel %vm3330_vm1, %v3303_v48, %v2926_v11  ;;  %v1899_v34 = vpack.c.bf16 %v1866_v38, %v1866_v38  ;;  %17867 = vst [vmem:[#allocation71_spill] sm:$0xff] %v12871_v13  ;;  %v1417_v11 = vmul.f32 %v17872_v50, %v17871_v12  ;;  %v2692_v5 = vunpack.c.l.b16 %v1829_v63 }
  0xe5   : > { %v1935_v46 = vmul.f32 %v12871_v13, %v12786_v31  ;;  %v1969_v60 = vpack.c.bf16 %v1936_v39, %v1936_v39  ;;  %v1449_v25 = vpack.c.bf16 %v1416_v45, %v1416_v45 }
  0xe6   : > { %v3076_v52 = vpop.permute.xlu1 %3075  ;;  %3085 = vrot.lane.b32.xlu2 %v3052_v30, %s11591_s21  ;;  %v2376_v30 = vunpack.c.l.b16 %v1689_v19  ;;  %v1727_v19 = vmul.f32 %v12658_v20, %v12877_v4  ;;  %v2840_v63 = vunpack.c.l.b16 %v1899_v34  ;;  %v1450_v18 = vpack.c.bf16 %v1417_v11, %v1417_v11 }
  0xe7   : > { %v3373_v32 = vsel %vm3365_vm3, %v3338_v53, %v3076_v52  ;;  %v12891_v53 = vsel %vm1309_vm2, %v1349_v16, %v11707_v7  ;;  %v354_v52 = vadd.s32 176, %v11693_v1  ;;  %v529_v16 = vand.u32 15, %v355_v6 }
  0xe8   : > { %v3437_v38 = vshrl.u32 %v3373_v32, 16  ;;  %v3440_v41 = vshll.u32 %v3373_v32, 16  ;;  %v12887_v48 = vpop.permute.xlu2 %2927  ;;  %17873 = vst [vmem:[#allocation31_spill] sm:$0xff] %v12891_v53  ;;  %v2691_v32 = vunpack.c.l.b16 %v1828_v27  ;;  %v2839_v27 = vunpack.c.l.b16 %v1898_v51 }
  0xe9   : > { %2622 = vrot.lane.b32.xlu0 %v12703_v26, %s11585_s27  ;;  %v522_v31 = vand.u32 15, %v354_v52  ;;  %v1868_v51 = vmul.f32 %v12871_v13, %v12891_v53  ;;  %vm899_vm5 = vcmp.le.s32.totalorder %v529_v16, 14  ;;  %v1760_v34 = vpack.c.bf16 %v1727_v19, %v1727_v19 }
  0xea   : > { %v3439_v50 = vrot.slane %v3437_v38, 3  ;;  %v3442_v40 = vrot.slane %v3440_v41, 4  ;;  %v1728_v38 = vmul.f32 %v12723_v47, %v12891_v53  ;;  %v1968_v41 = vpack.c.bf16 %v1935_v46, %v1935_v46 }
  0xeb   : > { %v2448_v55 = vpop.permute.xlu0 %2447  ;;  %v2714_v52 = vpack.c.b16 %v2692_v5, %v2691_v32  ;;  %vm770_vm14 = vcmp.ge.s32.totalorder %v522_v31, 1  ;;  %v3054_v5 = vsel %vm2405_vm7, %v12815_v17, %v12862_v37  ;;  %v12930_v39 = vsel %vm899_vm5, 1.0, %v17800_v56 }
  0xec   : > { %v12901_v12 = vor.u32 %v3442_v40, %v3439_v50  ;;  %2772 = vrot.lane.b32.xlu1 %v2739_v58, %s11589_s16  ;;  %v2398_v40 = vpack.c.b16 %v2376_v30, %v12868_v29  ;;  %v1867_v58 = vmul.f32 %v12726_v62, %v12877_v4  ;;  %v3165_v6 = vsel %vm3155_vm10, %v3118_v44, %v2448_v55  ;;  %v11081_v55 = vld [vmem:[%s11705_s25 + $0x64] sm:$0xff] }
  0xed   : > { %v3006_v45 = vunpack.c.l.b16 %v1968_v41  ;;  %v3007_v29 = vunpack.c.l.b16 %v1969_v60  ;;  %v2863_v44 = vpack.c.b16 %v2840_v63, %v2839_v27  ;;  %v10258_v31 = vsel %vm770_vm14, 1.0, %v17800_v56 }
  0xee   : > { %v2565_v59 = vpop.permute.xlu1 %2564  ;;  %v3444_v28 = vsel %vm3413_vm6, %v12743_v49, %v12901_v12  ;;  %2574 = vrot.lane.b32.xlu2 %v2548_v43, %s11586_s28  ;;  %v1761_v49 = vpack.c.bf16 %v1728_v38, %v1728_v38  ;;  %v12926_v43 = vunpack.c.l.b16 %v1449_v25  ;;  %v12932_v60 = vrot.slane %v2398_v40, 5 }
  0xef   : > { %10385 = vmatmul.msk.bf16.gmra.mxu0 %vm17636_vm9, %v3444_v28  ;;  %v3200_v46 = vsel %vm3190_vm11, %v3165_v6, %v2565_v59  ;;  %v12934_v30 = vunpack.c.l.b16 %v1450_v18  ;;  %v1900_v17 = vpack.c.bf16 %v1867_v58, %v1867_v58  ;;  %v1901_v50 = vpack.c.bf16 %v1868_v51, %v1868_v51 }
  0xf0   : > { %v12920_v11 = vpop.permute.xlu2 %2449  ;;  %v2526_v19 = vunpack.c.l.b16 %v1760_v34  ;;  %v2527_v16 = vunpack.c.l.b16 %v1761_v49  ;;  %v12937_v38 = vrot.slane %v2714_v52, 5  ;;  %v3029_v25 = vpack.c.b16 %v3007_v29, %v3006_v45 }
  0xf1   : > { %2937 = vrot.lane.b32.xlu0 %v12855_v21, %s11590_s17  ;;  %v3235_v41 = vsel %vm3225_vm12, %v3200_v46, %v12827_v2  ;;  %v1353_v27 = vrot.slane %v10258_v31, 1  ;;  %v2253_v63 = vshrl.u32 %v11081_v55, 16  ;;  %v17606_v59 = vrot.slane %v12930_v39, 7 }
  0xf2   : > { %v2256_v40 = vshll.u32 %v11081_v55, 16  ;;  %v2426_v58 = vsel %vm2405_vm7, %v12789_v22, %v12932_v60  ;;  %v2052_v52 = vpack.c.b16 %v12934_v30, %v12926_v43  ;;  %v2841_v6 = vunpack.c.l.b16 %v1900_v17  ;;  %v17879_v17 = vld [vmem:[#allocation53_spill] sm:$0xff] }
  0xf3   : > { %v2763_v32 = vpop.permute.xlu0 %2762  ;;  %v2842_v51 = vunpack.c.l.b16 %v1901_v50  ;;  %v2549_v2 = vpack.c.b16 %v2527_v16, %v2526_v19  ;;  %v2741_v34 = vsel %vm2405_vm7, %v12817_v3, %v12937_v38  ;;  %v12952_v49 = vrot.slane %v3029_v25, 5  ;;  %v17880_v50 = vld [vmem:[#allocation36_spill] sm:$0xff]  ;;  %v17881_v19 = vld [vmem:[#allocation54_spill] sm:$0xff] }
  0xf4   : > { %3087 = vrot.lane.b32.xlu1 %v3054_v5, %s11591_s21  ;;  %v3270_v18 = vsel %vm3260_vm13, %v3235_v41, %v2763_v32  ;;  %v17874_v45 = vrot.slane %v12762_v9, 7  ;;  %v2255_v55 = vrot.slane %v2253_v63, 4  ;;  %v12971_v3 = vsel %vm1538_vm4, %v11714_v14, %v17606_v59  ;;  %v17882_v16 = vld [vmem:[#allocation44_spill] sm:$0xff] }
  0xf5   : > { %17877 = vst [vmem:[#allocation74_spill] sm:$0xff] %v12971_v3  ;;  %v12976_v9 = vsel %vm1309_vm2, %v1353_v27, %v11707_v7  ;;  %v2258_v46 = vrot.slane %v2256_v40, 5  ;;  %v12979_v43 = vunpack.c.h.bf16 %v12834_v23  ;;  %v357_v31 = vadd.s32 200, %v11693_v1  ;;  %v11082_v63 = vld [vmem:[%s11705_s25 + $0x6c] sm:$0xff] }
  0xf6   : > { %v2880_v28 = vpop.permute.xlu1 %2879  ;;  %2889 = vrot.lane.b32.xlu2 %v2863_v44, %s11587_s29  ;;  %v12958_v22 = vsel %vm1538_vm4, %v17874_v45, %v11714_v14  ;;  %v12965_v44 = vsel %vm1309_vm2, %v11707_v7, %v1353_v27  ;;  %17878 = vst [vmem:[#allocation75_spill] sm:$0xff] %v12976_v9  ;;  %v2864_v30 = vpack.c.b16 %v2842_v51, %v2841_v6  ;;  %v2262_v59 = vshrl.u32 %v11082_v63, 16 }
  0xf7   : > { %17875 = vst [vmem:[#allocation35_spill] sm:$0xff] %v12958_v22  ;;  %v3305_v29 = vsel %vm3295_vm15, %v3270_v18, %v2880_v28  ;;  %v1418_v32 = vmul.f32 %v17880_v50, %v17879_v17  ;;  %v1419_v25 = vmul.f32 %v17882_v16, %v17881_v19  ;;  %v1657_v41 = vmul.f32 %v12723_v47, %v12958_v22 }
  0xf8   : > { %v12961_v5 = vpop.permute.xlu2 %2764  ;;  %17876 = vst [vmem:[#allocation73_spill] sm:$0xff] %v12965_v44  ;;  %v3340_v23 = vsel %vm3330_vm1, %v3305_v29, %v12887_v48  ;;  %v12995_v18 = vsel %vm2405_vm7, %v12862_v37, %v12952_v49  ;;  %v1729_v28 = vmul.f32 %v12726_v62, %v12965_v44  ;;  %v1658_v40 = vmul.f32 %v12726_v62, %v12971_v3 }
  0xf9   : > { %2459 = vrot.lane.b32.xlu0 %v2426_v58, %s11588_s14  ;;  %v1730_v6 = vmul.f32 %v12871_v13, %v12976_v9  ;;  %v1869_v51 = vmul.f32 %v12865_v10, %v12965_v44  ;;  %v543_v48 = vand.u32 15, %v357_v31  ;;  %v13006_v37 = vor.u32 %v2258_v46, %v2255_v55 }
  0xfa   : > { %v1870_v50 = vmul.f32 %v12979_v43, %v12976_v9  ;;  %v1451_v16 = vpack.c.bf16 %v1418_v32, %v1418_v32  ;;  %v1691_v42 = vpack.c.bf16 %v1658_v40, %v1658_v40  ;;  %v2265_v62 = vshll.u32 %v11082_v63, 16 }
  0xfb   : > { %v3078_v27 = vpop.permute.xlu0 %3077  ;;  %v1763_v47 = vpack.c.bf16 %v1730_v6, %v1730_v6  ;;  %v1902_v55 = vpack.c.bf16 %v1869_v51, %v1869_v51  ;;  %vm901_vm14 = vcmp.le.s32.totalorder %v543_v48, 14  ;;  %v1797_v63 = vmul.f32 %v12871_v13, %v12958_v22 }
  0xfc   : > { %2576 = vrot.lane.b32.xlu1 %v2549_v2, %s11586_s28  ;;  %v3375_v58 = vsel %vm3365_vm3, %v3340_v23, %v3078_v27  ;;  %v1452_v27 = vpack.c.bf16 %v1419_v25, %v1419_v25  ;;  %v1690_v23 = vpack.c.bf16 %v1657_v41, %v1657_v41  ;;  %v13019_v32 = vsel %vm901_vm14, 1.0, %v17800_v56 }
  0xfd   : > { %v3445_v2 = vshrl.u32 %v3375_v58, 16  ;;  %v3448_v45 = vshll.u32 %v3375_v58, 16  ;;  %v1762_v58 = vpack.c.bf16 %v1729_v28, %v1729_v28  ;;  %v13021_v25 = vunpack.c.l.b16 %v1451_v16 }
  0xfe   : > { %v2299_v29 = vpop.permute.xlu1 %2298  ;;  %2308 = vrot.lane.b32.xlu2 %v12703_v26, %s11584_s26  ;;  %v1903_v26 = vpack.c.bf16 %v1870_v50, %v1870_v50  ;;  %v2377_v41 = vunpack.c.l.b16 %v1690_v23  ;;  %v1798_v28 = vmul.f32 %v12865_v10, %v12971_v3  ;;  %v2267_v40 = vrot.slane %v2265_v62, 5 }
  0xff   : > { %v3447_v19 = vrot.slane %v3445_v2, 3  ;;  %v3450_v17 = vrot.slane %v3448_v45, 4  ;;  %v3121_v9 = vsel %vm3103_vm8, %v2052_v52, %v2299_v29  ;;  %v2528_v51 = vunpack.c.l.b16 %v1762_v58  ;;  %v17885_v58 = vld [vmem:[#allocation58_spill] sm:$0xff] }
 0x100   : > { %v13012_v31 = vpop.permute.xlu2 %3079  ;;  %v3167_v6 = vsel %vm3155_vm10, %v3121_v9, %v12920_v11  ;;  %v13034_v48 = vunpack.c.l.b16 %v1452_v27  ;;  %v17613_v2 = vrot.slane %v13019_v32, 7  ;;  %v2529_v29 = vunpack.c.l.b16 %v1763_v47  ;;  %v11418_v9 = vld [vmem:[%s11705_s25 + $0x70] sm:$0xff]  }
 0x101   : > { %v13014_v46 = vor.u32 %v3450_v17, %v3447_v19  ;;  %2774 = vrot.lane.b32.xlu0 %v2741_v34, %s11589_s16  ;;  %v2378_v34 = vunpack.c.l.b16 %v1691_v42  ;;  %v2264_v19 = vrot.slane %v2262_v59, 4  ;;  %v13038_v50 = vunpack.c.l.b16 %v1902_v55  ;;  %v17886_v55 = vld [vmem:[#allocation43_spill] sm:$0xff] }
 0x102   : > { %v13040_v42 = vunpack.c.l.b16 %v1903_v26  ;;  %v1830_v62 = vpack.c.bf16 %v1797_v63, %v1797_v63  ;;  %v17883_v11 = vrot.slane %v12930_v39, 7  ;;  %v356_v16 = vadd.s32 192, %v11693_v1 }
 0x103   : > { %v2567_v17 = vpop.permute.xlu0 %2566  ;;  %v3452_v52 = vsel %vm3413_vm6, %v12901_v12, %v13014_v46  ;;  %v1831_v12 = vpack.c.bf16 %v1798_v28, %v1798_v28  ;;  %v13055_v47 = vsel %vm2144_vm0, %v12819_v8, %v13006_v37  ;;  %v2399_v27 = vpack.c.b16 %v2378_v34, %v2377_v41  ;;  %v17887_v28 = vld [vmem:[#allocation59_spill] sm:$0xff] }
 0x104   : > { %2891 = vrot.lane.b32.xlu1 %v2864_v30, %s11587_s29  ;;  %10386 = vmatmul.msk.bf16.gmra.mxu0 %vm17636_vm9, %v3452_v52  ;;  %v3202_v30 = vsel %vm3190_vm11, %v3167_v6, %v2567_v17  ;;  %v13048_v59 = vsel %vm1538_vm4, %v17883_v11, %v11714_v14  ;;  %v13057_v23 = vor.u32 %v2267_v40, %v2264_v19  ;;  %v17888_v17 = vld [vmem:[#allocation47_spill] sm:$0xff]  ;;  %v536_v41 = vand.u32 15, %v356_v16 }
 0x105   : > { %17884 = vst [vmem:[#allocation36_spill] sm:$0xff] %v13048_v59  ;;  %v13061_v26 = vmul.f32 %v17886_v55, %v17885_v58  ;;  %v13068_v52 = vmul.f32 %v17888_v17, %v17887_v28  ;;  %v13074_v8 = vsel %vm1538_vm4, %v11714_v14, %v17613_v2  ;;  %v2550_v34 = vpack.c.b16 %v2529_v29, %v2528_v51 }
 0x106   : > { %v2615_v45 = vpop.permute.xlu1 %2614  ;;  %2624 = vrot.lane.b32.xlu2 %v12855_v21, %s11585_s27  ;;  %17889 = vst [vmem:[#allocation44_spill] sm:$0xff] %v13074_v8  ;;  %v1659_v40 = vmul.f32 %v12871_v13, %v13048_v59  ;;  %v13082_v6 = vunpack.c.l.bf16 %v11418_v9  ;;  %v2694_v11 = vunpack.c.l.b16 %v1831_v12  ;;  %vm772_vm5 = vcmp.ge.s32.totalorder %v536_v41, 1 }
 0x107   : > { %v3237_v39 = vsel %vm3225_vm12, %v3202_v30, %v2615_v45  ;;  %v2693_v45 = vunpack.c.l.b16 %v1830_v62  ;;  %v13090_v29 = vrot.slane %v2399_v27, 5  ;;  %v1660_v16 = vmul.f32 %v12865_v10, %v13074_v8 }
 0x108   : > { %v13064_v63 = vpop.permute.xlu2 %2568  ;;  %v3272_v51 = vsel %vm3260_vm13, %v3237_v39, %v12961_v5  ;;  %v1937_v55 = vmul.f32 %v12979_v43, %v12958_v22  ;;  %v13100_v12 = vsel %vm2144_vm0, %v13006_v37, %v13057_v23  ;;  %v1692_v39 = vpack.c.bf16 %v1659_v40, %v1659_v40 }
 0x109   : > { %3089 = vrot.lane.b32.xlu0 %v12995_v18, %s11591_s21  ;;  %v1938_v17 = vmul.f32 %v13082_v6, %v12971_v3  ;;  %v1799_v41 = vmul.f32 %v12979_v43, %v13048_v59  ;;  %v1800_v2 = vmul.f32 %v13082_v6, %v13074_v8  ;;  %v359_v40 = vadd.s32 216, %v11693_v1 }
 0x10a   : > { %v1693_v30 = vpack.c.bf16 %v1660_v16, %v1660_v16  ;;  %v1970_v19 = vpack.c.bf16 %v1937_v55, %v1937_v55  ;;  %v13122_v22 = vunpack.c.h.bf16 %v11418_v9 }
 0x10b   : > { %v2882_v18 = vpop.permute.xlu0 %2881  ;;  %v1971_v16 = vpack.c.bf16 %v1938_v17, %v1938_v17  ;;  %v1832_v55 = vpack.c.bf16 %v1799_v41, %v1799_v41  ;;  %v17892_v41 = vpack.c.b16 %v13034_v48, %v13021_v25 }
 0x10c   : > { %2310 = vrot.lane.b32.xlu1 %v12855_v21, %s11584_s26  ;;  %v3307_v62 = vsel %vm3295_vm15, %v3272_v51, %v2882_v18  ;;  %v1453_v21 = vpack.c.bf16 %v13061_v26, %v13061_v26  ;;  %v10259_v18 = vsel %vm772_vm5, 1.0, %v17800_v56  ;;  %v13112_v51 = vld [vmem:[%s11705_s25 + $0x78] sm:$0xff]   ;;  %v2715_v26 = vpack.c.b16 %v2694_v11, %v2693_v45 }
 0x10d   : > { %v13127_v45 = vunpack.c.l.bf16 %v13112_v51  ;;  %v2428_v11 = vsel %vm2405_vm7, %v12932_v60, %v13090_v29  ;;  %v2380_v20 = vunpack.c.l.b16 %v1693_v30  ;;  %v3008_v44 = vunpack.c.l.b16 %v1970_v19 }
 0x10e   : > { %v2930_v27 = vpop.permute.xlu1 %2929  ;;  %2939 = vrot.lane.b32.xlu2 %v13055_v47, %s11590_s17  ;;  %v13135_v13 = vrot.slane %v2715_v26, 5  ;;  %v1939_v57 = vmul.f32 %v13122_v22, %v13048_v59  ;;  %v2695_v17 = vunpack.c.l.b16 %v1832_v55  ;;  %v358_v30 = vadd.s32 208, %v11693_v1 }
 0x10f   : > { %v3342_v37 = vsel %vm3330_vm1, %v3307_v62, %v2930_v27  ;;  %v1357_v62 = vrot.slane %v10259_v18, 1  ;;  %v2028_v48 = vunpack.c.l.b16 %v1453_v21 }
 0x110   : > { %v3377_v5 = vsel %vm3365_vm3, %v3342_v37, %v13012_v31  ;;  %v13124_v58 = vpop.permute.xlu2 %2883  ;;  %v2379_v31 = vunpack.c.l.b16 %v1692_v39  ;;  %v1833_v37 = vpack.c.bf16 %v1800_v2, %v1800_v2  ;;  %v1940_v2 = vmul.f32 %v13127_v45, %v13074_v8 }
 0x111   : > { %v3453_v3 = vshrl.u32 %v3377_v5, 16  ;;  %v3456_v28 = vshll.u32 %v3377_v5, 16  ;;  %2578 = vrot.lane.b32.xlu0 %v2550_v34, %s11586_s28  ;;  %v557_v5 = vand.u32 15, %v359_v40  ;;  %v11083_v34 = vld [vmem:[%s11705_s25 + $0x74] sm:$0xff]  ;;  %v3009_v39 = vunpack.c.l.b16 %v1971_v16 }
 0x112   : > { %v13150_v19 = vsel %vm1309_vm2, %v1357_v62, %v11707_v7  ;;  %v2271_v55 = vshrl.u32 %v11083_v34, 16  ;;  %v550_v21 = vand.u32 15, %v358_v30 }
 0x113   : > { %v3455_v9 = vrot.slane %v3453_v3, 3  ;;  %v3458_v27 = vrot.slane %v3456_v28, 4  ;;  %v2301_v18 = vpop.permute.xlu0 %2300  ;;  %v13144_v3 = vsel %vm1309_vm2, %v11707_v7, %v1357_v62  ;;  %vm903_vm14 = vcmp.le.s32.totalorder %v557_v5, 14  ;;  %17891 = vst [vmem:[#allocation47_spill] sm:$0xff] %v13150_v19 }
 0x114   : > { %2626 = vrot.lane.b32.xlu1 %v13055_v47, %s11585_s27  ;;  %17890 = vst [vmem:[#allocation43_spill] sm:$0xff] %v13144_v3  ;;  %v3124_v26 = vsel %vm3103_vm8, %v17892_v41, %v2301_v18  ;;  %v13162_v16 = vsel %vm903_vm14, 1.0, %v17800_v56  ;;  %v2400_v62 = vpack.c.b16 %v2380_v20, %v2379_v31  ;;  %v1731_v25 = vmul.f32 %v12865_v10, %v13144_v3 }
 0x115   : > { %v13140_v60 = vor.u32 %v3458_v27, %v3455_v9  ;;  %v2696_v9 = vunpack.c.l.b16 %v1833_v37  ;;  %v2274_v27 = vshll.u32 %v11083_v34, 16  ;;  %v1732_v18 = vmul.f32 %v12979_v43, %v13150_v19 }
 0x116   : > { %v2452_v28 = vpop.permute.xlu1 %2451  ;;  %2461 = vrot.lane.b32.xlu2 %v2428_v11, %s11588_s14  ;;  %v1973_v41 = vpack.c.bf16 %v1940_v2, %v1940_v2  ;;  %v17893_v37 = vpack.c.b16 %v13040_v42, %v13038_v50  ;;  %v17894_v20 = vpack.c.bf16 %v13068_v52, %v13068_v52  ;;  %v17623_v34 = vrot.slane %v13162_v16, 7 }
 0x117   : > { %v3460_v40 = vsel %vm3413_vm6, %v13014_v46, %v13140_v60  ;;  %v1972_v46 = vpack.c.bf16 %v1939_v57, %v1939_v57  ;;  %v3169_v11 = vsel %vm3155_vm10, %v3124_v26, %v2452_v28  ;;  %v3030_v57 = vpack.c.b16 %v3009_v39, %v3008_v44 }
 0x118   : > { %10387 = vmatmul.msk.bf16.gmra.mxu0 %vm17636_vm9, %v3460_v40  ;;  %v2303_v5 = vpop.permute.xlu2 %2302  ;;  %v2029_v31 = vunpack.c.l.b16 %v17894_v20  ;;  %v2743_v40 = vsel %vm2405_vm7, %v12937_v38, %v13135_v13  ;;  %v2716_v2 = vpack.c.b16 %v2696_v9, %v2695_v17  ;;  %v17895_v28 = vrot.slane %v13019_v32, 7 }
 0x119   : > { %2893 = vrot.lane.b32.xlu0 %v17893_v37, %s11587_s29  ;;  %v13189_v42 = vrot.slane %v2400_v62, 5  ;;  %v2273_v52 = vrot.slane %v2271_v55, 4  ;;  %v2276_v30 = vrot.slane %v2274_v27, 5  ;;  %v1764_v37 = vpack.c.bf16 %v1731_v25, %v1731_v25 }
 0x11a   : > { %v13185_v26 = vsel %vm1538_vm4, %v17895_v28, %v11714_v14  ;;  %v3204_v38 = vsel %vm3190_vm11, %v3169_v11, %v13064_v63  ;;  %v1765_v44 = vpack.c.bf16 %v1732_v18, %v1732_v18  ;;  %v3010_v39 = vunpack.c.l.b16 %v1972_v46 }
 0x11b   : > { %17896 = vst [vmem:[#allocation76_spill] sm:$0xff] %v13185_v26  ;;  %v2617_v50 = vpop.permute.xlu0 %2616  ;;  %v3011_v17 = vunpack.c.l.b16 %v1973_v41  ;;  %v13198_v20 = vsel %vm1538_vm4, %v11714_v14, %v17623_v34  ;;  %v1661_v62 = vmul.f32 %v12979_v43, %v13185_v26  ;;  %vm774_vm5 = vcmp.ge.s32.totalorder %v550_v21, 1 }
 0x11c   : > { %2941 = vrot.lane.b32.xlu1 %v13100_v12, %s11590_s17  ;;  %v3239_v32 = vsel %vm3225_vm12, %v3204_v38, %v2617_v50  ;;  %17897 = vst [vmem:[#allocation77_spill] sm:$0xff] %v13198_v20  ;;  %v3057_v55 = vrot.slane %v3030_v57, 5  ;;  %v2430_v63 = vsel %vm2405_vm7, %v13090_v29, %v13189_v42  ;;  %v13206_v27 = vrot.slane %v2716_v2, 5 }
 0x11d   : > { %v13208_v25 = vor.u32 %v2276_v30, %v2273_v52  ;;  %v13210_v18 = vunpack.c.l.b16 %v1764_v37  ;;  %v13215_v11 = vunpack.c.l.b16 %v1765_v44  ;;  %v1662_v21 = vmul.f32 %v13082_v6, %v13198_v20 }
 0x11e   : > { %v2767_v9 = vpop.permute.xlu1 %2766  ;;  %2776 = vrot.lane.b32.xlu2 %v2743_v40, %s11589_s16  ;;  %v10260_v40 = vsel %vm774_vm5, 1.0, %v17800_v56  ;;  %v2054_v57 = vpack.c.b16 %v2029_v31, %v2028_v48  ;;  %v3031_v29 = vpack.c.b16 %v3011_v17, %v3010_v39  ;;  %v1694_v2 = vpack.c.bf16 %v1661_v62, %v1661_v62 }
 0x11f   : > { %v3274_v46 = vsel %vm3260_vm13, %v3239_v32, %v2767_v9  ;;  %v1871_v28 = vmul.f32 %v13082_v6, %v13144_v3  ;;  %v1872_v50 = vmul.f32 %v13122_v22, %v13150_v19  ;;  %v3058_v48 = vsel %vm2405_vm7, %v12952_v49, %v3057_v55 }
 0x120   : > { %v13213_v41 = vpop.permute.xlu2 %2618  ;;  %v3309_v30 = vsel %vm3295_vm15, %v3274_v46, %v13124_v58  ;;  %v1361_v31 = vrot.slane %v10260_v40, 1  ;;  %v13238_v38 = vsel %vm2144_vm0, %v13057_v23, %v13208_v25  ;;  %v2551_v44 = vpack.c.b16 %v13215_v11, %v13210_v18 }
 0x121   : > { %2312 = vrot.lane.b32.xlu0 %v13055_v47, %s11584_s26  ;;  %v2745_v47 = vsel %vm2405_vm7, %v13135_v13, %v13206_v27  ;;  %v1695_v39 = vpack.c.bf16 %v1662_v21, %v1662_v21  ;;  %v3127_v58 = vsel %vm3103_vm8, %v2054_v57, %v2303_v5  ;;  %v13243_v49 = vrot.slane %v3031_v29, 5  ;;  %v13248_v13 = vld [vmem:[%s11705_s25 + $0x80] sm:$0xff]  }
 0x122   : > { %v13245_v32 = vunpack.c.l.b16 %v1694_v2  ;;  %v360_v9 = vadd.s32 224, %v11693_v1  ;;  %v1904_v23 = vpack.c.bf16 %v1871_v28, %v1871_v28  ;;  %v1801_v18 = vmul.f32 %v13122_v22, %v13185_v26 }
 0x123   : > { %v2932_v52 = vpop.permute.xlu0 %2931  ;;  %v13257_v11 = vsel %vm1309_vm2, %v11707_v7, %v1361_v31  ;;  %v1802_v21 = vmul.f32 %v13127_v45, %v13198_v20  ;;  %v2382_v57 = vunpack.c.l.b16 %v1695_v39  ;;  %v13265_v29 = vsel %vm1309_vm2, %v1361_v31, %v11707_v7 }
 0x124   : > { %2463 = vrot.lane.b32.xlu1 %v2430_v63, %s11588_s14  ;;  %v3344_v37 = vsel %vm3330_vm1, %v3309_v30, %v2932_v52  ;;  %v1905_v63 = vpack.c.bf16 %v1872_v50, %v1872_v50  ;;  %17898 = vst [vmem:[#allocation78_spill] sm:$0xff] %v13257_v11  ;;  %vm1164_vm14 = vcmask 519168   ;;  %v13268_v2 = vunpack.c.l.bf16 %v13248_v13 }
 0x125   : > { %17899 = vst [vmem:[#allocation79_spill] sm:$0xff] %v13265_v29  ;;  %v564_v52 = vand.u32 15, %v360_v9  ;;  %v361_v30 = vadd.s32 232, %v11693_v1  ;;  %v13276_v39 = vunpack.c.h.bf16 %v13112_v51  ;;  %v3060_v9 = vsel %vm2405_vm7, %v3057_v55, %v13243_v49 }
 0x126   : > { %v3082_v17 = vpop.permute.xlu1 %3081  ;;  %3091 = vrot.lane.b32.xlu2 %v3058_v48, %s11591_s21  ;;  %17900 = vst [vmem:[#allocation80_spill] sm:$0xff] %v13268_v2  ;;  %v1733_v48 = vmul.f32 %v13082_v6, %v13257_v11  ;;  %v1423_v55 = vmul.f32 %v12253_v15, %v12526_v36  ;;  %v2846_v59 = vunpack.c.l.b16 %v1905_v63 }
 0x127   : > { %v3379_v62 = vsel %vm3365_vm3, %v3344_v37, %v3082_v17  ;;  %v1834_v37 = vpack.c.bf16 %v1801_v18, %v1801_v18  ;;  %v17901_v18 = vld [vmem:[#allocation52_spill] sm:$0xff]  ;;  %vm13300_vm5 = vcmp.ge.s32.totalorder %v564_v52, 1  ;;  %v1874_v63 = vmul.f32 %v13276_v39, %v13265_v29 }
 0x128   : > { %v3461_v46 = vshrl.u32 %v3379_v62, 16  ;;  %v3464_v5 = vshll.u32 %v3379_v62, 16  ;;  %v13261_v40 = vpop.permute.xlu2 %2933  ;;  %v1734_v62 = vmul.f32 %v13122_v22, %v13265_v29  ;;  %v1422_v51 = vmul.f32 %v17901_v18, %v12508_v24 }
 0x129   : > { %2628 = vrot.lane.b32.xlu0 %v13100_v12, %s11585_s27  ;;  %v571_v18 = vand.u32 15, %v361_v30  ;;  %v1766_v8 = vpack.c.bf16 %v1733_v48, %v1733_v48  ;;  %v2697_v52 = vunpack.c.l.b16 %v1834_v37  ;;  %v11084_v37 = vld [vmem:[%s11705_s25 + $0x7c] sm:$0xff] }
 0x12a   : > { %v3463_v28 = vrot.slane %v3461_v46, 3  ;;  %v3466_v50 = vrot.slane %v3464_v5, 4  ;;  %v1835_v46 = vpack.c.bf16 %v1802_v21, %v1802_v21  ;;  %v11592_v5 = vmov 0  }
 0x12b   : > { %v2454_v17 = vpop.permute.xlu0 %2453  ;;  %1166 = vst.msk [vmem:[#allocation2 + $0x4] sm:$0xf] %vm1164_vm14, %v11592_v5  ;;  %v1767_v15 = vpack.c.bf16 %v1734_v62, %v1734_v62  ;;  %v1455_v24 = vpack.c.bf16 %v1422_v51, %v1422_v51 }
 0x12c   : > { %v13278_v31 = vor.u32 %v3466_v50, %v3463_v28  ;;  %2778 = vrot.lane.b32.xlu1 %v2745_v47, %s11589_s16  ;;  %v1941_v28 = vmul.f32 %v13276_v39, %v13185_v26  ;;  %v1942_v47 = vmul.f32 %v13198_v20, %v13268_v2  ;;  %1167 = vst.msk [vmem:[#allocation2 + $0x8] sm:$0xf] %vm1164_vm14, %v11592_v5  ;;  %v2698_v36 = vunpack.c.l.b16 %v1835_v46 }
 0x12d   : > { %1165 = vst.msk [vmem:[#allocation2] sm:$0xf] %vm1164_vm14, %v11592_v5  ;;  %v3171_v26 = vsel %vm3155_vm10, %v3127_v58, %v2454_v17  ;;  %v2401_v20 = vpack.c.b16 %v2382_v57, %v13245_v32  ;;  %v2532_v46 = vunpack.c.l.b16 %v1766_v8  ;;  %v2533_v51 = vunpack.c.l.b16 %v1767_v15 }
 0x12e   : > { %v2571_v21 = vpop.permute.xlu1 %2570  ;;  %v3468_v50 = vsel %vm3413_vm6, %v13140_v60, %v13278_v31  ;;  %2580 = vrot.lane.b32.xlu2 %v2551_v44, %s11586_s28  ;;  %v2845_v60 = vunpack.c.l.b16 %v1904_v23  ;;  %1168 = vst.msk [vmem:[#allocation2 + $0x8c] sm:$0xf] %vm1164_vm14, %v11592_v5  ;;  %v1974_v58 = vpack.c.bf16 %v1941_v28, %v1941_v28  ;;  %v1975_v17 = vpack.c.bf16 %v1942_v47, %v1942_v47 }
 0x12f   : > { %10388 = vmatmul.msk.bf16.gmra.mxu0 %vm17636_vm9, %v3468_v50  ;;  %v10261_v44 = vsel %vm13300_vm5, 1.0, %v17800_v56  ;;  %1169 = vst.msk [vmem:[#allocation2 + $0x90] sm:$0xf] %vm1164_vm14, %v11592_v5  ;;  %v3206_v32 = vsel %vm3190_vm11, %v3171_v26, %v2571_v21  ;;  %v1873_v23 = vmul.f32 %v13127_v45, %v13257_v11  ;;  %vm13326_vm9 = vcmp.le.s32.totalorder %v571_v18, 14 }
 0x130   : > { %v13312_v30 = vpop.permute.xlu2 %2455  ;;  %1170 = vst.msk [vmem:[#allocation2 + $0x94] sm:$0xf] %vm1164_vm14, %v11592_v5  ;;  %v13332_v34 = vrot.slane %v2401_v20, 5  ;;  %v2866_v48 = vpack.c.b16 %v2846_v59, %v2845_v60  ;;  %v1456_v26 = vpack.c.bf16 %v1423_v55, %v1423_v55  ;;  %v2717_v28 = vpack.c.b16 %v2698_v36, %v2697_v52 }
 0x131   : > { %2943 = vrot.lane.b32.xlu0 %v13238_v38, %s11590_s17  ;;  %1171 = vst.msk [vmem:[#allocation5] sm:$0xf] %vm1164_vm14, %v11592_v5  ;;  %v1365_v47 = vrot.slane %v10261_v44, 1  ;;  %v3241_v20 = vsel %vm3225_vm12, %v3206_v32, %v13213_v41  ;;  %v3012_v21 = vunpack.c.l.b16 %v1974_v58  ;;  %v3013_v59 = vunpack.c.l.b16 %v1975_v17 }
 0x132   : > { %1172 = vst.msk [vmem:[#allocation5 + $0x4] sm:$0xf] %vm1164_vm14, %v11592_v5  ;;  %v13345_v50 = vsel %vm13326_vm9, 1.0, %v17800_v56  ;;  %v1906_v55 = vpack.c.bf16 %v1873_v23, %v1873_v23  ;;  %v1907_v18 = vpack.c.bf16 %v1874_v63, %v1874_v63  ;;  %v2432_v41 = vsel %vm2405_vm7, %v13189_v42, %v13332_v34 }
 0x133   : > { %v2769_v62 = vpop.permute.xlu0 %2768  ;;  %1173 = vst.msk [vmem:[#allocation5 + $0x28] sm:$0xf] %vm1164_vm14, %v11592_v5  ;;  %v2031_v60 = vunpack.c.l.b16 %v1456_v26  ;;  %v2280_v15 = vshrl.u32 %v11084_v37, 16  ;;  %v2283_v52 = vshll.u32 %v11084_v37, 16  ;;  %v2552_v58 = vpack.c.b16 %v2533_v51, %v2532_v46 }
 0x134   : > { %3093 = vrot.lane.b32.xlu1 %v3060_v9, %s11591_s21  ;;  %v3276_v8 = vsel %vm3260_vm13, %v3241_v20, %v2769_v62  ;;  %v2030_v9 = vunpack.c.l.b16 %v1455_v24  ;;  %1174 = vst.msk [vmem:[#allocation5 + $0x2c] sm:$0xf] %vm1164_vm14, %v11592_v5  ;;  %v13359_v24 = vsel %vm1309_vm2, %v11707_v7, %v1365_v47  ;;  %v1596_v17 = vrot.slane %v13345_v50, 7 }
 0x135   : > { %1175 = vst [vmem:[#allocation6] sm:$0xf] %v11592_v5  ;;  %v13366_v42 = vrot.slane %v2717_v28, 5  ;;  %v3032_v23 = vpack.c.b16 %v3013_v59, %v3012_v21  ;;  %v2847_v63 = vunpack.c.l.b16 %v1906_v55  ;;  %v2848_v57 = vunpack.c.l.b16 %v1907_v18 }
 0x136   : > { %v2886_v36 = vpop.permute.xlu1 %2885  ;;  %2895 = vrot.lane.b32.xlu2 %v2866_v48, %s11587_s29  ;;  %17906 = vst [vmem:[#allocation52_spill] sm:$0xff] %v13359_v24  ;;  %v13372_v48 = vsel %vm1309_vm2, %v1365_v47, %v11707_v7  ;;  %v363_v26 = vadd.s32 248, %v11693_v1  ;;  %v2055_v37 = vpack.c.b16 %v2031_v60, %v2030_v9  ;;  %v1735_v62 = vmul.f32 %v13127_v45, %v13359_v24 }
 0x137   : > { %1176 = vst [vmem:[#allocation6 + $0x4] sm:$0xf] %v11592_v5  ;;  %v3311_v44 = vsel %vm3295_vm15, %v3276_v8, %v2886_v36  ;;  %v2282_v46 = vrot.slane %v2280_v15, 4  ;;  %v2285_v51 = vrot.slane %v2283_v52, 5  ;;  %v17908_v47 = vrot.slane %v13162_v16, 7 }
 0x138   : > { %v13364_v32 = vpop.permute.xlu2 %2770  ;;  %1177 = vst [vmem:[#allocation6 + $0x28] sm:$0xf] %v11592_v5  ;;  %v3346_v20 = vsel %vm3330_vm1, %v3311_v44, %v13261_v40  ;;  %v585_v59 = vand.u32 15, %v363_v26  ;;  %v13394_v36 = vrot.slane %v3032_v23, 5  ;;  %v1736_v40 = vmul.f32 %v13276_v39, %v13372_v48  ;;  %v13406_v15 = vld [vmem:[%s17494_s2] ss:$0 sm:$0xff] }
 0x139   : > { %2465 = vrot.lane.b32.xlu0 %v2432_v41, %s11588_s14  ;;  %17907 = vst [vmem:[#allocation81_spill] sm:$0xff] %v13372_v48  ;;  %v13385_v21 = vsel %vm1538_vm4, %v17908_v47, %v11714_v14  ;;  %v1424_v16 = vmul.f32 %v12256_v0, %v12747_v33  ;;  %v2747_v41 = vsel %vm2405_vm7, %v13206_v27, %v13366_v42  ;;  %vm17912_vm5 = vcmask 588800  }
 0x13a   : > { %1178 = vst [vmem:[#allocation6 + $0x2c] sm:$0xf] %v11592_v5  ;;  %v13391_v5 = vsel %vm1538_vm4, %v11714_v14, %v1596_v17  ;;  %v2867_v60 = vpack.c.b16 %v2848_v57, %v2847_v63  ;;  %v13410_v52 = vor.u32 %v2285_v51, %v2282_v46  ;;  %v1663_v0 = vmul.f32 %v13122_v22, %v13385_v21 }
 0x13b   : > { %v3084_v28 = vpop.permute.xlu0 %3083  ;;  %17909 = vst [vmem:[#allocation82_spill] sm:$0xff] %v13385_v21  ;;  %vm907_vm9 = vcmp.le.s32.totalorder %v585_v59, 14  ;;  %v1768_v23 = vpack.c.bf16 %v1735_v62, %v1735_v62  ;;  %v1425_v63 = vmul.f32 %v12441_v35, %v12751_v54  ;;  %v1769_v26 = vpack.c.bf16 %v1736_v40, %v1736_v40 }
 0x13c   : > { %2582 = vrot.lane.b32.xlu1 %v2552_v58, %s11586_s28  ;;  %17910 = vst [vmem:[#allocation83_spill] sm:$0xff] %v13391_v5  ;;  %v3381_v8 = vsel %vm3365_vm3, %v3346_v20, %v3084_v28  ;;  %v1664_v58 = vmul.f32 %v13127_v45, %v13391_v5  ;;  %v1457_v46 = vpack.c.bf16 %v1424_v16, %v1424_v16  ;;  %v13428_v62 = vunpack.c.h.bf16 %v13248_v13 }
 0x13d   : > { %v3469_v9 = vshrl.u32 %v3381_v8, 16  ;;  %v3472_v55 = vshll.u32 %v3381_v8, 16  ;;  %17911 = vst [vmem:[#allocation84_spill] sm:$0xff] %v13410_v52  ;;  %v10278_v35 = vsel %vm907_vm9, 1.0, %v17800_v56  ;;  %v1696_v59 = vpack.c.bf16 %v1663_v0, %v1663_v0  ;;  %v13456_v0 = vld [vmem:[%s11705_s25 + $0x88] sm:$0xff]  }
 0x13e   : > { %v2305_v18 = vpop.permute.xlu1 %2304  ;;  %2314 = vrot.lane.b32.xlu2 %v13100_v12, %s11584_s26  ;;  %v3062_v12 = vsel %vm2405_vm7, %v13243_v49, %v13394_v36  ;;  %v13435_v49 = vsel %vm2144_vm0, %v13208_v25, %v13410_v52  ;;  %v1697_v8 = vpack.c.bf16 %v1664_v58, %v1664_v58  ;;  %v13441_v40 = vunpack.c.l.b16 %v1768_v23 }
 0x13f   : > { %v3471_v44 = vrot.slane %v3469_v9, 3  ;;  %v3474_v27 = vrot.slane %v3472_v55, 4  ;;  %v3130_v28 = vsel %vm3103_vm8, %v2055_v37, %v2305_v18  ;;  %v1458_v16 = vpack.c.bf16 %v1425_v63, %v1425_v63 }
 0x140   : > { %v13418_v57 = vpop.permute.xlu2 %3085  ;;  %v13445_v9 = vmul.f32 %v13359_v24, %v13268_v2  ;;  %v3173_v25 = vsel %vm3155_vm10, %v3130_v28, %v13312_v30  ;;  %v13450_v18 = vunpack.c.l.b16 %v1769_v26  ;;  %v1804_v30 = vmul.f32 %v13391_v5, %v13268_v2 }
 0x141   : > { %v13423_v51 = vor.u32 %v3474_v27, %v3471_v44  ;;  %2780 = vrot.lane.b32.xlu0 %v2747_v41, %s11589_s16  ;;  %v3638_v20 = vpop.f32.mrf.mxu0  ;;  %v11085_v41 = vld [vmem:[%s11705_s25 + $0x84] sm:$0xff]  ;;  %v13459_v44 = vunpack.c.l.b16 %v1457_v46  ;;  %v1803_v27 = vmul.f32 %v13276_v39, %v13385_v21  ;;  %v1876_v63 = vmul.f32 %v13428_v62, %v13372_v48 }
 0x142   : > { %v3639_v47 = vadd.f32 %v13406_v15, %v3638_v20  ;;  %v2383_v26 = vunpack.c.l.b16 %v1696_v59  ;;  %v2384_v28 = vunpack.c.l.b16 %v1697_v8  ;;  %v13469_v20 = vunpack.c.l.b16 %v1458_v16 }
 0x143   : > { %v2573_v37 = vpop.permute.xlu0 %2572  ;;  %v3476_v13 = vsel %vm3413_vm6, %v13278_v31, %v13423_v51  ;;  %v1908_v46 = vpack.c.bf16 %v13445_v9, %v13445_v9  ;;  %v2553_v8 = vpack.c.b16 %v13450_v18, %v13441_v40  ;;  %v2599_v16 = vshll.u32 %v11085_v41, 16 }
 0x144   : > { %2897 = vrot.lane.b32.xlu1 %v2867_v60, %s11587_s29  ;;  %v3718_v55 = vmax.f32 %v3639_v47, 0.0  ;;  %10389 = vmatmul.msk.bf16.gmra.mxu0 %vm17912_vm5, %v3476_v13  ;;  %v13453_v60 = vrot.slane %v10278_v35, 7  ;;  %v3208_v31 = vsel %vm3190_vm11, %v3173_v25, %v2573_v37  ;;  %v13477_v35 = vsel %vm1538_vm4, %v1596_v17, %v11714_v14 }
 0x145   : > { %17914 = vst [vmem:[#allocation86_spill] sm:$0xff] %v13477_v35  ;;  %v13480_v47 = vunpack.c.l.bf16 %v13456_v0  ;;  %v2596_v13 = vshrl.u32 %v11085_v41, 16  ;;  %v1836_v9 = vpack.c.bf16 %v1803_v27, %v1803_v27  ;;  %v362_v25 = vadd.s32 240, %v11693_v1 }
 0x146   : > { %17913 = vst [vmem:[#allocation85_spill] sm:$0xff] %v13453_v60  ;;  %v2621_v58 = vpop.permute.xlu1 %2620  ;;  %v3750_v23 = vpack.c.bf16 %v3718_v55, %v3718_v55  ;;  %2630 = vrot.lane.b32.xlu2 %v13238_v38, %s11585_s27  ;;  %v13491_v50 = vsel %vm1538_vm4, %v11714_v14, %v13453_v60  ;;  %v1837_v55 = vpack.c.bf16 %v1804_v30, %v1804_v30  ;;  %v2601_v1 = vrot.slane %v2599_v16, 5 }
 0x147   : > { %17915 = vst [vmem:[#allocation87_spill] sm:$0xff] %v13480_v47  ;;  %v3243_v37 = vsel %vm3225_vm12, %v3208_v31, %v2621_v58  ;;  %v1909_v58 = vpack.c.bf16 %v1876_v63, %v1876_v63  ;;  %v1665_v40 = vmul.f32 %v13276_v39, %v13477_v35  ;;  %v1666_v41 = vmul.f32 %v13491_v50, %v13268_v2 }
 0x148   : > { %3782 = vst.msk [vmem:[#allocation2 + $0xc] sm:$0xf] %vm1164_vm14, %v3750_v23  ;;  %v13484_v59 = vpop.permute.xlu2 %2574  ;;  %v2402_v23 = vpack.c.b16 %v2384_v28, %v2383_v26  ;;  %v1943_v27 = vmul.f32 %v13428_v62, %v13385_v21  ;;  %v1944_v30 = vmul.f32 %v13480_v47, %v13391_v5  ;;  %v2056_v28 = vpack.c.b16 %v13469_v20, %v13459_v44 }
 0x149   : > { %17916 = vst [vmem:[#allocation88_spill] sm:$0xff] %v13491_v50  ;;  %3095 = vrot.lane.b32.xlu0 %v3062_v12, %s11591_s21  ;;  %v3640_v17 = vpop.f32.mrf.mxu0  ;;  %v3278_v12 = vsel %vm3260_vm13, %v3243_v37, %v13364_v32  ;;  %v2699_v60 = vunpack.c.l.b16 %v1836_v9  ;;  %v2700_v32 = vunpack.c.l.b16 %v1837_v55  ;;  %v578_v37 = vand.u32 15, %v362_v25 }
 0x14a   : > { %v3641_v31 = vadd.f32 %v13406_v15, %v3640_v17  ;;  %v13514_v21 = vrot.slane %v2402_v23, 5  ;;  %v1976_v44 = vpack.c.bf16 %v1943_v27, %v1943_v27  ;;  %v1977_v20 = vpack.c.bf16 %v1944_v30, %v1944_v30 }
 0x14b   : > { %v2888_v18 = vpop.permute.xlu0 %2887  ;;  %v1805_v55 = vmul.f32 %v13428_v62, %v13477_v35  ;;  %v1806_v25 = vmul.f32 %v13480_v47, %v13491_v50  ;;  %v2849_v23 = vunpack.c.l.b16 %v1908_v46  ;;  %vm13526_vm9 = vcmp.ge.s32.totalorder %v578_v37, 1 }
 0x14c   : > { %2316 = vrot.lane.b32.xlu1 %v13238_v38, %s11584_s26  ;;  %v3719_v63 = vmax.f32 %v3641_v31, 0.0  ;;  %v3313_v26 = vsel %vm3295_vm15, %v3278_v12, %v2888_v18  ;;  %v2598_v38 = vrot.slane %v2596_v13, 4  ;;  %v1698_v31 = vpack.c.bf16 %v1665_v40, %v1665_v40 }
 0x14d   : > { %v1699_v12 = vpack.c.bf16 %v1666_v41, %v1666_v41  ;;  %v2434_v27 = vsel %vm2405_vm7, %v13332_v34, %v13514_v21  ;;  %v1838_v37 = vpack.c.bf16 %v1805_v55, %v1805_v55 }
 0x14e   : > { %v2936_v17 = vpop.permute.xlu1 %2935  ;;  %v3751_v54 = vpack.c.bf16 %v3719_v63, %v3719_v63  ;;  %2945 = vrot.lane.b32.xlu2 %v13435_v49, %s11590_s17  ;;  %v13533_v30 = vor.u32 %v2601_v1, %v2598_v38  ;;  %v2385_v46 = vunpack.c.l.b16 %v1698_v31  ;;  %v10262_v1 = vsel %vm13526_vm9, 1.0, %v17800_v56  ;;  %vm17938_vm9 = vmmov %vm17912_vm5 }
 0x14f   : > { %v3348_v33 = vsel %vm3330_vm1, %v3313_v26, %v2936_v17  ;;  %v13538_v26 = vld [vmem:[%s11705_s25 + $0x90] sm:$0xf]  ;;  %v1426_v31 = vmul.f32 %v12436_v61, %v12877_v4  ;;  %v17941_v4 = vld [vmem:[#allocation75_spill] sm:$0xff] }
 0x150   : > { %v3383_v18 = vsel %vm3365_vm3, %v3348_v33, %v13418_v57  ;;  %3783 = vst.msk [vmem:[#allocation2 + $0x10] sm:$0xf] %vm1164_vm14, %v3751_v54  ;;  %v13519_v9 = vpop.permute.xlu2 %2889  ;;  %v2850_v33 = vunpack.c.l.b16 %v1909_v58  ;;  %v2718_v57 = vpack.c.b16 %v2700_v32, %v2699_v60  ;;  %v3014_v60 = vunpack.c.l.b16 %v1976_v44  ;;  %v11086_v44 = vld [vmem:[%s11705_s25 + $0x8c] sm:$0xff] }
 0x151   : > { %v3477_v13 = vshrl.u32 %v3383_v18, 16  ;;  %v3480_v16 = vshll.u32 %v3383_v18, 16  ;;  %2584 = vrot.lane.b32.xlu0 %v2553_v8, %s11586_s28  ;;  %17919 = vst [vmem:[#allocation89_spill] sm:$0xff] %v13533_v30  ;;  %v2386_v8 = vunpack.c.l.b16 %v1699_v12  ;;  %v3015_v58 = vunpack.c.l.b16 %v1977_v20 }
 0x152   : > { %17920 = vst [vmem:[#allocation90_spill] sm:$0xff] %v13538_v26  ;;  %v1839_v18 = vpack.c.bf16 %v1806_v25, %v1806_v25  ;;  %v13548_v12 = vrot.slane %v2718_v57, 5  ;;  %v13562_v61 = vsel %vm2144_vm0, %v13410_v52, %v13533_v30  ;;  %v1459_v25 = vpack.c.bf16 %v1426_v31, %v1426_v31  ;;  %v17934_v52 = vld [vmem:[#allocation21_spill] sm:$0xff] }
 0x153   : > { %v3479_v54 = vrot.slane %v3477_v13, 3  ;;  %v3482_v41 = vrot.slane %v3480_v16, 4  ;;  %v2307_v63 = vpop.permute.xlu0 %2306  ;;  %v2868_v13 = vpack.c.b16 %v2850_v33, %v2849_v23  ;;  %v1369_v33 = vrot.slane %v10262_v1, 1 }
 0x154   : > { %2632 = vrot.lane.b32.xlu1 %v13435_v49, %s11585_s27  ;;  %v3133_v20 = vsel %vm3103_vm8, %v2056_v28, %v2307_v63  ;;  %v17921_v28 = vld [vmem:[#allocation62_spill] sm:$0xff]  ;;  %v2749_v55 = vsel %vm2405_vm7, %v13366_v42, %v13548_v12  ;;  %v17922_v1 = vunpack.c.h.bf16 %v13456_v0 }
 0x155   : > { %v3643_v17 = vpop.f32.mrf.mxu0  ;;  %v13540_v32 = vor.u32 %v3482_v41, %v3479_v54  ;;  %v1427_v23 = vmul.f32 %v17921_v28, %v12891_v53  ;;  %v3033_v54 = vpack.c.b16 %v3015_v58, %v3014_v60  ;;  %v2701_v41 = vunpack.c.l.b16 %v1838_v37 }
 0x156   : > { %v3644_v34 = vadd.f32 %v13406_v15, %v3643_v17  ;;  %v2458_v38 = vpop.permute.xlu1 %2457  ;;  %2467 = vrot.lane.b32.xlu2 %v2434_v27, %s11588_s14  ;;  %v2702_v27 = vunpack.c.l.b16 %v1839_v18  ;;  %v1945_v28 = vmul.f32 %v17922_v1, %v13477_v35  ;;  %v13584_v37 = vsel %vm1309_vm2, %v11707_v7, %v1369_v33  ;;  %v13590_v18 = vld [vmem:[#allocation2 + $0x4] sm:$0xff] }
 0x157   : > { %v3484_v16 = vsel %vm3413_vm6, %v13423_v51, %v13540_v32  ;;  %v2403_v51 = vpack.c.b16 %v2386_v8, %v2385_v46  ;;  %v3175_v17 = vsel %vm3155_vm10, %v3133_v20, %v2458_v38  ;;  %v17923_v46 = vunpack.c.l.bf16 %v13538_v26  ;;  %17924 = vst [vmem:[#allocation62_spill] sm:$0xff] %v13584_v37 }
 0x158   : > { %v3720_v40 = vmax.f32 %v3644_v34, 0.0  ;;  %10390 = vmatmul.msk.bf16.gmra.mxu0 %vm17912_vm5, %v3484_v16  ;;  %v13566_v57 = vpop.permute.xlu2 %2308  ;;  %v2911_v34 = vshrl.u32 %v11086_v44, 16  ;;  %v2914_v16 = vshll.u32 %v11086_v44, 16  ;;  %v1460_v58 = vpack.c.bf16 %v1427_v23, %v1427_v23 }
 0x159   : > { %2899 = vrot.lane.b32.xlu0 %v2868_v13, %s11587_s29  ;;  %v1946_v8 = vmul.f32 %v17923_v46, %v13491_v50  ;;  %v13588_v42 = vsel %vm1309_vm2, %v1369_v33, %v11707_v7  ;;  %v3210_v38 = vsel %vm3190_vm11, %v3175_v17, %v13484_v59  ;;  %v13594_v31 = vrot.slane %v2403_v51, 5 }
 0x15a   : > { %v3752_v63 = vpack.c.bf16 %v3720_v40, %v3720_v40  ;;  %17925 = vst [vmem:[#allocation91_spill] sm:$0xff] %v13588_v42  ;;  %v13596_v44 = vrot.slane %v3033_v54, 5  ;;  %v2719_v20 = vpack.c.b16 %v2702_v27, %v2701_v41  ;;  %v13598_v40 = vld [vmem:[#allocation2 + $0x8] sm:$0xff]   ;;  %v2913_v33 = vrot.slane %v2911_v34, 4 }
 0x15b   : > { %v2623_v60 = vpop.permute.xlu0 %2622  ;;  %17926 = vst [vmem:[#allocation92_spill] sm:$0xff] %v13594_v31  ;;  %v2916_v46 = vrot.slane %v2914_v16, 5  ;;  %v1737_v59 = vmul.f32 %v13584_v37, %v13268_v2  ;;  %v1738_v51 = vmul.f32 %v13428_v62, %v13588_v42  ;;  %v1978_v54 = vpack.c.bf16 %v1945_v28, %v1945_v28 }
 0x15c   : > { %3784 = vst.msk [vmem:[#allocation2 + $0x14] sm:$0xf] %vm1164_vm14, %v3752_v63  ;;  %2947 = vrot.lane.b32.xlu1 %v13562_v61, %s11590_s17  ;;  %v3245_v23 = vsel %vm3225_vm12, %v3210_v38, %v2623_v60  ;;  %v1979_v17 = vpack.c.bf16 %v1946_v8, %v1946_v8  ;;  %v4458_v27 = vshrl.u32 %v13590_v18, 16  ;;  %v4461_v60 = vshll.u32 %v13590_v18, 16 }
 0x15d   : > { %v3645_v13 = vpop.f32.mrf.mxu0  ;;  %v13610_v38 = vunpack.c.h.bf16 %v13598_v40  ;;  %v2034_v34 = vunpack.c.l.b16 %v1459_v25  ;;  %v2035_v16 = vunpack.c.l.b16 %v1460_v58  ;;  %v3064_v28 = vsel %vm2405_vm7, %v13394_v36, %v13596_v44 }
 0x15e   : > { %v3646_v63 = vadd.f32 %v13406_v15, %v3645_v13  ;;  %v2773_v1 = vpop.permute.xlu1 %2772  ;;  %2782 = vrot.lane.b32.xlu2 %v2749_v55, %s11589_s16  ;;  %v2436_v13 = vsel %vm2405_vm7, %v13514_v21, %v13594_v31  ;;  %v13623_v8 = vrot.slane %v2719_v20, 5  ;;  %v13625_v25 = vor.u32 %v2916_v46, %v2913_v33 }
 0x15f   : > { %17927 = vst [vmem:[#allocation93_spill] sm:$0xff] %v13610_v38  ;;  %v3280_v55 = vsel %vm3260_vm13, %v3245_v23, %v2773_v1  ;;  %v1770_v58 = vpack.c.bf16 %v1737_v59, %v1737_v59  ;;  %v1771_v18 = vpack.c.bf16 %v1738_v51, %v1738_v51  ;;  %v3016_v23 = vunpack.c.l.b16 %v1978_v54 }
 0x160   : > { %v3721_v41 = vmax.f32 %v3646_v63, 0.0  ;;  %v13616_v56 = vpop.permute.xlu2 %2624  ;;  %17928 = vst [vmem:[#allocation94_spill] sm:$0xff] %v13623_v8  ;;  %v3017_v63 = vunpack.c.l.b16 %v1979_v17  ;;  %v1877_v36 = vmul.f32 %v13480_v47, %v13584_v37  ;;  %v4088_v33 = vmul.f32 %v13610_v38, %v11714_v14  ;;  %v17942_v47 = vld [vmem:[#allocation22_spill] sm:$0xff] }
 0x161   : > { %2318 = vrot.lane.b32.xlu0 %v13435_v49, %s11584_s26  ;;  %17929 = vst [vmem:[#allocation95_spill] sm:$0xff] %v13625_v25  ;;  %v3315_v49 = vsel %vm3295_vm15, %v3280_v55, %v13519_v9  ;;  %v2057_v46 = vpack.c.b16 %v2035_v16, %v2034_v34  ;;  %v17930_v51 = vunpack.c.h.bf16 %v13456_v0  ;;  %v2751_v9 = vsel %vm2405_vm7, %v13548_v12, %v13623_v8  ;;  %v17932_v34 = vld [vmem:[#allocation17_spill] sm:$0xff] }
 0x162   : > { %v3753_v62 = vpack.c.bf16 %v3721_v41, %v3721_v41  ;;  %v2918_v55 = vsel %vm2144_vm0, %v13533_v30, %v13625_v25  ;;  %v2536_v0 = vunpack.c.l.b16 %v1770_v58  ;;  %v1910_v12 = vpack.c.bf16 %v1877_v36, %v1877_v36  ;;  %v17933_v25 = vld [vmem:[#allocation20_spill] sm:$0xff] }
 0x163   : > { %v11421_v1 = vld [vmem:[#allocation2 + $0x10] sm:$0xff]   ;;  %v2938_v21 = vpop.permute.xlu0 %2937  ;;  %v1878_v54 = vmul.f32 %v17930_v51, %v13588_v42  ;;  %v4121_v35 = vpack.c.bf16 %v4088_v33, %v4088_v33  ;;  %v1429_v7 = vmul.f32 %v17942_v47, %v17941_v4  ;;  %v17949_v47 = vld [vmem:[#allocation27_spill] sm:$0xff] }
 0x164   : > { %3785 = vst.msk [vmem:[#allocation2 + $0x18] sm:$0xf] %vm1164_vm14, %v3753_v62  ;;  %2469 = vrot.lane.b32.xlu1 %v2436_v13, %s11588_s14  ;;  %v13633_v20 = vunpack.c.l.bf16 %v11421_v1  ;;  %v3350_v59 = vsel %vm3330_vm1, %v3315_v49, %v2938_v21  ;;  %v13641_v17 = vunpack.c.h.bf16 %v11421_v1  ;;  %v13649_v13 = vrot.slane %v4458_v27, 4  ;;  %v11092_v49 = vld [vmem:[#allocation2 + $0xc] sm:$0xff] }
 0x165   : > { %v2537_v1 = vunpack.c.l.b16 %v1771_v18  ;;  %v3034_v21 = vpack.c.b16 %v3017_v63, %v3016_v23  ;;  %v1911_v5 = vpack.c.bf16 %v1878_v54, %v1878_v54  ;;  %v4463_v23 = vrot.slane %v4461_v60, 5 }
 0x166   : > { %17931 = vst [vmem:[#allocation96_spill] sm:$0xff] %v13641_v17  ;;  %v3088_v41 = vpop.permute.xlu1 %3087  ;;  %v4089_v16 = vmul.f32 %v13633_v20, %v17932_v34  ;;  %3097 = vrot.lane.b32.xlu2 %v3064_v28, %s11591_s21  ;;  %v4022_v30 = vmul.f32 %v13633_v20, %v17933_v25  ;;  %v3136_v28 = vsel %vm3103_vm8, %v2057_v46, %v13566_v57  ;;  %v4466_v33 = vshrl.u32 %v11092_v49, 16 }
 0x167   : > { %v3385_v62 = vsel %vm3365_vm3, %v3350_v59, %v3088_v41  ;;  %v4023_v59 = vmul.f32 %v13641_v17, %v17934_v52  ;;  %v2554_v63 = vpack.c.b16 %v2537_v1, %v2536_v0  ;;  %v13665_v36 = vrot.slane %v3034_v21, 5 }
 0x168   : > { %v3485_v51 = vshrl.u32 %v3385_v62, 16  ;;  %v3488_v50 = vshll.u32 %v3385_v62, 16  ;;  %v13655_v2 = vpop.permute.xlu2 %2939  ;;  %v4122_v27 = vpack.c.bf16 %v4089_v16, %v4089_v16  ;;  %v4469_v57 = vshll.u32 %v11092_v49, 16  ;;  %v17937_v49 = vld [vmem:[#allocation18_spill] sm:$0xff] }
 0x169   : > { %2634 = vrot.lane.b32.xlu0 %v13562_v61, %s11585_s27  ;;  %17935 = vst [vmem:[#allocation17_spill] sm:$0xff] %v13665_v36  ;;  %v2851_v46 = vunpack.c.l.b16 %v1910_v12  ;;  %v2852_v60 = vunpack.c.l.b16 %v1911_v5  ;;  %v4055_v0 = vpack.c.bf16 %v4022_v30, %v4022_v30  ;;  %v4056_v1 = vpack.c.bf16 %v4023_v59, %v4023_v59 }
 0x16a   : > { %v3487_v58 = vrot.slane %v3485_v51, 3  ;;  %v3490_v18 = vrot.slane %v3488_v50, 4  ;;  %v13667_v41 = vunpack.c.l.b16 %v4122_v27  ;;  %v13672_v50 = vunpack.c.l.b16 %v4121_v35  ;;  %v17940_v27 = vld [vmem:[#allocation67_spill] sm:$0xff] }
 0x16b   : > { %v11093_v54 = vld [vmem:[#allocation2 + $0x14] sm:$0xff]  ;;  %v2460_v26 = vpop.permute.xlu0 %2459  ;;  %v3950_v35 = vmul.f32 %v13610_v38, %v17937_v49  ;;  %v4468_v59 = vrot.slane %v4466_v33, 4 }
 0x16c   : > { %v13669_v16 = vor.u32 %v3490_v18, %v3487_v58  ;;  %2784 = vrot.lane.b32.xlu1 %v2751_v9, %s11589_s16  ;;  %v3648_v62 = vpop.f32.mrf.mxu0  ;;  %v17936_v9 = vld [vmem:[#allocation19_spill] sm:$0xff]  ;;  %v3177_v18 = vsel %vm3155_vm10, %v3136_v28, %v2460_v26  ;;  %v4475_v5 = vshrl.u32 %v11093_v54, 16  ;;  %v4478_v30 = vshll.u32 %v11093_v54, 16 }
 0x16d   : > { %v3649_v61 = vadd.f32 %v13406_v15, %v3648_v62  ;;  %v3951_v58 = vmul.f32 %v13633_v20, %v17936_v9  ;;  %v17939_v62 = vld [vmem:[#allocation73_spill] sm:$0xff]  ;;  %v4471_v26 = vrot.slane %v4469_v57, 5  ;;  %v13696_v28 = vunpack.c.l.b16 %v4055_v0 }
 0x16e   : > { %v2577_v21 = vpop.permute.xlu1 %2576  ;;  %v3492_v51 = vsel %vm3413_vm6, %v13540_v32, %v13669_v16  ;;  %2586 = vrot.lane.b32.xlu2 %v2554_v63, %s11586_s28  ;;  %v3066_v32 = vsel %vm2405_vm7, %v13596_v44, %v13665_v36  ;;  %v1428_v53 = vmul.f32 %v17940_v27, %v17939_v62  ;;  %v13698_v63 = vunpack.c.l.b16 %v4056_v1 }
 0x16f   : > { %v3722_v12 = vmax.f32 %v3649_v61, 0.0  ;;  %10391 = vmatmul.msk.bf16.gmra.mxu0 %vm17938_vm9, %v3492_v51  ;;  %17943 = vst [vmem:[#allocation20_spill] sm:$0xff] %v13696_v28  ;;  %v3212_v54 = vsel %vm3190_vm11, %v3177_v18, %v2577_v21  ;;  %v2869_v44 = vpack.c.b16 %v2852_v60, %v2851_v46  ;;  %v3984_v33 = vpack.c.bf16 %v3951_v58, %v3951_v58  ;;  %v13707_v18 = vld [vmem:[#allocation2 + $0x4] sm:$0xf]  ;;  %vm17965_vm9 = vmmov %vm17912_vm5 }
 0x170   : > { %v13694_v8 = vpop.permute.xlu2 %2461  ;;  %17944 = vst [vmem:[#allocation21_spill] sm:$0xff] %v13698_v63  ;;  %v4477_v51 = vrot.slane %v4475_v5, 4  ;;  %v4480_v27 = vrot.slane %v4478_v30, 5  ;;  %v4464_v1 = vor.u32 %v4463_v23, %v13649_v13  ;;  %v1461_v4 = vpack.c.bf16 %v1428_v53, %v1428_v53  ;;  %v17952_v63 = vld [vmem:[#allocation71_spill] sm:$0xff] }
 0x171   : > { %v3754_v61 = vpack.c.bf16 %v3722_v12, %v3722_v12  ;;  %2949 = vrot.lane.b32.xlu0 %v2918_v55, %s11590_s17  ;;  %v3983_v12 = vpack.c.bf16 %v3950_v35, %v3950_v35  ;;  %v1462_v21 = vpack.c.bf16 %v1429_v7, %v1429_v7  ;;  %v13709_v55 = vunpack.c.l.b16 %v3984_v33 }
 0x172   : > { %v3247_v60 = vsel %vm3225_vm12, %v3212_v54, %v13616_v56  ;;  %v13714_v58 = vor.u32 %v4471_v26, %v4468_v59  ;;  %v13720_v7 = vor.u32 %v4480_v27, %v4477_v51  ;;  %v17667_v53 = vunpack.c.l.bf16 %v13707_v18 }
 0x173   : > { %3786 = vst.msk [vmem:[#allocation2 + $0x1c] sm:$0xf] %vm1164_vm14, %v3754_v61  ;;  %v2775_v0 = vpop.permute.xlu0 %2774  ;;  %v13716_v35 = vunpack.c.l.b16 %v3983_v12  ;;  %v2036_v23 = vunpack.c.l.b16 %v1461_v4  ;;  %v17668_v56 = vunpack.c.l.bf16 %v13598_v40  ;;  %v2037_v33 = vunpack.c.l.b16 %v1462_v21 }
 0x174   : > { %3099 = vrot.lane.b32.xlu1 %v3066_v32, %s11591_s21  ;;  %v3650_v57 = vpop.f32.mrf.mxu0  ;;  %17945 = vst [vmem:[#allocation19_spill] sm:$0xff] %v13714_v58  ;;  %v3282_v5 = vsel %vm3260_vm13, %v3247_v60, %v2775_v0  ;;  %v4473_v26 = vsel %vm2144_vm0, %v4464_v1, %v13714_v58  ;;  %v4090_v51 = vmul.f32 %v13641_v17, %v17937_v49 }
 0x175   : > { %v3651_v46 = vadd.f32 %v13406_v15, %v3650_v57  ;;  %17946 = vst [vmem:[#allocation18_spill] sm:$0xff] %v13720_v7  ;;  %v13738_v4 = vsel %vm2144_vm0, %v13714_v58, %v13720_v7  ;;  %v3948_v57 = vmul.f32 %v17667_v53, %v11714_v14  ;;  %v17951_v58 = vld [vmem:[#allocation57_spill] sm:$0xff]  ;;  %v1431_v62 = vmul.f32 %v17952_v63, %v13150_v19 }
 0x176   : > { %v2892_v30 = vpop.permute.xlu1 %2891  ;;  %2901 = vrot.lane.b32.xlu2 %v2869_v44, %s11587_s29  ;;  %17947 = vst [vmem:[#allocation67_spill] sm:$0xff] %v13738_v4  ;;  %v1430_v28 = vmul.f32 %v17951_v58, %v13144_v3  ;;  %v4228_v63 = vmul.f32 %v13641_v17, %v11714_v14 }
 0x177   : > { %v3723_v32 = vmax.f32 %v3651_v46, 0.0  ;;  %v3317_v61 = vsel %vm3295_vm15, %v3282_v5, %v2892_v30  ;;  %v3949_v46 = vmul.f32 %v17668_v56, %v17932_v34  ;;  %v2058_v5 = vpack.c.b16 %v2037_v33, %v2036_v23  ;;  %v17950_v56 = vld [vmem:[#allocation25_spill] sm:$0xff] }
 0x178   : > { %v13729_v54 = vpop.permute.xlu2 %2776  ;;  %v3352_v21 = vsel %vm3330_vm1, %v3317_v61, %v13655_v2  ;;  %v4123_v61 = vpack.c.bf16 %v4090_v51, %v4090_v51  ;;  %v3981_v23 = vpack.c.bf16 %v3948_v57, %v3948_v57  ;;  %v17954_v51 = vld [vmem:[#allocation28_spill] sm:$0xff] }
 0x179   : > { %v3755_v59 = vpack.c.bf16 %v3723_v32, %v3723_v32  ;;  %4602 = vrot.lane.b32.xlu0 %v4473_v26, %s11591_s21 }
 0x17a   : > { %v11422_v44 = vld [vmem:[#allocation2 + $0x18] sm:$0xff]  }
 0x17b   : > { %3787 = vst.msk [vmem:[#allocation2 + $0x20] sm:$0xf] %vm1164_vm14, %v3755_v59  ;;  %v13740_v27 = vunpack.c.l.bf16 %v11422_v44  ;;  %v13742_v12 = vunpack.c.h.bf16 %v11422_v44  ;;  %v3090_v0 = vpop.permute.xlu0 %3089 }
 0x17c   : > { %4604 = vrot.lane.b32.xlu1 %v13738_v4, %s11591_s21  ;;  %v3387_v60 = vsel %vm3365_vm3, %v3352_v21, %v3090_v0  ;;  %v13764_v0 = vmul.f32 %v13641_v17, %v17950_v56 }
 0x17d   : > { %17948 = vst [vmem:[#allocation22_spill] sm:$0xff] %v13740_v27  ;;  %v4162_v30 = vmul.f32 %v13740_v27, %v17933_v25  ;;  %v3493_v32 = vshrl.u32 %v3387_v60, 16  ;;  %v3496_v59 = vshll.u32 %v3387_v60, 16  ;;  %v4163_v44 = vmul.f32 %v13742_v12, %v17934_v52 }
 0x17e   : > { %v2311_v26 = vpop.permute.xlu1 %2310  ;;  %v4024_v53 = vmul.f32 %v13740_v27, %v17949_v47  ;;  %4600 = vrot.lane.b32.xlu2 %v4464_v1, %s11591_s21  ;;  %v3982_v60 = vpack.c.bf16 %v3949_v46, %v3949_v46  ;;  %v4091_v14 = vmul.f32 %v13740_v27, %v17936_v9 }
 0x17f   : > { %v4195_v2 = vpack.c.bf16 %v4162_v30, %v4162_v30  ;;  %v3495_v33 = vrot.slane %v3493_v32, 3  ;;  %v3498_v21 = vrot.slane %v3496_v59, 4  ;;  %v4196_v13 = vpack.c.bf16 %v4163_v44, %v4163_v44 }
 0x180   : > { %v13766_v4 = vpop.permute.xlu2 %3091  ;;  %v4025_v30 = vmul.f32 %v13742_v12, %v17954_v51  ;;  %v3139_v57 = vsel %vm3103_vm8, %v2058_v5, %v2311_v26  ;;  %v4057_v44 = vpack.c.bf16 %v4024_v53, %v4024_v53  ;;  %v4668_v5 = vunpack.c.l.b16 %v3982_v60 }
 0x181   : > { %v13772_v1 = vunpack.c.l.b16 %v4195_v2  ;;  %v13776_v36 = vor.u32 %v3498_v21, %v3495_v33  ;;  %v3653_v32 = vpop.f32.mrf.mxu0  ;;  %v13779_v46 = vunpack.c.l.b16 %v4196_v13  ;;  %v4667_v2 = vunpack.c.l.b16 %v3981_v23 }
 0x182   : > { %v11094_v59 = vld [vmem:[#allocation2 + $0x1c] sm:$0xff]  ;;  %v3654_v31 = vadd.f32 %v13406_v15, %v3653_v32  ;;  %v4058_v58 = vpack.c.bf16 %v4025_v30, %v4025_v30  ;;  %v3179_v13 = vsel %vm3155_vm10, %v3139_v57, %v13694_v8  ;;  %v13795_v17 = vunpack.c.l.b16 %v4057_v44  ;;  %v17957_v44 = vld [vmem:[#allocation29_spill] sm:$0xff] }
 0x183   : > { %17953 = vst [vmem:[#allocation27_spill] sm:$0xff] %v13772_v1  ;;  %v2579_v19 = vpop.permute.xlu0 %2578  ;;  %v3500_v33 = vsel %vm3413_vm6, %v13669_v16, %v13776_v36  ;;  %v4484_v21 = vshrl.u32 %v11094_v59, 16  ;;  %v4487_v3 = vshll.u32 %v11094_v59, 16  ;;  %v4916_v8 = vunpack.c.l.b16 %v4123_v61 }
 0x184   : > { %v3724_v26 = vmax.f32 %v3654_v31, 0.0  ;;  %10392 = vmatmul.msk.bf16.gmra.mxu0 %vm17912_vm5, %v3500_v33  ;;  %v3214_v23 = vsel %vm3190_vm11, %v3179_v13, %v2579_v19  ;;  %17955 = vst [vmem:[#allocation25_spill] sm:$0xff] %v13795_v17  ;;  %v1463_v31 = vpack.c.bf16 %v1430_v28, %v1430_v28  ;;  %v13797_v59 = vunpack.c.l.b16 %v4058_v58 }
 0x185   : > { %v4486_v32 = vrot.slane %v4484_v21, 4  ;;  %v4489_v16 = vrot.slane %v4487_v3, 5  ;;  %v1464_v33 = vpack.c.bf16 %v1431_v62, %v1431_v62  ;;  %v3985_v53 = vpack.c.bf16 %v13764_v0, %v13764_v0 }
 0x186   : > { %v2627_v30 = vpop.permute.xlu1 %2626  ;;  %v3756_v60 = vpack.c.bf16 %v3724_v26, %v3724_v26  ;;  %17956 = vst [vmem:[#allocation57_spill] sm:$0xff] %v13797_v59  ;;  %v4700_v1 = vpack.c.b16 %v4668_v5, %v4667_v2  ;;  %v4124_v28 = vpack.c.bf16 %v4091_v14, %v4091_v14  ;;  %v3953_v61 = vmul.f32 %v13740_v27, %v17957_v44 }
 0x187   : > { %v13799_v57 = vor.u32 %v4489_v16, %v4486_v32  ;;  %v3249_v19 = vsel %vm3225_vm12, %v3214_v23, %v2627_v30  ;;  %v17959_v0 = vpack.c.b16 %v13709_v55, %v13716_v35  ;;  %v4229_v5 = vmul.f32 %v13740_v27, %v17932_v34 }
 0x188   : > { %3788 = vst.msk [vmem:[#allocation2 + $0x24] sm:$0xf] %vm1164_vm14, %v3756_v60  ;;  %v13805_v21 = vpop.permute.xlu2 %2580  ;;  %v4261_v26 = vpack.c.bf16 %v4228_v63, %v4228_v63  ;;  %v2038_v14 = vunpack.c.l.b16 %v1463_v31  ;;  %v4917_v23 = vunpack.c.l.b16 %v4124_v28  ;;  %v3986_v30 = vpack.c.bf16 %v3953_v61, %v3953_v61 }
 0x189   : > { %v3655_v58 = vpop.f32.mrf.mxu0  ;;  %v13814_v62 = vsel %vm2144_vm0, %v13720_v7, %v13799_v57  ;;  %v13819_v2 = vrot.slane %v17959_v0, 5  ;;  %v3284_v16 = vsel %vm3260_vm13, %v3249_v19, %v13729_v54  ;;  %v4671_v60 = vunpack.c.l.b16 %v3985_v53 }
 0x18a   : > { %17958 = vst [vmem:[#allocation71_spill] sm:$0xff] %v13814_v62  ;;  %v3656_v13 = vadd.f32 %v13406_v15, %v3655_v58  ;;  %4606 = vrot.lane.b32.xlu2 %v13814_v62, %s11591_s21  ;;  %v4262_v55 = vpack.c.bf16 %v4229_v5, %v4229_v5  ;;  %v13828_v35 = vrot.slane %v4700_v1, 5  ;;  %v4948_v63 = vpack.c.b16 %v4917_v23, %v4916_v8 }
 0x18b   : > { %v2894_v32 = vpop.permute.xlu0 %2893  ;;  %v4672_v3 = vunpack.c.l.b16 %v3986_v30  ;;  %v2039_v7 = vunpack.c.l.b16 %v1464_v33  ;;  %v13831_v17 = vunpack.c.l.b16 %v4261_v26  ;;  %v17962_v33 = vpack.c.b16 %v13667_v41, %v13672_v50 }
 0x18c   : > { %17960 = vst [vmem:[#allocation28_spill] sm:$0xff] %v13828_v35  ;;  %v3725_v0 = vmax.f32 %v3656_v13, 0.0  ;;  %v3319_v34 = vsel %vm3295_vm15, %v3284_v16, %v2894_v32  ;;  %v13833_v31 = vunpack.c.l.b16 %v4262_v55  ;;  %v13838_v28 = vsel %vm2405_vm7, %v13828_v35, %v13819_v2  ;;  %v17969_v35 = vld [vmem:[#allocation38_spill] sm:$0xff] }
 0x18d   : > { %17961 = vst [vmem:[#allocation29_spill] sm:$0xff] %v13838_v28  ;;  %v13841_v53 = vrot.slane %v4948_v63, 5  ;;  %v4702_v19 = vpack.c.b16 %v4672_v3, %v4671_v60  ;;  %v13848_v5 = vrot.slane %v17962_v33, 5  ;;  %v2059_v16 = vpack.c.b16 %v2039_v7, %v2038_v14 }
 0x18e   : > { %v2942_v58 = vpop.permute.xlu1 %2941  ;;  %v3757_v54 = vpack.c.bf16 %v3725_v0, %v3725_v0 }
 0x18f   : > { %v3354_v1 = vsel %vm3330_vm1, %v3319_v34, %v2942_v58  ;;  %v11423_v61 = vld [vmem:[#allocation2 + $0x20] sm:$0xff]   ;;  %17963 = vst [vmem:[#allocation97_spill] sm:$0xff] %v13848_v5  ;;  %v4092_v34 = vmul.f32 %v13742_v12, %v17950_v56 }
 0x190   : > { %v3389_v8 = vsel %vm3365_vm3, %v3354_v1, %v13766_v4  ;;  %3789 = vst.msk [vmem:[#allocation2 + $0x28] sm:$0xf] %vm1164_vm14, %v3757_v54  ;;  %v13853_v30 = vpop.permute.xlu2 %2895  ;;  %v13855_v32 = vunpack.c.l.bf16 %v11423_v61  ;;  %v13857_v3 = vunpack.c.h.bf16 %v11423_v61  ;;  %v13862_v4 = vsel %vm2405_vm7, %v13848_v5, %v13841_v53 }
 0x191   : > { %v3501_v13 = vshrl.u32 %v3389_v8, 16  ;;  %v3504_v23 = vshll.u32 %v3389_v8, 16  ;;  %17964 = vst [vmem:[#allocation98_spill] sm:$0xff] %v13862_v4  ;;  %v4125_v26 = vpack.c.bf16 %v4092_v34, %v4092_v34 }
 0x192   : > { %v4164_v55 = vmul.f32 %v13855_v32, %v17949_v47  ;;  %v4165_v0 = vmul.f32 %v13857_v3, %v17954_v51  ;;  %v4093_v63 = vmul.f32 %v13855_v32, %v17957_v44  ;;  %v4027_v34 = vmul.f32 %v13857_v3, %v17969_v35 }
 0x193   : > { %v3503_v41 = vrot.slane %v3501_v13, 3  ;;  %v3506_v50 = vrot.slane %v3504_v23, 4  ;;  %v2313_v60 = vpop.permute.xlu0 %2312 }
 0x194   : > { %v4197_v7 = vpack.c.bf16 %v4164_v55, %v4164_v55  ;;  %v4198_v14 = vpack.c.bf16 %v4165_v0, %v4165_v0  ;;  %v3142_v61 = vsel %vm3103_vm8, %v2059_v16, %v2313_v60  ;;  %v4126_v62 = vpack.c.bf16 %v4093_v63, %v4093_v63 }
 0x195   : > { %v3658_v58 = vpop.f32.mrf.mxu0  ;;  %v13872_v54 = vor.u32 %v3506_v50, %v3503_v41  ;;  %v1432_v41 = vmul.f32 %v12865_v10, %v13257_v11  ;;  %v13893_v63 = vrot.slane %v4702_v19, 5  ;;  %v4060_v11 = vpack.c.bf16 %v4027_v34, %v4027_v34 }
 0x196   : > { %v3659_v1 = vadd.f32 %v13406_v15, %v3658_v58  ;;  %v2464_v8 = vpop.permute.xlu1 %2463  ;;  %v13884_v58 = vunpack.c.l.b16 %v4197_v7  ;;  %v13886_v55 = vunpack.c.l.b16 %v4198_v14  ;;  %v4918_v14 = vunpack.c.l.b16 %v4125_v26 }
 0x197   : > { %v3508_v33 = vsel %vm3413_vm6, %v13776_v36, %v13872_v54  ;;  %v11095_v23 = vld [vmem:[#allocation2 + $0x24] sm:$0xff]  ;;  %v3181_v60 = vsel %vm3155_vm10, %v3142_v61, %v2464_v8  ;;  %v4919_v28 = vunpack.c.l.b16 %v4126_v62  ;;  %v13925_v34 = vunpack.c.l.b16 %v4060_v11 }
 0x198   : > { %v3726_v13 = vmax.f32 %v3659_v1, 0.0  ;;  %10393 = vmatmul.msk.bf16.gmra.mxu0 %vm17965_vm9, %v3508_v33  ;;  %v13882_v50 = vpop.permute.xlu2 %2314  ;;  %17966 = vst [vmem:[#allocation99_spill] sm:$0xff] %v13884_v58  ;;  %v4493_v0 = vshrl.u32 %v11095_v23, 16  ;;  %v4496_v36 = vshll.u32 %v11095_v23, 16  ;;  %v1433_v1 = vmul.f32 %v12979_v43, %v13265_v29  ;;  %v17968_v23 = vld [vmem:[#allocation37_spill] sm:$0xff]  ;;  %vm17990_vm9 = vmmov %vm17912_vm5 }
 0x199   : > { %17967 = vst [vmem:[#allocation100_spill] sm:$0xff] %v13886_v55  ;;  %v3216_v8 = vsel %vm3190_vm11, %v3181_v60, %v13805_v21  ;;  %v4026_v43 = vmul.f32 %v13855_v32, %v17968_v23  ;;  %v4949_v26 = vpack.c.b16 %v4919_v28, %v4918_v14  ;;  %v13909_v21 = vsel %vm2405_vm7, %v13819_v2, %v13893_v63 }
 0x19a   : > { %v3758_v16 = vpack.c.bf16 %v3726_v13, %v3726_v13  ;;  %v4495_v7 = vrot.slane %v4493_v0, 4  ;;  %v4498_v33 = vrot.slane %v4496_v36, 5  ;;  %v1465_v13 = vpack.c.bf16 %v1432_v41, %v1432_v41  ;;  %17970 = vst [vmem:[#allocation101_spill] sm:$0xff] %v13909_v21 }
 0x19b   : > { %v2629_v10 = vpop.permute.xlu0 %2628  ;;  %v1466_v62 = vpack.c.bf16 %v1433_v1, %v1433_v1  ;;  %v4059_v36 = vpack.c.bf16 %v4026_v43, %v4026_v43  ;;  %17973 = vst [vmem:[#allocation104_spill] sm:$0xff] %v13925_v34 }
 0x19c   : > { %3790 = vst.msk [vmem:[#allocation2 + $0x2c] sm:$0xf] %vm1164_vm14, %v3758_v16  ;;  %v3251_v19 = vsel %vm3225_vm12, %v3216_v8, %v2629_v10  ;;  %v13904_v0 = vor.u32 %v4498_v33, %v4495_v7  ;;  %v13916_v10 = vrot.slane %v4949_v26, 5 }
 0x19d   : > { %v3660_v61 = vpop.f32.mrf.mxu0  ;;  %v13923_v1 = vunpack.c.l.b16 %v4059_v36  ;;  %v2041_v33 = vunpack.c.l.b16 %v1466_v62  ;;  %v17975_v62 = vld [vmem:[#allocation32_spill] sm:$0xff] }
 0x19e   : > { %v3661_v16 = vadd.f32 %v13406_v15, %v3660_v61  ;;  %v2779_v29 = vpop.permute.xlu1 %2778  ;;  %v13914_v60 = vsel %vm2144_vm0, %v13799_v57, %v13904_v0  ;;  %v13930_v7 = vsel %vm2405_vm7, %v13841_v53, %v13916_v10  ;;  %v2040_v57 = vunpack.c.l.b16 %v1465_v13 }
 0x19f   : > { %17971 = vst [vmem:[#allocation102_spill] sm:$0xff] %v13914_v60  ;;  %v3286_v15 = vsel %vm3260_vm13, %v3251_v19, %v2779_v29  ;;  %4608 = vrot.lane.b32.xlu0 %v13914_v60, %s11591_s21  ;;  %v4230_v53 = vmul.f32 %v13742_v12, %v17937_v49  ;;  %v4094_v36 = vmul.f32 %v13857_v3, %v17975_v62 }
 0x1a0   : > { %v3727_v41 = vmax.f32 %v3661_v16, 0.0  ;;  %v13921_v28 = vpop.permute.xlu2 %2630  ;;  %17972 = vst [vmem:[#allocation103_spill] sm:$0xff] %v13923_v1  ;;  %v3321_v61 = vsel %vm3295_vm15, %v3286_v15, %v13853_v30  ;;  %v2060_v30 = vpack.c.b16 %v2041_v33, %v2040_v57  ;;  %v17976_v15 = vld [vmem:[#allocation33_spill] sm:$0xff]  ;;  %v4231_v29 = vmul.f32 %v13855_v32, %v17936_v9  ;;  %v17978_v57 = vld [vmem:[#allocation42_spill] sm:$0xff] }
 0x1a1   : > { %17974 = vst [vmem:[#allocation105_spill] sm:$0xff] %v13930_v7  ;;  %v4263_v60 = vpack.c.bf16 %v4230_v53, %v4230_v53  ;;  %v4127_v4 = vpack.c.bf16 %v4094_v36, %v4094_v36  ;;  %v13965_v9 = vmul.f32 %v13082_v6, %v13359_v24 }
 0x1a2   : > { %v3759_v2 = vpack.c.bf16 %v3727_v41, %v3727_v41  ;;  %v3145_v5 = vsel %vm3103_vm8, %v2060_v30, %v13882_v50  ;;  %v13978_v50 = vld [vmem:[%s17494_s2] ss:$0 sm:$0xff] }
 0x1a3   : > { %v11424_v14 = vld [vmem:[#allocation2 + $0x28] sm:$0xff]   ;;  %v2944_v8 = vpop.permute.xlu0 %2943 }
 0x1a4   : > { %3791 = vst.msk [vmem:[#allocation2 + $0x30] sm:$0xf] %vm1164_vm14, %v3759_v2  ;;  %v13937_v11 = vunpack.c.l.bf16 %v11424_v14  ;;  %v13939_v43 = vunpack.c.h.bf16 %v11424_v14  ;;  %v3356_v13 = vsel %vm3330_vm1, %v3321_v61, %v2944_v8  ;;  %v17977_v14 = vld [vmem:[#allocation41_spill] sm:$0xff] }
 0x1a6   : > { %v3094_v19 = vpop.permute.xlu1 %3093  ;;  %v4166_v16 = vmul.f32 %v13937_v11, %v17968_v23  ;;  %v4167_v26 = vmul.f32 %v13939_v43, %v17969_v35  ;;  %v4095_v2 = vmul.f32 %v13937_v11, %v17976_v15  ;;  %v4028_v49 = vmul.f32 %v13937_v11, %v17977_v14 }
 0x1a7   : > { %v3391_v41 = vsel %vm3365_vm3, %v3356_v13, %v3094_v19  ;;  %v4029_v33 = vmul.f32 %v13939_v43, %v17978_v57 }
 0x1a8   : > { %v3509_v8 = vshrl.u32 %v3391_v41, 16  ;;  %v3512_v61 = vshll.u32 %v3391_v41, 16  ;;  %v13957_v21 = vpop.permute.xlu2 %2945  ;;  %v4199_v1 = vpack.c.bf16 %v4166_v16, %v4166_v16  ;;  %v4200_v34 = vpack.c.bf16 %v4167_v26, %v4167_v26 }
 0x1a9   : > { %v4128_v7 = vpack.c.bf16 %v4095_v2, %v4095_v2  ;;  %v4061_v59 = vpack.c.bf16 %v4028_v49, %v4028_v49  ;;  %v4264_v49 = vpack.c.bf16 %v4231_v29, %v4231_v29 }
 0x1aa   : > { %v3511_v13 = vrot.slane %v3509_v8, 3  ;;  %v3514_v19 = vrot.slane %v3512_v61, 4  ;;  %v13967_v53 = vunpack.c.l.b16 %v4199_v1  ;;  %v13969_v16 = vunpack.c.l.b16 %v4200_v34  ;;  %v17981_v61 = vld [vmem:[#allocation39_spill] sm:$0xff] }
 0x1ab   : > { %v11096_v41 = vld [vmem:[#allocation2 + $0x2c] sm:$0xff]  ;;  %v2466_v58 = vpop.permute.xlu0 %2465  ;;  %v4921_v8 = vunpack.c.l.b16 %v4128_v7  ;;  %v3956_v36 = vmul.f32 %v13857_v3, %v17981_v61  ;;  %v4062_v34 = vpack.c.bf16 %v4029_v33, %v4029_v33  ;;  %v13986_v29 = vunpack.c.l.b16 %v4061_v59 }
 0x1ac   : > { %17979 = vst [vmem:[#allocation32_spill] sm:$0xff] %v13967_v53  ;;  %v13971_v26 = vor.u32 %v3514_v19, %v3511_v13  ;;  %v3663_v2 = vpop.f32.mrf.mxu0  ;;  %v4502_v1 = vshrl.u32 %v11096_v41, 16  ;;  %v4505_v30 = vshll.u32 %v11096_v41, 16  ;;  %v4920_v19 = vunpack.c.l.b16 %v4127_v4 }
 0x1ad   : > { %17980 = vst [vmem:[#allocation33_spill] sm:$0xff] %v13969_v16  ;;  %v3664_v6 = vadd.f32 %v13978_v50, %v3663_v2  ;;  %v3183_v57 = vsel %vm3155_vm10, %v3145_v5, %v2466_v58  ;;  %v1435_v33 = vmul.f32 %v13122_v22, %v13372_v48  ;;  %v3989_v35 = vpack.c.bf16 %v3956_v36, %v3956_v36  ;;  %v11113_v48 = vld [vmem:[%s17495_s3 + $0x20] sm:$0xff] }
 0x1ae   : > { %v2583_v24 = vpop.permute.xlu1 %2582  ;;  %v3516_v13 = vsel %vm3413_vm6, %v13872_v54, %v13971_v26  ;;  %17982 = vst [vmem:[#allocation39_spill] sm:$0xff] %v13986_v29  ;;  %v4504_v2 = vrot.slane %v4502_v1, 4  ;;  %v4507_v14 = vrot.slane %v4505_v30, 5  ;;  %v4950_v41 = vpack.c.b16 %v4921_v8, %v4920_v19 }
 0x1af   : > { %v3728_v55 = vmax.f32 %v3664_v6, 0.0  ;;  %10394 = vmatmul.msk.bf16.gmra.mxu0 %vm17912_vm5, %v3516_v13  ;;  %v5172_v27 = vunpack.c.l.b16 %v4264_v49  ;;  %v13996_v59 = vunpack.c.l.b16 %v4062_v34  ;;  %v4232_v5 = vmul.f32 %v13857_v3, %v17950_v56  ;;  %v17984_v6 = vld [vmem:[#allocation40_spill] sm:$0xff] }
 0x1b0   : > { %v13992_v23 = vor.u32 %v4507_v14, %v4504_v2  ;;  %v13994_v7 = vpop.permute.xlu2 %2467  ;;  %v3218_v4 = vsel %vm3190_vm11, %v3183_v57, %v2583_v24  ;;  %v14001_v58 = vrot.slane %v4950_v41, 5  ;;  %v3957_v22 = vmul.f32 %v13937_v11, %v17984_v6 }
 0x1b1   : > { %v3760_v54 = vpack.c.bf16 %v3728_v55, %v3728_v55  ;;  %17983 = vst [vmem:[#allocation106_spill] sm:$0xff] %v13996_v59  ;;  %v5171_v8 = vunpack.c.l.b16 %v4263_v60  ;;  %v1467_v14 = vpack.c.bf16 %v13965_v9, %v13965_v9  ;;  %v17986_v24 = vpack.c.b16 %v13833_v31, %v13831_v17  ;;  %v11116_v17 = vld [vmem:[%s17495_s3 + $0x38] sm:$0xff] }
 0x1b2   : > { %v14009_v55 = vsel %vm2144_vm0, %v13904_v0, %v13992_v23  ;;  %v1468_v60 = vpack.c.bf16 %v1435_v33, %v1435_v33  ;;  %v14023_v0 = vsel %vm2405_vm7, %v13916_v10, %v14001_v58  ;;  %v3990_v1 = vpack.c.bf16 %v3957_v22, %v3957_v22  ;;  %6539 = vmatpush.bf16.msra.mxu1 %v11116_v17 }
 0x1b3   : > { %3792 = vst.msk [vmem:[#allocation2 + $0x34] sm:$0xf] %vm1164_vm14, %v3760_v54  ;;  %v5219_v57 = vrot.slane %v17986_v24, 5  ;;  %v2781_v49 = vpop.permute.xlu0 %2780  ;;  %4610 = vrot.lane.b32.xlu1 %v14009_v55, %s11591_s21  ;;  %v5203_v9 = vpack.c.b16 %v5172_v27, %v5171_v8  ;;  %v3253_v34 = vsel %vm3225_vm12, %v3218_v4, %v13921_v28  ;;  %v14031_v31 = vunpack.c.l.b16 %v3989_v35  ;;  %11442 = vmatpush.bf16.msra.mxu2 %v11116_v17 }
 0x1b4   : > { %17985 = vst [vmem:[#allocation40_spill] sm:$0xff] %v14009_v55  ;;  %v3665_v36 = vpop.f32.mrf.mxu0  ;;  %v4265_v13 = vpack.c.bf16 %v4232_v5, %v4232_v5  ;;  %v3288_v19 = vsel %vm3260_vm13, %v3253_v34, %v2781_v49  ;;  %v14034_v33 = vunpack.c.l.b16 %v3990_v1  ;;  %v4233_v27 = vmul.f32 %v13937_v11, %v17957_v44  ;;  %v11115_v44 = vld [vmem:[%s17495_s3 + $0x30] sm:$0xff] }
 0x1b5   : > { %17987 = vst [vmem:[#allocation107_spill] sm:$0xff] %v14023_v0  ;;  %v3666_v30 = vadd.f32 %v13978_v50, %v3665_v36  ;;  %v14036_v10 = vrot.slane %v5203_v9, 5  ;;  %v2042_v8 = vunpack.c.l.b16 %v1467_v14  ;;  %v2043_v24 = vunpack.c.l.b16 %v1468_v60 }
 0x1b6   : > { %v2898_v2 = vpop.permute.xlu1 %2897  ;;  %v4266_v54 = vpack.c.bf16 %v4233_v27, %v4233_v27  ;;  %v14052_v36 = vunpack.c.l.b16 %v4265_v13  ;;  %v1436_v1 = vmul.f32 %v13127_v45, %v13584_v37  ;;  %6540 = vmatpush.bf16.msra.mxu1 %v11115_v44  ;;  %v5580_v34 = vshrl.u32 %v5219_v57, 16 }
 0x1b7   : > { %v3729_v41 = vmax.f32 %v3666_v30, 0.0  ;;  %v14044_v35 = vsel %vm2405_vm7, %v5219_v57, %v14036_v10  ;;  %v3323_v4 = vsel %vm3295_vm15, %v3288_v19, %v2898_v2  ;;  %11443 = vmatpush.bf16.msra.mxu2 %v11115_v44  ;;  %v1437_v17 = vmul.f32 %v13276_v39, %v13588_v42  ;;  %v17989_v44 = vld [vmem:[#allocation48_spill] sm:$0xff] }
 0x1b8   : > { %v14047_v22 = vpop.permute.xlu2 %2782  ;;  %v14054_v49 = vunpack.c.l.b16 %v4266_v54  ;;  %v3358_v30 = vsel %vm3330_vm1, %v3323_v4, %v13957_v21  ;;  %v5583_v13 = vshll.u32 %v5219_v57, 16  ;;  %v2061_v27 = vpack.c.b16 %v2043_v24, %v2042_v8 }
 0x1b9   : > { %v3761_v5 = vpack.c.bf16 %v3729_v41, %v3729_v41  ;;  %v4096_v54 = vmul.f32 %v13939_v43, %v17981_v61  ;;  %v17988_v21 = vunpack.c.l.bf16 %v13598_v40  ;;  %v14077_v57 = vmul.f32 %v13610_v38, %v17934_v52 }
 0x1ba   : > { %v11425_v41 = vld [vmem:[#allocation2 + $0x30] sm:$0xff]   ;;  %v14079_v8 = vrot.slane %v5580_v34, 3  ;;  %v14085_v56 = vrot.slane %v5583_v13, 4  ;;  %v5588_v40 = vshrl.u32 %v14044_v35, 16  ;;  %v5591_v52 = vshll.u32 %v14044_v35, 16 }
 0x1bb   : > { %3793 = vst.msk [vmem:[#allocation2 + $0x38] sm:$0xf] %vm1164_vm14, %v3761_v5  ;;  %v3096_v9 = vpop.permute.xlu0 %3095  ;;  %v1469_v5 = vpack.c.bf16 %v1436_v1, %v1436_v1  ;;  %v14071_v4 = vmul.f32 %v17988_v21, %v17933_v25  ;;  %v14083_v1 = vunpack.c.l.bf16 %v11425_v41  ;;  %v4129_v28 = vpack.c.bf16 %v4096_v54, %v4096_v54 }
 0x1bc   : > { %v3393_v60 = vsel %vm3365_vm3, %v3358_v30, %v3096_v9  ;;  %v3958_v9 = vmul.f32 %v13939_v43, %v17989_v44  ;;  %v3954_v13 = vmul.f32 %v13742_v12, %v17975_v62  ;;  %v3955_v35 = vmul.f32 %v13855_v32, %v17976_v15 }
 0x1bd   : > { %v3517_v19 = vshrl.u32 %v3393_v60, 16  ;;  %v3520_v2 = vshll.u32 %v3393_v60, 16  ;;  %v1470_v60 = vpack.c.bf16 %v1437_v17, %v1437_v17  ;;  %v14093_v14 = vunpack.c.l.b16 %v1469_v5 }
 0x1be   : > { %v2317_v45 = vpop.permute.xlu1 %2316  ;;  %v3991_v17 = vpack.c.bf16 %v3958_v9, %v3958_v9  ;;  %v4097_v9 = vmul.f32 %v14083_v1, %v17984_v6 }
 0x1bf   : > { %v3519_v30 = vrot.slane %v3517_v19, 3  ;;  %v3522_v39 = vrot.slane %v3520_v2, 4  ;;  %v3148_v19 = vsel %vm3103_vm8, %v2061_v27, %v2317_v45  ;;  %v11114_v45 = vld [vmem:[%s17495_s3 + $0x28] sm:$0xff] }
 0x1c0   : > { %v14081_v24 = vpop.permute.xlu2 %3097  ;;  %v3185_v5 = vsel %vm3155_vm10, %v3148_v19, %v13994_v7  ;;  %6541 = vmatpush.bf16.msra.mxu1 %v11114_v45  ;;  %11444 = vmatpush.bf16.msra.mxu2 %v11114_v45  ;;  %v14114_v7 = vunpack.c.l.b16 %v1470_v60  ;;  %v3814_v19 = vld [vmem:[#allocation2] sm:$0x8]  ;;  %v4130_v60 = vpack.c.bf16 %v4097_v9, %v4097_v9 }
 0x1c1   : > { %v14088_v25 = vor.u32 %v3522_v39, %v3519_v30  ;;  %v3668_v2 = vpop.f32.mrf.mxu0 }
 0x1c2   : > { %v11097_v21 = vld [vmem:[#allocation2 + $0x34] sm:$0xff]  ;;  %v3669_v34 = vadd.f32 %v13978_v50, %v3668_v2  ;;  %v5590_v2 = vrot.slane %v5588_v40, 3  ;;  %v5586_v40 = vor.u32 %v14085_v56, %v14079_v8  ;;  %v17993_v56 = vld [vmem:[#allocation16_spill] sm:$0xff] }
 0x1c3   : > { %v2585_v55 = vpop.permute.xlu0 %2584  ;;  %v3524_v30 = vsel %vm3413_vm6, %v13971_v26, %v14088_v25  ;;  %v4511_v39 = vshrl.u32 %v11097_v21, 16  ;;  %v4514_v27 = vshll.u32 %v11097_v21, 16 }
 0x1c4   : > { %v3730_v54 = vmax.f32 %v3669_v34, 0.0  ;;  %10395 = vmatmul.msk.bf16.gmra.mxu0 %vm17990_vm9, %v3524_v30  ;;  %v3220_v26 = vsel %vm3190_vm11, %v3185_v5, %v2585_v55  ;;  %v5593_v34 = vrot.slane %v5591_v52, 4  ;;  %v4922_v30 = vunpack.c.l.b16 %v4129_v28  ;;  %6542 = vmatpush.bf16.msra.mxu1 %v11113_v48  ;;  %vm18021_vm9 = vmmov %vm17912_vm5 }
 0x1c5   : > { %v4513_v42 = vrot.slane %v4511_v39, 4  ;;  %v4516_v37 = vrot.slane %v4514_v27, 5  ;;  %v14120_v55 = vunpack.c.l.b16 %v3991_v17  ;;  %v3987_v39 = vpack.c.bf16 %v3954_v13, %v3954_v13  ;;  %11445 = vmatpush.bf16.msra.mxu2 %v11113_v48  ;;  %v11112_v48 = vld [vmem:[%s17495_s3 + $0x18] sm:$0xff] }
 0x1c6   : > { %v2633_v21 = vpop.permute.xlu1 %2632  ;;  %v3762_v29 = vpack.c.bf16 %v3730_v54, %v3730_v54  ;;  %v3988_v27 = vpack.c.bf16 %v3955_v35, %v3955_v35  ;;  %v14126_v52 = vunpack.c.h.bf16 %v11425_v41  ;;  %v17991_v54 = vld [vmem:[#allocation49_spill] sm:$0xff]  ;;  %v14140_v41 = vor.u32 %v5593_v34, %v5590_v2 }
 0x1c7   : > { %v14118_v59 = vor.u32 %v4516_v37, %v4513_v42  ;;  %v3255_v5 = vsel %vm3225_vm12, %v3220_v26, %v2633_v21  ;;  %v3959_v28 = vmul.f32 %v14083_v1, %v17991_v54  ;;  %v3847_v42 = vunpack.c.l.bf16 %v3814_v19 }
 0x1c8   : > { %3794 = vst.msk [vmem:[#allocation2 + $0x3c] sm:$0xf] %vm1164_vm14, %v3762_v29  ;;  %v14124_v45 = vpop.permute.xlu2 %2586  ;;  %v17994_v29 = vunpack.c.l.bf16 %v13707_v18  ;;  %v4923_v13 = vunpack.c.l.b16 %v4130_v60  ;;  %v3290_v18 = vsel %vm3260_vm13, %v3255_v5, %v14047_v22  ;;  %v14159_v2 = vunpack.c.l.b16 %v3987_v39  ;;  %v17997_v22 = vld [vmem:[#allocation14_spill] sm:$0xff]  ;;  %6543 = vmatpush.bf16.msra.mxu1 %v11112_v48 }
 0x1c9   : > { %v3670_v38 = vpop.f32.mrf.mxu0  ;;  %v14133_v37 = vsel %vm2144_vm0, %v13992_v23, %v14118_v59  ;;  %v3992_v35 = vpack.c.bf16 %v3959_v28, %v3959_v28  ;;  %v17995_v23 = vpack.c.b16 %v14054_v49, %v14052_v36  ;;  %v14161_v21 = vunpack.c.l.b16 %v3988_v27  ;;  %v11111_v28 = vld [vmem:[%s17495_s3 + $0x10] sm:$0xff]  ;;  %11446 = vmatpush.bf16.msra.mxu2 %v11112_v48 }
 0x1ca   : > { %17992 = vst [vmem:[#allocation48_spill] sm:$0xff] %v14133_v37  ;;  %v14138_v8 = vmul.f32 %v17994_v29, %v17993_v56  ;;  %v3671_v17 = vadd.f32 %v13978_v50, %v3670_v38  ;;  %4612 = vrot.lane.b32.xlu2 %v14133_v37, %s11591_s21  ;;  %v14157_v38 = vsel %vm3413_vm6, %v5586_v40, %v14140_v41 }
 0x1cb   : > { %v14148_v9 = vrot.slane %v17995_v23, 5  ;;  %v2900_v26 = vpop.permute.xlu0 %2899  ;;  %17996 = vst [vmem:[#allocation49_spill] sm:$0xff] %v14157_v38  ;;  %v4951_v49 = vpack.c.b16 %v4923_v13, %v4922_v30  ;;  %v14164_v19 = vunpack.c.l.b16 %v3992_v35  ;;  %v3880_v5 = vmul.f32 %v3847_v42, %v17997_v22  ;;  %v11109_v38 = vld [vmem:[%s17495_s3] sm:$0xff] }
 0x1cc   : > { %v3731_v34 = vmax.f32 %v3671_v17, 0.0  ;;  %v3325_v36 = vsel %vm3295_vm15, %v3290_v18, %v2900_v26  ;;  %v2062_v13 = vpack.c.b16 %v14114_v7, %v14093_v14  ;;  %v14190_v23 = vmul.f32 %v13939_v43, %v17975_v62  ;;  %6544 = vmatpush.bf16.msra.mxu1 %v11111_v28 }
 0x1cd   : > { %v14173_v40 = vsel %vm2405_vm7, %v14036_v10, %v14148_v9  ;;  %v14178_v29 = vrot.slane %v4951_v49, 5  ;;  %v4705_v42 = vpack.c.b16 %v14164_v19, %v14120_v55  ;;  %v4098_v10 = vmul.f32 %v14126_v52, %v17989_v44  ;;  %11447 = vmatpush.bf16.msra.mxu2 %v11111_v28 }
 0x1ce   : > { %v2948_v60 = vpop.permute.xlu1 %2947  ;;  %v3763_v30 = vpack.c.bf16 %v3731_v34, %v3731_v34  ;;  %v14203_v7 = vmul.f32 %v13633_v20, %v17949_v47  ;;  %v3913_v49 = vpack.c.bf16 %v3880_v5, %v3880_v5  ;;  %v3914_v19 = vpack.c.bf16 %v14138_v8, %v14138_v8  ;;  %v18000_v47 = vld [vmem:[#allocation46_spill] sm:$0xff] }
 0x1cf   : > { %v3360_v27 = vsel %vm3330_vm1, %v3325_v36, %v2948_v60  ;;  %v11426_v35 = vld [vmem:[#allocation2 + $0x38] sm:$0xff]   ;;  %v14208_v62 = vsel %vm2405_vm7, %v14001_v58, %v14178_v29  ;;  %v11110_v60 = vld [vmem:[%s17495_s3 + $0x8] sm:$0xff]  ;;  %v4267_v5 = vpack.c.bf16 %v14190_v23, %v14190_v23 }
 0x1d0   : > { %v3395_v17 = vsel %vm3365_vm3, %v3360_v27, %v14081_v24  ;;  %3795 = vst.msk [vmem:[#allocation2 + $0x40] sm:$0xf] %vm1164_vm14, %v3763_v30  ;;  %v14193_v48 = vpop.permute.xlu2 %2901  ;;  %v14195_v55 = vunpack.c.l.bf16 %v11426_v35  ;;  %v14197_v24 = vunpack.c.h.bf16 %v11426_v35  ;;  %v17999_v27 = vld [vmem:[#allocation45_spill] sm:$0xff]  ;;  %6545 = vmatpush.bf16.msra.mxu1 %v11110_v60 }
 0x1d1   : > { %v3525_v26 = vshrl.u32 %v3395_v17, 16  ;;  %v3528_v18 = vshll.u32 %v3395_v17, 16  ;;  %17998 = vst [vmem:[#allocation108_spill] sm:$0xff] %v14208_v62  ;;  %11448 = vmatpush.bf16.msra.mxu2 %v11110_v60  ;;  %v5632_v60 = vshll.u32 %v14173_v40, 16 }
 0x1d2   : > { %v4170_v20 = vmul.f32 %v14195_v55, %v17999_v27  ;;  %v4171_v17 = vmul.f32 %v14197_v24, %v18000_v47  ;;  %v4099_v58 = vmul.f32 %v14195_v55, %v17991_v54 }
 0x1d3   : > { %v3527_v34 = vrot.slane %v3525_v26, 3  ;;  %v3530_v36 = vrot.slane %v3528_v18, 4  ;;  %v2319_v30 = vpop.permute.xlu0 %2318  ;;  %v4131_v26 = vpack.c.bf16 %v4098_v10, %v4098_v10  ;;  %v18001_v18 = vpack.c.b16 %v14034_v33, %v14031_v31 }
 0x1d4   : > { %v3151_v8 = vsel %vm3103_vm8, %v2062_v13, %v2319_v30  ;;  %v4203_v23 = vpack.c.bf16 %v4170_v20, %v4170_v20  ;;  %v14238_v10 = vunpack.c.l.b16 %v3913_v49  ;;  %v14240_v31 = vunpack.c.l.b16 %v3914_v19  ;;  %6546 = vmatpush.bf16.msra.mxu1 %v11109_v38 }
 0x1d5   : > { %v14223_v28 = vor.u32 %v3530_v36, %v3527_v34  ;;  %v3673_v35 = vpop.f32.mrf.mxu0  ;;  %v14229_v14 = vrot.slane %v18001_v18, 5  ;;  %v4204_v34 = vpack.c.bf16 %v4171_v17, %v4171_v17  ;;  %v4132_v36 = vpack.c.bf16 %v4099_v58, %v4099_v58  ;;  %11449 = vmatpush.bf16.msra.mxu2 %v11109_v38 }
 0x1d6   : > { %v3674_v39 = vadd.f32 %v13978_v50, %v3673_v35  ;;  %v2470_v37 = vpop.permute.xlu1 %2469  ;;  %v4235_v33 = vmul.f32 %v14083_v1, %v17976_v15  ;;  %v14246_v17 = vunpack.c.l.b16 %v4203_v23  ;;  %v5629_v19 = vshrl.u32 %v14173_v40, 16 }
 0x1d7   : > { %v3532_v13 = vsel %vm3413_vm6, %v14088_v25, %v14223_v28  ;;  %v3187_v35 = vsel %vm3155_vm10, %v3151_v8, %v2470_v37  ;;  %v11098_v20 = vld [vmem:[#allocation2 + $0x3c] sm:$0xff]  ;;  %v14248_v58 = vunpack.c.l.b16 %v4204_v34  ;;  %v4925_v18 = vunpack.c.l.b16 %v4132_v36  ;;  %v18002_v25 = vld [vmem:[#allocation53_spill] sm:$0xff] }
 0x1d8   : > { %v3732_v30 = vmax.f32 %v3674_v39, 0.0  ;;  %10396 = vmatmul.msk.bf16.gmra.mxu0 %vm17912_vm5, %v3532_v13  ;;  %v4032_v49 = vmul.f32 %v14195_v55, %v18002_v25  ;;  %v4520_v15 = vshrl.u32 %v11098_v20, 16  ;;  %v4523_v39 = vshll.u32 %v11098_v20, 16  ;;  %v4601_v23 = vpop.permute.xlu2 %4600  ;;  %v18003_v20 = vld [vmem:[#allocation54_spill] sm:$0xff] }
 0x1d9   : > { %v4924_v37 = vunpack.c.l.b16 %v4131_v26  ;;  %v3222_v8 = vsel %vm3190_vm11, %v3187_v35, %v14124_v45  ;;  %v14258_v36 = vrot.slane %v4705_v42, 5  ;;  %v4268_v13 = vpack.c.bf16 %v4235_v33, %v4235_v33 }
 0x1da   : > { %v3764_v62 = vpack.c.bf16 %v3732_v30, %v3732_v30  ;;  %v4522_v40 = vrot.slane %v4520_v15, 4  ;;  %v4525_v30 = vrot.slane %v4523_v39, 5  ;;  %v4033_v26 = vmul.f32 %v14197_v24, %v18003_v20  ;;  %v18004_v15 = vld [vmem:[#allocation96_spill] sm:$0xff] }
 0x1db   : > { %v2635_v56 = vpop.permute.xlu0 %2634  ;;  %v4952_v22 = vpack.c.b16 %v4925_v18, %v4924_v37  ;;  %v4065_v35 = vpack.c.bf16 %v4032_v49, %v4032_v49  ;;  %v5631_v53 = vrot.slane %v5629_v19, 3  ;;  %v5634_v16 = vrot.slane %v5632_v60, 4 }
 0x1dc   : > { %3796 = vst.msk [vmem:[#allocation2 + $0x44] sm:$0xf] %vm1164_vm14, %v3764_v62  ;;  %v3257_v0 = vsel %vm3225_vm12, %v3222_v8, %v2635_v56  ;;  %v14265_v38 = vor.u32 %v4525_v30, %v4522_v40  ;;  %v4066_v62 = vpack.c.bf16 %v4033_v26, %v4033_v26  ;;  %v3885_v18 = vmul.f32 %v18004_v15, %v17954_v51  ;;  %v18023_v15 = vld [vmem:[#allocation38_spill] sm:$0xff] }
 0x1dd   : > { %v3675_v45 = vpop.f32.mrf.mxu0  ;;  %v14267_v33 = vrot.slane %v4952_v22, 5  ;;  %v14271_v39 = vunpack.c.l.b16 %v4065_v35  ;;  %v14276_v56 = vsel %vm2405_vm7, %v14229_v14, %v14258_v36  ;;  %v14278_v49 = vunpack.c.l.b16 %v4267_v5 }
 0x1de   : > { %v3676_v42 = vadd.f32 %v13978_v50, %v3675_v45  ;;  %v2785_v34 = vpop.permute.xlu1 %2784  ;;  %18006 = vst [vmem:[#allocation53_spill] sm:$0xff] %v14276_v56  ;;  %v4360_v60 = vpack.c.b16 %v14240_v31, %v14238_v10  ;;  %v14285_v22 = vsel %vm2144_vm0, %v14118_v59, %v14265_v38  ;;  %v14295_v5 = vunpack.c.l.b16 %v4066_v62 }
 0x1df   : > { %18005 = vst [vmem:[#allocation45_spill] sm:$0xff] %v14271_v39  ;;  %v14290_v51 = vsel %vm2405_vm7, %v14178_v29, %v14267_v33  ;;  %v3292_v37 = vsel %vm3260_vm13, %v3257_v0, %v2785_v34  ;;  %4614 = vrot.lane.b32.xlu0 %v14285_v22, %s11591_s21  ;;  %v14297_v8 = vor.u32 %v5634_v16, %v5631_v53  ;;  %v14299_v10 = vunpack.c.l.b16 %v4268_v13 }
 0x1e0   : > { %v3733_v19 = vmax.f32 %v3676_v42, 0.0  ;;  %18007 = vst [vmem:[#allocation54_spill] sm:$0xff] %v14285_v22  ;;  %v3916_v59 = vpack.c.bf16 %v14077_v57, %v14077_v57  ;;  %v3917_v40 = vpack.c.bf16 %v14203_v7, %v14203_v7  ;;  %v18010_v29 = vpack.c.b16 %v14161_v21, %v14159_v2  ;;  %v18014_v42 = vld [vmem:[#allocation27_spill] sm:$0xff] }
 0x1e1   : > { %18008 = vst [vmem:[#allocation109_spill] sm:$0xff] %v14290_v51  ;;  %v3918_v34 = vpack.c.bf16 %v3885_v18, %v3885_v18  ;;  %v14313_v53 = vsel %vm3413_vm6, %v14140_v41, %v14297_v8  ;;  %v3327_v2 = vsel %vm3295_vm15, %v3292_v37, %v14193_v48  ;;  %v5254_v41 = vsel %vm3365_vm3, %v4360_v60, %v4601_v23 }
 0x1e2   : > { %18009 = vst [vmem:[#allocation110_spill] sm:$0xff] %v14295_v5  ;;  %v3765_v31 = vpack.c.bf16 %v3733_v19, %v3733_v19  ;;  %v4722_v0 = vrot.slane %v18010_v29, 5  ;;  %v18015_v62 = vpack.c.b16 %v13779_v46, %v18014_v42  ;;  %v4331_v60 = vunpack.c.l.b16 %v3917_v40 }
 0x1e3   : > { %v11427_v30 = vld [vmem:[#allocation2 + $0x40] sm:$0xff]   ;;  %18011 = vst [vmem:[#allocation111_spill] sm:$0xff] %v14313_v53  ;;  %v2950_v57 = vpop.permute.xlu0 %2949  ;;  %v4332_v37 = vunpack.c.l.b16 %v3918_v34  ;;  %v5519_v29 = vshrl.u32 %v5254_v41, 16 }
 0x1e4   : > { %3797 = vst.msk [vmem:[#allocation2 + $0x48] sm:$0xf] %vm1164_vm14, %v3765_v31  ;;  %v14322_v21 = vsel %vm2405_vm7, %v4722_v0, %v14229_v14  ;;  %v14326_v7 = vsel %vm2405_vm7, %v13893_v63, %v4722_v0  ;;  %v3362_v13 = vsel %vm3330_vm1, %v3327_v2, %v2950_v57  ;;  %v14330_v45 = vpop.permute.xlu2 %4606  ;;  %v18016_v14 = vpack.c.bf16 %v14071_v4, %v14071_v4  ;;  %v18019_v34 = vld [vmem:[#allocation50_spill] sm:$0xff] }
 0x1e5   : > { %18012 = vst [vmem:[#allocation112_spill] sm:$0xff] %v14322_v21  ;;  %v14337_v48 = vsel %vm3365_vm3, %v18015_v62, %v14330_v45  ;;  %v4330_v63 = vunpack.c.l.b16 %v3916_v59  ;;  %v14342_v19 = vunpack.c.l.bf16 %v11427_v30  ;;  %v14345_v31 = vunpack.c.h.bf16 %v11427_v30  ;;  %v18018_v59 = vld [vmem:[#allocation22_spill] sm:$0xff] }
 0x1e6   : > { %18013 = vst [vmem:[#allocation113_spill] sm:$0xff] %v14326_v7  ;;  %v3100_v35 = vpop.permute.xlu1 %3099  ;;  %v4329_v18 = vunpack.c.l.b16 %v18016_v14  ;;  %v5522_v0 = vshll.u32 %v5254_v41, 16  ;;  %v18017_v14 = vld [vmem:[#allocation37_spill] sm:$0xff]  ;;  %v4362_v16 = vpack.c.b16 %v4332_v37, %v4331_v60  ;;  %v4100_v30 = vmul.f32 %v14197_v24, %v18019_v34 }
 0x1e7   : > { %v3397_v23 = vsel %vm3365_vm3, %v3362_v13, %v3100_v35  ;;  %v4172_v4 = vmul.f32 %v14342_v19, %v18002_v25  ;;  %v14351_v26 = vmul.f32 %v18018_v59, %v18017_v14  ;;  %v4173_v40 = vmul.f32 %v14345_v31, %v18003_v20 }
 0x1e8   : > { %v3533_v57 = vshrl.u32 %v3397_v23, 16  ;;  %v3536_v46 = vshll.u32 %v3397_v23, 16  ;;  %v4361_v62 = vpack.c.b16 %v4330_v63, %v4329_v18  ;;  %v5521_v41 = vrot.slane %v5519_v29, 3 }
 0x1e9   : > { %v5524_v35 = vrot.slane %v5522_v0, 4  ;;  %v4206_v7 = vpack.c.bf16 %v4173_v40, %v4173_v40 }
 0x1ea   : > { %v3535_v2 = vrot.slane %v3533_v57, 3  ;;  %v3538_v42 = vrot.slane %v3536_v46, 4  ;;  %v4205_v57 = vpack.c.bf16 %v4172_v4, %v4172_v4  ;;  %v18022_v4 = vld [vmem:[#allocation51_spill] sm:$0xff] }
 0x1eb   : > { %v11099_v13 = vld [vmem:[#allocation2 + $0x44] sm:$0xff]  ;;  %v4603_v63 = vpop.permute.xlu0 %4602 }
 0x1ec   : > { %v14357_v23 = vor.u32 %v3538_v42, %v3535_v2  ;;  %v3678_v18 = vpop.f32.mrf.mxu0  ;;  %v5257_v14 = vsel %vm3365_vm3, %v4361_v62, %v4603_v63  ;;  %v4529_v59 = vshrl.u32 %v11099_v13, 16  ;;  %v4532_v60 = vshll.u32 %v11099_v13, 16 }
 0x1ed   : > { %v3679_v46 = vadd.f32 %v13978_v50, %v3678_v18  ;;  %v5526_v37 = vshrl.u32 %v5257_v14, 16  ;;  %v5529_v22 = vshll.u32 %v5257_v14, 16  ;;  %v4101_v18 = vmul.f32 %v14342_v19, %v18022_v4 }
 0x1ee   : > { %18020 = vst [vmem:[#allocation27_spill] sm:$0xff] %v14357_v23  ;;  %v3540_v56 = vsel %vm3413_vm6, %v14223_v28, %v14357_v23  ;;  %v4605_v0 = vpop.permute.xlu1 %4604  ;;  %v4531_v2 = vrot.slane %v4529_v59, 4  ;;  %v4534_v42 = vrot.slane %v4532_v60, 5  ;;  %v5525_v63 = vor.u32 %v5524_v35, %v5521_v41  ;;  %v18026_v59 = vld [vmem:[#allocation55_spill] sm:$0xff] }
 0x1ef   : > { %v3734_v29 = vmax.f32 %v3679_v46, 0.0  ;;  %10397 = vmatmul.msk.bf16.gmra.mxu0 %vm18021_vm9, %v3540_v56  ;;  %v5528_v21 = vrot.slane %v5526_v37, 3  ;;  %v5531_v62 = vrot.slane %v5529_v22, 4  ;;  %v4133_v13 = vpack.c.bf16 %v4100_v30, %v4100_v30  ;;  %v18028_v22 = vld [vmem:[#allocation58_spill] sm:$0xff]  ;;  %v18029_v41 = vld [vmem:[#allocation59_spill] sm:$0xff] }
 0x1f0   : > { %v3887_v14 = vmul.f32 %v13742_v12, %v18023_v15  ;;  %v14369_v39 = vor.u32 %v4534_v42, %v4531_v2  ;;  %v14371_v28 = vunpack.c.l.b16 %v4205_v57  ;;  %v5260_v40 = vsel %vm3365_vm3, %v4362_v16, %v4605_v0 }
 0x1f1   : > { %v3766_v53 = vpack.c.bf16 %v3734_v29, %v3734_v29  ;;  %v14374_v56 = vor.u32 %v5531_v62, %v5528_v21  ;;  %v14376_v46 = vunpack.c.l.b16 %v4206_v7  ;;  %v3962_v60 = vmul.f32 %v14197_v24, %v18026_v59  ;;  %v18031_v62 = vld [vmem:[#allocation56_spill] sm:$0xff] }
 0x1f2   : > { %18024 = vst [vmem:[#allocation37_spill] sm:$0xff] %v14371_v28  ;;  %v14384_v12 = vsel %vm2144_vm0, %v14265_v38, %v14369_v39  ;;  %v4134_v15 = vpack.c.bf16 %v4101_v18, %v4101_v18  ;;  %v4034_v30 = vmul.f32 %v14342_v19, %v18028_v22  ;;  %v4035_v16 = vmul.f32 %v14345_v31, %v18029_v41 }
 0x1f3   : > { %18025 = vst [vmem:[#allocation22_spill] sm:$0xff] %v14376_v46  ;;  %4616 = vrot.lane.b32.xlu1 %v14384_v12, %s11591_s21  ;;  %v5533_v7 = vsel %vm3413_vm6, %v5525_v63, %v14374_v56  ;;  %v4926_v35 = vunpack.c.l.b16 %v4133_v13  ;;  %v18030_v38 = vpack.c.b16 %v14299_v10, %v14278_v49  ;;  %v5596_v42 = vshrl.u32 %v5260_v40, 16 }
 0x1f4   : > { %3798 = vst.msk [vmem:[#allocation2 + $0x4c] sm:$0xf] %vm1164_vm14, %v3766_v53  ;;  %v3680_v21 = vpop.f32.mrf.mxu0  ;;  %6547 = vmatmul.bf16.vlgmr.msra.gmra.mxu1 %v5533_v7  ;;  %v4927_v29 = vunpack.c.l.b16 %v4134_v15  ;;  %v4067_v0 = vpack.c.bf16 %v4034_v30, %v4034_v30  ;;  %v4068_v2 = vpack.c.bf16 %v4035_v16, %v4035_v16  ;;  %v5599_v18 = vshll.u32 %v5260_v40, 16 }
 0x1f5   : > { %18027 = vst [vmem:[#allocation50_spill] sm:$0xff] %v14384_v12  ;;  %v14399_v57 = vrot.slane %v18030_v38, 5  ;;  %v3681_v37 = vadd.f32 %v13978_v50, %v3680_v21  ;;  %v3963_v63 = vmul.f32 %v14342_v19, %v18031_v62  ;;  %v3995_v12 = vpack.c.bf16 %v3962_v60, %v3962_v60 }
 0x1f6   : > { %v4953_v53 = vpack.c.b16 %v4927_v29, %v4926_v35  ;;  %v14404_v13 = vunpack.c.l.b16 %v4067_v0  ;;  %v14406_v5 = vunpack.c.l.b16 %v4068_v2  ;;  %v3919_v49 = vpack.c.bf16 %v14351_v26, %v14351_v26 }
 0x1f7   : > { %v3735_v23 = vmax.f32 %v3681_v37, 0.0  ;;  %v3920_v10 = vpack.c.bf16 %v3887_v14, %v3887_v14  ;;  %v3996_v21 = vpack.c.bf16 %v3963_v63, %v3963_v63  ;;  %v5225_v15 = vsel %vm2405_vm7, %v14148_v9, %v14399_v57  ;;  %v18035_v63 = vld [vmem:[#allocation41_spill] sm:$0xff] }
 0x1f8   : > { %18032 = vst [vmem:[#allocation51_spill] sm:$0xff] %v14404_v13  ;;  %v4975_v30 = vrot.slane %v4953_v53, 5  ;;  %v5598_v16 = vrot.slane %v5596_v42, 3  ;;  %v4102_v35 = vmul.f32 %v14345_v31, %v18026_v59  ;;  %v14417_v38 = vunpack.c.l.b16 %v3995_v12  ;;  %v18036_v13 = vld [vmem:[#allocation63_spill] sm:$0xff] }
 0x1f9   : > { %18033 = vst [vmem:[#allocation38_spill] sm:$0xff] %v14406_v5  ;;  %v3767_v40 = vpack.c.bf16 %v3735_v23, %v3735_v23  ;;  %v14419_v37 = vunpack.c.l.b16 %v3996_v21  ;;  %v5601_v26 = vrot.slane %v5599_v18, 4  ;;  %v4333_v53 = vunpack.c.l.b16 %v3919_v49 }
 0x1fa   : > { %v14428_v23 = vsel %vm2405_vm7, %v14267_v33, %v4975_v30  ;;  %v4334_v29 = vunpack.c.l.b16 %v3920_v10  ;;  %v5670_v42 = vshrl.u32 %v5225_v15, 16  ;;  %v5673_v18 = vshll.u32 %v5225_v15, 16 }
 0x1fb   : > { %v11428_v7 = vld [vmem:[#allocation2 + $0x48] sm:$0xff]   ;;  %3799 = vst.msk [vmem:[#allocation2 + $0x50] sm:$0xf] %vm1164_vm14, %v3767_v40  ;;  %v14438_v21 = vmul.f32 %v13855_v32, %v18035_v63  ;;  %v4135_v49 = vpack.c.bf16 %v4102_v35, %v4102_v35  ;;  %v14442_v10 = vor.u32 %v5601_v26, %v5598_v16  ;;  %v3964_v5 = vmul.f32 %v14345_v31, %v18036_v13  ;;  %v18038_v16 = vld [vmem:[#allocation42_spill] sm:$0xff] }
 0x1fc   : > { %v14422_v14 = vunpack.c.l.bf16 %v11428_v7  ;;  %v14424_v9 = vunpack.c.h.bf16 %v11428_v7  ;;  %18034 = vst [vmem:[#allocation55_spill] sm:$0xff] %v14428_v23  ;;  %v4363_v60 = vpack.c.b16 %v4334_v29, %v4333_v53  ;;  %v4236_v15 = vmul.f32 %v14126_v52, %v17981_v61 }
 0x1fd   : > { %v5672_v23 = vrot.slane %v5670_v42, 3  ;;  %v5675_v28 = vrot.slane %v5673_v18, 4  ;;  %v3889_v26 = vmul.f32 %v13857_v3, %v18038_v16  ;;  %v3921_v53 = vpack.c.bf16 %v14438_v21, %v14438_v21 }
 0x1fe   : > { %v4174_v12 = vmul.f32 %v14422_v14, %v18028_v22  ;;  %v4175_v2 = vmul.f32 %v14424_v9, %v18029_v41  ;;  %v4103_v33 = vmul.f32 %v14422_v14, %v18031_v62  ;;  %v4928_v29 = vunpack.c.l.b16 %v4135_v49 }
 0x1ff   : > { %v5603_v42 = vsel %vm3413_vm6, %v14374_v56, %v14442_v10  ;;  %v14464_v21 = vor.u32 %v5675_v28, %v5672_v23  ;;  %v3960_v56 = vmul.f32 %v14126_v52, %v18019_v34 }
 0x200   : > { %v4207_v40 = vpack.c.bf16 %v4174_v12, %v4174_v12  ;;  %v4208_v7 = vpack.c.bf16 %v4175_v2, %v4175_v2  ;;  %v4136_v0 = vpack.c.bf16 %v4103_v33, %v4103_v33  ;;  %v5263_v2 = vsel %vm3365_vm3, %v4363_v60, %v14330_v45 }
 0x201   : > { %v3683_v46 = vpop.f32.mrf.mxu0  ;;  %v4237_v45 = vmul.f32 %v14195_v55, %v17984_v6  ;;  %v4269_v60 = vpack.c.bf16 %v4236_v15, %v4236_v15  ;;  %v3961_v15 = vmul.f32 %v14195_v55, %v18022_v4 }
 0x202   : > { %v14448_v51 = vunpack.c.l.b16 %v4207_v40  ;;  %v14450_v32 = vunpack.c.l.b16 %v4208_v7  ;;  %v11100_v35 = vld [vmem:[#allocation2 + $0x4c] sm:$0xff]  ;;  %v4929_v12 = vunpack.c.l.b16 %v4136_v0  ;;  %v3684_v61 = vadd.f32 %v13978_v50, %v3683_v46 }
 0x203   : > { %v4538_v33 = vshrl.u32 %v11100_v35, 16  ;;  %v4541_v40 = vshll.u32 %v11100_v35, 16  ;;  %v3997_v7 = vpack.c.bf16 %v3964_v5, %v3964_v5  ;;  %v14477_v5 = vsel %vm3413_vm6, %v14297_v8, %v14464_v21 }
 0x204   : > { %18037 = vst [vmem:[#allocation58_spill] sm:$0xff] %v14448_v51  ;;  %v4954_v3 = vpack.c.b16 %v4929_v12, %v4928_v29  ;;  %v3736_v13 = vmax.f32 %v3684_v61, 0.0  ;;  %6552 = vmatmul.bf16.gmra.mxu1 %v5603_v42  ;;  %v18040_v51 = vld [vmem:[#allocation64_spill] sm:$0xff]  ;;  %v4270_v28 = vpack.c.bf16 %v4237_v45, %v4237_v45  ;;  %v3993_v29 = vpack.c.bf16 %v3960_v56, %v3960_v56 }
 0x205   : > { %v4540_v46 = vrot.slane %v4538_v33, 4  ;;  %v4543_v0 = vrot.slane %v4541_v40, 5  ;;  %v3965_v35 = vmul.f32 %v14422_v14, %v18040_v51  ;;  %18041 = vst [vmem:[#allocation56_spill] sm:$0xff] %v14477_v5  ;;  %v5177_v61 = vunpack.c.l.b16 %v4269_v60 }
 0x206   : > { %v14468_v49 = vrot.slane %v4954_v3, 5  ;;  %v3768_v18 = vpack.c.bf16 %v3736_v13, %v3736_v13  ;;  %v3922_v13 = vpack.c.bf16 %v3889_v26, %v3889_v26  ;;  %v5178_v42 = vunpack.c.l.b16 %v4270_v28 }
 0x207   : > { %v14479_v23 = vor.u32 %v4543_v0, %v4540_v46  ;;  %v3998_v12 = vpack.c.bf16 %v3965_v35, %v3965_v35  ;;  %v5637_v33 = vshrl.u32 %v5263_v2, 16  ;;  %v5640_v8 = vshll.u32 %v5263_v2, 16 }
 0x208   : > { %18039 = vst [vmem:[#allocation59_spill] sm:$0xff] %v14468_v49  ;;  %v14483_v6 = vsel %vm2405_vm7, %v4975_v30, %v14468_v49  ;;  %v3994_v30 = vpack.c.bf16 %v3961_v15, %v3961_v15  ;;  %v4683_v46 = vunpack.c.l.b16 %v3997_v7  ;;  %v5206_v26 = vpack.c.b16 %v5178_v42, %v5177_v61 }
 0x209   : > { %18042 = vst [vmem:[#allocation41_spill] sm:$0xff] %v14483_v6  ;;  %v3685_v40 = vpop.f32.mrf.mxu0  ;;  %v14491_v3 = vsel %vm2144_vm0, %v14369_v39, %v14479_v23  ;;  %v4679_v0 = vunpack.c.l.b16 %v3993_v29  ;;  %v4335_v35 = vunpack.c.l.b16 %v3921_v53  ;;  %v5639_v5 = vrot.slane %v5637_v33, 3 }
 0x20a   : > { %3800 = vst.msk [vmem:[#allocation2 + $0x54] sm:$0xf] %vm1164_vm14, %v3768_v18  ;;  %v3686_v45 = vadd.f32 %v13978_v50, %v3685_v40  ;;  %4618 = vrot.lane.b32.xlu2 %v14491_v3, %s11591_s21  ;;  %v4684_v18 = vunpack.c.l.b16 %v3998_v12  ;;  %v4680_v60 = vunpack.c.l.b16 %v3994_v30  ;;  %v14496_v28 = vrot.slane %v5206_v26, 5 }
 0x20b   : > { %18043 = vst [vmem:[#allocation42_spill] sm:$0xff] %v14491_v3  ;;  %v5642_v6 = vrot.slane %v5640_v8, 4  ;;  %v4336_v39 = vunpack.c.l.b16 %v3922_v13  ;;  %v18044_v40 = vpack.c.b16 %v14419_v37, %v14417_v38  ;;  %v4168_v33 = vmul.f32 %v14083_v1, %v18035_v63  ;;  %v18048_v63 = vld [vmem:[#allocation100_spill] sm:$0xff] }
 0x20c   : > { %v3737_v56 = vmax.f32 %v3686_v45, 0.0  ;;  %v4708_v2 = vpack.c.b16 %v4684_v18, %v4683_v46  ;;  %v4706_v49 = vpack.c.b16 %v4680_v60, %v4679_v0  ;;  %v5227_v29 = vsel %vm2405_vm7, %v14399_v57, %v14496_v28  ;;  %v18047_v46 = vld [vmem:[#allocation60_spill] sm:$0xff]  ;;  %v18049_v18 = vld [vmem:[#allocation99_spill] sm:$0xff]  ;;  %v18051_v0 = vld [vmem:[#allocation61_spill] sm:$0xff] }
 0x20d   : > { %v14501_v51 = vrot.slane %v18044_v40, 5  ;;  %v4364_v37 = vpack.c.b16 %v4336_v39, %v4335_v35  ;;  %v14518_v42 = vor.u32 %v5642_v6, %v5639_v5  ;;  %v4169_v8 = vmul.f32 %v14126_v52, %v18038_v16 }
 0x20e   : > { %v3769_v15 = vpack.c.bf16 %v3737_v56, %v3737_v56  ;;  %v14503_v7 = vrot.slane %v4708_v2, 5  ;;  %v4728_v12 = vrot.slane %v4706_v49, 5  ;;  %v3890_v30 = vmul.f32 %v13937_v11, %v17999_v27 }
 0x20f   : > { %v3891_v45 = vmul.f32 %v13939_v43, %v18000_v47  ;;  %v18050_v26 = vpack.c.b16 %v18048_v63, %v18049_v18  ;;  %v5644_v16 = vsel %vm3413_vm6, %v14442_v10, %v14518_v42  ;;  %v5711_v43 = vshrl.u32 %v5227_v29, 16 }
 0x210   : > { %3801 = vst.msk [vmem:[#allocation2 + $0x58] sm:$0xf] %vm1164_vm14, %v3769_v15  ;;  %v14516_v38 = vsel %vm2405_vm7, %v14501_v51, %v14503_v7  ;;  %v14524_v57 = vsel %vm2405_vm7, %v14258_v36, %v4728_v12  ;;  %v5714_v56 = vshll.u32 %v5227_v29, 16  ;;  %v4201_v2 = vpack.c.bf16 %v4168_v33, %v4168_v33 }
 0x211   : > { %v11429_v53 = vld [vmem:[#allocation2 + $0x50] sm:$0xff]   ;;  %18045 = vst [vmem:[#allocation114_spill] sm:$0xff] %v14516_v38  ;;  %v4609_v49 = vpop.permute.xlu0 %4608  ;;  %v4202_v63 = vpack.c.bf16 %v4169_v8, %v4169_v8  ;;  %v3924_v18 = vpack.c.bf16 %v3891_v45, %v3891_v45  ;;  %v5713_v3 = vrot.slane %v5711_v43, 3  ;;  %v4239_v8 = vmul.f32 %v14342_v19, %v17991_v54 }
 0x212   : > { %v14509_v61 = vunpack.c.l.bf16 %v11429_v53  ;;  %v14511_v13 = vunpack.c.h.bf16 %v11429_v53  ;;  %18046 = vst [vmem:[#allocation115_spill] sm:$0xff] %v14524_v57  ;;  %v5266_v6 = vsel %vm3365_vm3, %v4364_v37, %v4609_v49  ;;  %v14539_v36 = vsel %vm3365_vm3, %v18050_v26, %v4609_v49 }
 0x213   : > { %v5678_v15 = vshrl.u32 %v5266_v6, 16  ;;  %v5681_v40 = vshll.u32 %v5266_v6, 16  ;;  %v3923_v53 = vpack.c.bf16 %v3890_v30, %v3890_v30  ;;  %v5716_v38 = vrot.slane %v5714_v56, 4  ;;  %v18053_v56 = vld [vmem:[#allocation68_spill] sm:$0xff] }
 0x214   : > { %v4176_v5 = vmul.f32 %v14509_v61, %v18047_v46  ;;  %v4177_v11 = vmul.f32 %v14511_v13, %v18051_v0  ;;  %6557 = vmatmul.bf16.gmra.mxu1 %v5644_v16  ;;  %v4238_v16 = vmul.f32 %v14197_v24, %v17989_v44  ;;  %v5072_v33 = vunpack.c.l.b16 %v4201_v2 }
 0x215   : > { %v3688_v60 = vpop.f32.mrf.mxu0  ;;  %v5683_v47 = vrot.slane %v5681_v40, 4  ;;  %v4039_v44 = vmul.f32 %v14511_v13, %v18053_v56 }
 0x216   : > { %v3689_v35 = vadd.f32 %v13978_v50, %v3688_v60  ;;  %v4209_v39 = vpack.c.bf16 %v4176_v5, %v4176_v5  ;;  %v4210_v26 = vpack.c.bf16 %v4177_v11, %v4177_v11  ;;  %v5680_v5 = vrot.slane %v5678_v15, 3  ;;  %v18052_v11 = vld [vmem:[#allocation30_spill] sm:$0xff] }
 0x217   : > { %v11101_v49 = vld [vmem:[#allocation2 + $0x54] sm:$0xff]  ;;  %v4038_v43 = vmul.f32 %v14509_v61, %v18052_v11  ;;  %v14562_v15 = vor.u32 %v5716_v38, %v5713_v3  ;;  %v4271_v40 = vpack.c.bf16 %v4238_v16, %v4238_v16 }
 0x218   : > { %v3738_v37 = vmax.f32 %v3689_v35, 0.0  ;;  %v14547_v10 = vunpack.c.l.b16 %v4209_v39  ;;  %v4547_v57 = vshrl.u32 %v11101_v49, 16  ;;  %v4550_v60 = vshll.u32 %v11101_v49, 16 }
 0x219   : > { %v14551_v6 = vunpack.c.l.b16 %v4210_v26  ;;  %v5073_v39 = vunpack.c.l.b16 %v4202_v63  ;;  %v4071_v49 = vpack.c.bf16 %v4038_v43, %v4038_v43  ;;  %v5684_v26 = vor.u32 %v5683_v47, %v5680_v5 }
 0x21a   : > { %v3770_v29 = vpack.c.bf16 %v3738_v37, %v3738_v37  ;;  %v4549_v30 = vrot.slane %v4547_v57, 4  ;;  %v4552_v45 = vrot.slane %v4550_v60, 5  ;;  %v4072_v57 = vpack.c.bf16 %v4039_v44, %v4039_v44 }
 0x21b   : > { %v14572_v63 = vsel %vm2405_vm7, %v4728_v12, %v14501_v51  ;;  %v4272_v60 = vpack.c.bf16 %v4239_v8, %v4239_v8  ;;  %v5179_v47 = vunpack.c.l.b16 %v4271_v40  ;;  %v4337_v5 = vunpack.c.l.b16 %v3923_v53  ;;  %v18058_v40 = vld [vmem:[#allocation33_spill] sm:$0xff] }
 0x21c   : > { %3802 = vst.msk [vmem:[#allocation2 + $0x5c] sm:$0xf] %vm1164_vm14, %v3770_v29  ;;  %v4553_v37 = vor.u32 %v4552_v45, %v4549_v30  ;;  %v14568_v29 = vsel %vm3413_vm6, %v14464_v21, %v14562_v15  ;;  %v14580_v38 = vunpack.c.l.b16 %v4072_v57  ;;  %v4338_v30 = vunpack.c.l.b16 %v3924_v18 }
 0x21d   : > { %v3690_v35 = vpop.f32.mrf.mxu0  ;;  %18054 = vst [vmem:[#allocation60_spill] sm:$0xff] %v14568_v29  ;;  %v5180_v21 = vunpack.c.l.b16 %v4272_v60  ;;  %v5685_v8 = vsel %vm3413_vm6, %v14518_v42, %v5684_v26  ;;  %v3892_v43 = vmul.f32 %v14083_v1, %v18002_v25  ;;  %v3893_v44 = vmul.f32 %v14126_v52, %v18003_v20 }
 0x21e   : > { %v3691_v54 = vadd.f32 %v13978_v50, %v3690_v35  ;;  %18055 = vst [vmem:[#allocation100_spill] sm:$0xff] %v14572_v63  ;;  %v14576_v3 = vsel %vm2144_vm0, %v14479_v23, %v4553_v37  ;;  %v14578_v50 = vunpack.c.l.b16 %v4071_v49  ;;  %v5101_v23 = vpack.c.b16 %v5073_v39, %v5072_v33  ;;  %v18059_v33 = vld [vmem:[#allocation32_spill] sm:$0xff] }
 0x21f   : > { %18056 = vst [vmem:[#allocation99_spill] sm:$0xff] %v14576_v3  ;;  %4620 = vrot.lane.b32.xlu0 %v14576_v3, %s11591_s21  ;;  %v5207_v12 = vpack.c.b16 %v5180_v21, %v5179_v47  ;;  %v4365_v18 = vpack.c.b16 %v4338_v30, %v4337_v5  ;;  %v18060_v39 = vpack.c.b16 %v18058_v40, %v18059_v33  ;;  %v14608_v5 = vld [vmem:[%s17494_s2] ss:$0 sm:$0xff] }
 0x220   : > { %v3739_v2 = vmax.f32 %v3691_v54, 0.0  ;;  %18057 = vst [vmem:[#allocation61_spill] sm:$0xff] %v14578_v50  ;;  %v3925_v54 = vpack.c.bf16 %v3892_v43, %v3892_v43  ;;  %v3926_v49 = vpack.c.bf16 %v3893_v44, %v3893_v44  ;;  %v18061_v44 = vld [vmem:[#allocation69_spill] sm:$0xff] }
 0x221   : > { %v18064_v50 = vld [vmem:[#allocation65_spill] sm:$0xff] }
 0x222   : > { %v3771_v16 = vpack.c.bf16 %v3739_v2, %v3739_v2  ;;  %v4340_v43 = vunpack.c.l.b16 %v3926_v49  ;;  %v18063_v49 = vld [vmem:[#allocation70_spill] sm:$0xff] }
 0x224   : > { %3803 = vst.msk [vmem:[#allocation2 + $0x60] sm:$0xf] %vm1164_vm14, %v3771_v16  ;;  %v4613_v45 = vpop.permute.xlu2 %4612  ;;  %6562 = vmatmul.bf16.gmra.mxu1 %v5685_v8  ;;  %v14603_v16 = vld [vmem:[#allocation2 + $0x58] sm:$0xff]  }
 0x225   : > { %v14594_v53 = vsel %vm3365_vm3, %v5101_v23, %v4613_v45  ;;  %v4611_v35 = vpop.permute.xlu1 %4610 }
 0x226   : > { %v5269_v2 = vsel %vm3365_vm3, %v4365_v18, %v4611_v35  ;;  %v14601_v42 = vsel %vm3365_vm3, %v18060_v39, %v4611_v35  ;;  %v4339_v18 = vunpack.c.l.b16 %v3925_v54  ;;  %v3968_v35 = vmul.f32 %v14511_v13, %v18061_v44 }
 0x227   : > { %v5719_v57 = vshrl.u32 %v5269_v2, 16  ;;  %v5722_v25 = vshll.u32 %v5269_v2, 16  ;;  %v14614_v39 = vunpack.c.l.bf16 %v14603_v16 }
 0x229   : > { %v5721_v47 = vrot.slane %v5719_v57, 3  ;;  %v5724_v20 = vrot.slane %v5722_v25, 4  ;;  %v14616_v25 = vrot.slane %v5207_v12, 5 }
 0x22b   : > { %v11102_v60 = vld [vmem:[#allocation2 + $0x5c] sm:$0xff]  ;;  %v5725_v57 = vor.u32 %v5724_v20, %v5721_v47  ;;  %v5229_v47 = vsel %vm2405_vm7, %v14496_v28, %v14616_v25  ;;  %v5571_v28 = vshrl.u32 %v14337_v48, 16 }
 0x22c   : > { %v3693_v21 = vpop.f32.mrf.mxu0  ;;  %v4556_v23 = vshrl.u32 %v11102_v60, 16  ;;  %v4559_v8 = vshll.u32 %v11102_v60, 16  ;;  %v3969_v60 = vmul.f32 %v14614_v39, %v18063_v49 }
 0x22d   : > { %v3694_v30 = vadd.f32 %v14608_v5, %v3693_v21  ;;  %v4366_v21 = vpack.c.b16 %v4340_v43, %v4339_v18  ;;  %v5726_v12 = vsel %vm3413_vm6, %v5684_v26, %v5725_v57 }
 0x22e   : > { %v4558_v40 = vrot.slane %v4556_v23, 4  ;;  %v4561_v33 = vrot.slane %v4559_v8, 5 }
 0x22f   : > { %v3740_v2 = vmax.f32 %v3694_v30, 0.0  ;;  %v4001_v30 = vpack.c.bf16 %v3968_v35, %v3968_v35  ;;  %v5752_v35 = vshrl.u32 %v5229_v47, 16 }
 0x230   : > { %v14618_v3 = vor.u32 %v4561_v33, %v4558_v40  ;;  %v5755_v33 = vshll.u32 %v5229_v47, 16 }
 0x231   : > { %v3772_v51 = vpack.c.bf16 %v3740_v2, %v3740_v2  ;;  %v14635_v18 = vunpack.c.l.b16 %v4001_v30  ;;  %v5623_v30 = vshll.u32 %v14539_v36, 16 }
 0x232   : > { %v14623_v54 = vsel %vm2144_vm0, %v4553_v37, %v14618_v3  ;;  %v4002_v37 = vpack.c.bf16 %v3969_v60, %v3969_v60  ;;  %v5620_v60 = vshrl.u32 %v14539_v36, 16  ;;  %v3966_v36 = vmul.f32 %v14424_v9, %v18064_v50 }
 0x233   : > { %3804 = vst.msk [vmem:[#allocation2 + $0x64] sm:$0xf] %vm1164_vm14, %v3772_v51  ;;  %4622 = vrot.lane.b32.xlu1 %v14623_v54, %s11591_s21  ;;  %v5272_v51 = vsel %vm3365_vm3, %v4366_v21, %v4613_v45  ;;  %v5574_v45 = vshll.u32 %v14337_v48, 16  ;;  %v4240_v21 = vmul.f32 %v14345_v31, %v18019_v34  ;;  %v5625_v48 = vrot.slane %v5623_v30, 4 }
 0x234   : > { %18062 = vst [vmem:[#allocation30_spill] sm:$0xff] %v14623_v54  ;;  %v3695_v23 = vpop.f32.mrf.mxu0  ;;  %6567 = vmatmul.bf16.gmra.mxu1 %v5726_v12  ;;  %v14637_v43 = vunpack.c.l.b16 %v4002_v37  ;;  %v5760_v2 = vshrl.u32 %v5272_v51, 16  ;;  %v5763_v40 = vshll.u32 %v5272_v51, 16  ;;  %v5757_v12 = vrot.slane %v5755_v33, 4 }
 0x235   : > { %v3696_v20 = vadd.f32 %v14608_v5, %v3695_v23  ;;  %v5754_v23 = vrot.slane %v5752_v35, 3  ;;  %v5573_v37 = vrot.slane %v5571_v28, 3  ;;  %v5622_v54 = vrot.slane %v5620_v60, 3 }
 0x236   : > { %v5762_v47 = vrot.slane %v5760_v2, 3  ;;  %v5765_v51 = vrot.slane %v5763_v40, 4  ;;  %v4273_v34 = vpack.c.bf16 %v4240_v21, %v4240_v21  ;;  %v4242_v33 = vmul.f32 %v14424_v9, %v18026_v59 }
 0x237   : > { %v3741_v8 = vmax.f32 %v3696_v20, 0.0  ;;  %v4241_v20 = vmul.f32 %v14422_v14, %v18022_v4  ;;  %v14650_v63 = vor.u32 %v5757_v12, %v5754_v23  ;;  %v3894_v4 = vmul.f32 %v14195_v55, %v18028_v22  ;;  %v18065_v22 = vld [vmem:[#allocation66_spill] sm:$0xff] }
 0x238   : > { %v14652_v29 = vor.u32 %v5765_v51, %v5762_v47  ;;  %v14662_v28 = vor.u32 %v5625_v48, %v5622_v54  ;;  %v5181_v60 = vunpack.c.l.b16 %v4273_v34  ;;  %v3999_v47 = vpack.c.bf16 %v3966_v36, %v3966_v36 }
 0x239   : > { %v3773_v26 = vpack.c.bf16 %v3741_v8, %v3741_v8  ;;  %v5576_v8 = vrot.slane %v5574_v45, 4  ;;  %v14668_v21 = vsel %vm3413_vm6, %v14562_v15, %v14650_v63  ;;  %v3967_v59 = vmul.f32 %v14509_v61, %v18065_v22 }
 0x23a   : > { %v5767_v30 = vsel %vm3413_vm6, %v5725_v57, %v14652_v29  ;;  %v4243_v51 = vmul.f32 %v14509_v61, %v18031_v62  ;;  %v3895_v15 = vmul.f32 %v14197_v24, %v18029_v41  ;;  %v3927_v62 = vpack.c.bf16 %v3894_v4, %v3894_v4 }
 0x23b   : > { %3805 = vst.msk [vmem:[#allocation2 + $0x68] sm:$0xf] %vm1164_vm14, %v3773_v26  ;;  %v4274_v26 = vpack.c.bf16 %v4241_v20, %v4241_v20  ;;  %v14656_v35 = vor.u32 %v5576_v8, %v5573_v37  ;;  %v4275_v8 = vpack.c.bf16 %v4242_v33, %v4242_v33  ;;  %v4000_v34 = vpack.c.bf16 %v3967_v59, %v3967_v59 }
 0x23c   : > { %v3928_v33 = vpack.c.bf16 %v3895_v15, %v3895_v15 }
 0x23d   : > { %v5182_v54 = vunpack.c.l.b16 %v4274_v26  ;;  %v14681_v48 = vsel %vm3413_vm6, %v14656_v35, %v14662_v28  ;;  %v4276_v26 = vpack.c.bf16 %v4243_v51, %v4243_v51 }
 0x23f   : > { %v5208_v36 = vpack.c.b16 %v5182_v54, %v5181_v60 }
 0x241   : > { %v3698_v2 = vpop.f32.mrf.mxu0 }
 0x242   : > { %v11103_v40 = vld [vmem:[#allocation2 + $0x64] sm:$0xff]  ;;  %v3699_v45 = vadd.f32 %v14608_v5, %v3698_v2 }
 0x243   : > { %v4565_v23 = vshrl.u32 %v11103_v40, 16  ;;  %v4568_v12 = vshll.u32 %v11103_v40, 16  ;;  %v4685_v40 = vunpack.c.l.b16 %v3999_v47 }
 0x244   : > { %v3742_v55 = vmax.f32 %v3699_v45, 0.0  ;;  %6572 = vmatmul.bf16.gmra.mxu1 %v5767_v30  ;;  %v4686_v45 = vunpack.c.l.b16 %v4000_v34  ;;  %v5230_v30 = vrot.slane %v5208_v36, 5 }
 0x245   : > { %v4567_v20 = vrot.slane %v4565_v23, 4  ;;  %v4570_v37 = vrot.slane %v4568_v12, 5  ;;  %v1472_v23 = vld [vmem:[%s11705_s25 + $0x84] sm:$0x1]  ;;  %v5183_v12 = vunpack.c.l.b16 %v4275_v8  ;;  %v4342_v8 = vunpack.c.l.b16 %v3928_v33 }
 0x246   : > { %v3774_v57 = vpack.c.bf16 %v3742_v55, %v3742_v55  ;;  %v5184_v55 = vunpack.c.l.b16 %v4276_v26  ;;  %v4709_v59 = vpack.c.b16 %v4686_v45, %v4685_v40  ;;  %v5231_v4 = vsel %vm2405_vm7, %v14616_v25, %v5230_v30 }
 0x247   : > { %v14683_v2 = vor.u32 %v4570_v37, %v4567_v20  ;;  %v5793_v47 = vshrl.u32 %v5231_v4, 16  ;;  %v5796_v54 = vshll.u32 %v5231_v4, 16  ;;  %v4341_v37 = vunpack.c.l.b16 %v3927_v62 }
 0x248   : > { %3806 = vst.msk [vmem:[#allocation2 + $0x6c] sm:$0xf] %vm1164_vm14, %v3774_v57  ;;  %v5209_v51 = vpack.c.b16 %v5184_v55, %v5183_v12  ;;  %v14697_v15 = vrot.slane %v4709_v59, 5  ;;  %v11140_v57 = vld [vmem:[%s17495_s3 + $0xf8] sm:$0xff]  ;;  %v1773_v12 = vld [vmem:[%s11705_s25 + $0x8c] sm:$0x1] }
 0x249   : > { %v3700_v24 = vpop.f32.mrf.mxu0  ;;  %v14689_v41 = vsel %vm2144_vm0, %v14618_v3, %v14683_v2  ;;  %v1473_v3 = vunpack.c.l.bf16 %v1472_v23  ;;  %v5795_v34 = vrot.slane %v5793_v47, 3  ;;  %v5798_v36 = vrot.slane %v5796_v54, 4  ;;  %6806 = vmatpush.bf16.msrb.mxu0 %v11140_v57 }
 0x24a   : > { %18066 = vst [vmem:[#allocation68_spill] sm:$0xff] %v14689_v41  ;;  %v3701_v60 = vadd.f32 %v14608_v5, %v3700_v24  ;;  %4624 = vrot.lane.b32.xlu2 %v14689_v41, %s11591_s21  ;;  %v14702_v26 = vrot.slane %v5209_v51, 5  ;;  %v14707_v25 = vsel %vm2405_vm7, %v14503_v7, %v14697_v15  ;;  %v18068_v24 = vld [vmem:[#allocation85_spill] sm:$0xff]  ;;  %v4367_v23 = vpack.c.b16 %v4342_v8, %v4341_v37 }
 0x24b   : > { %18067 = vst [vmem:[#allocation33_spill] sm:$0xff] %v14707_v25  ;;  %v14709_v62 = vor.u32 %v5798_v36, %v5795_v34  ;;  %v1667_v33 = vmul.f32 %v18068_v24, %v1473_v3  ;;  %v5664_v59 = vshll.u32 %v14601_v42, 16  ;;  %v1774_v3 = vunpack.c.l.bf16 %v1773_v12  ;;  %v18097_v25 = vld [vmem:[#allocation25_spill] sm:$0xff] }
 0x24c   : > { %v3743_v20 = vmax.f32 %v3701_v60, 0.0  ;;  %v14713_v45 = vsel %vm2405_vm7, %v5230_v30, %v14702_v26  ;;  %v5661_v60 = vshrl.u32 %v14601_v42, 16  ;;  %v18069_v30 = vpack.c.b16 %v14248_v58, %v14246_v17 }
 0x24d   : > { %v14721_v55 = vsel %vm3413_vm6, %v14650_v63, %v14709_v62  ;;  %v1700_v37 = vpack.c.bf16 %v1667_v33, %v1667_v33  ;;  %v5702_v8 = vshrl.u32 %v14594_v53, 16  ;;  %v5705_v57 = vshll.u32 %v14594_v53, 16 }
 0x24e   : > { %v3775_v40 = vpack.c.bf16 %v3743_v20, %v3743_v20  ;;  %v5663_v36 = vrot.slane %v5661_v60, 3  ;;  %v3896_v58 = vmul.f32 %v14342_v19, %v18047_v46  ;;  %v5666_v33 = vrot.slane %v5664_v59, 4 }
 0x250   : > { %3807 = vst.msk [vmem:[#allocation2 + $0x70] sm:$0xf] %vm1164_vm14, %v3775_v40  ;;  %v3929_v59 = vpack.c.bf16 %v3896_v58, %v3896_v58 }
 0x251   : > { %v4615_v7 = vpop.permute.xlu0 %4614 }
 0x252   : > { %v5275_v4 = vsel %vm3365_vm3, %v4367_v23, %v4615_v7  ;;  %v14730_v47 = vsel %vm3365_vm3, %v18069_v30, %v4615_v7  ;;  %v3897_v23 = vmul.f32 %v14345_v31, %v18051_v0  ;;  %v2387_v7 = vunpack.c.l.b16 %v1700_v37 }
 0x253   : > { %v5801_v51 = vshrl.u32 %v5275_v4, 16  ;;  %v5804_v20 = vshll.u32 %v5275_v4, 16  ;;  %v1807_v4 = vmul.f32 %v1774_v3, %v18068_v24  ;;  %v4343_v58 = vunpack.c.l.b16 %v3929_v59 }
 0x254   : > { %v2404_v3 = vpack.c.b16 %v2387_v7, %v2387_v7 }
 0x255   : > { %v3703_v54 = vpop.f32.mrf.mxu0  ;;  %v5803_v42 = vrot.slane %v5801_v51, 3  ;;  %v5806_v34 = vrot.slane %v5804_v20, 4  ;;  %v5704_v51 = vrot.slane %v5702_v8, 3  ;;  %v5707_v20 = vrot.slane %v5705_v57, 4 }
 0x256   : > { %v3704_v63 = vadd.f32 %v14608_v5, %v3703_v54 }
 0x257   : > { %v11104_v17 = vld [vmem:[#allocation2 + $0x6c] sm:$0xff]  ;;  %v14739_v12 = vor.u32 %v5806_v34, %v5803_v42  ;;  %v5667_v42 = vor.u32 %v5666_v33, %v5663_v36  ;;  %v3930_v34 = vpack.c.bf16 %v3897_v23, %v3897_v23  ;;  %v2437_v33 = vrot.slane %v2404_v3, 5 }
 0x258   : > { %v3744_v40 = vmax.f32 %v3704_v63, 0.0  ;;  %v4574_v53 = vshrl.u32 %v11104_v17, 16  ;;  %v4577_v54 = vshll.u32 %v11104_v17, 16  ;;  %v1913_v63 = vld [vmem:[%s11705_s25 + $0x94] sm:$0x1] }
 0x259   : > { %v5808_v60 = vsel %vm3413_vm6, %v14652_v29, %v14739_v12  ;;  %v1914_v57 = vunpack.c.l.bf16 %v1913_v63  ;;  %v18070_v29 = vpack.c.b16 %v14637_v43, %v14635_v18  ;;  %v4344_v23 = vunpack.c.l.b16 %v3930_v34  ;;  %v18077_v34 = vld [vmem:[#allocation92_spill] sm:$0xff] }
 0x25a   : > { %v3776_v30 = vpack.c.bf16 %v3744_v40, %v3744_v40  ;;  %6577 = vmatmul.bf16.gmra.mxu1 %v5808_v60  ;;  %v4576_v19 = vrot.slane %v4574_v53, 4  ;;  %v4579_v31 = vrot.slane %v4577_v54, 5  ;;  %v1840_v40 = vpack.c.bf16 %v1807_v4, %v1807_v4  ;;  %v11144_v60 = vld [vmem:[%s17495_s3 + $0x118] sm:$0xff] }
 0x25b   : > { %v14753_v41 = vrot.slane %v18070_v29, 5  ;;  %v1947_v18 = vmul.f32 %v1914_v57, %v18068_v24  ;;  %v14772_v54 = vsel %vm3413_vm6, %v14662_v28, %v5667_v42  ;;  %v4368_v63 = vpack.c.b16 %v4344_v23, %v4343_v58  ;;  %6899 = vmatpush.bf16.msrb.mxu1 %v11144_v60  ;;  %v18079_v58 = vld [vmem:[#allocation37_spill] sm:$0xff] }
 0x25c   : > { %3808 = vst.msk [vmem:[#allocation2 + $0x74] sm:$0xf] %vm1164_vm14, %v3776_v30  ;;  %v14748_v8 = vor.u32 %v4579_v31, %v4576_v19  ;;  %v14755_v30 = vor.u32 %v5707_v20, %v5704_v51  ;;  %v2703_v7 = vunpack.c.l.b16 %v1840_v40  ;;  %v3899_v51 = vmul.f32 %v14424_v9, %v18053_v56  ;;  %v11139_v20 = vld [vmem:[%s17495_s3 + $0xf0] sm:$0xff]  ;;  %v18075_v19 = vld [vmem:[#allocation58_spill] sm:$0xff] }
 0x25d   : > { %v3705_v37 = vpop.f32.mrf.mxu0  ;;  %18071 = vst [vmem:[#allocation32_spill] sm:$0xff] %v14753_v41  ;;  %v14768_v43 = vsel %vm2405_vm7, %v14697_v15, %v14753_v41  ;;  %6807 = vmatpush.bf16.msrb.mxu0 %v11139_v20  ;;  %v18076_v31 = vpack.c.b16 %v14450_v32, %v18075_v19  ;;  %v2438_v3 = vsel %vm2405_vm7, %v18077_v34, %v2437_v33 }
 0x25e   : > { %v3706_v17 = vadd.f32 %v14608_v5, %v3705_v37  ;;  %v14760_v36 = vsel %vm2144_vm0, %v14683_v2, %v14748_v8  ;;  %18073 = vst [vmem:[#allocation70_spill] sm:$0xff] %v14768_v43  ;;  %v3898_v2 = vmul.f32 %v14422_v14, %v18052_v11  ;;  %v14786_v15 = vsel %vm3413_vm6, %v5667_v42, %v14755_v30 }
 0x25f   : > { %18072 = vst [vmem:[#allocation69_spill] sm:$0xff] %v14760_v36  ;;  %4626 = vrot.lane.b32.xlu2 %v14760_v36, %s11591_s21  ;;  %v2720_v40 = vpack.c.b16 %v2703_v7, %v2703_v7  ;;  %v3932_v57 = vpack.c.bf16 %v3899_v51, %v3899_v51 }
 0x260   : > { %v3745_v53 = vmax.f32 %v3706_v17, 0.0  ;;  %18074 = vst [vmem:[#allocation65_spill] sm:$0xff] %v14786_v15  ;;  %v1980_v17 = vpack.c.bf16 %v1947_v18, %v1947_v18  ;;  %v3931_v42 = vpack.c.bf16 %v3898_v2, %v3898_v2 }
 0x261   : > { %v2752_v60 = vrot.slane %v2720_v40, 5  ;;  %v4346_v33 = vunpack.c.l.b16 %v3932_v57  ;;  %v5837_v57 = vshll.u32 %v14713_v45, 16 }
 0x262   : > { %v3777_v4 = vpack.c.bf16 %v3745_v53, %v3745_v53  ;;  %v18078_v53 = vld [vmem:[#allocation22_spill] sm:$0xff]  ;;  %v3018_v19 = vunpack.c.l.b16 %v1980_v17 }
 0x263   : > { %v18080_v23 = vpack.c.b16 %v18078_v53, %v18079_v58  ;;  %v18081_v58 = vld [vmem:[#allocation94_spill] sm:$0xff] }
 0x264   : > { %3809 = vst.msk [vmem:[#allocation2 + $0x78] sm:$0xf] %vm1164_vm14, %v3777_v4  ;;  %v4619_v28 = vpop.permute.xlu2 %4618 }
 0x265   : > { %v14793_v59 = vsel %vm3365_vm3, %v18076_v31, %v4619_v28  ;;  %v4617_v37 = vpop.permute.xlu1 %4616  ;;  %v4345_v31 = vunpack.c.l.b16 %v3931_v42  ;;  %v5834_v42 = vshrl.u32 %v14713_v45, 16 }
 0x266   : > { %v5278_v29 = vsel %vm3365_vm3, %v4368_v63, %v4617_v37  ;;  %v14802_v4 = vsel %vm3365_vm3, %v18080_v23, %v4617_v37  ;;  %v2753_v37 = vsel %vm2405_vm7, %v18081_v58, %v2752_v60  ;;  %v3035_v23 = vpack.c.b16 %v3018_v19, %v3018_v19 }
 0x267   : > { %2471 = vrot.lane.b32.xlu2 %v2438_v3, %s11588_s14  ;;  %v5842_v32 = vshrl.u32 %v5278_v29, 16  ;;  %v5845_v20 = vshll.u32 %v5278_v29, 16  ;;  %v4369_v3 = vpack.c.b16 %v4346_v33, %v4345_v31  ;;  %v5836_v45 = vrot.slane %v5834_v42, 3  ;;  %v18089_v42 = vld [vmem:[#allocation64_spill] sm:$0xff] }
 0x268   : > { %v3067_v19 = vrot.slane %v3035_v23, 5 }
 0x269   : > { %v5844_v18 = vrot.slane %v5842_v32, 3  ;;  %v5847_v2 = vrot.slane %v5845_v20, 4  ;;  %v5281_v32 = vsel %vm3365_vm3, %v4369_v3, %v4619_v28 }
 0x26a   : > { %v5886_v31 = vshll.u32 %v5281_v32, 16 }
 0x26b   : > { %v11105_v7 = vld [vmem:[#allocation2 + $0x74] sm:$0xff]  ;;  %v5848_v53 = vor.u32 %v5847_v2, %v5844_v18 }
 0x26c   : > { %v3708_v51 = vpop.f32.mrf.mxu0  ;;  %v4583_v34 = vshrl.u32 %v11105_v7, 16  ;;  %v4586_v36 = vshll.u32 %v11105_v7, 16  ;;  %v18084_v18 = vld [vmem:[#allocation17_spill] sm:$0xff] }
 0x26d   : > { %v3709_v63 = vadd.f32 %v14608_v5, %v3708_v51  ;;  %v5849_v17 = vsel %vm3413_vm6, %v14739_v12, %v5848_v53  ;;  %v5883_v12 = vshrl.u32 %v5281_v32, 16  ;;  %v3068_v2 = vsel %vm2405_vm7, %v18084_v18, %v3067_v19  ;;  %v18090_v32 = vld [vmem:[#allocation13_spill] sm:$0xff] }
 0x26e   : > { %v4585_v29 = vrot.slane %v4583_v34, 4  ;;  %v4588_v40 = vrot.slane %v4586_v36, 5  ;;  %6582 = vmatmul.bf16.gmra.mxu1 %v5849_v17  ;;  %v5888_v34 = vrot.slane %v5886_v31, 4  ;;  %v18088_v17 = vld [vmem:[#allocation97_spill] sm:$0xff]  ;;  %v18092_v31 = vld [vmem:[#allocation72_spill] sm:$0xff]  ;;  %v14856_v18 = vunpack.c.h.bf16 %v14603_v16 }
 0x26f   : > { %v3746_v24 = vmax.f32 %v3709_v63, 0.0  ;;  %2786 = vrot.lane.b32.xlu2 %v2753_v37, %s11589_s16  ;;  %v5885_v63 = vrot.slane %v5883_v12, 3  ;;  %v14849_v12 = vld [vmem:[#allocation2 + $0x60] sm:$0xff]   ;;  %s10183_s16 = scalar_lea.hbm %s17501_s9, %s11664_s13  ;;  %s11538_s13 = scalar_lea.hbm %s17501_s9, 2 }
 0x270   : > { %v4589_v7 = vor.u32 %v4588_v40, %v4585_v29  ;;  %v18087_v29 = vld [vmem:[#allocation63_spill] sm:$0xff] }
 0x271   : > { %v3778_v20 = vpack.c.bf16 %v3746_v24, %v3746_v24  ;;  %v14814_v60 = vpop.f32.mrf.mxu1  ;;  %v5839_v24 = vrot.slane %v5837_v57, 4  ;;  %v4244_v40 = vmul.f32 %v14511_v13, %v18087_v29 }
 0x272   : > { %18082 = vst [vmem:[#allocation66_spill] sm:$0xff] %v14814_v60  ;;  %v14819_v36 = vsel %vm2144_vm0, %v14748_v8, %v4589_v7 }
 0x273   : > { %3810 = vst.msk [vmem:[#allocation2 + $0x7c] sm:$0xf] %vm1164_vm14, %v3778_v20  ;;  %4628 = vrot.lane.b32.xlu0 %v14819_v36, %s11591_s21  ;;  %v14826_v58 = vor.u32 %v5839_v24, %v5836_v45  ;;  %v18091_v20 = vld [vmem:[#allocation87_spill] sm:$0xff] }
 0x274   : > { %18083 = vst [vmem:[#allocation58_spill] sm:$0xff] %v14819_v36  ;;  %v3710_v33 = vpop.f32.mrf.mxu0  ;;  %v1739_v19 = vmul.f32 %v18091_v20, %v18090_v32 }
 0x275   : > { %v3711_v28 = vadd.f32 %v14608_v5, %v3710_v33  ;;  %v14832_v37 = vsel %vm3413_vm6, %v14709_v62, %v14826_v58  ;;  %v14837_v5 = vor.u32 %v5888_v34, %v5885_v63  ;;  %v4245_v62 = vmul.f32 %v14614_v39, %v18089_v42 }
 0x276   : > { %18085 = vst [vmem:[#allocation92_spill] sm:$0xff] %v14832_v37  ;;  %v3900_v33 = vmul.f32 %v14509_v61, %v18092_v31  ;;  %v5746_v63 = vshll.u32 %v14730_v47, 16  ;;  %v14861_v34 = vunpack.c.l.bf16 %v14849_v12  ;;  %v1772_v36 = vpack.c.bf16 %v1739_v19, %v1739_v19 }
 0x277   : > { %v3747_v51 = vmax.f32 %v3711_v28, 0.0  ;;  %3101 = vrot.lane.b32.xlu2 %v3068_v2, %s11591_s21  ;;  %v5890_v3 = vsel %vm3413_vm6, %v5848_v53, %v14837_v5  ;;  %v18093_v53 = vld [vmem:[#allocation31_spill] sm:$0xff]  ;;  %v4277_v2 = vpack.c.bf16 %v4244_v40, %v4244_v40  ;;  %v4246_v40 = vmul.f32 %v14856_v18, %v18064_v50 }
 0x278   : > { %v3901_v45 = vmul.f32 %v14511_v13, %v18093_v53  ;;  %v5748_v41 = vrot.slane %v5746_v63, 4 }
 0x279   : > { %v3779_v8 = vpack.c.bf16 %v3747_v51, %v3747_v51  ;;  %v14835_v23 = vpop.f32.mrf.mxu1  ;;  %v5743_v51 = vshrl.u32 %v14730_v47, 16  ;;  %v5185_v16 = vunpack.c.l.b16 %v4277_v2  ;;  %v18096_v47 = vld [vmem:[#allocation57_spill] sm:$0xff] }
 0x27a   : > { %18086 = vst [vmem:[#allocation22_spill] sm:$0xff] %v14835_v23  ;;  %v3933_v23 = vpack.c.bf16 %v3900_v33, %v3900_v33  ;;  %v18098_v37 = vpack.c.b16 %v18096_v47, %v18097_v25  ;;  %v2538_v33 = vunpack.c.l.b16 %v1772_v36  ;;  %v4030_v25 = vmul.f32 %v14083_v1, %v17999_v27 }
 0x27b   : > { %3811 = vst.msk [vmem:[#allocation2 + $0x80] sm:$0xf] %vm1164_vm14, %v3779_v8  ;;  %v4278_v8 = vpack.c.bf16 %v4245_v62, %v4245_v62  ;;  %v5745_v43 = vrot.slane %v5743_v51, 3 }
 0x27c   : > { %v4347_v36 = vunpack.c.l.b16 %v3933_v23  ;;  %v4063_v27 = vpack.c.bf16 %v4030_v25, %v4030_v25 }
 0x27d   : > { %v5186_v62 = vunpack.c.l.b16 %v4278_v8  ;;  %v4014_v8 = vld [vmem:[#allocation2 + $0x8] sm:$0x8] }
 0x27e   : > { %6587 = vmatmul.bf16.gmra.mxu1 %v5890_v3 }
 0x27f   : > { %4997 = vrot.lane.b32.xlu2 %v18088_v17, %s11591_s21  ;;  %v5210_v63 = vpack.c.b16 %v5186_v62, %v5185_v16 }
 0x281   : > { %v14863_v3 = vpop.f32.mrf.mxu1 }
 0x282   : > { %v11106_v57 = vld [vmem:[#allocation2 + $0x7c] sm:$0xff]  ;;  %18094 = vst [vmem:[#allocation37_spill] sm:$0xff] %v14863_v3 }
 0x283   : > { %v4592_v24 = vshrl.u32 %v11106_v57, 16  ;;  %v4595_v28 = vshll.u32 %v11106_v57, 16  ;;  %v3934_v57 = vpack.c.bf16 %v3901_v45, %v3901_v45  ;;  %v18100_v45 = vld [vmem:[#allocation90_spill] sm:$0xff] }
 0x285   : > { %v4594_v17 = vrot.slane %v4592_v24, 4  ;;  %v4597_v20 = vrot.slane %v4595_v28, 5  ;;  %v4247_v24 = vmul.f32 %v14861_v34, %v18065_v22  ;;  %v18101_v28 = vunpack.c.l.bf16 %v18100_v45 }
 0x286   : > { %v4348_v47 = vunpack.c.l.b16 %v3934_v57  ;;  %v2555_v45 = vpack.c.b16 %v2538_v33, %v2538_v33  ;;  %v18104_v57 = vld [vmem:[#allocation107_spill] sm:$0xff] }
 0x287   : > { %v14865_v60 = vor.u32 %v4597_v20, %v4594_v17  ;;  %4837 = vrot.lane.b32.xlu2 %v18098_v37, %s11591_s21  ;;  %v1879_v2 = vmul.f32 %v18101_v28, %v18090_v32  ;;  %v18102_v37 = vld [vmem:[#allocation46_spill] sm:$0xff]  ;;  %v4279_v17 = vpack.c.bf16 %v4246_v40, %v4246_v40  ;;  %v4280_v20 = vpack.c.bf16 %v4247_v24, %v4247_v24 }
 0x288   : > { %v4031_v51 = vmul.f32 %v14126_v52, %v18102_v37  ;;  %v4017_v52 = vunpack.c.l.bf16 %v4014_v8  ;;  %v4370_v62 = vpack.c.b16 %v4348_v47, %v4347_v36  ;;  %v4793_v37 = vunpack.c.l.b16 %v4063_v27 }
 0x289   : > { %18095 = vst [vmem:[#allocation94_spill] sm:$0xff] %v14865_v60  ;;  %4632 = vrot.lane.b32.xlu0 %v14865_v60, %s11591_s21  ;;  %v14879_v19 = vsel %vm2144_vm0, %v4589_v7, %v14865_v60  ;;  %v14890_v7 = vor.u32 %v5748_v41, %v5745_v43  ;;  %v5234_v60 = vrot.slane %v5210_v63, 5  ;;  %v1912_v28 = vpack.c.bf16 %v1879_v2, %v1879_v2  ;;  %v14897_v40 = vpop.f32.mrf.mxu1  ;;  %v18108_v63 = vld [vmem:[#allocation14_spill] sm:$0xff] }
 0x28a   : > { %18099 = vst [vmem:[#allocation17_spill] sm:$0xff] %v14879_v19  ;;  %4630 = vrot.lane.b32.xlu1 %v14879_v19, %s11591_s21  ;;  %v11138_v19 = vld [vmem:[%s17495_s3 + $0xe8] sm:$0xff]  ;;  %v5187_v3 = vunpack.c.l.b16 %v4279_v17  ;;  %v5188_v1 = vunpack.c.l.b16 %v4280_v20  ;;  %v4064_v15 = vpack.c.bf16 %v4031_v51, %v4031_v51  ;;  %v4020_v8 = vmul.f32 %v4017_v52, %v18108_v63  ;;  %v18110_v20 = vld [vmem:[#allocation93_spill] sm:$0xff] }
 0x28b   : > { %v5235_v16 = vsel %vm2405_vm7, %v14702_v26, %v5234_v60  ;;  %18103 = vst [vmem:[#allocation63_spill] sm:$0xff] %v14897_v40  ;;  %6808 = vmatpush.bf16.msrb.mxu0 %v11138_v19  ;;  %v14904_v24 = vsel %vm3413_vm6, %v14755_v30, %v14890_v7  ;;  %v2853_v33 = vunpack.c.l.b16 %v1912_v28  ;;  %v18107_v19 = vld [vmem:[#allocation84_spill] sm:$0xff] }
 0x28c   : > { %v5875_v41 = vshrl.u32 %v5235_v16, 16  ;;  %v5878_v43 = vshll.u32 %v5235_v16, 16  ;;  %v5211_v23 = vpack.c.b16 %v5188_v1, %v5187_v3  ;;  %18105 = vst [vmem:[#allocation97_spill] sm:$0xff] %v14904_v24  ;;  %v4794_v51 = vunpack.c.l.b16 %v4064_v15  ;;  %v18109_v17 = vld [vmem:[#allocation16_spill] sm:$0xff] }
 0x28d   : > { %v4021_v36 = vmul.f32 %v18110_v20, %v18109_v17  ;;  %v2870_v16 = vpack.c.b16 %v2853_v33, %v2853_v33  ;;  %v18113_v33 = vld [vmem:[#allocation73_spill] sm:$0xff] }
 0x28e   : > { %v5877_v2 = vrot.slane %v5875_v41, 3  ;;  %v5880_v26 = vrot.slane %v5878_v43, 4  ;;  %v14907_v25 = vrot.slane %v5211_v23, 5  ;;  %v4821_v23 = vpack.c.b16 %v4794_v51, %v4793_v37 }
 0x28f   : > { %5003 = vrot.lane.b32.xlu2 %v18104_v57, %s11591_s21  ;;  %v4053_v57 = vpack.c.bf16 %v4020_v8, %v4020_v8  ;;  %v4036_v37 = vmul.f32 %v14422_v14, %v18047_v46  ;;  %v18116_v8 = vld [vmem:[#allocation89_spill] sm:$0xff]  ;;  %v4107_v14 = vmul.f32 %v14614_v39, %v18065_v22 }
 0x290   : > { %18106 = vst [vmem:[#allocation64_spill] sm:$0xff] %v14907_v25  ;;  %v5881_v47 = vor.u32 %v5880_v26, %v5877_v2  ;;  %v18114_v26 = vld [vmem:[#allocation75_spill] sm:$0xff] }
 0x291   : > { %2588 = vrot.lane.b32.xlu0 %v2555_v45, %s11586_s28  ;;  %v14911_v3 = vpop.permute.xlu0 %4620  ;;  %v5237_v45 = vsel %vm2405_vm7, %v5234_v60, %v14907_v25  ;;  %v14927_v60 = vpop.f32.mrf.mxu1  ;;  %v4140_v22 = vpack.c.bf16 %v4107_v14, %v4107_v14  ;;  %s10175_s28 = scalar_lea.sflag [#allocation8], %s323_s24 }
 0x292   : > { %2320 = vrot.lane.b32.xlu1 %v18107_v19, %s11584_s26  ;;  %v5284_v30 = vsel %vm3365_vm3, %v4370_v62, %v14911_v3  ;;  %v14922_v41 = vsel %vm3413_vm6, %v14826_v58, %v5881_v47  ;;  %v5916_v15 = vshrl.u32 %v5237_v45, 16  ;;  %v5919_v27 = vshll.u32 %v5237_v45, 16  ;;  %18112 = vst [vmem:[#allocation72_spill] sm:$0xff] %v14927_v60 }
 0x293   : > { %v5924_v28 = vshrl.u32 %v5284_v30, 16  ;;  %v5927_v1 = vshll.u32 %v5284_v30, 16  ;;  %18111 = vst [vmem:[#allocation87_spill] sm:$0xff] %v14922_v41  ;;  %v4054_v62 = vpack.c.bf16 %v4021_v36, %v4021_v36  ;;  %v3902_v58 = vmul.f32 %v14614_v39, %v18113_v33 }
 0x294   : > { %v5918_v19 = vrot.slane %v5916_v15, 3  ;;  %v5921_v20 = vrot.slane %v5919_v27, 4  ;;  %v3903_v30 = vmul.f32 %v14856_v18, %v18114_v26  ;;  %v4037_v45 = vmul.f32 %v14424_v9, %v18051_v0 }
 0x295   : > { %v5926_v52 = vrot.slane %v5924_v28, 3  ;;  %v5929_v43 = vrot.slane %v5927_v1, 4  ;;  %v4105_v28 = vmul.f32 %v14509_v61, %v18089_v42  ;;  %v4783_v1 = vunpack.c.l.b16 %v4053_v57 }
 0x296   : > { %v14936_v51 = vor.u32 %v5921_v20, %v5918_v19  ;;  %v4104_v15 = vmul.f32 %v14424_v9, %v18087_v29  ;;  %v3936_v27 = vpack.c.bf16 %v3903_v30, %v3903_v30  ;;  %v4106_v0 = vmul.f32 %v14511_v13, %v18064_v50  ;;  %v11143_v29 = vld [vmem:[%s17495_s3 + $0x110] sm:$0xff]  ;;  %v18119_v20 = vld [vmem:[#allocation95_spill] sm:$0xff] }
 0x297   : > { %4843 = vrot.lane.b32.xlu2 %v4821_v23, %s11591_s21  ;;  %v14925_v2 = vor.u32 %v5929_v43, %v5926_v52  ;;  %v4069_v52 = vpack.c.bf16 %v4036_v37, %v4036_v37  ;;  %v14958_v61 = vunpack.c.h.bf16 %v14849_v12  ;;  %v4070_v42 = vpack.c.bf16 %v4037_v45, %v4037_v45  ;;  %v18121_v30 = vld [vmem:[#allocation47_spill] sm:$0xff]  ;;  %6900 = vmatpush.bf16.msrb.mxu1 %v11143_v29 }
 0x298   : > { %18115 = vst [vmem:[#allocation31_spill] sm:$0xff] %v14936_v51  ;;  %v14951_v46 = vsel %vm3413_vm6, %v5881_v47, %v14936_v51  ;;  %v4138_v43 = vpack.c.bf16 %v4105_v28, %v4105_v28  ;;  %v5784_v57 = vshrl.u32 %v14802_v4, 16  ;;  %v5787_v47 = vshll.u32 %v14802_v4, 16  ;;  %v11137_v45 = vld [vmem:[%s17495_s3 + $0xe0] sm:$0xff] }
 0x299   : > { %2903 = vrot.lane.b32.xlu0 %v2870_v16, %s11587_s29  ;;  %v5931_v36 = vsel %vm3413_vm6, %v14837_v5, %v14925_v2  ;;  %v4784_v16 = vunpack.c.l.b16 %v4054_v62  ;;  %18117 = vst [vmem:[#allocation57_spill] sm:$0xff] %v14951_v46  ;;  %v3935_v5 = vpack.c.bf16 %v3902_v58, %v3902_v58  ;;  %v18118_v62 = vld [vmem:[#allocation55_spill] sm:$0xff]  ;;  %v4137_v9 = vpack.c.bf16 %v4104_v15, %v4104_v15  ;;  %v14977_v28 = vpop.f32.mrf.mxu1 }
 0x29a   : > { %2636 = vrot.lane.b32.xlu1 %v18116_v8, %s11585_s27  ;;  %6592 = vmatmul.bf16.gmra.mxu1 %v5931_v36  ;;  %v4350_v50 = vunpack.c.l.b16 %v3936_v27  ;;  %v4799_v12 = vunpack.c.l.b16 %v4069_v52  ;;  %v4139_v19 = vpack.c.bf16 %v4106_v0, %v4106_v0  ;;  %v18120_v58 = vld [vmem:[#allocation43_spill] sm:$0xff]  ;;  %v3905_v37 = vmul.f32 %v14958_v61, %v18121_v30  ;;  %18122 = vst [vmem:[#allocation25_spill] sm:$0xff] %v14977_v28  ;;  %s10187_s27 = sshll.u32 %s10183_s16, 4  ;;  %s10188_s27 = int_to_ptr.hbm [resolvable:$true] %s10187_s27 }
 0x29b   : > { %v4816_v23 = vpack.c.b16 %v4784_v16, %v4783_v1  ;;  %v4349_v13 = vunpack.c.l.b16 %v3935_v5  ;;  %v3904_v4 = vmul.f32 %v14861_v34, %v18120_v58  ;;  %v4800_v8 = vunpack.c.l.b16 %v4070_v42  ;;  %v14979_v5 = vld [vmem:[#allocation2 + $0x70] sm:$0xff]   ;;  %6809 = vmatpush.bf16.msrb.mxu0 %v11137_v45  ;;  %s11532_s29 = sshra.s32 %s10188_s27, 4  ;;  %s11533_s29 = int_to_ptr.hbm [resolvable:$true] %s11532_s29 }
 0x29c   : > { %v4931_v36 = vunpack.c.l.b16 %v4138_v43  ;;  %v4933_v1 = vunpack.c.l.b16 %v4140_v22  ;;  %v5786_v16 = vrot.slane %v5784_v57, 3  ;;  %v5789_v14 = vrot.slane %v5787_v47, 4  ;;  %p11539_p0 = scmp.lt.s32.totalorder %s11533_s29, %s17501_s9 }
 0x29d   : > { %v4930_v15 = vunpack.c.l.b16 %v4137_v9  ;;  %v5825_v27 = vshrl.u32 %v14793_v59, 16  ;;  %v5828_v52 = vshll.u32 %v14793_v59, 16  ;;  %v4371_v0 = vpack.c.b16 %v4350_v50, %v4349_v13 }
 0x29e   : > { %v4932_v43 = vunpack.c.l.b16 %v4139_v19  ;;  %v3938_v29 = vpack.c.bf16 %v3905_v37, %v3905_v37  ;;  %v4042_v47 = vmul.f32 %v14861_v34, %v18113_v33  ;;  %v14990_v9 = vunpack.c.l.bf16 %v14979_v5 }
 0x29f   : > { %5009 = vrot.lane.b32.xlu2 %v18118_v62, %s11591_s21  ;;  %v3937_v62 = vpack.c.bf16 %v3904_v4, %v3904_v4  ;;  %v4955_v28 = vpack.c.b16 %v4931_v36, %v4930_v15  ;;  %v5790_v59 = vor.u32 %v5789_v14, %v5786_v16  ;;  %v4043_v13 = vmul.f32 %v14958_v61, %v18114_v26  ;;  %v18123_v36 = vld [vmem:[#allocation98_spill] sm:$0xff]  ;;  %v18124_v16 = vld [vmem:[#allocation21_spill] sm:$0xff]  ;;  %v18125_v14 = vld [vmem:[#allocation20_spill] sm:$0xff] }
 0x2a0   : > { %v4956_v57 = vpack.c.b16 %v4933_v1, %v4932_v43  ;;  %v5827_v19 = vrot.slane %v5825_v27, 3  ;;  %v5830_v4 = vrot.slane %v5828_v52, 4  ;;  %v4352_v1 = vunpack.c.l.b16 %v3938_v29 }
 0x2a1   : > { %4833 = vrot.lane.b32.xlu0 %v4816_v23, %s11591_s21  ;;  %v11432_v23 = vld [vmem:[#allocation2 + $0x68] sm:$0xff]   ;;  %v4351_v45 = vunpack.c.l.b16 %v3937_v62  ;;  %v18126_v15 = vpack.c.b16 %v18124_v16, %v18125_v14  ;;  %v15009_v52 = vrot.slane %v4955_v28, 5  ;;  %v4076_v60 = vpack.c.bf16 %v4043_v13, %v4043_v13 }
 0x2a2   : > { %2951 = vrot.lane.b32.xlu1 %v18119_v20, %s11590_s17  ;;  %v4824_v20 = vpack.c.b16 %v4800_v8, %v4799_v12  ;;  %v14995_v50 = vunpack.c.l.bf16 %v11432_v23  ;;  %v14997_v12 = vunpack.c.h.bf16 %v11432_v23  ;;  %v18127_v23 = vld [vmem:[#allocation44_spill] sm:$0xff]  ;;  %v15013_v62 = vsel %vm3413_vm6, %v14890_v7, %v5790_v59  ;;  %v18132_v13 = vld [vmem:[#allocation35_spill] sm:$0xff]  ;;  %s11534_s17 = scalar_lea.hbm %s11533_s29, 1 }
 0x2a3   : > { %v4113_v27 = vmul.f32 %v14990_v9, %v18127_v23  ;;  %18128 = vst [vmem:[#allocation90_spill] sm:$0xff] %v15013_v62  ;;  %v15015_v29 = vor.u32 %v5830_v4, %v5827_v19  ;;  %v18131_v14 = vld [vmem:[#allocation36_spill] sm:$0xff]  ;;  %v4110_v19 = vmul.f32 %v14958_v61, %v18132_v13  ;;  %p11535_p11 = scmp.ne.s32.totalorder %s11533_s29, %s11534_s17  ;;  %p11540_p1 = scmp.lt.s32.totalorder %s11538_s13, %s11534_s17 }
 0x2a4   : > { %v15019_v16 = vpop.permute.xlu2 %4624  ;;  %v4112_v28 = vmul.f32 %v14997_v12, %v18131_v14  ;;  %v18135_v14 = vld [vmem:[#allocation18_spill] sm:$0xff] }
 0x2a5   : > { %v14983_v42 = vpop.permute.xlu1 %4622  ;;  %v4146_v4 = vpack.c.bf16 %v4113_v27, %v4113_v27  ;;  %v15039_v40 = vsel %vm3413_vm6, %v5790_v59, %v15015_v29  ;;  %v18136_v27 = vld [vmem:[#allocation78_spill] sm:$0xff]  ;;  %v4143_v23 = vpack.c.bf16 %v4110_v19, %v4110_v19  ;;  %p11536_p12 = pnand %p11535_p11, %p11681_p5  ;;  %p11541_p2 = por %p11540_p1, %p11539_p0 }
 0x2a6   : > { %v5287_v22 = vsel %vm3365_vm3, %v4371_v0, %v14983_v42  ;;  %18134 = vst [vmem:[#allocation107_spill] sm:$0xff] %v15039_v40  ;;  %v18139_v19 = vld [vmem:[#allocation106_spill] sm:$0xff] }
 0x2a7   : > { %4849 = vrot.lane.b32.xlu2 %v4824_v20, %s11591_s21  ;;  %v5965_v37 = vshrl.u32 %v5287_v22, 16  ;;  %v5968_v8 = vshll.u32 %v5287_v22, 16  ;;  %v15005_v20 = vrot.slane %v4956_v57, 5  ;;  %v4075_v22 = vpack.c.bf16 %v4042_v47, %v4042_v47  ;;  %v18130_v57 = vld [vmem:[#allocation74_spill] sm:$0xff]  ;;  %p11537_p13 = pneg %p11536_p12 }
 0x2a8   : > { %v4936_v41 = vunpack.c.l.b16 %v4143_v23  ;;  %v18146_v23 = vld [vmem:[#allocation81_spill] sm:$0xff] }
 0x2a9   : > { %4999 = vrot.lane.b32.xlu0 %v18123_v36, %s11591_s21  ;;  %v5967_v0 = vrot.slane %v5965_v37, 3  ;;  %v5970_v43 = vrot.slane %v5968_v8, 4  ;;  %v15017_v36 = vpop.f32.mrf.mxu1  ;;  %v4111_v8 = vmul.f32 %v14995_v50, %v18130_v57  ;;  %v4982_v7 = vsel %vm2405_vm7, %v15009_v52, %v15005_v20  ;;  %p11542_p3 = pnand %p11541_p2, %p11537_p13 }
 0x2aa   : > { %4835 = vrot.lane.b32.xlu1 %v18126_v15, %s11591_s21  ;;  %18129 = vst [vmem:[#allocation46_spill] sm:$0xff] %v15017_v36  ;;  %v4372_v15 = vpack.c.b16 %v4352_v1, %v4351_v45  ;;  %v18133_v45 = vld [vmem:[#allocation105_spill] sm:$0xff]  ;;  %v4806_v1 = vunpack.c.l.b16 %v4076_v60  ;;  %v4145_v36 = vpack.c.bf16 %v4112_v28, %v4112_v28 }
 0x2ab   : > { %v5971_v37 = vor.u32 %v5970_v43, %v5967_v0  ;;  %v4805_v43 = vunpack.c.l.b16 %v4075_v22  ;;  %v11434_v60 = vld [vmem:[#allocation2 + $0x78] sm:$0xff]  }
 0x2ac   : > { %v5290_v0 = vsel %vm3365_vm3, %v4372_v15, %v15019_v16  ;;  %v3906_v15 = vmul.f32 %v14995_v50, %v18136_v27  ;;  %v4938_v46 = vunpack.c.l.b16 %v4145_v36  ;;  %v15047_v40 = vunpack.c.l.bf16 %v11434_v60 }
 0x2ad   : > { %v5972_v47 = vsel %vm3413_vm6, %v14925_v2, %v5971_v37  ;;  %v4144_v2 = vpack.c.bf16 %v4111_v8, %v4111_v8  ;;  %v6006_v22 = vshrl.u32 %v5290_v0, 16  ;;  %v6009_v51 = vshll.u32 %v5290_v0, 16 }
 0x2ae   : > { %6597 = vmatmul.bf16.gmra.mxu1 %v5972_v47  ;;  %v18137_v47 = vld [vmem:[#allocation79_spill] sm:$0xff]  ;;  %v4827_v8 = vpack.c.b16 %v4806_v1, %v4805_v43  ;;  %v3939_v62 = vpack.c.bf16 %v3906_v15, %v3906_v15  ;;  %v15049_v25 = vunpack.c.h.bf16 %v11434_v60  ;;  %v18142_v43 = vld [vmem:[#allocation104_spill] sm:$0xff] }
 0x2af   : > { %5015 = vrot.lane.b32.xlu2 %v4982_v7, %s11591_s21  ;;  %v3907_v7 = vmul.f32 %v14997_v12, %v18137_v47  ;;  %v4937_v28 = vunpack.c.l.b16 %v4144_v2  ;;  %v6011_v13 = vrot.slane %v6009_v51, 4  ;;  %v18143_v1 = vld [vmem:[#allocation103_spill] sm:$0xff]  ;;  %v18145_v51 = vld [vmem:[#allocation52_spill] sm:$0xff] }
 0x2b0   : > { %v18144_v2 = vpack.c.b16 %v18142_v43, %v18143_v1  ;;  %v4353_v15 = vunpack.c.l.b16 %v3939_v62 }
 0x2b1   : > { %5001 = vrot.lane.b32.xlu0 %v18133_v45, %s11591_s21  ;;  %v4939_v45 = vunpack.c.l.b16 %v4146_v4  ;;  %v3940_v59 = vpack.c.bf16 %v3907_v7, %v3907_v7  ;;  %v15051_v57 = vpop.f32.mrf.mxu1  ;;  %v18140_v4 = vld [vmem:[#allocation39_spill] sm:$0xff]  ;;  %v4958_v36 = vpack.c.b16 %v4937_v28, %v4936_v41 }
 0x2b2   : > { %5128 = vrot.lane.b32.xlu1 %v18135_v14, %s11591_s21  ;;  %v6008_v14 = vrot.slane %v6006_v22, 3  ;;  %18138 = vst [vmem:[#allocation84_spill] sm:$0xff] %v15051_v57  ;;  %v18141_v0 = vpack.c.b16 %v18139_v19, %v18140_v4  ;;  %v4048_v22 = vmul.f32 %v15047_v40, %v18145_v51 }
 0x2b3   : > { %v4959_v24 = vpack.c.b16 %v4939_v45, %v4938_v46  ;;  %v4354_v7 = vunpack.c.l.b16 %v3940_v59  ;;  %v4049_v46 = vmul.f32 %v15049_v25, %v18146_v23  ;;  %v15070_v19 = vrot.slane %v4958_v36, 5 }
 0x2b4   : > { %v6012_v45 = vor.u32 %v6011_v13, %v6008_v14  ;;  %v4081_v28 = vpack.c.bf16 %v4048_v22, %v4048_v22  ;;  %v18148_v13 = vld [vmem:[#allocation109_spill] sm:$0xff]  ;;  %v18149_v14 = vld [vmem:[#allocation108_spill] sm:$0xff]  ;;  %v18150_v22 = vld [vmem:[#allocation38_spill] sm:$0xff] }
 0x2b5   : > { %v15066_v60 = vrot.slane %v4959_v24, 5  ;;  %v4373_v41 = vpack.c.b16 %v4354_v7, %v4353_v15  ;;  %v4082_v4 = vpack.c.bf16 %v4049_v46, %v4049_v46  ;;  %v18151_v46 = vld [vmem:[#allocation51_spill] sm:$0xff] }
 0x2b6   : > { %v4811_v36 = vunpack.c.l.b16 %v4081_v28  ;;  %v4040_v28 = vmul.f32 %v14614_v39, %v18092_v31 }
 0x2b7   : > { %4855 = vrot.lane.b32.xlu2 %v4827_v8, %s11591_s21  ;;  %v4988_v62 = vsel %vm2405_vm7, %v15070_v19, %v15066_v60 }
 0x2b9   : > { %4841 = vrot.lane.b32.xlu0 %v18141_v0, %s11591_s21  ;;  %v15068_v8 = vpop.permute.xlu2 %4626  ;;  %v6013_v0 = vsel %vm3413_vm6, %v5971_v37, %v6012_v45  ;;  %v15079_v24 = vpop.f32.mrf.mxu1  ;;  %v4812_v37 = vunpack.c.l.b16 %v4082_v4  ;;  %v4041_v4 = vmul.f32 %v14856_v18, %v18093_v53 }
 0x2ba   : > { %4839 = vrot.lane.b32.xlu1 %v18144_v2, %s11591_s21  ;;  %v5293_v59 = vsel %vm3365_vm3, %v4373_v41, %v15068_v8  ;;  %18147 = vst [vmem:[#allocation14_spill] sm:$0xff] %v15079_v24  ;;  %v18152_v41 = vpack.c.b16 %v18150_v22, %v18151_v46  ;;  %v4180_v46 = vmul.f32 %v14861_v34, %v18092_v31 }
 0x2bb   : > { %v6047_v43 = vshrl.u32 %v5293_v59, 16  ;;  %v6050_v1 = vshll.u32 %v5293_v59, 16  ;;  %v4830_v2 = vpack.c.b16 %v4812_v37, %v4811_v36  ;;  %v11136_v36 = vld [vmem:[%s17495_s3 + $0xd8] sm:$0xff]  ;;  %v4109_v37 = vmul.f32 %v14861_v34, %v18063_v49 }
 0x2bc   : > { %6810 = vmatpush.bf16.msrb.mxu0 %v11136_v36  ;;  %v4213_v36 = vpack.c.bf16 %v4180_v46, %v4180_v46 }
 0x2bd   : > { %v6049_v15 = vrot.slane %v6047_v43, 3  ;;  %v6052_v7 = vrot.slane %v6050_v1, 4  ;;  %v4073_v43 = vpack.c.bf16 %v4040_v28, %v4040_v28  ;;  %v4074_v1 = vpack.c.bf16 %v4041_v4, %v4041_v4 }
 0x2be   : > { %6602 = vmatmul.bf16.gmra.mxu1 %v6013_v0  ;;  %v18153_v0 = vld [vmem:[#allocation110_spill] sm:$0xff]  ;;  %v15129_v28 = vunpack.c.h.bf16 %v14979_v5 }
 0x2bf   : > { %5021 = vrot.lane.b32.xlu2 %v4988_v62, %s11591_s21  ;;  %v18154_v62 = vld [vmem:[#allocation45_spill] sm:$0xff] }
 0x2c0   : > { %v3909_v5 = vmul.f32 %v15129_v28, %v18146_v23  ;;  %v18164_v23 = vld [vmem:[#allocation83_spill] sm:$0xff] }
 0x2c1   : > { %5007 = vrot.lane.b32.xlu0 %v18148_v13, %s11591_s21  ;;  %v18155_v13 = vpack.c.b16 %v18153_v0, %v18154_v62  ;;  %v15098_v59 = vpop.f32.mrf.mxu1  ;;  %v18158_v0 = vld [vmem:[#allocation59_spill] sm:$0xff] }
 0x2c2   : > { %5005 = vrot.lane.b32.xlu1 %v18149_v14, %s11591_s21  ;;  %18156 = vst [vmem:[#allocation16_spill] sm:$0xff] %v15098_v59  ;;  %v15100_v14 = vor.u32 %v6052_v7, %v6049_v15  ;;  %v18157_v15 = vpack.c.b16 %v14551_v6, %v14547_v10  ;;  %v4980_v62 = vsel %vm2405_vm7, %v18158_v0, %v15009_v52  ;;  %v18159_v10 = vld [vmem:[#allocation41_spill] sm:$0xff]  ;;  %v4803_v6 = vunpack.c.l.b16 %v4073_v43  ;;  %v18166_v59 = vld [vmem:[#allocation82_spill] sm:$0xff] }
 0x2c3   : > { %v4179_v52 = vmul.f32 %v14856_v18, %v18053_v56  ;;  %v4184_v56 = vmul.f32 %v14990_v9, %v18120_v58  ;;  %v4185_v0 = vmul.f32 %v15129_v28, %v18121_v30 }
 0x2c4   : > { %v6054_v22 = vsel %vm3413_vm6, %v6012_v45, %v15100_v14  ;;  %v5423_v7 = vsel %vm3365_vm3, %v18157_v15, %v14911_v3  ;;  %v4178_v45 = vmul.f32 %v14614_v39, %v18052_v11  ;;  %v4804_v3 = vunpack.c.l.b16 %v4074_v1  ;;  %v3846_v15 = vld [vmem:[#allocation2 + $0x80] sm:$0xf] }
 0x2c5   : > { %v5869_v4 = vshll.u32 %v5423_v7, 16 }
 0x2c6   : > { %v4211_v43 = vpack.c.bf16 %v4178_v45, %v4178_v45  ;;  %v4826_v1 = vpack.c.b16 %v4804_v3, %v4803_v6  ;;  %v4212_v45 = vpack.c.bf16 %v4179_v52, %v4179_v52  ;;  %v11141_v6 = vld [vmem:[%s17495_s3 + $0x100] sm:$0xff] }
 0x2c7   : > { %4861 = vrot.lane.b32.xlu2 %v4830_v2, %s11591_s21  ;;  %v4108_v2 = vmul.f32 %v14856_v18, %v18061_v44 }
 0x2c9   : > { %4847 = vrot.lane.b32.xlu0 %v18152_v41, %s11591_s21  ;;  %v4181_v41 = vmul.f32 %v14958_v61, %v18093_v53  ;;  %v4141_v31 = vpack.c.bf16 %v4108_v2, %v4108_v2  ;;  %v5866_v53 = vshrl.u32 %v5423_v7, 16  ;;  %v15133_v11 = vpop.f32.mrf.mxu1  ;;  %v11142_v7 = vld [vmem:[%s17495_s3 + $0x108] sm:$0xff] }
 0x2ca   : > { %4845 = vrot.lane.b32.xlu1 %v18155_v13, %s11591_s21  ;;  %v4142_v13 = vpack.c.bf16 %v4109_v37, %v4109_v37  ;;  %18160 = vst [vmem:[#allocation93_spill] sm:$0xff] %v15133_v11  ;;  %v3908_v37 = vmul.f32 %v14990_v9, %v18145_v51  ;;  %6901 = vmatpush.bf16.msrb.mxu1 %v11142_v7 }
 0x2cb   : > { %v4934_v2 = vunpack.c.l.b16 %v4141_v31  ;;  %v5868_v46 = vrot.slane %v5866_v53, 3  ;;  %v4044_v53 = vmul.f32 %v14995_v50, %v18120_v58  ;;  %v4046_v7 = vmul.f32 %v14990_v9, %v18136_v27 }
 0x2cc   : > { %v4935_v39 = vunpack.c.l.b16 %v4142_v13  ;;  %v3941_v31 = vpack.c.bf16 %v3908_v37, %v3908_v37  ;;  %v4218_v37 = vpack.c.bf16 %v4185_v0, %v4185_v0  ;;  %v4047_v58 = vmul.f32 %v15129_v28, %v18137_v47 }
 0x2ce   : > { %6607 = vmatmul.bf16.gmra.mxu1 %v6054_v22  ;;  %v4214_v22 = vpack.c.bf16 %v4181_v41, %v4181_v41  ;;  %v5871_v41 = vrot.slane %v5869_v4, 4  ;;  %v4957_v3 = vpack.c.b16 %v4935_v39, %v4934_v2  ;;  %v4045_v4 = vmul.f32 %v14997_v12, %v18121_v30  ;;  %v18163_v30 = vld [vmem:[#allocation77_spill] sm:$0xff] }
 0x2cf   : > { %v4217_v39 = vpack.c.bf16 %v4184_v56, %v4184_v56  ;;  %v5083_v2 = vunpack.c.l.b16 %v4212_v45  ;;  %6902 = vmatpush.bf16.msrb.mxu1 %v11141_v6  ;;  %v18165_v56 = vld [vmem:[#allocation76_spill] sm:$0xff]  ;;  %v5089_v24 = vunpack.c.l.b16 %v4218_v37  ;;  %v4080_v57 = vpack.c.bf16 %v4047_v58, %v4047_v58 }
 0x2d0   : > { %v5085_v13 = vunpack.c.l.b16 %v4214_v22  ;;  %v18161_v22 = vld [vmem:[#allocation61_spill] sm:$0xff]  ;;  %v15162_v51 = vor.u32 %v5871_v41, %v5868_v46  ;;  %v4078_v11 = vpack.c.bf16 %v4045_v4, %v4045_v4  ;;  %v4079_v41 = vpack.c.bf16 %v4046_v7, %v4046_v7 }
 0x2d1   : > { %5013 = vrot.lane.b32.xlu0 %v4980_v62, %s11591_s21  ;;  %v5084_v62 = vunpack.c.l.b16 %v4213_v36  ;;  %v5082_v36 = vunpack.c.l.b16 %v4211_v43  ;;  %v18162_v52 = vpack.c.b16 %v14580_v38, %v18161_v22  ;;  %v4115_v43 = vmul.f32 %v15047_v40, %v18163_v30 }
 0x2d2   : > { %5011 = vrot.lane.b32.xlu1 %v18159_v10, %s11591_s21  ;;  %v15146_v10 = vunpack.c.l.bf16 %v3846_v15  ;;  %v3942_v15 = vpack.c.bf16 %v3909_v5, %v3909_v5  ;;  %v4983_v5 = vrot.slane %v4957_v3, 5  ;;  %v4355_v22 = vunpack.c.l.b16 %v3941_v31 }
 0x2d3   : > { %v4114_v0 = vmul.f32 %v15129_v28, %v18165_v56  ;;  %v5088_v45 = vunpack.c.l.b16 %v4217_v39  ;;  %v15179_v6 = vsel %vm3413_vm6, %v15015_v29, %v15162_v51  ;;  %v5106_v3 = vpack.c.b16 %v5083_v2, %v5082_v36 }
 0x2d4   : > { %v4117_v38 = vmul.f32 %v15146_v10, %v18164_v23  ;;  %v4356_v46 = vunpack.c.l.b16 %v3942_v15  ;;  %v4986_v31 = vsel %vm2405_vm7, %v4983_v5, %v15070_v19  ;;  %v4984_v7 = vsel %vm2405_vm7, %v15005_v20, %v4983_v5 }
 0x2d5   : > { %v5425_v37 = vsel %vm3365_vm3, %v5106_v3, %v14983_v42  ;;  %v4808_v29 = vunpack.c.l.b16 %v4078_v11  ;;  %v4147_v36 = vpack.c.bf16 %v4114_v0, %v4114_v0  ;;  %v5109_v2 = vpack.c.b16 %v5089_v24, %v5088_v45 }
 0x2d6   : > { %v4150_v4 = vpack.c.bf16 %v4117_v38, %v4117_v38  ;;  %v4374_v19 = vpack.c.b16 %v4356_v46, %v4355_v22  ;;  %v4810_v38 = vunpack.c.l.b16 %v4080_v57  ;;  %v5907_v47 = vshrl.u32 %v5425_v37, 16 }
 0x2d7   : > { %v5910_v27 = vshll.u32 %v5425_v37, 16 }
 0x2d9   : > { %4853 = vrot.lane.b32.xlu0 %v4826_v1, %s11591_s21  ;;  %v5107_v1 = vpack.c.b16 %v5085_v13, %v5084_v62  ;;  %v4116_v62 = vmul.f32 %v15049_v25, %v18166_v59  ;;  %v15174_v13 = vpop.f32.mrf.mxu1  ;;  %v5912_v37 = vrot.slane %v5910_v27, 4  ;;  %v11123_v27 = vld [vmem:[%s17495_s3 + $0x70] sm:$0xff] }
 0x2da   : > { %4851 = vrot.lane.b32.xlu1 %v18162_v52, %s11591_s21  ;;  %v4077_v52 = vpack.c.bf16 %v4044_v53, %v4044_v53  ;;  %18167 = vst [vmem:[#allocation73_spill] sm:$0xff] %v15174_v13  ;;  %v4148_v53 = vpack.c.bf16 %v4115_v43, %v4115_v43  ;;  %v4809_v43 = vunpack.c.l.b16 %v4079_v41 }
 0x2db   : > { %v5427_v15 = vsel %vm3365_vm3, %v5107_v1, %v15019_v16  ;;  %v4149_v58 = vpack.c.bf16 %v4116_v62, %v4116_v62 }
 0x2dc   : > { %v4807_v39 = vunpack.c.l.b16 %v4077_v52  ;;  %v5948_v13 = vshrl.u32 %v5427_v15, 16  ;;  %v5951_v16 = vshll.u32 %v5427_v15, 16  ;;  %v4941_v1 = vunpack.c.l.b16 %v4148_v53  ;;  %v11132_v53 = vld [vmem:[%s17495_s3 + $0xb8] sm:$0xff]  ;;  %v11135_v15 = vld [vmem:[%s17495_s3 + $0xd0] sm:$0xff] }
 0x2dd   : > { %v4940_v52 = vunpack.c.l.b16 %v4147_v36  ;;  %v4942_v11 = vunpack.c.l.b16 %v4149_v58  ;;  %v4829_v46 = vpack.c.b16 %v4810_v38, %v4809_v43  ;;  %6717 = vmatpush.bf16.msra.mxu3 %v11132_v53  ;;  %v11131_v58 = vld [vmem:[%s17495_s3 + $0xb0] sm:$0xff]  ;;  %6811 = vmatpush.bf16.msrb.mxu0 %v11135_v15 }
 0x2de   : > { %v4828_v57 = vpack.c.b16 %v4808_v29, %v4807_v39  ;;  %v5950_v41 = vrot.slane %v5948_v13, 3  ;;  %v5953_v62 = vrot.slane %v5951_v16, 4  ;;  %v4182_v13 = vmul.f32 %v14995_v50, %v18113_v33 }
 0x2df   : > { %v4960_v45 = vpack.c.b16 %v4941_v1, %v4940_v52  ;;  %v4183_v29 = vmul.f32 %v14997_v12, %v18114_v26  ;;  %v18169_v52 = vld [vmem:[#allocation91_spill] sm:$0xff] }
 0x2e0   : > { %v15222_v33 = vor.u32 %v5953_v62, %v5950_v41  ;;  %v4215_v16 = vpack.c.bf16 %v4182_v13, %v4182_v13 }
 0x2e1   : > { %5019 = vrot.lane.b32.xlu0 %v4986_v31, %s11591_s21  ;;  %v4943_v31 = vunpack.c.l.b16 %v4150_v4  ;;  %v15195_v0 = vpop.f32.mrf.mxu1  ;;  %v11124_v4 = vld [vmem:[%s17495_s3 + $0x78] sm:$0xff]  ;;  %v4989_v38 = vrot.slane %v4960_v45, 5  ;;  %v4216_v1 = vpack.c.bf16 %v4183_v29, %v4183_v29  ;;  %6718 = vmatpush.bf16.msra.mxu3 %v11131_v58  ;;  %v3912_v58 = vmul.f32 %v15146_v10, %v18090_v32 }
 0x2e2   : > { %5017 = vrot.lane.b32.xlu1 %v4984_v7, %s11591_s21  ;;  %v5909_v7 = vrot.slane %v5907_v47, 3  ;;  %6628 = vmatpush.bf16.msrb.mxu2 %v11124_v4  ;;  %v5086_v62 = vunpack.c.l.b16 %v4215_v16 }
 0x2e3   : > { %v4961_v3 = vpack.c.b16 %v4943_v31, %v4942_v11  ;;  %v11130_v31 = vld [vmem:[%s17495_s3 + $0xa8] sm:$0xff]  ;;  %v3911_v11 = vmul.f32 %v15049_v25, %v18169_v52  ;;  %v5087_v45 = vunpack.c.l.b16 %v4216_v1  ;;  %v11128_v1 = vld [vmem:[%s17495_s3 + $0x98] sm:$0xff] }
 0x2e4   : > { %v5913_v26 = vor.u32 %v5912_v37, %v5909_v7 }
 0x2e5   : > { %v4629_v20 = vpop.permute.xlu0 %4628  ;;  %v15220_v47 = vrot.slane %v4961_v3, 5  ;;  %6719 = vmatpush.bf16.msra.mxu3 %v11130_v31  ;;  %v11129_v3 = vld [vmem:[%s17495_s3 + $0xa0] sm:$0xff]  ;;  %v3944_v4 = vpack.c.bf16 %v3911_v11, %v3911_v11  ;;  %v11120_v31 = vld [vmem:[%s17495_s3 + $0x58] sm:$0xff]  ;;  %v11127_v11 = vld [vmem:[%s17495_s3 + $0x90] sm:$0xff] }
 0x2e6   : > { %v5296_v5 = vsel %vm3365_vm3, %v4374_v19, %v4629_v20  ;;  %v15193_v42 = vsel %vm3365_vm3, %v5109_v2, %v4629_v20  ;;  %v15224_v2 = vpop.permute.xlu2 %2471  ;;  %v18168_v20 = vld [vmem:[#allocation62_spill] sm:$0xff]  ;;  %6629 = vmatpush.bf16.msrb.mxu2 %v11123_v27  ;;  %v15252_v41 = vsel %vm3413_vm6, %v5913_v26, %v15222_v33 }
 0x2e7   : > { %v6088_v22 = vshrl.u32 %v5296_v5, 16  ;;  %v6091_v24 = vshll.u32 %v5296_v5, 16  ;;  %v3910_v5 = vmul.f32 %v15047_v40, %v18168_v20  ;;  %v4358_v37 = vunpack.c.l.b16 %v3944_v4 }
 0x2e9   : > { %v6090_v36 = vrot.slane %v6088_v22, 3  ;;  %v6093_v39 = vrot.slane %v6091_v24, 4  ;;  %4859 = vrot.lane.b32.xlu0 %v4829_v46, %s11591_s21  ;;  %v4992_v22 = vsel %vm2405_vm7, %v4989_v38, %v15220_v47  ;;  %v15241_v24 = vpop.f32.mrf.mxu1  ;;  %v4990_v46 = vsel %vm2405_vm7, %v15066_v60, %v4989_v38  ;;  %6720 = vmatpush.bf16.msra.mxu3 %v11129_v3 }
 0x2ea   : > { %4857 = vrot.lane.b32.xlu1 %v4828_v57, %s11591_s21  ;;  %v15248_v57 = vsel %vm3413_vm6, %v15162_v51, %v5913_v26  ;;  %v3943_v53 = vpack.c.bf16 %v3910_v5, %v3910_v5  ;;  %v11121_v51 = vld [vmem:[%s17495_s3 + $0x60] sm:$0xff]  ;;  %v5108_v60 = vpack.c.b16 %v5087_v45, %v5086_v62 }
 0x2eb   : > { %v15215_v19 = vor.u32 %v6093_v39, %v6090_v36  ;;  %v18170_v36 = vld [vmem:[#allocation80_spill] sm:$0xff] }
 0x2ec   : > { %v4357_v7 = vunpack.c.l.b16 %v3943_v53  ;;  %v1438_v39 = vmul.f32 %v18090_v32, %v18170_v36  ;;  %v5429_v13 = vsel %vm3365_vm3, %v5108_v60, %v15068_v8  ;;  %v11126_v36 = vld [vmem:[%s17495_s3 + $0x88] sm:$0xff] }
 0x2ed   : > { %v6095_v43 = vsel %vm3413_vm6, %v15100_v14, %v15215_v19  ;;  %v11122_v14 = vld [vmem:[%s17495_s3 + $0x68] sm:$0xff]  ;;  %v5989_v27 = vshrl.u32 %v5429_v13, 16  ;;  %v5992_v26 = vshll.u32 %v5429_v13, 16  ;;  %6721 = vmatpush.bf16.msra.mxu3 %v11128_v1  ;;  %v11125_v1 = vld [vmem:[%s17495_s3 + $0x80] sm:$0xff] }
 0x2ee   : > { %6612 = vmatmul.bf16.gmra.mxu1 %v6095_v43  ;;  %6630 = vmatpush.bf16.msrb.mxu2 %v11122_v14  ;;  %v15261_v15 = vpop.permute.xlu2 %2786  ;;  %v4375_v38 = vpack.c.b16 %v4358_v37, %v4357_v7  ;;  %v1471_v16 = vpack.c.bf16 %v1438_v39, %v1438_v39  ;;  %v11119_v14 = vld [vmem:[%s17495_s3 + $0x50] sm:$0xff]  ;;  %v11118_v39 = vld [vmem:[%s17495_s3 + $0x48] sm:$0xff] }
 0x2ef   : > { %v5991_v62 = vrot.slane %v5989_v27, 3  ;;  %v5994_v45 = vrot.slane %v5992_v26, 4 }
 0x2f0   : > { %v2046_v53 = vunpack.c.l.b16 %v1471_v16 }
 0x2f1   : > { %5025 = vrot.lane.b32.xlu0 %v4992_v22, %s11591_s21  ;;  %v15267_v29 = vpop.f32.mrf.mxu1  ;;  %v3945_v22 = vpack.c.bf16 %v3912_v58, %v3912_v58  ;;  %6722 = vmatpush.bf16.msra.mxu3 %v11127_v11  ;;  %v15295_v13 = vor.u32 %v5994_v45, %v5991_v62  ;;  %v11134_v45 = vld [vmem:[%s17495_s3 + $0xc8] sm:$0xff] }
 0x2f2   : > { %5023 = vrot.lane.b32.xlu1 %v4990_v46, %s11591_s21  ;;  %6631 = vmatpush.bf16.msrb.mxu2 %v11121_v51  ;;  %18171 = vst [vmem:[#allocation75_spill] sm:$0xff] %v15267_v29  ;;  %v18172_v46 = vld [vmem:[#allocation49_spill] sm:$0xff]  ;;  %v2063_v26 = vpack.c.b16 %v2046_v53, %v2046_v53  ;;  %v18187_v29 = vld [vmem:[#allocation71_spill] sm:$0xff] }
 0x2f3   : > { %v4359_v7 = vunpack.c.l.b16 %v3945_v22  ;;  %v15311_v22 = vsel %vm3413_vm6, %v15222_v33, %v15295_v13  ;;  %6812 = vmatpush.bf16.msrb.mxu0 %v11134_v45  ;;  %v11133_v33 = vld [vmem:[%s17495_s3 + $0xc0] sm:$0xff] }
 0x2f5   : > { %6723 = vmatpush.bf16.msra.mxu3 %v11126_v36 }
 0x2f6   : > { %6632 = vmatpush.bf16.msrb.mxu2 %v11120_v31  ;;  %v3102_v51 = vpop.permute.xlu2 %3101  ;;  %v11117_v31 = vld [vmem:[%s17495_s3 + $0x40] sm:$0xff] }
 0x2f7   : > { %6813 = vmatpush.bf16.msrb.mxu0 %v11133_v33 }
 0x2f9   : > { %v15297_v58 = vpop.f32.mrf.mxu1  ;;  %6724 = vmatpush.bf16.msra.mxu3 %v11125_v1 }
 0x2fa   : > { %6633 = vmatpush.bf16.msrb.mxu2 %v11119_v14  ;;  %18173 = vst [vmem:[#allocation89_spill] sm:$0xff] %v15297_v58 }
 0x2fb   : > { %v4633_v43 = vpop.permute.xlu0 %4632 }
 0x2fc   : > { %v15277_v5 = vpop.permute.xlu1 %4630 }
 0x2fd   : > { %v5299_v8 = vsel %vm3365_vm3, %v4375_v38, %v15277_v5 }
 0x2fe   : > { %10615 = vmatmul.msk.bf16.vlgmr.msrb.gmra.mxu1 %vm3365_vm3, %v18172_v46  ;;  %v6129_v3 = vshrl.u32 %v5299_v8, 16  ;;  %v6132_v4 = vshll.u32 %v5299_v8, 16  ;;  %6634 = vmatpush.bf16.msrb.mxu2 %v11118_v39  ;;  %v4376_v8 = vpack.c.b16 %v4359_v7, %v4359_v7 }
 0x300   : > { %v6131_v60 = vrot.slane %v6129_v3, 3  ;;  %v6134_v37 = vrot.slane %v6132_v4, 4  ;;  %v5302_v46 = vsel %vm3365_vm3, %v4376_v8, %v4633_v43  ;;  %v4998_v3 = vpop.permute.xlu2 %4997 }
 0x301   : > { %v6170_v53 = vshrl.u32 %v5302_v46, 16  ;;  %v15322_v43 = vpop.f32.mrf.mxu1 }
 0x302   : > { %v6135_v16 = vor.u32 %v6134_v37, %v6131_v60  ;;  %6635 = vmatpush.bf16.msrb.mxu2 %v11117_v31  ;;  %18174 = vst [vmem:[#allocation55_spill] sm:$0xff] %v15322_v43  ;;  %v18175_v37 = vld [vmem:[#allocation111_spill] sm:$0xff] }
 0x303   : > { %v2589_v27 = vpop.permute.xlu0 %2588  ;;  %v6172_v36 = vrot.slane %v6170_v53, 3 }
 0x304   : > { %v2321_v38 = vpop.permute.xlu1 %2320  ;;  %v6136_v14 = vsel %vm3413_vm6, %v15215_v19, %v6135_v16  ;;  %v6173_v19 = vshll.u32 %v5302_v46, 16 }
 0x305   : > { %v3154_v11 = vsel %vm3103_vm8, %v2063_v26, %v2321_v38  ;;  %6617 = vmatmul.bf16.vlgmr.msra.gmra.mxu2 %v6136_v14  ;;  %v4154_v26 = vld [vmem:[#allocation2 + $0x10] sm:$0x8]  ;;  %vm18184_vm8 = vmmov %vm17912_vm5 }
 0x306   : > { %v3189_v62 = vsel %vm3155_vm10, %v3154_v11, %v15224_v2  ;;  %v6175_v39 = vrot.slane %v6173_v19, 4  ;;  %v4157_v1 = vunpack.c.l.bf16 %v4154_v26  ;;  %v18180_v26 = vld [vmem:[#allocation101_spill] sm:$0xff] }
 0x307   : > { %v3224_v7 = vsel %vm3190_vm11, %v3189_v62, %v2589_v27  ;;  %v18176_v27 = vld [vmem:[#allocation96_spill] sm:$0xff]  ;;  %v18177_v62 = vld [vmem:[#allocation19_spill] sm:$0xff] }
 0x308   : > { %v6176_v8 = vor.u32 %v6175_v39, %v6172_v36  ;;  %v4161_v46 = vmul.f32 %v18176_v27, %v18109_v17  ;;  %v5356_v45 = vsel %vm3365_vm3, %v18177_v62, %v4998_v3  ;;  %v4160_v33 = vmul.f32 %v4157_v1, %v18108_v63 }
 0x309   : > { %v5549_v17 = vshrl.u32 %v5356_v45, 16  ;;  %v5552_v39 = vshll.u32 %v5356_v45, 16 }
 0x30a   : > { %v6177_v36 = vsel %vm3413_vm6, %v6135_v16, %v6176_v8 }
 0x30b   : > { %v2904_v4 = vpop.permute.xlu0 %2903 }
 0x30c   : > { %v2637_v60 = vpop.permute.xlu1 %2636 }
 0x30d   : > { %v3259_v2 = vsel %vm3225_vm12, %v3224_v7, %v2637_v60  ;;  %v4838_v60 = vpop.permute.xlu2 %4837  ;;  %v18179_v7 = vld [vmem:[#allocation28_spill] sm:$0xff] }
 0x30e   : > { %10616 = vmatmul.msk.bf16.gmra.mxu1 %vm3365_vm3, %v18175_v37  ;;  %v3294_v38 = vsel %vm3260_vm13, %v3259_v2, %v15261_v15  ;;  %v15338_v15 = vpop.f32.mrf.mxu1  ;;  %v5311_v3 = vsel %vm3365_vm3, %v18180_v26, %v4838_v60 }
 0x30f   : > { %v3329_v14 = vsel %vm3295_vm15, %v3294_v38, %v2904_v4  ;;  %18178 = vst [vmem:[#allocation95_spill] sm:$0xff] %v15338_v15  ;;  %v4194_v38 = vpack.c.bf16 %v4161_v46, %v4161_v46  ;;  %v5604_v1 = vshrl.u32 %v5311_v3, 16  ;;  %v5607_v27 = vshll.u32 %v5311_v3, 16  ;;  %v18181_v15 = vld [vmem:[#allocation67_spill] sm:$0xff] }
 0x311   : > { %v5065_v45 = vunpack.c.l.b16 %v4194_v38 }
 0x313   : > { %v4834_v31 = vpop.permute.xlu0 %4833 }
 0x314   : > { %v2952_v11 = vpop.permute.xlu1 %2951  ;;  %v5305_v2 = vsel %vm3365_vm3, %v18179_v7, %v4834_v31  ;;  %v4193_v31 = vpack.c.bf16 %v4160_v33, %v4160_v33  ;;  %v5551_v7 = vrot.slane %v5549_v17, 3  ;;  %v18185_v33 = vld [vmem:[#allocation56_spill] sm:$0xff]  ;;  %v5609_v17 = vrot.slane %v5607_v27, 4 }
 0x315   : > { %v3364_v53 = vsel %vm3330_vm1, %v3329_v14, %v2952_v11  ;;  %6622 = vmatmul.bf16.gmra.mxu2 %v6177_v36  ;;  %v5534_v14 = vshrl.u32 %v5305_v2, 16  ;;  %v5537_v63 = vshll.u32 %v5305_v2, 16  ;;  %v18182_v36 = vld [vmem:[#allocation29_spill] sm:$0xff] }
 0x316   : > { %v3399_v19 = vsel %vm3365_vm3, %v3364_v53, %v3102_v51 }
 0x317   : > { %v3541_v37 = vshrl.u32 %v3399_v19, 16  ;;  %v3544_v4 = vshll.u32 %v3399_v19, 16  ;;  %v5554_v19 = vrot.slane %v5552_v39, 4  ;;  %v5539_v26 = vrot.slane %v5537_v63, 4  ;;  %v15354_v39 = vpop.f32.mrf.mxu1 }
 0x318   : > { %18186 = vst [vmem:[#allocation43_spill] sm:$0xff] %v15354_v39 }
 0x319   : > { %v3543_v11 = vrot.slane %v3541_v37, 3  ;;  %v3546_v51 = vrot.slane %v3544_v4, 4  ;;  %v18183_v37 = vld [vmem:[#allocation27_spill] sm:$0xff]  ;;  %v5536_v4 = vrot.slane %v5534_v14, 3 }
 0x31b   : > { %v3547_v62 = vor.u32 %v3546_v51, %v3543_v11  ;;  %v5000_v53 = vpop.permute.xlu0 %4999  ;;  %v5540_v14 = vor.u32 %v5539_v26, %v5536_v4 }
 0x31c   : > { %v5359_v16 = vsel %vm3365_vm3, %v18181_v15, %v5000_v53  ;;  %v4836_v8 = vpop.permute.xlu1 %4835  ;;  %v5606_v15 = vrot.slane %v5604_v1, 3 }
 0x31d   : > { %v5556_v43 = vshrl.u32 %v5359_v16, 16  ;;  %v5559_v60 = vshll.u32 %v5359_v16, 16  ;;  %v5308_v46 = vsel %vm3365_vm3, %v18182_v36, %v4836_v8  ;;  %v3548_v2 = vsel %vm3413_vm6, %v18183_v37, %v3547_v62 }
 0x31e   : > { %v5541_v3 = vshrl.u32 %v5308_v46, 16  ;;  %v5544_v11 = vshll.u32 %v5308_v46, 16  ;;  %10398 = vmatmul.msk.bf16.gmra.mxu0 %vm18184_vm8, %v3548_v2  ;;  %10617 = vmatmul.msk.bf16.gmra.mxu1 %vm3365_vm3, %v18185_v33  ;;  %v5064_v8 = vunpack.c.l.b16 %v4193_v31  ;;  %v5555_v36 = vor.u32 %v5554_v19, %v5551_v7 }
 0x31f   : > { %v5558_v38 = vrot.slane %v5556_v43, 3  ;;  %v5561_v51 = vrot.slane %v5559_v60, 4  ;;  %v5610_v58 = vor.u32 %v5609_v17, %v5606_v15  ;;  %v6030_v60 = vshrl.u32 %v15193_v42, 16  ;;  %v15364_v17 = vpop.f32.mrf.mxu1 }
 0x320   : > { %v5543_v53 = vrot.slane %v5541_v3, 3  ;;  %v5546_v16 = vrot.slane %v5544_v11, 4  ;;  %v5097_v46 = vpack.c.b16 %v5065_v45, %v5064_v8  ;;  %v6033_v31 = vshll.u32 %v15193_v42, 16  ;;  %18188 = vst [vmem:[#allocation47_spill] sm:$0xff] %v15364_v17 }
 0x321   : > { %v5562_v62 = vor.u32 %v5561_v51, %v5558_v38 }
 0x322   : > { %v5547_v63 = vor.u32 %v5546_v16, %v5543_v53  ;;  %v6035_v15 = vrot.slane %v6033_v31, 4 }
 0x323   : > { %v5002_v37 = vpop.permute.xlu0 %5001  ;;  %v5563_v2 = vsel %vm3413_vm6, %v5555_v36, %v5562_v62 }
 0x324   : > { %v5362_v1 = vsel %vm3365_vm3, %v18187_v29, %v5002_v37  ;;  %v5129_v27 = vpop.permute.xlu1 %5128  ;;  %6725 = vmatmul.bf16.vlgmr.msra.gmra.mxu3 %v5563_v2  ;;  %v5548_v43 = vsel %vm3413_vm6, %v5540_v14, %v5547_v63  ;;  %v5611_v19 = vsel %vm3413_vm6, %v5547_v63, %v5610_v58  ;;  %v6032_v29 = vrot.slane %v6030_v60, 3  ;;  %v18189_v14 = vld [vmem:[#allocation112_spill] sm:$0xff]  ;;  %v18190_v37 = vld [vmem:[#allocation113_spill] sm:$0xff]  ;;  %v5004_v60 = vpop.permute.xlu2 %5003 }
 0x325   : > { %v5407_v7 = vsel %vm3365_vm3, %v5097_v46, %v5129_v27  ;;  %v5612_v26 = vshrl.u32 %v5362_v1, 16  ;;  %v5615_v3 = vshll.u32 %v5362_v1, 16  ;;  %6636 = vmatmul.bf16.vlgmr.msrb.gmra.mxu2 %v5548_v43  ;;  %v18191_v27 = vld [vmem:[#allocation60_spill] sm:$0xff] }
 0x326   : > { %v5564_v4 = vshrl.u32 %v5407_v7, 16  ;;  %v5567_v45 = vshll.u32 %v5407_v7, 16  ;;  %v15368_v36 = vor.u32 %v6035_v15, %v6032_v29 }
 0x327   : > { %v5614_v51 = vrot.slane %v5612_v26, 3  ;;  %v5617_v53 = vrot.slane %v5615_v3, 4 }
 0x328   : > { %v5566_v11 = vrot.slane %v5564_v4, 3  ;;  %v5569_v33 = vrot.slane %v5567_v45, 4  ;;  %v15381_v26 = vsel %vm3413_vm6, %v15295_v13, %v15368_v36 }
 0x329   : > { %v5618_v43 = vor.u32 %v5617_v53, %v5614_v51 }
 0x32a   : > { %v5570_v38 = vor.u32 %v5569_v33, %v5566_v11 }
 0x32b   : > { %v4842_v16 = vpop.permute.xlu0 %4841  ;;  %v15376_v45 = vpop.f32.mrf.mxu1  ;;  %v5619_v11 = vsel %vm3413_vm6, %v5562_v62, %v5618_v43 }
 0x32c   : > { %v4840_v42 = vpop.permute.xlu1 %4839  ;;  %v5578_v8 = vsel %vm3413_vm6, %v5570_v38, %v14656_v35  ;;  %v5317_v63 = vsel %vm3365_vm3, %v18189_v14, %v4842_v16  ;;  %18192 = vst [vmem:[#allocation98_spill] sm:$0xff] %v15376_v45  ;;  %v18193_v38 = vld [vmem:[#allocation102_spill] sm:$0xff] }
 0x32d   : > { %v5314_v46 = vsel %vm3365_vm3, %v18190_v37, %v4840_v42  ;;  %v5686_v31 = vshrl.u32 %v5317_v63, 16  ;;  %v5689_v7 = vshll.u32 %v5317_v63, 16  ;;  %v5365_v51 = vsel %vm3365_vm3, %v18193_v38, %v5004_v60 }
 0x32e   : > { %v5645_v2 = vshrl.u32 %v5314_v46, 16  ;;  %v5648_v1 = vshll.u32 %v5314_v46, 16  ;;  %6814 = vmatmul.bf16.vlgmr.msrb.gmra.mxu0 %v5578_v8  ;;  %10618 = vmatmul.msk.bf16.gmra.mxu1 %vm3365_vm3, %v18191_v27  ;;  %v5653_v16 = vshrl.u32 %v5365_v51, 16  ;;  %v5656_v42 = vshll.u32 %v5365_v51, 16  ;;  %v4844_v8 = vpop.permute.xlu2 %4843  ;;  %v18195_v46 = vld [vmem:[#allocation53_spill] sm:$0xff] }
 0x32f   : > { %v5688_v33 = vrot.slane %v5686_v31, 3  ;;  %v5691_v29 = vrot.slane %v5689_v7, 4  ;;  %v18196_v7 = vld [vmem:[#allocation40_spill] sm:$0xff] }
 0x330   : > { %v5647_v4 = vrot.slane %v5645_v2, 3  ;;  %v5650_v35 = vrot.slane %v5648_v1, 4  ;;  %v5655_v37 = vrot.slane %v5653_v16, 3  ;;  %v5658_v62 = vrot.slane %v5656_v42, 4 }
 0x331   : > { %v5692_v53 = vor.u32 %v5691_v29, %v5688_v33  ;;  %v5320_v2 = vsel %vm3365_vm3, %v18195_v46, %v4844_v8  ;;  %v18198_v29 = vld [vmem:[#allocation115_spill] sm:$0xff] }
 0x332   : > { %v5651_v3 = vor.u32 %v5650_v35, %v5647_v4  ;;  %v5659_v1 = vor.u32 %v5658_v62, %v5655_v37 }
 0x333   : > { %v15388_v13 = vpop.f32.mrf.mxu1  ;;  %v5008_v16 = vpop.permute.xlu0 %5007 }
 0x334   : > { %6730 = vmatmul.bf16.gmra.mxu3 %v5619_v11  ;;  %v5652_v15 = vsel %vm3413_vm6, %v5610_v58, %v5651_v3  ;;  %v5693_v14 = vsel %vm3413_vm6, %v5651_v3, %v5692_v53  ;;  %18194 = vst [vmem:[#allocation21_spill] sm:$0xff] %v15388_v13  ;;  %v5006_v63 = vpop.permute.xlu1 %5005  ;;  %v5727_v58 = vshrl.u32 %v5320_v2, 16  ;;  %v5660_v27 = vsel %vm3413_vm6, %v5618_v43, %v5659_v1 }
 0x335   : > { %6641 = vmatmul.bf16.gmra.mxu2 %v5611_v19  ;;  %v5730_v19 = vshll.u32 %v5320_v2, 16  ;;  %v5368_v4 = vsel %vm3365_vm3, %v18196_v7, %v5006_v63  ;;  %v18200_v2 = vld [vmem:[#allocation48_spill] sm:$0xff] }
 0x336   : > { %v5729_v60 = vrot.slane %v5727_v58, 3  ;;  %v5694_v11 = vshrl.u32 %v5368_v4, 16  ;;  %v5697_v33 = vshll.u32 %v5368_v4, 16  ;;  %v5010_v4 = vpop.permute.xlu2 %5009 }
 0x337   : > { %v5732_v31 = vrot.slane %v5730_v19, 4 }
 0x338   : > { %v5696_v51 = vrot.slane %v5694_v11, 3  ;;  %v5699_v43 = vrot.slane %v5697_v33, 4 }
 0x33a   : > { %v5700_v37 = vor.u32 %v5699_v43, %v5696_v51 }
 0x33b   : > { %v15398_v35 = vpop.f32.mrf.mxu1  ;;  %v4848_v19 = vpop.permute.xlu0 %4847 }
 0x33c   : > { %18197 = vst [vmem:[#allocation20_spill] sm:$0xff] %v15398_v35  ;;  %v4846_v3 = vpop.permute.xlu1 %4845  ;;  %v5701_v46 = vsel %vm3413_vm6, %v5659_v1, %v5700_v37 }
 0x33e   : > { %6819 = vmatmul.bf16.gmra.mxu0 %v14681_v48  ;;  %10619 = vmatmul.msk.bf16.gmra.mxu1 %vm3365_vm3, %v14668_v21  ;;  %v5733_v48 = vor.u32 %v5732_v31, %v5729_v60  ;;  %v5323_v21 = vsel %vm3365_vm3, %v18198_v29, %v4846_v3  ;;  %v18201_v31 = vld [vmem:[#allocation100_spill] sm:$0xff]  ;;  %v18203_v29 = vld [vmem:[#allocation65_spill] sm:$0xff] }
 0x33f   : > { %v5768_v42 = vshrl.u32 %v5323_v21, 16  ;;  %v5771_v8 = vshll.u32 %v5323_v21, 16  ;;  %v18204_v21 = vld [vmem:[#allocation92_spill] sm:$0xff] }
 0x340   : > { %v5734_v38 = vsel %vm3413_vm6, %v5692_v53, %v5733_v48  ;;  %v5371_v53 = vsel %vm3365_vm3, %v18200_v2, %v5008_v16  ;;  %v18207_v2 = vld [vmem:[#allocation114_spill] sm:$0xff] }
 0x341   : > { %v5773_v62 = vrot.slane %v5771_v8, 4  ;;  %v5735_v60 = vshrl.u32 %v5371_v53, 16 }
 0x343   : > { %v15406_v63 = vpop.f32.mrf.mxu1  ;;  %v5737_v3 = vrot.slane %v5735_v60, 3 }
 0x344   : > { %6735 = vmatmul.bf16.gmra.mxu3 %v5660_v27  ;;  %18199 = vst [vmem:[#allocation105_spill] sm:$0xff] %v15406_v63 }
 0x345   : > { %6646 = vmatmul.bf16.gmra.mxu2 %v5652_v15  ;;  %v5770_v15 = vrot.slane %v5768_v42, 3  ;;  %v4850_v42 = vpop.permute.xlu2 %4849 }
 0x347   : > { %v5774_v58 = vor.u32 %v5773_v62, %v5770_v15  ;;  %v18206_v15 = vld [vmem:[#allocation54_spill] sm:$0xff] }
 0x348   : > { %v5374_v62 = vsel %vm3365_vm3, %v18206_v15, %v5010_v4 }
 0x349   : > { %v5775_v27 = vsel %vm3413_vm6, %v5733_v48, %v5774_v58  ;;  %v5779_v60 = vshll.u32 %v5374_v62, 16 }
 0x34b   : > { %v15414_v7 = vpop.f32.mrf.mxu1 }
 0x34c   : > { %18202 = vst [vmem:[#allocation18_spill] sm:$0xff] %v15414_v7 }
 0x34e   : > { %6824 = vmatmul.bf16.gmra.mxu0 %v14772_v54  ;;  %10620 = vmatmul.msk.bf16.gmra.mxu1 %vm3365_vm3, %v14721_v55  ;;  %v5738_v54 = vshll.u32 %v5371_v53, 16  ;;  %v5326_v55 = vsel %vm3365_vm3, %v18201_v31, %v4848_v19  ;;  %v5329_v53 = vsel %vm3365_vm3, %v18207_v2, %v4850_v42  ;;  %v5776_v19 = vshrl.u32 %v5374_v62, 16 }
 0x34f   : > { %v5809_v1 = vshrl.u32 %v5326_v55, 16  ;;  %v5812_v33 = vshll.u32 %v5326_v55, 16  ;;  %v5850_v31 = vshrl.u32 %v5329_v53, 16 }
 0x350   : > { %v5740_v11 = vrot.slane %v5738_v54, 4  ;;  %v4249_v54 = vmul.f32 %v14995_v50, %v18063_v49  ;;  %v5778_v4 = vrot.slane %v5776_v19, 3  ;;  %v18213_v19 = vld [vmem:[#allocation74_spill] sm:$0xff] }
 0x351   : > { %v5811_v48 = vrot.slane %v5809_v1, 3  ;;  %v5814_v43 = vrot.slane %v5812_v33, 4  ;;  %v5852_v1 = vrot.slane %v5850_v31, 3  ;;  %v18214_v31 = vld [vmem:[#allocation35_spill] sm:$0xff] }
 0x352   : > { %v5741_v51 = vor.u32 %v5740_v11, %v5737_v3  ;;  %v4248_v3 = vmul.f32 %v14958_v61, %v18061_v44  ;;  %v5781_v11 = vrot.slane %v5779_v60, 4  ;;  %v18211_v44 = vld [vmem:[#allocation50_spill] sm:$0xff]  ;;  %v3971_v60 = vmul.f32 %v14861_v34, %v18213_v19 }
 0x353   : > { %v15419_v16 = vpop.f32.mrf.mxu1  ;;  %v5815_v8 = vor.u32 %v5814_v43, %v5811_v48  ;;  %v5012_v48 = vpop.permute.xlu1 %5011 }
 0x354   : > { %6740 = vmatmul.bf16.gmra.mxu3 %v5701_v46  ;;  %18205 = vst [vmem:[#allocation106_spill] sm:$0xff] %v15419_v16  ;;  %v5782_v49 = vor.u32 %v5781_v11, %v5778_v4  ;;  %v5377_v62 = vsel %vm3365_vm3, %v18211_v44, %v5012_v48  ;;  %v4251_v4 = vmul.f32 %v14990_v9, %v18213_v19  ;;  %v18217_v44 = vld [vmem:[#allocation57_spill] sm:$0xff]  ;;  %v18219_v16 = vld [vmem:[#allocation42_spill] sm:$0xff] }
 0x355   : > { %6651 = vmatmul.bf16.gmra.mxu2 %v5693_v14  ;;  %v5742_v14 = vsel %vm3413_vm6, %v5700_v37, %v5741_v51  ;;  %v15425_v46 = vsel %vm3413_vm6, %v5774_v58, %v5815_v8  ;;  %v5853_v37 = vshll.u32 %v5329_v53, 16  ;;  %v4282_v58 = vpack.c.bf16 %v4249_v54, %v4249_v54 }
 0x356   : > { %v5783_v42 = vsel %vm3413_vm6, %v5741_v51, %v5782_v49  ;;  %v5820_v51 = vshll.u32 %v5377_v62, 16  ;;  %v4004_v11 = vpack.c.bf16 %v3971_v60, %v3971_v60  ;;  %v4284_v34 = vpack.c.bf16 %v4251_v4, %v4251_v4  ;;  %v18218_v60 = vld [vmem:[#allocation33_spill] sm:$0xff] }
 0x357   : > { %v5855_v33 = vrot.slane %v5853_v37, 4  ;;  %v5190_v43 = vunpack.c.l.b16 %v4282_v58  ;;  %v3970_v37 = vmul.f32 %v14856_v18, %v18214_v31  ;;  %v5014_v18 = vpop.permute.xlu0 %5013 }
 0x358   : > { %v4690_v48 = vunpack.c.l.b16 %v4004_v11 }
 0x35e   : > { %6829 = vmatmul.bf16.gmra.mxu0 %v18203_v29  ;;  %10621 = vmatmul.msk.bf16.gmra.mxu1 %vm3365_vm3, %v18204_v21  ;;  %v18209_v29 = vld [vmem:[#allocation97_spill] sm:$0xff]  ;;  %v4281_v21 = vpack.c.bf16 %v4248_v3, %v4248_v3  ;;  %v5817_v3 = vshrl.u32 %v5377_v62, 16 }
 0x360   : > { %v5189_v15 = vunpack.c.l.b16 %v4281_v21  ;;  %v15457_v21 = vpop.permute.xlu2 %5015 }
 0x362   : > { %v5212_v54 = vpack.c.b16 %v5190_v43, %v5189_v15  ;;  %v18215_v43 = vld [vmem:[#allocation64_spill] sm:$0xff]  ;;  %v18216_v15 = vld [vmem:[#allocation90_spill] sm:$0xff] }
 0x364   : > { %6745 = vmatmul.bf16.gmra.mxu3 %v5742_v14  ;;  %v15438_v14 = vor.u32 %v5855_v33, %v5852_v1  ;;  %v5238_v58 = vrot.slane %v5212_v54, 5  ;;  %v4250_v1 = vmul.f32 %v14997_v12, %v18214_v31  ;;  %v5819_v33 = vrot.slane %v5817_v3, 3 }
 0x365   : > { %6656 = vmatmul.bf16.gmra.mxu2 %v5734_v38  ;;  %v18210_v38 = vld [vmem:[#allocation87_spill] sm:$0xff] }
 0x366   : > { %v15447_v53 = vsel %vm3413_vm6, %v5815_v8, %v15438_v14  ;;  %v4003_v8 = vpack.c.bf16 %v3970_v37, %v3970_v37  ;;  %v4283_v62 = vpack.c.bf16 %v4250_v1, %v4250_v1 }
 0x368   : > { %v4689_v19 = vunpack.c.l.b16 %v4003_v8 }
 0x36a   : > { %v4711_v4 = vpack.c.b16 %v4690_v48, %v4689_v19  ;;  %v4854_v48 = vpop.permute.xlu0 %4853 }
 0x36b   : > { %v15431_v55 = vpop.f32.mrf.mxu1 }
 0x36c   : > { %18208 = vst [vmem:[#allocation39_spill] sm:$0xff] %v15431_v55  ;;  %v15471_v7 = vrot.slane %v4711_v4, 5 }
 0x36e   : > { %6834 = vmatmul.bf16.gmra.mxu0 %v18209_v29  ;;  %10622 = vmatmul.msk.bf16.gmra.mxu1 %vm3365_vm3, %v18210_v38  ;;  %v5822_v29 = vrot.slane %v5820_v51, 4  ;;  %v4852_v38 = vpop.permute.xlu1 %4851  ;;  %v5192_v51 = vunpack.c.l.b16 %v4284_v34 }
 0x36f   : > { %v5332_v54 = vsel %vm3365_vm3, %v18218_v60, %v4852_v38  ;;  %v18221_v60 = vld [vmem:[#allocation70_spill] sm:$0xff] }
 0x370   : > { %v5823_v31 = vor.u32 %v5822_v29, %v5819_v33  ;;  %v5891_v11 = vshrl.u32 %v5332_v54, 16  ;;  %v4856_v29 = vpop.permute.xlu2 %4855 }
 0x372   : > { %v5824_v55 = vsel %vm3413_vm6, %v5782_v49, %v5823_v31  ;;  %v5893_v38 = vrot.slane %v5891_v11, 3 }
 0x373   : > { %v15443_v2 = vpop.f32.mrf.mxu1 }
 0x374   : > { %18212 = vst [vmem:[#allocation104_spill] sm:$0xff] %v15443_v2  ;;  %6750 = vmatmul.bf16.gmra.mxu3 %v5783_v42  ;;  %v5894_v2 = vshll.u32 %v5332_v54, 16 }
 0x375   : > { %6661 = vmatmul.bf16.gmra.mxu2 %v5775_v27  ;;  %v5239_v27 = vsel %vm2405_vm7, %v18215_v43, %v5238_v58  ;;  %v5191_v43 = vunpack.c.l.b16 %v4283_v62 }
 0x376   : > { %v5957_v37 = vshrl.u32 %v5239_v27, 16  ;;  %v5960_v3 = vshll.u32 %v5239_v27, 16  ;;  %v5896_v33 = vrot.slane %v5894_v2, 4  ;;  %v5335_v2 = vsel %vm3365_vm3, %v18221_v60, %v4854_v48 }
 0x377   : > { %v5213_v8 = vpack.c.b16 %v5192_v51, %v5191_v43 }
 0x378   : > { %v5962_v1 = vrot.slane %v5960_v3, 4  ;;  %v5897_v54 = vor.u32 %v5896_v33, %v5893_v38 }
 0x379   : > { %v15476_v62 = vrot.slane %v5213_v8, 5 }
 0x37b   : > { %v15461_v42 = vpop.f32.mrf.mxu1 }
 0x37e   : > { %6839 = vmatmul.bf16.gmra.mxu0 %v18216_v15  ;;  %10623 = vmatmul.msk.bf16.gmra.mxu1 %vm3365_vm3, %v18217_v44  ;;  %v5380_v15 = vsel %vm3365_vm3, %v18219_v16, %v5014_v18  ;;  %v5959_v44 = vrot.slane %v5957_v37, 3  ;;  %v18220_v16 = vld [vmem:[#allocation32_spill] sm:$0xff] }
 0x37f   : > { %v5858_v27 = vshrl.u32 %v5380_v15, 16  ;;  %v5861_v34 = vshll.u32 %v5380_v15, 16  ;;  %v18222_v37 = vld [vmem:[#allocation44_spill] sm:$0xff]  ;;  %v5241_v15 = vsel %vm2405_vm7, %v5238_v58, %v15476_v62 }
 0x380   : > { %v5963_v49 = vor.u32 %v5962_v1, %v5959_v44  ;;  %v4253_v3 = vmul.f32 %v15047_v40, %v18222_v37  ;;  %v15494_v44 = vsel %vm3413_vm6, %v15438_v14, %v5897_v54  ;;  %v18225_v1 = vld [vmem:[#allocation36_spill] sm:$0xff]  ;;  %v6001_v60 = vshll.u32 %v5241_v15, 16 }
 0x381   : > { %v5860_v51 = vrot.slane %v5858_v27, 3  ;;  %v5863_v4 = vrot.slane %v5861_v34, 4  ;;  %v4252_v8 = vmul.f32 %v15129_v28, %v18225_v1  ;;  %v5935_v27 = vshll.u32 %v5335_v2, 16  ;;  %v18226_v34 = vld [vmem:[#allocation107_spill] sm:$0xff] }
 0x382   : > { %v4286_v48 = vpack.c.bf16 %v4253_v3, %v4253_v3 }
 0x383   : > { %v15473_v19 = vpop.f32.mrf.mxu1  ;;  %v4285_v58 = vpack.c.bf16 %v4252_v8, %v4252_v8  ;;  %v5937_v63 = vrot.slane %v5935_v27, 4  ;;  %v4254_v8 = vmul.f32 %v15049_v25, %v18165_v56 }
 0x384   : > { %6755 = vmatmul.bf16.gmra.mxu3 %v5824_v55  ;;  %v4739_v55 = vsel %vm2405_vm7, %v18220_v16, %v15471_v7  ;;  %v5864_v16 = vor.u32 %v5863_v4, %v5860_v51  ;;  %v5194_v13 = vunpack.c.l.b16 %v4286_v48 }
 0x385   : > { %6666 = vmatmul.bf16.gmra.mxu2 %v15425_v46  ;;  %v5338_v18 = vsel %vm3365_vm3, %v4739_v55, %v4856_v29  ;;  %v18224_v46 = vld [vmem:[#allocation31_spill] sm:$0xff]  ;;  %v5932_v29 = vshrl.u32 %v5335_v2, 16  ;;  %v5998_v55 = vshrl.u32 %v5241_v15, 16  ;;  %v4255_v2 = vmul.f32 %v15146_v10, %v18163_v30 }
 0x386   : > { %v5964_v43 = vsel %vm3413_vm6, %v18224_v46, %v5963_v49  ;;  %v5973_v38 = vshrl.u32 %v5338_v18, 16  ;;  %v5976_v33 = vshll.u32 %v5338_v18, 16  ;;  %v5865_v18 = vsel %vm3413_vm6, %v5823_v31, %v5864_v16 }
 0x387   : > { %v5934_v14 = vrot.slane %v5932_v29, 3  ;;  %v6000_v3 = vrot.slane %v5998_v55, 3  ;;  %v5193_v51 = vunpack.c.l.b16 %v4285_v58  ;;  %v4288_v27 = vpack.c.bf16 %v4255_v2, %v4255_v2 }
 0x388   : > { %v15486_v11 = vpop.f32.mrf.mxu2  ;;  %v5975_v46 = vrot.slane %v5973_v38, 3  ;;  %v18228_v38 = vld [vmem:[#allocation99_spill] sm:$0xff]  ;;  %v4287_v55 = vpack.c.bf16 %v4254_v8, %v4254_v8 }
 0x389   : > { %18223 = vst [vmem:[#allocation103_spill] sm:$0xff] %v15486_v11  ;;  %v5978_v11 = vrot.slane %v5976_v33, 4  ;;  %v5938_v15 = vor.u32 %v5937_v63, %v5934_v14  ;;  %v5383_v33 = vsel %vm3365_vm3, %v18228_v38, %v15457_v21  ;;  %v5214_v29 = vpack.c.b16 %v5194_v13, %v5193_v51  ;;  %v11515_v14 = vld [vmem:[%s17494_s2] ss:$0 sm:$0xff]  ;;  %v5018_v38 = vpop.permute.xlu1 %5017 }
 0x38a   : > { %v5902_v63 = vshll.u32 %v5383_v33, 16  ;;  %v5196_v21 = vunpack.c.l.b16 %v4288_v27  ;;  %v5195_v51 = vunpack.c.l.b16 %v4287_v55  ;;  %v18231_v55 = vld [vmem:[#allocation30_spill] sm:$0xff] }
 0x38b   : > { %v15500_v35 = vpop.f32.mrf.mxu1  ;;  %v15507_v4 = vor.u32 %v5978_v11, %v5975_v46  ;;  %v15520_v11 = vsel %vm3413_vm6, %v5897_v54, %v5938_v15 }
 0x38c   : > { %v5904_v2 = vrot.slane %v5902_v63, 4 }
 0x38d   : > { %v15516_v31 = vsel %vm3413_vm6, %v5938_v15, %v15507_v4 }
 0x38e   : > { %6844 = vmatmul.bf16.gmra.mxu0 %v18226_v34  ;;  %10624 = vmatmul.msk.bf16.gmra.mxu1 %vm3365_vm3, %v5964_v43  ;;  %v6003_v43 = vrot.slane %v6001_v60, 4  ;;  %v5899_v34 = vshrl.u32 %v5383_v33, 16  ;;  %v5242_v60 = vrot.slane %v5214_v29, 5 }
 0x390   : > { %v15502_v45 = vpop.f32.mrf.mxu2  ;;  %v6004_v48 = vor.u32 %v6003_v43, %v6000_v3  ;;  %v5243_v3 = vsel %vm2405_vm7, %v15476_v62, %v5242_v60  ;;  %v5215_v43 = vpack.c.b16 %v5196_v21, %v5195_v51  ;;  %v5386_v62 = vsel %vm3365_vm3, %v18231_v55, %v5018_v38 }
 0x391   : > { %18227 = vst [vmem:[#allocation109_spill] sm:$0xff] %v15502_v45  ;;  %v6039_v29 = vshrl.u32 %v5243_v3, 16  ;;  %v6042_v27 = vshll.u32 %v5243_v3, 16  ;;  %v3973_v21 = vmul.f32 %v14995_v50, %v18222_v37  ;;  %v5940_v51 = vshrl.u32 %v5386_v62, 16 }
 0x392   : > { %v6005_v54 = vsel %vm3413_vm6, %v5963_v49, %v6004_v48  ;;  %v15541_v63 = vrot.slane %v5215_v43, 5  ;;  %v3972_v3 = vmul.f32 %v14958_v61, %v18225_v1  ;;  %v4050_v38 = vmul.f32 %v15146_v10, %v18168_v20  ;;  %v18241_v20 = vld [vmem:[#allocation85_spill] sm:$0xff] }
 0x393   : > { %v15524_v13 = vpop.f32.mrf.mxu1  ;;  %v4006_v37 = vpack.c.bf16 %v3973_v21, %v3973_v21  ;;  %v5942_v61 = vrot.slane %v5940_v51, 3 }
 0x394   : > { %6760 = vmatmul.bf16.gmra.mxu3 %v5865_v18  ;;  %v5245_v43 = vsel %vm2405_vm7, %v5242_v60, %v15541_v63  ;;  %v4005_v55 = vpack.c.bf16 %v3972_v3, %v3972_v3  ;;  %v18233_v3 = vld [vmem:[#allocation22_spill] sm:$0xff] }
 0x395   : > { %6671 = vmatmul.bf16.gmra.mxu2 %v15447_v53  ;;  %v5901_v53 = vrot.slane %v5899_v34, 3 }
 0x397   : > { %v15534_v33 = vor.u32 %v5904_v2, %v5901_v53  ;;  %v6044_v53 = vrot.slane %v6042_v27, 4  ;;  %v15550_v2 = vld [vmem:[%s17496_s4] ss:$0 sm:$0xff] }
 0x398   : > { %v15522_v58 = vpop.f32.mrf.mxu2 }
 0x399   : > { %18229 = vst [vmem:[#allocation108_spill] sm:$0xff] %v15522_v58 }
 0x39b   : > { %v3713_v46 = vpop.f32.mrf.mxu0 }
 0x39c   : > { %v3714_v18 = vadd.f32 %v11515_v14, %v3713_v46 }
 0x39e   : > { %v3748_v15 = vmax.f32 %v3714_v18, 0.0  ;;  %6849 = vmatmul.bf16.gmra.mxu0 %v15179_v6  ;;  %10625 = vmatmul.msk.bf16.gmra.mxu1 %vm3365_vm3, %v6005_v54  ;;  %v5906_v6 = vsel %vm3413_vm6, %v5864_v16, %v15534_v33  ;;  %v6041_v18 = vrot.slane %v6039_v29, 3  ;;  %v15552_v54 = vpop.f32.mrf.mxu1  ;;  %v18232_v29 = vld [vmem:[#allocation66_spill] sm:$0xff] }
 0x39f   : > { %v6549_v27 = vadd.f32 %v15550_v2, %v18232_v29 }
 0x3a0   : > { %v3780_v8 = vpack.c.bf16 %v3748_v15, %v3748_v15  ;;  %v15537_v34 = vpop.f32.mrf.mxu2  ;;  %v5943_v15 = vshll.u32 %v5386_v62, 16 }
 0x3a1   : > { %18230 = vst [vmem:[#allocation38_spill] sm:$0xff] %v15537_v34  ;;  %v18238_v34 = vld [vmem:[#allocation88_spill] sm:$0xff] }
 0x3a2   : > { %3812 = vst.msk [vmem:[#allocation2 + $0x84] sm:$0xf] %vm1164_vm14, %v3780_v8  ;;  %v6045_v8 = vor.u32 %v6044_v53, %v6041_v18  ;;  %v5945_v1 = vrot.slane %v5943_v15, 4  ;;  %v4083_v18 = vpack.c.bf16 %v4050_v38, %v4050_v38 }
 0x3a3   : > { %v3715_v49 = vpop.f32.mrf.mxu0 }
 0x3a4   : > { %v3716_v46 = vadd.f32 %v11515_v14, %v3715_v49  ;;  %6765 = vmatmul.bf16.gmra.mxu3 %v5906_v6  ;;  %v6080_v49 = vshrl.u32 %v5245_v43, 16  ;;  %v6083_v6 = vshll.u32 %v5245_v43, 16  ;;  %v6046_v21 = vsel %vm3413_vm6, %v6004_v48, %v6045_v8  ;;  %v18234_v48 = vld [vmem:[#allocation68_spill] sm:$0xff] }
 0x3a5   : > { %6676 = vmatmul.bf16.gmra.mxu2 %v15494_v44  ;;  %v15564_v44 = vunpack.c.l.b16 %v4006_v37  ;;  %v15569_v43 = vunpack.c.l.b16 %v4005_v55  ;;  %v15571_v15 = vor.u32 %v5945_v1, %v5942_v61  ;;  %v15577_v37 = vmul.f32 %v14997_v12, %v18165_v56 }
 0x3a6   : > { %v3749_v16 = vmax.f32 %v3716_v46, 0.0  ;;  %v6085_v29 = vrot.slane %v6083_v6, 4  ;;  %v15587_v61 = vmul.f32 %v14990_v9, %v18163_v30 }
 0x3a7   : > { %v6726_v14 = vpop.f32.mrf.mxu3  ;;  %v5947_v9 = vsel %vm3413_vm6, %v15534_v33, %v15571_v15 }
 0x3a8   : > { %v3781_v50 = vpack.c.bf16 %v3749_v16, %v3749_v16  ;;  %v6637_v62 = vpop.f32.mrf.mxu2  ;;  %v5020_v16 = vpop.permute.xlu0 %5019 }
 0x3a9   : > { %v6638_v46 = vadd.f32 %v6637_v62, %v6549_v27  ;;  %v6551_v27 = vadd.f32 %v15550_v2, %v18233_v3  ;;  %v4813_v62 = vunpack.c.l.b16 %v4083_v18 }
 0x3aa   : > { %3813 = vst.msk [vmem:[#allocation2 + $0x88] sm:$0xf] %vm1164_vm14, %v3781_v50  ;;  %v6082_v50 = vrot.slane %v6080_v49, 3  ;;  %v18235_v49 = vld [vmem:[#allocation37_spill] sm:$0xff] }
 0x3ab   : > { %v6815_v60 = vpop.f32.mrf.mxu0  ;;  %v6727_v53 = vadd.f32 %v6726_v14, %v6638_v46  ;;  %v5389_v14 = vsel %vm3365_vm3, %v18234_v48, %v5020_v16  ;;  %v6554_v6 = vadd.f32 %v15550_v2, %v18235_v49 }
 0x3ac   : > { %v5984_v49 = vshll.u32 %v5389_v14, 16 }
 0x3ad   : > { %v6816_v38 = vadd.f32 %v6815_v60, %v6727_v53  ;;  %v15596_v60 = vor.u32 %v6085_v29, %v6082_v50  ;;  %v18237_v50 = vld [vmem:[#allocation86_spill] sm:$0xff] }
 0x3ae   : > { %6854 = vmatmul.bf16.gmra.mxu0 %v15248_v57  ;;  %10626 = vmatmul.msk.bf16.gmra.mxu1 %vm3365_vm3, %v6046_v21  ;;  %v15581_v57 = vpop.f32.mrf.mxu1  ;;  %v5981_v21 = vshrl.u32 %v5389_v14, 16 }
 0x3af   : > { %v6728_v51 = vpop.f32.mrf.mxu3  ;;  %v6905_v56 = vadd.f32 %v15461_v42, %v6816_v38 }
 0x3b0   : > { %v6639_v53 = vpop.f32.mrf.mxu2 }
 0x3b1   : > { %v4015_v55 = vld [vmem:[#allocation2 + $0x84] sm:$0xff]   ;;  %v6984_v18 = vmax.f32 %v6905_v56, 0.0  ;;  %v6640_v1 = vadd.f32 %v6639_v53, %v6551_v27  ;;  %v6087_v27 = vsel %vm3413_vm6, %v6045_v8, %v15596_v60 }
 0x3b2   : > { %v11107_v12 = vld [vmem:[#allocation2 + $0x84] sm:$0xff]  ;;  %v15592_v46 = vunpack.c.l.bf16 %v4015_v55  ;;  %v15594_v16 = vunpack.c.h.bf16 %v4015_v55 }
 0x3b3   : > { %v6817_v3 = vpop.f32.mrf.mxu0  ;;  %v4873_v30 = vshrl.u32 %v11107_v12, 16  ;;  %v4876_v48 = vshll.u32 %v11107_v12, 16  ;;  %7016 = vst.msk [vmem:[#allocation3] sm:$0xff] %vm3365_vm3, %v6984_v18  ;;  %v6729_v33 = vadd.f32 %v6728_v51, %v6640_v1  ;;  %v5983_v12 = vrot.slane %v5981_v21, 3  ;;  %v11108_v18 = vld [vmem:[#allocation2 + $0x8c] sm:$0xff] }
 0x3b4   : > { %18236 = vst [vmem:[#allocation51_spill] sm:$0xff] %v15592_v46  ;;  %v4051_v42 = vmul.f32 %v15592_v46, %v18169_v52  ;;  %6770 = vmatmul.bf16.gmra.mxu3 %v5947_v9  ;;  %v4118_v29 = vmul.f32 %v15592_v46, %v18237_v50  ;;  %v4119_v58 = vmul.f32 %v15594_v16, %v18238_v34  ;;  %v4086_v51 = vld [vmem:[#allocation2 + $0x8c] sm:$0x1]  ;;  %v5123_v52 = vshll.u32 %v11108_v18, 16 }
 0x3b5   : > { %v4875_v38 = vrot.slane %v4873_v30, 4  ;;  %v4878_v55 = vrot.slane %v4876_v48, 5  ;;  %v4052_v14 = vmul.f32 %v15594_v16, %v18090_v32  ;;  %v5986_v48 = vrot.slane %v5984_v49, 4  ;;  %6681 = vmatmul.bf16.gmra.mxu2 %v15520_v11 }
 0x3b6   : > { %v4084_v45 = vpack.c.bf16 %v4051_v42, %v4051_v42  ;;  %v4151_v9 = vpack.c.bf16 %v4118_v29, %v4118_v29  ;;  %v4152_v30 = vpack.c.bf16 %v4119_v58, %v4119_v58  ;;  %v6818_v17 = vadd.f32 %v6817_v3, %v6729_v33  ;;  %v18239_v42 = vld [vmem:[#allocation94_spill] sm:$0xff]  ;;  %v15622_v29 = vpop.f32.mrf.mxu1 }
 0x3b7   : > { %v6731_v56 = vpop.f32.mrf.mxu3  ;;  %v15612_v53 = vor.u32 %v4878_v55, %v4875_v38  ;;  %v4256_v1 = vmul.f32 %v15592_v46, %v18166_v59  ;;  %v4087_v55 = vunpack.c.l.bf16 %v4086_v51  ;;  %v4085_v11 = vpack.c.bf16 %v4052_v14, %v4052_v14 }
 0x3b8   : > { %v4814_v39 = vunpack.c.l.b16 %v4084_v45  ;;  %v4944_v21 = vunpack.c.l.b16 %v4151_v9  ;;  %v4945_v38 = vunpack.c.l.b16 %v4152_v30  ;;  %v6907_v58 = vadd.f32 %v15473_v19, %v6818_v17  ;;  %v6642_v49 = vpop.f32.mrf.mxu2 }
 0x3b9   : > { %v15620_v8 = vsel %vm2144_vm0, %v18239_v42, %v15612_v53  ;;  %v5120_v3 = vshrl.u32 %v11108_v18, 16  ;;  %v4120_v42 = vmul.f32 %v4087_v55, %v18241_v20  ;;  %v4257_v9 = vmul.f32 %v15594_v16, %v18164_v23 }
 0x3ba   : > { %18240 = vst [vmem:[#allocation110_spill] sm:$0xff] %v15620_v8  ;;  %v4831_v45 = vpack.c.b16 %v4814_v39, %v4813_v62  ;;  %5130 = vrot.lane.b32.xlu1 %v15620_v8, %s11591_s21  ;;  %v4962_v32 = vpack.c.b16 %v4945_v38, %v4944_v21  ;;  %v6985_v30 = vmax.f32 %v6907_v58, 0.0  ;;  %v6643_v51 = vadd.f32 %v6642_v49, %v6554_v6 }
 0x3bb   : > { %v6820_v33 = vpop.f32.mrf.mxu0  ;;  %v5122_v17 = vrot.slane %v5120_v3, 4  ;;  %v4289_v39 = vpack.c.bf16 %v4256_v1, %v4256_v1  ;;  %v5125_v62 = vrot.slane %v5123_v52, 5  ;;  %v4153_v8 = vpack.c.bf16 %v4120_v42, %v4120_v42 }
 0x3bc   : > { %4863 = vrot.lane.b32.xlu2 %v4831_v45, %s11591_s21  ;;  %v4993_v19 = vrot.slane %v4962_v32, 5  ;;  %v4290_v14 = vpack.c.bf16 %v4257_v9, %v4257_v9  ;;  %7017 = vst.msk [vmem:[#allocation3 + $0x8] sm:$0xff] %vm3365_vm3, %v6985_v30  ;;  %v6732_v46 = vadd.f32 %v6731_v56, %v6643_v51  ;;  %v4815_v21 = vunpack.c.l.b16 %v4085_v11  ;;  %v5022_v45 = vpop.permute.xlu2 %5021 }
 0x3bd   : > { %v15634_v18 = vor.u32 %v5986_v48, %v5983_v12  ;;  %v5197_v38 = vunpack.c.l.b16 %v4289_v39  ;;  %v5126_v1 = vor.u32 %v5125_v62, %v5122_v17  ;;  %v4946_v32 = vunpack.c.l.b16 %v4153_v8  ;;  %v18242_v48 = vld [vmem:[#allocation63_spill] sm:$0xff]  ;;  %v4858_v39 = vpop.permute.xlu1 %4857 }
 0x3be   : > { %6859 = vmatmul.bf16.gmra.mxu0 %v15252_v41  ;;  %10627 = vmatmul.msk.bf16.gmra.mxu1 %vm3365_vm3, %v6087_v27  ;;  %v4994_v6 = vsel %vm2405_vm7, %v15220_v47, %v4993_v19  ;;  %v5198_v52 = vunpack.c.l.b16 %v4290_v14  ;;  %v6821_v58 = vadd.f32 %v6820_v33, %v6732_v46  ;;  %v4007_v56 = vpack.c.bf16 %v15577_v37, %v15577_v37  ;;  %v15661_v51 = vpop.f32.mrf.mxu1 }
 0x3bf   : > { %v6733_v55 = vpop.f32.mrf.mxu3  ;;  %5027 = vrot.lane.b32.xlu0 %v4994_v6, %s11591_s21  ;;  %v5127_v41 = vsel %vm2144_vm0, %v15612_v53, %v5126_v1  ;;  %v4963_v27 = vpack.c.b16 %v4946_v32, %v4946_v32  ;;  %v6556_v11 = vadd.f32 %v15550_v2, %v18242_v48  ;;  %v4008_v47 = vpack.c.bf16 %v15587_v61, %v15587_v61  ;;  %v18244_v61 = vld [vmem:[#allocation69_spill] sm:$0xff] }
 0x3c0   : > { %v5216_v12 = vpack.c.b16 %v5198_v52, %v5197_v38  ;;  %v6910_v8 = vadd.f32 %v15500_v35, %v6821_v58  ;;  %v4832_v46 = vpack.c.b16 %v4815_v21, %v4815_v21  ;;  %v18243_v3 = vpack.c.b16 %v15564_v44, %v15569_v43  ;;  %v6644_v49 = vpop.f32.mrf.mxu2  ;;  %v15676_v48 = vld [vmem:[#allocation2 + $0x8c] sm:$0xff]  }
 0x3c1   : > { %v5988_v42 = vsel %vm3413_vm6, %v15571_v15, %v15634_v18  ;;  %v4995_v9 = vrot.slane %v4963_v27, 5  ;;  %v5392_v35 = vsel %vm3365_vm3, %v18244_v61, %v5022_v45  ;;  %v6645_v44 = vadd.f32 %v6644_v49, %v6556_v11  ;;  %v18245_v11 = vld [vmem:[#allocation78_spill] sm:$0xff]  ;;  %v18247_v49 = vld [vmem:[#allocation79_spill] sm:$0xff] }
 0x3c2   : > { %5132 = vrot.lane.b32.xlu1 %v5127_v41, %s11591_s21  ;;  %v15652_v37 = vrot.slane %v18243_v3, 5  ;;  %v15657_v30 = vrot.slane %v5216_v12, 5  ;;  %v6986_v17 = vmax.f32 %v6910_v8, 0.0  ;;  %v4693_v43 = vunpack.c.l.b16 %v4007_v56 }
 0x3c3   : > { %v6822_v33 = vpop.f32.mrf.mxu0  ;;  %v7048_v62 = vld [vmem:[#allocation3] ss:$2 sm:$0xff]  ;;  %v7080_v14 = vld [vmem:[#allocation3 + $0x1] ss:$2 sm:$0xff]  ;;  %v6734_v38 = vadd.f32 %v6733_v55, %v6645_v44  ;;  %v6022_v52 = vshrl.u32 %v5392_v35, 16  ;;  %v4694_v58 = vunpack.c.l.b16 %v4008_v47  ;;  %v4996_v56 = vsel %vm2405_vm7, %v4993_v19, %v4995_v9 }
 0x3c4   : > { %4865 = vrot.lane.b32.xlu2 %v4832_v46, %s11591_s21  ;;  %6775 = vmatmul.bf16.gmra.mxu3 %v5988_v42  ;;  %v5247_v15 = vsel %vm2405_vm7, %v15541_v63, %v15657_v30  ;;  %v7111_v21 = vadd.f32 %v7080_v14, %v7048_v62  ;;  %7018 = vst.msk [vmem:[#allocation3 + $0x10] sm:$0xff] %vm3365_vm3, %v6986_v17  ;;  %v4158_v19 = vunpack.c.l.bf16 %v15676_v48  ;;  %v4159_v8 = vunpack.c.h.bf16 %v15676_v48  ;;  %v18246_v46 = vld [vmem:[#allocation72_spill] sm:$0xff] }
 0x3c5   : > { %v6121_v6 = vshrl.u32 %v5247_v15, 16  ;;  %v6124_v32 = vshll.u32 %v5247_v15, 16  ;;  %v4741_v45 = vsel %vm2405_vm7, %v15471_v7, %v15652_v37  ;;  %v6823_v63 = vadd.f32 %v6822_v33, %v6734_v38  ;;  %6686 = vmatmul.bf16.gmra.mxu2 %v15516_v31 }
 0x3c6   : > { %v5341_v27 = vsel %vm3365_vm3, %v4741_v45, %v4858_v39  ;;  %7127 = vst.msk [vmem:[#allocation4] sm:$0xff] %vm3365_vm3, %v7111_v21  ;;  %v4186_v47 = vmul.f32 %v15047_v40, %v18245_v11  ;;  %v6025_v7 = vshll.u32 %v5392_v35, 16  ;;  %v6559_v3 = vadd.f32 %v15550_v2, %v18246_v46  ;;  %v15699_v45 = vpop.f32.mrf.mxu1  ;;  %v5024_v11 = vpop.permute.xlu1 %5023  ;;  %v18248_v46 = vld [vmem:[#allocation25_spill] sm:$0xff] }
 0x3c7   : > { %v6736_v41 = vpop.f32.mrf.mxu3  ;;  %5029 = vrot.lane.b32.xlu0 %v4996_v56, %s11591_s21  ;;  %v6123_v55 = vrot.slane %v6121_v6, 3  ;;  %v6126_v12 = vrot.slane %v6124_v32, 4  ;;  %v4187_v31 = vmul.f32 %v15049_v25, %v18247_v49  ;;  %v6912_v33 = vadd.f32 %v15524_v13, %v6823_v63 }
 0x3c8   : > { %v6014_v9 = vshrl.u32 %v5341_v27, 16  ;;  %v6017_v61 = vshll.u32 %v5341_v27, 16  ;;  %v6647_v17 = vpop.f32.mrf.mxu2  ;;  %v4258_v44 = vmul.f32 %v4158_v19, %v18237_v50  ;;  %v4259_v39 = vmul.f32 %v4159_v8, %v18238_v34 }
 0x3c9   : > { %v15688_v42 = vor.u32 %v6126_v12, %v6123_v55  ;;  %v6024_v62 = vrot.slane %v6022_v52, 3  ;;  %v4713_v14 = vpack.c.b16 %v4694_v58, %v4693_v43  ;;  %v6987_v15 = vmax.f32 %v6912_v33, 0.0 }
 0x3ca   : > { %5134 = vrot.lane.b32.xlu1 %v5126_v1, %s11591_s21  ;;  %v6648_v13 = vadd.f32 %v6647_v17, %v6559_v3  ;;  %v6027_v21 = vrot.slane %v6025_v7, 4  ;;  %v4291_v38 = vpack.c.bf16 %v4258_v44, %v4258_v44  ;;  %v4292_v6 = vpack.c.bf16 %v4259_v39, %v4259_v39  ;;  %v18249_v44 = vld [vmem:[#allocation58_spill] sm:$0xff] }
 0x3cb   : > { %v6825_v35 = vpop.f32.mrf.mxu0  ;;  %v6128_v1 = vsel %vm3413_vm6, %v15596_v60, %v15688_v42  ;;  %v4219_v32 = vpack.c.bf16 %v4186_v47, %v4186_v47  ;;  %7019 = vst.msk [vmem:[#allocation3 + $0x18] sm:$0xff] %vm3365_vm3, %v6987_v15  ;;  %v6016_v43 = vrot.slane %v6014_v9, 3  ;;  %v6019_v52 = vrot.slane %v6017_v61, 4 }
 0x3cc   : > { %v6737_v56 = vadd.f32 %v6736_v41, %v6648_v13  ;;  %v5199_v27 = vunpack.c.l.b16 %v4291_v38  ;;  %v5200_v63 = vunpack.c.l.b16 %v4292_v6  ;;  %v4220_v12 = vpack.c.bf16 %v4187_v31, %v4187_v31 }
 0x3cd   : > { %v15704_v60 = vrot.slane %v4713_v14, 5  ;;  %v15706_v47 = vor.u32 %v6027_v21, %v6024_v62  ;;  %v6561_v41 = vadd.f32 %v15550_v2, %v18248_v46  ;;  %v5090_v3 = vunpack.c.l.b16 %v4219_v32 }
 0x3ce   : > { %6864 = vmatmul.bf16.gmra.mxu0 %v15311_v22  ;;  %10628 = vmatmul.msk.bf16.gmra.mxu1 %vm3365_vm3, %v6128_v1  ;;  %v6826_v55 = vadd.f32 %v6825_v35, %v6737_v56  ;;  %v5217_v7 = vpack.c.b16 %v5200_v63, %v5199_v27  ;;  %v15711_v49 = vor.u32 %v6019_v52, %v6016_v43  ;;  %v4860_v35 = vpop.permute.xlu0 %4859  ;;  %v5091_v14 = vunpack.c.l.b16 %v4220_v12  ;;  %v15736_v52 = vpop.f32.mrf.mxu1  ;;  %v4226_v63 = vld [vmem:[#allocation2 + $0x94] sm:$0x1] }
 0x3cf   : > { %v6738_v58 = vpop.f32.mrf.mxu3  ;;  %v6029_v31 = vsel %vm3413_vm6, %v15634_v18, %v15706_v47  ;;  %v3977_v17 = vmul.f32 %v15047_v40, %v18164_v23  ;;  %v5395_v39 = vsel %vm3365_vm3, %v18249_v44, %v5024_v11  ;;  %v3976_v15 = vmul.f32 %v15129_v28, %v18166_v59  ;;  %v18250_v11 = vld [vmem:[#allocation46_spill] sm:$0xff] }
 0x3d0   : > { %v6915_v22 = vadd.f32 %v15552_v54, %v6826_v55  ;;  %v6649_v33 = vpop.f32.mrf.mxu2  ;;  %v15716_v61 = vrot.slane %v5217_v7, 5  ;;  %v4743_v18 = vsel %vm2405_vm7, %v15652_v37, %v15704_v60  ;;  %v6063_v56 = vshrl.u32 %v5395_v39, 16 }
 0x3d1   : > { %v6650_v54 = vadd.f32 %v6649_v33, %v6561_v41  ;;  %v5344_v32 = vsel %vm3365_vm3, %v4743_v18, %v4860_v35  ;;  %v6066_v59 = vshll.u32 %v5395_v39, 16  ;;  %v6021_v28 = vsel %vm3413_vm6, %v15507_v4, %v15711_v49 }
 0x3d2   : > { %v6988_v62 = vmax.f32 %v6915_v22, 0.0  ;;  %v7050_v13 = vld [vmem:[#allocation3 + $0x10] ss:$2 sm:$0xff]  ;;  %v7082_v21 = vld [vmem:[#allocation3 + $0x11] ss:$2 sm:$0xff]  ;;  %v5249_v40 = vsel %vm2405_vm7, %v15657_v30, %v15716_v61  ;;  %v4010_v43 = vpack.c.bf16 %v3977_v17, %v3977_v17  ;;  %v4009_v55 = vpack.c.bf16 %v3976_v15, %v3976_v15 }
 0x3d3   : > { %v6827_v9 = vpop.f32.mrf.mxu0  ;;  %v7112_v23 = vadd.f32 %v7082_v21, %v7050_v13  ;;  %v6739_v1 = vadd.f32 %v6738_v58, %v6650_v54  ;;  %v6162_v38 = vshrl.u32 %v5249_v40, 16  ;;  %v6165_v6 = vshll.u32 %v5249_v40, 16 }
 0x3d4   : > { %6780 = vmatmul.bf16.gmra.mxu3 %v6029_v31  ;;  %7020 = vst.msk [vmem:[#allocation3 + $0x20] sm:$0xff] %vm3365_vm3, %v6988_v62  ;;  %v4227_v12 = vunpack.c.l.bf16 %v4226_v63  ;;  %v6564_v7 = vadd.f32 %v15550_v2, %v18250_v11  ;;  %v6055_v46 = vshrl.u32 %v5344_v32, 16  ;;  %v6058_v22 = vshll.u32 %v5344_v32, 16 }
 0x3d5   : > { %7128 = vst.msk [vmem:[#allocation4 + $0x8] sm:$0xff] %vm3365_vm3, %v7112_v23  ;;  %v6828_v30 = vadd.f32 %v6827_v9, %v6739_v1  ;;  %6691 = vmatmul.bf16.gmra.mxu2 %v6021_v28  ;;  %v6164_v27 = vrot.slane %v6162_v38, 3  ;;  %v6167_v58 = vrot.slane %v6165_v6, 4  ;;  %v6065_v33 = vrot.slane %v6063_v56, 3 }
 0x3d6   : > { %v6068_v31 = vrot.slane %v6066_v59, 4  ;;  %v4260_v9 = vmul.f32 %v4227_v12, %v18241_v20  ;;  %v5110_v44 = vpack.c.b16 %v5091_v14, %v5090_v3  ;;  %v4696_v39 = vunpack.c.l.b16 %v4010_v43  ;;  %v5026_v56 = vpop.permute.xlu0 %5025  ;;  %v18251_v59 = vld [vmem:[#allocation84_spill] sm:$0xff]  ;;  %v18252_v12 = vld [vmem:[#allocation17_spill] sm:$0xff] }
 0x3d7   : > { %v6741_v37 = vpop.f32.mrf.mxu3  ;;  %v6917_v41 = vadd.f32 %v15581_v57, %v6828_v30  ;;  %v15741_v4 = vor.u32 %v6167_v58, %v6164_v27  ;;  %v4695_v13 = vunpack.c.l.b16 %v4009_v55  ;;  %v6057_v3 = vrot.slane %v6055_v46, 3 }
 0x3d8   : > { %v6652_v17 = vpop.f32.mrf.mxu2  ;;  %v4293_v18 = vpack.c.bf16 %v4260_v9, %v4260_v9  ;;  %v5433_v57 = vsel %vm3365_vm3, %v5110_v44, %v15277_v5  ;;  %v6060_v14 = vrot.slane %v6058_v22, 4  ;;  %v15752_v40 = vor.u32 %v6068_v31, %v6065_v33 }
 0x3d9   : > { %v6989_v62 = vmax.f32 %v6917_v41, 0.0  ;;  %v6653_v54 = vadd.f32 %v6652_v17, %v6564_v7  ;;  %v6169_v15 = vsel %vm3413_vm6, %v15688_v42, %v15741_v4  ;;  %v4714_v38 = vpack.c.b16 %v4696_v39, %v4695_v13  ;;  %v4862_v17 = vpop.permute.xlu2 %4861 }
 0x3da   : > { %v5201_v1 = vunpack.c.l.b16 %v4293_v18  ;;  %v6071_v6 = vshrl.u32 %v5433_v57, 16  ;;  %v6074_v32 = vshll.u32 %v5433_v57, 16  ;;  %v6566_v28 = vadd.f32 %v15550_v2, %v18251_v59 }
 0x3db   : > { %v6830_v35 = vpop.f32.mrf.mxu0  ;;  %7021 = vst.msk [vmem:[#allocation3 + $0x28] sm:$0xff] %vm3365_vm3, %v6989_v62  ;;  %v6742_v21 = vadd.f32 %v6741_v37, %v6653_v54  ;;  %v15756_v37 = vpop.f32.mrf.mxu1  ;;  %v15759_v43 = vor.u32 %v6060_v14, %v6057_v3  ;;  %v6070_v58 = vsel %vm3413_vm6, %v15706_v47, %v15752_v40  ;;  %v15764_v55 = vrot.slane %v4714_v38, 5  ;;  %v18253_v38 = vld [vmem:[#allocation14_spill] sm:$0xff] }
 0x3dc   : > { %v5218_v5 = vpack.c.b16 %v5201_v1, %v5201_v1  ;;  %v5398_v11 = vsel %vm3365_vm3, %v18252_v12, %v5026_v56  ;;  %v6073_v41 = vrot.slane %v6071_v6, 3  ;;  %v6076_v22 = vrot.slane %v6074_v32, 4  ;;  %v7144_v3 = vld [vmem:[#allocation4 + $0x8] sm:$0xff] }
 0x3dd   : > { %v6831_v42 = vadd.f32 %v6830_v35, %v6742_v21  ;;  %v6104_v39 = vshrl.u32 %v5398_v11, 16  ;;  %v6107_v62 = vshll.u32 %v5398_v11, 16  ;;  %v6062_v54 = vsel %vm3413_vm6, %v15711_v49, %v15759_v43  ;;  %v7143_v21 = vld [vmem:[#allocation4] sm:$0xff] }
 0x3de   : > { %6869 = vmatmul.bf16.gmra.mxu0 %v15381_v26  ;;  %10629 = vmatmul.msk.bf16.gmra.mxu1 %vm3365_vm3, %v6169_v15  ;;  %v5250_v63 = vrot.slane %v5218_v5, 5  ;;  %v4745_v18 = vsel %vm2405_vm7, %v15704_v60, %v15764_v55  ;;  %v15778_v14 = vor.u32 %v6076_v22, %v6073_v41  ;;  %v7145_v1 = vadd.f32 %v7144_v3, %v7143_v21 }
 0x3df   : > { %v6743_v23 = vpop.f32.mrf.mxu3  ;;  %v6920_v26 = vadd.f32 %v15622_v29, %v6831_v42  ;;  %v6569_v49 = vadd.f32 %v15550_v2, %v18253_v38  ;;  %v6106_v60 = vrot.slane %v6104_v39, 3  ;;  %v6109_v32 = vrot.slane %v6107_v62, 4 }
 0x3e0   : > { %v6654_v30 = vpop.f32.mrf.mxu2  ;;  %v5251_v31 = vsel %vm2405_vm7, %v15716_v61, %v5250_v63  ;;  %v7146_v59 = vmul.f32 0.25, %v7145_v1  ;;  %v6078_v63 = vsel %vm3413_vm6, %v15368_v36, %v15778_v14  ;;  %v18255_v1 = vld [vmem:[#allocation93_spill] sm:$0xff] }
 0x3e1   : > { %v6990_v7 = vmax.f32 %v6920_v26, 0.0  ;;  %v6655_v46 = vadd.f32 %v6654_v30, %v6566_v28  ;;  %v6203_v9 = vshrl.u32 %v5251_v31, 16  ;;  %v6206_v44 = vshll.u32 %v5251_v31, 16  ;;  %v15799_v31 = vld [vmem:[#allocation5 + $0x4] sm:$0xf] }
 0x3e2   : > { %v7052_v29 = vld [vmem:[#allocation3 + $0x20] ss:$2 sm:$0xff]  ;;  %v7084_v33 = vld [vmem:[#allocation3 + $0x21] ss:$2 sm:$0xff]  ;;  %v6574_v38 = vadd.f32 %v15550_v2, %v18255_v1 }
 0x3e3   : > { %v6832_v27 = vpop.f32.mrf.mxu0  ;;  %v7113_v35 = vadd.f32 %v7084_v33, %v7052_v29  ;;  %7022 = vst.msk [vmem:[#allocation3 + $0x30] sm:$0xff] %vm3365_vm3, %v6990_v7  ;;  %v6744_v47 = vadd.f32 %v6743_v23, %v6655_v46  ;;  %v6205_v57 = vrot.slane %v6203_v9, 3  ;;  %v6208_v13 = vrot.slane %v6206_v44, 4  ;;  %v15784_v26 = vpop.f32.mrf.mxu1  ;;  %v18254_v33 = vld [vmem:[#allocation16_spill] sm:$0xff] }
 0x3e4   : > { %6785 = vmatmul.bf16.gmra.mxu3 %v6070_v58  ;;  %v5347_v23 = vsel %vm3365_vm3, %v4745_v18, %v4862_v17  ;;  %v15793_v7 = vor.u32 %v6109_v32, %v6106_v60  ;;  %v6571_v36 = vadd.f32 %v15550_v2, %v18254_v33 }
 0x3e5   : > { %7129 = vst.msk [vmem:[#allocation4 + $0x10] sm:$0xff] %vm3365_vm3, %v7113_v35  ;;  %v6833_v61 = vadd.f32 %v6832_v27, %v6744_v47  ;;  %6696 = vmatmul.bf16.gmra.mxu2 %v6062_v54  ;;  %v6209_v6 = vor.u32 %v6208_v13, %v6205_v57  ;;  %v6096_v28 = vshrl.u32 %v5347_v23, 16  ;;  %v6099_v58 = vshll.u32 %v5347_v23, 16 }
 0x3e6   : > { %v6111_v47 = vsel %vm3413_vm6, %v15752_v40, %v15793_v7 }
 0x3e7   : > { %v6746_v15 = vpop.f32.mrf.mxu3  ;;  %v6922_v42 = vadd.f32 %v15661_v51, %v6833_v61  ;;  %v6210_v12 = vsel %vm3413_vm6, %v15741_v4, %v6209_v6  ;;  %v7147_v51 = vpack.c.bf16 %v7146_v59, %v7146_v59  ;;  %v6098_v22 = vrot.slane %v6096_v28, 3 }
 0x3e8   : > { %v6657_v56 = vpop.f32.mrf.mxu2  ;;  %v6101_v29 = vrot.slane %v6099_v58, 4 }
 0x3e9   : > { %v6991_v30 = vmax.f32 %v6922_v42, 0.0  ;;  %v6658_v27 = vadd.f32 %v6657_v56, %v6569_v49  ;;  %7148 = vst.msk [vmem:[#allocation5 + $0x8] sm:$0xf] %vm1164_vm14, %v7147_v51 }
 0x3ea   : > { %v15804_v39 = vor.u32 %v6101_v29, %v6098_v22  ;;  %v3946_v22 = vld [vmem:[#allocation2 + $0x84] sm:$0x1] }
 0x3eb   : > { %v6835_v5 = vpop.f32.mrf.mxu0  ;;  %7023 = vst.msk [vmem:[#allocation3 + $0x38] sm:$0xff] %vm3365_vm3, %v6991_v30  ;;  %v6747_v11 = vadd.f32 %v6746_v15, %v6658_v27  ;;  %v7442_v15 = vunpack.c.l.b16 %v15799_v31  ;;  %v15807_v18 = vpop.f32.mrf.mxu1 }
 0x3ec   : > { %v6103_v40 = vsel %vm3413_vm6, %v15759_v43, %v15804_v39 }
 0x3ed   : > { %v6836_v41 = vadd.f32 %v6835_v5, %v6747_v11  ;;  %v3979_v11 = vmul.f32 %v15146_v10, %v18238_v34 }
 0x3ee   : > { %6874 = vmatmul.bf16.gmra.mxu0 %v6078_v63  ;;  %10630 = vmatmul.msk.bf16.gmra.mxu1 %vm3365_vm3, %v6210_v12 }
 0x3ef   : > { %v6748_v46 = vpop.f32.mrf.mxu3  ;;  %v6925_v4 = vadd.f32 %v15699_v45, %v6836_v41 }
 0x3f0   : > { %v6659_v17 = vpop.f32.mrf.mxu2  ;;  %v15810_v57 = vld [vmem:[#allocation5 + $0x8] sm:$0xf] }
 0x3f1   : > { %v6992_v9 = vmax.f32 %v6925_v4, 0.0  ;;  %v6660_v44 = vadd.f32 %v6659_v17, %v6571_v36  ;;  %v7443_v13 = vunpack.c.l.b16 %v15810_v57  ;;  %v3978_v36 = vmul.f32 %v15049_v25, %v18237_v50 }
 0x3f2   : > { %v7054_v62 = vld [vmem:[#allocation3 + $0x30] ss:$2 sm:$0xff]  ;;  %v7086_v54 = vld [vmem:[#allocation3 + $0x31] ss:$2 sm:$0xff] }
 0x3f3   : > { %v6837_v35 = vpop.f32.mrf.mxu0  ;;  %v7114_v45 = vadd.f32 %v7086_v54, %v7054_v62  ;;  %7024 = vst.msk [vmem:[#allocation3 + $0x40] sm:$0xff] %vm3365_vm3, %v6992_v9  ;;  %v6749_v61 = vadd.f32 %v6748_v46, %v6660_v44  ;;  %v7450_v23 = vpack.c.b16 %v7443_v13, %v7442_v15  ;;  %v15825_v58 = vpop.f32.mrf.mxu1  ;;  %v4012_v9 = vpack.c.bf16 %v3979_v11, %v3979_v11 }
 0x3f4   : > { %6790 = vmatmul.bf16.gmra.mxu3 %v6111_v47  ;;  %v3947_v44 = vunpack.c.l.bf16 %v3946_v22  ;;  %v4011_v62 = vpack.c.bf16 %v3978_v36, %v3978_v36  ;;  %v6579_v54 = vadd.f32 %v15550_v2, %v15195_v0  ;;  %v6581_v0 = vadd.f32 %v15550_v2, %v15241_v24 }
 0x3f5   : > { %7130 = vst.msk [vmem:[#allocation4 + $0x18] sm:$0xff] %vm3365_vm3, %v7114_v45  ;;  %v6838_v3 = vadd.f32 %v6837_v35, %v6749_v61  ;;  %6701 = vmatmul.bf16.gmra.mxu2 %v6103_v40  ;;  %v7455_v42 = vshrl.u32 %v7450_v23, 16  ;;  %v7458_v6 = vshll.u32 %v7450_v23, 16  ;;  %v4698_v50 = vunpack.c.l.b16 %v4012_v9 }
 0x3f6   : > { %v3980_v45 = vmul.f32 %v3947_v44, %v18241_v20  ;;  %v4697_v23 = vunpack.c.l.b16 %v4011_v62 }
 0x3f7   : > { %v6751_v21 = vpop.f32.mrf.mxu3  ;;  %v6927_v49 = vadd.f32 %v15736_v52, %v6838_v3  ;;  %v7457_v5 = vrot.slane %v7455_v42, 4  ;;  %v7460_v59 = vrot.slane %v7458_v6, 5  ;;  %v18256_v52 = vld [vmem:[#allocation73_spill] sm:$0xff] }
 0x3f8   : > { %v6662_v60 = vpop.f32.mrf.mxu2  ;;  %v6576_v12 = vadd.f32 %v15550_v2, %v18256_v52 }
 0x3f9   : > { %v6993_v43 = vmax.f32 %v6927_v49, 0.0  ;;  %v6663_v56 = vadd.f32 %v6662_v60, %v6574_v38  ;;  %v15823_v30 = vor.u32 %v7460_v59, %v7457_v5  ;;  %v4715_v38 = vpack.c.b16 %v4698_v50, %v4697_v23 }
 0x3fa   : > { %v4013_v49 = vpack.c.bf16 %v3980_v45, %v3980_v45 }
 0x3fb   : > { %v6840_v32 = vpop.f32.mrf.mxu0  ;;  %7025 = vst.msk [vmem:[#allocation3 + $0x48] sm:$0xff] %vm3365_vm3, %v6993_v43  ;;  %v6752_v28 = vadd.f32 %v6751_v21, %v6663_v56  ;;  %7489 = vrot.lane.b32.xlu2 %v15823_v30, %s11591_s21  ;;  %v15840_v15 = vpop.f32.mrf.mxu1  ;;  %v4746_v60 = vrot.slane %v4715_v38, 5  ;;  %v18260_v38 = vld [vmem:[#allocation52_spill] sm:$0xff] }
 0x3fd   : > { %v6841_v63 = vadd.f32 %v6840_v32, %v6752_v28  ;;  %v4699_v32 = vunpack.c.l.b16 %v4013_v49  ;;  %v4747_v52 = vsel %vm2405_vm7, %v15764_v55, %v4746_v60  ;;  %v4188_v49 = vmul.f32 %v15146_v10, %v18260_v38 }
 0x3ff   : > { %v6753_v27 = vpop.f32.mrf.mxu3  ;;  %v6930_v51 = vadd.f32 %v15756_v37, %v6841_v63 }
 0x400   : > { %v6664_v46 = vpop.f32.mrf.mxu2 }
 0x401   : > { %v6994_v29 = vmax.f32 %v6930_v51, 0.0  ;;  %v6665_v33 = vadd.f32 %v6664_v46, %v6576_v12  ;;  %v4716_v51 = vpack.c.b16 %v4699_v32, %v4699_v32 }
 0x402   : > { %v7056_v4 = vld [vmem:[#allocation3 + $0x40] ss:$2 sm:$0xff]  ;;  %v7088_v17 = vld [vmem:[#allocation3 + $0x41] ss:$2 sm:$0xff] }
 0x403   : > { %v6842_v41 = vpop.f32.mrf.mxu0  ;;  %v7115_v35 = vadd.f32 %v7088_v17, %v7056_v4  ;;  %7026 = vst.msk [vmem:[#allocation3 + $0x50] sm:$0xff] %vm3365_vm3, %v6994_v29  ;;  %v6754_v47 = vadd.f32 %v6753_v27, %v6665_v33  ;;  %v15848_v56 = vpop.f32.mrf.mxu1  ;;  %v18257_v29 = vld [vmem:[#allocation75_spill] sm:$0xff] }
 0x404   : > { %v6584_v33 = vadd.f32 %v15550_v2, %v18257_v29 }
 0x405   : > { %7131 = vst.msk [vmem:[#allocation4 + $0x20] sm:$0xff] %vm3365_vm3, %v7115_v35  ;;  %v6843_v34 = vadd.f32 %v6842_v41, %v6754_v47  ;;  %v4748_v35 = vrot.slane %v4716_v51, 5 }
 0x407   : > { %v6756_v37 = vpop.f32.mrf.mxu3  ;;  %v6932_v25 = vadd.f32 %v15784_v26, %v6843_v34  ;;  %v4749_v62 = vsel %vm2405_vm7, %v4746_v60, %v4748_v35  ;;  %v18264_v35 = vld [vmem:[#allocation55_spill] sm:$0xff] }
 0x408   : > { %v6667_v61 = vpop.f32.mrf.mxu2 }
 0x409   : > { %v6995_v21 = vmax.f32 %v6932_v25, 0.0  ;;  %v6668_v3 = vadd.f32 %v6667_v61, %v6579_v54  ;;  %v18258_v61 = vld [vmem:[#allocation81_spill] sm:$0xff] }
 0x40b   : > { %v6845_v40 = vpop.f32.mrf.mxu0  ;;  %7027 = vst.msk [vmem:[#allocation3 + $0x58] sm:$0xff] %vm3365_vm3, %v6995_v21  ;;  %v6757_v1 = vadd.f32 %v6756_v37, %v6668_v3  ;;  %v15858_v34 = vpop.f32.mrf.mxu1 }
 0x40d   : > { %v6846_v6 = vadd.f32 %v6845_v40, %v6757_v1  ;;  %v18259_v40 = vld [vmem:[#allocation51_spill] sm:$0xff] }
 0x40e   : > { %v4189_v21 = vmul.f32 %v18259_v40, %v18258_v61 }
 0x40f   : > { %v6758_v42 = vpop.f32.mrf.mxu3  ;;  %v6935_v26 = vadd.f32 %v15807_v18, %v6846_v6 }
 0x410   : > { %v6669_v20 = vpop.f32.mrf.mxu2  ;;  %v4222_v60 = vpack.c.bf16 %v4189_v21, %v4189_v21 }
 0x411   : > { %v6996_v5 = vmax.f32 %v6935_v26, 0.0  ;;  %v6670_v59 = vadd.f32 %v6669_v20, %v6581_v0 }
 0x412   : > { %v7058_v28 = vld [vmem:[#allocation3 + $0x50] ss:$2 sm:$0xff]  ;;  %v7090_v27 = vld [vmem:[#allocation3 + $0x51] ss:$2 sm:$0xff] }
 0x413   : > { %v6847_v43 = vpop.f32.mrf.mxu0  ;;  %v7116_v63 = vadd.f32 %v7090_v27, %v7058_v28  ;;  %7028 = vst.msk [vmem:[#allocation3 + $0x60] sm:$0xff] %vm3365_vm3, %v6996_v5  ;;  %v6759_v24 = vadd.f32 %v6758_v42, %v6670_v59  ;;  %v18261_v42 = vld [vmem:[#allocation89_spill] sm:$0xff]  ;;  %v4221_v27 = vpack.c.bf16 %v4188_v49, %v4188_v49 }
 0x414   : > { %v6586_v6 = vadd.f32 %v15550_v2, %v18261_v42 }
 0x415   : > { %7132 = vst.msk [vmem:[#allocation4 + $0x28] sm:$0xff] %vm3365_vm3, %v7116_v63  ;;  %v6848_v22 = vadd.f32 %v6847_v43, %v6759_v24  ;;  %v18262_v24 = vld [vmem:[#allocation62_spill] sm:$0xff] }
 0x416   : > { %v4864_v12 = vpop.permute.xlu2 %4863  ;;  %v4190_v51 = vmul.f32 %v15594_v16, %v18262_v24  ;;  %v11152_v16 = vld [vmem:[%s17497_s5 + $0x38] sm:$0xff] }
 0x417   : > { %v5350_v18 = vsel %vm3365_vm3, %v4747_v52, %v4864_v12  ;;  %v6761_v11 = vpop.f32.mrf.mxu3  ;;  %v6937_v17 = vadd.f32 %v15825_v58, %v6848_v22  ;;  %v5093_v12 = vunpack.c.l.b16 %v4222_v60  ;;  %v7150_v22 = vld [vmem:[#allocation4 + $0x18] sm:$0xff]  ;;  %8298 = vmatpush.bf16.msra.mxu2 %v11152_v16  ;;  %v18265_v60 = vld [vmem:[#allocation95_spill] sm:$0xff] }
 0x418   : > { %v6137_v46 = vshrl.u32 %v5350_v18, 16  ;;  %v6140_v41 = vshll.u32 %v5350_v18, 16  ;;  %v6672_v55 = vpop.f32.mrf.mxu2 }
 0x419   : > { %v6997_v44 = vmax.f32 %v6937_v17, 0.0  ;;  %v6673_v37 = vadd.f32 %v6672_v55, %v6584_v33  ;;  %v5092_v33 = vunpack.c.l.b16 %v4221_v27  ;;  %v6589_v55 = vadd.f32 %v15550_v2, %v18264_v35  ;;  %v18266_v27 = vld [vmem:[#allocation110_spill] sm:$0xff] }
 0x41a   : > { %v6139_v36 = vrot.slane %v6137_v46, 3  ;;  %v6142_v4 = vrot.slane %v6140_v41, 4  ;;  %v7149_v41 = vld [vmem:[#allocation4 + $0x10] sm:$0xff] }
 0x41b   : > { %v6850_v47 = vpop.f32.mrf.mxu0  ;;  %7029 = vst.msk [vmem:[#allocation3 + $0x68] sm:$0xff] %vm3365_vm3, %v6997_v44  ;;  %v6762_v50 = vadd.f32 %v6761_v11, %v6673_v37  ;;  %v15878_v11 = vpop.f32.mrf.mxu1 }
 0x41c   : > { %v6143_v9 = vor.u32 %v6142_v4, %v6139_v36  ;;  %v7151_v36 = vadd.f32 %v7150_v22, %v7149_v41  ;;  %v7155_v4 = vld [vmem:[#allocation4 + $0x20] sm:$0xff]  ;;  %v7156_v17 = vld [vmem:[#allocation4 + $0x28] sm:$0xff] }
 0x41d   : > { %v6851_v3 = vadd.f32 %v6850_v47, %v6762_v50  ;;  %v7157_v47 = vadd.f32 %v7156_v17, %v7155_v4 }
 0x41e   : > { %v4866_v54 = vpop.permute.xlu2 %4865  ;;  %v6144_v25 = vsel %vm3413_vm6, %v15804_v39, %v6143_v9  ;;  %v7152_v50 = vmul.f32 0.25, %v7151_v36  ;;  %v18268_v36 = vld [vmem:[#allocation10_spill] sm:$0xff] }
 0x41f   : > { %v5353_v45 = vsel %vm3365_vm3, %v4749_v62, %v4866_v54  ;;  %6706 = vmatmul.bf16.gmra.mxu2 %v6144_v25  ;;  %v6763_v58 = vpop.f32.mrf.mxu3  ;;  %v6940_v0 = vadd.f32 %v15840_v15, %v6851_v3  ;;  %v18263_v15 = vld [vmem:[#allocation91_spill] sm:$0xff]  ;;  %v5111_v62 = vpack.c.b16 %v5093_v12, %v5092_v33  ;;  %v4223_v54 = vpack.c.bf16 %v4190_v51, %v4190_v51  ;;  %v18267_v12 = vld [vmem:[#allocation13_spill] sm:$0xff] }
 0x420   : > { %v6178_v23 = vshrl.u32 %v5353_v45, 16  ;;  %v6181_v1 = vshll.u32 %v5353_v45, 16  ;;  %v6674_v39 = vpop.f32.mrf.mxu2  ;;  %v4191_v18 = vmul.f32 %v4158_v19, %v18263_v15  ;;  %v7158_v40 = vmul.f32 0.25, %v7157_v47 }
 0x421   : > { %v6998_v32 = vmax.f32 %v6940_v0, 0.0  ;;  %v6675_v20 = vadd.f32 %v6674_v39, %v6586_v6  ;;  %v5094_v42 = vunpack.c.l.b16 %v4223_v54  ;;  %v4192_v24 = vmul.f32 %v4159_v8, %v18267_v12 }
 0x422   : > { %v7060_v43 = vld [vmem:[#allocation3 + $0x60] ss:$2 sm:$0xff]  ;;  %v7092_v5 = vld [vmem:[#allocation3 + $0x61] ss:$2 sm:$0xff]  ;;  %v6180_v59 = vrot.slane %v6178_v23, 3  ;;  %v6183_v28 = vrot.slane %v6181_v1, 4  ;;  %v4224_v25 = vpack.c.bf16 %v4191_v18, %v4191_v18  ;;  %v7153_v23 = vpack.c.bf16 %v7152_v50, %v7152_v50 }
 0x423   : > { %v6852_v26 = vpop.f32.mrf.mxu0  ;;  %v7117_v63 = vadd.f32 %v7092_v5, %v7060_v43  ;;  %7030 = vst.msk [vmem:[#allocation3 + $0x70] sm:$0xff] %vm3365_vm3, %v6998_v32  ;;  %v6764_v52 = vadd.f32 %v6763_v58, %v6675_v20  ;;  %v7159_v38 = vpack.c.bf16 %v7158_v40, %v7158_v40  ;;  %v15899_v20 = vpop.f32.mrf.mxu1  ;;  %v1008_v4 = vand.u32 7, %v18268_v36  ;;  %v18270_v50 = vld [vmem:[#allocation43_spill] sm:$0xff] }
 0x424   : > { %v6184_v29 = vor.u32 %v6183_v28, %v6180_v59  ;;  %v5095_v6 = vunpack.c.l.b16 %v4224_v25  ;;  %7154 = vst.msk [vmem:[#allocation5 + $0xc] sm:$0xf] %vm1164_vm14, %v7153_v23  ;;  %v4225_v47 = vpack.c.bf16 %v4192_v24, %v4192_v24  ;;  %v18279_v24 = vld [vmem:[#allocation47_spill] sm:$0xff] }
 0x425   : > { %7133 = vst.msk [vmem:[#allocation4 + $0x30] sm:$0xff] %vm3365_vm3, %v7117_v63  ;;  %v6853_v46 = vadd.f32 %v6852_v26, %v6764_v52  ;;  %vm15937_vm10 = vcmp.le.s32.totalorder %v1008_v4, 6  ;;  %vm16093_vm5 = vcmp.ge.s32.totalorder %v1008_v4, 1 }
 0x426   : > { %v6185_v21 = vsel %vm3413_vm6, %v6143_v9, %v6184_v29  ;;  %7160 = vst.msk [vmem:[#allocation5 + $0x10] sm:$0xf] %vm1164_vm14, %v7159_v38  ;;  %v15895_v9 = vld [vmem:[%s17496_s4] ss:$0 sm:$0xff]  ;;  %v5096_v38 = vunpack.c.l.b16 %v4225_v47 }
 0x427   : > { %v6766_v10 = vpop.f32.mrf.mxu3  ;;  %v6942_v19 = vadd.f32 %v15848_v56, %v6853_v46  ;;  %v6591_v32 = vadd.f32 %v15895_v9, %v18265_v60 }
 0x428   : > { %v6677_v44 = vpop.f32.mrf.mxu2 }
 0x429   : > { %v6999_v45 = vmax.f32 %v6942_v19, 0.0  ;;  %v6678_v58 = vadd.f32 %v6677_v44, %v6589_v55  ;;  %v18269_v44 = vld [vmem:[#allocation11_spill] sm:$0xff] }
 0x42b   : > { %v6855_v37 = vpop.f32.mrf.mxu0  ;;  %7031 = vst.msk [vmem:[#allocation3 + $0x78] sm:$0xff] %vm3365_vm3, %v6999_v45  ;;  %v6767_v2 = vadd.f32 %v6766_v10, %v6678_v58  ;;  %v5112_v10 = vpack.c.b16 %v5095_v6, %v5094_v42  ;;  %v15915_v35 = vld [vmem:[#allocation5 + $0xc] sm:$0xf]  ;;  %v6594_v45 = vadd.f32 %v15895_v9, %v18270_v50 }
 0x42c   : > { %v5131_v61 = vpop.permute.xlu1 %5130  ;;  %v7444_v54 = vunpack.c.l.b16 %v15915_v35 }
 0x42d   : > { %v5436_v3 = vsel %vm3365_vm3, %v5111_v62, %v5131_v61  ;;  %v6856_v0 = vadd.f32 %v6855_v37, %v6767_v2  ;;  %v15917_v55 = vld [vmem:[#allocation5 + $0x10] sm:$0xf]  ;;  %v1015_v37 = vand.u32 7, %v18269_v44 }
 0x42e   : > { %v6112_v56 = vshrl.u32 %v5436_v3, 16  ;;  %v6115_v1 = vshll.u32 %v5436_v3, 16  ;;  %v7445_v25 = vunpack.c.l.b16 %v15917_v55 }
 0x42f   : > { %6711 = vmatmul.bf16.gmra.mxu2 %v6185_v21  ;;  %v6768_v49 = vpop.f32.mrf.mxu3  ;;  %v6945_v43 = vadd.f32 %v15858_v34, %v6856_v0  ;;  %vm15943_vm11 = vcmp.ge.s32.totalorder %v1015_v37, 1  ;;  %vm15947_vm12 = vcmp.le.s32.totalorder %v1015_v37, 6 }
 0x430   : > { %v6114_v39 = vrot.slane %v6112_v56, 3  ;;  %v6117_v26 = vrot.slane %v6115_v1, 4  ;;  %v6679_v28 = vpop.f32.mrf.mxu2  ;;  %v7451_v21 = vpack.c.b16 %v7445_v25, %v7444_v54 }
 0x431   : > { %v5028_v59 = vpop.permute.xlu0 %5027  ;;  %v7000_v51 = vmax.f32 %v6945_v43, 0.0  ;;  %v6680_v15 = vadd.f32 %v6679_v28, %v6591_v32 }
 0x432   : > { %v15902_v5 = vor.u32 %v6117_v26, %v6114_v39  ;;  %v5401_v63 = vsel %vm3365_vm3, %v18266_v27, %v5028_v59  ;;  %v7062_v22 = vld [vmem:[#allocation3 + $0x70] ss:$2 sm:$0xff]  ;;  %v7094_v34 = vld [vmem:[#allocation3 + $0x71] ss:$2 sm:$0xff]  ;;  %v7463_v6 = vshrl.u32 %v7451_v21, 16  ;;  %v7466_v0 = vshll.u32 %v7451_v21, 16  ;;  %v6951_v26 = vpop.f32.mrf.mxu1 }
 0x433   : > { %v6857_v52 = vpop.f32.mrf.mxu0  ;;  %v6145_v18 = vshrl.u32 %v5401_v63, 16  ;;  %v6148_v46 = vshll.u32 %v5401_v63, 16  ;;  %v7118_v17 = vadd.f32 %v7094_v34, %v7062_v22  ;;  %7032 = vst.msk [vmem:[#allocation3 + $0x80] sm:$0xff] %vm3365_vm3, %v7000_v51  ;;  %v6769_v16 = vadd.f32 %v6768_v49, %v6680_v15 }
 0x434   : > { %v5133_v41 = vpop.permute.xlu1 %5132  ;;  %v6119_v33 = vsel %vm3413_vm6, %v15778_v14, %v15902_v5  ;;  %v7465_v28 = vrot.slane %v7463_v6, 4  ;;  %v7468_v27 = vrot.slane %v7466_v0, 5  ;;  %v6596_v51 = vadd.f32 %v15895_v9, %v18279_v24  ;;  %v18282_v0 = vld [vmem:[#allocation98_spill] sm:$0xff]  ;;  %v18283_v24 = vld [vmem:[#allocation12_spill] sm:$0xff] }
 0x435   : > { %v5439_v29 = vsel %vm3365_vm3, %v5112_v10, %v5133_v41  ;;  %v6147_v48 = vrot.slane %v6145_v18, 3  ;;  %v6150_v8 = vrot.slane %v6148_v46, 4  ;;  %6879 = vmatmul.bf16.gmra.mxu0 %v6119_v33  ;;  %7134 = vst.msk [vmem:[#allocation4 + $0x38] sm:$0xff] %vm3365_vm3, %v7118_v17  ;;  %v6858_v62 = vadd.f32 %v6857_v52, %v6769_v16  ;;  %v18278_v10 = vld [vmem:[#allocation15_spill] sm:$0xff] }
 0x436   : > { %v6153_v58 = vshrl.u32 %v5439_v29, 16  ;;  %v6156_v61 = vshll.u32 %v5439_v29, 16  ;;  %v1022_v12 = vand.u32 7, %v18278_v10  ;;  %v5113_v15 = vpack.c.b16 %v5096_v38, %v5096_v38 }
 0x437   : > { %v6771_v19 = vpop.f32.mrf.mxu3  ;;  %v15921_v14 = vor.u32 %v6150_v8, %v6147_v48  ;;  %v6947_v40 = vadd.f32 %v15878_v11, %v6858_v62  ;;  %v15963_v41 = vor.u32 %v7468_v27, %v7465_v28  ;;  %v15973_v33 = vunpack.c.l.bf16 %v15810_v57  ;;  %v11147_v57 = vld [vmem:[%s17497_s5 + $0x10] sm:$0xff] }
 0x438   : > { %v6682_v56 = vpop.f32.mrf.mxu2  ;;  %v6155_v60 = vrot.slane %v6153_v58, 3  ;;  %v6158_v32 = vrot.slane %v6156_v61, 4  ;;  %v7201_v16 = vunpack.c.l.bf16 %v15799_v31  ;;  %vm1102_vm13 = vcmp.ge.s32.totalorder %v1022_v12, 1 }
 0x439   : > { %v5030_v3 = vpop.permute.xlu0 %5029  ;;  %v6152_v23 = vsel %vm3413_vm6, %v15793_v7, %v15921_v14  ;;  %v7001_v7 = vmax.f32 %v6947_v40, 0.0  ;;  %v6683_v39 = vadd.f32 %v6682_v56, %v6594_v45  ;;  %vm1134_vm1 = vcmp.le.s32.totalorder %v1022_v12, 6 }
 0x43a   : > { %v5404_v11 = vsel %vm3365_vm3, %v15612_v53, %v5030_v3  ;;  %6795 = vmatmul.bf16.gmra.mxu3 %v6152_v23  ;;  %v18277_v53 = vmov 0.0   ;;  %v15975_v17 = vor.u32 %v6158_v32, %v6155_v60  ;;  %v6954_v49 = vpop.f32.mrf.mxu1  ;;  %v11151_v32 = vld [vmem:[%s17497_s5 + $0x30] sm:$0xff] }
 0x43b   : > { %v6860_v1 = vpop.f32.mrf.mxu0  ;;  %v6186_v43 = vshrl.u32 %v5404_v11, 16  ;;  %v10287_v59 = vsel %vm15937_vm10, 1.0, %v18277_v53  ;;  %7033 = vst.msk [vmem:[#allocation3 + $0x88] sm:$0xff] %vm3365_vm3, %v7001_v7  ;;  %v6189_v63 = vshll.u32 %v5404_v11, 16  ;;  %v6772_v52 = vadd.f32 %v6771_v19, %v6683_v39  ;;  %8299 = vmatpush.bf16.msra.mxu2 %v11151_v32 }
 0x43c   : > { %v15961_v46 = vsel %vm15947_vm12, 1.0, %v18277_v53  ;;  %v15968_v34 = vsel %vm15943_vm11, 1.0, %v18277_v53  ;;  %v15970_v29 = vrot.slane %v10287_v59, 7  ;;  %v5135_v8 = vpop.permute.xlu1 %5134  ;;  %v7470_v19 = vsel %vm2144_vm0, %v15823_v30, %v15963_v41 }
 0x43d   : > { %v6861_v22 = vadd.f32 %v6860_v1, %v6772_v52  ;;  %v6188_v48 = vrot.slane %v6186_v43, 3  ;;  %v6191_v47 = vrot.slane %v6189_v63, 4  ;;  %v7286_v37 = vrot.slane %v15961_v46, 7  ;;  %7491 = vrot.lane.b32.xlu0 %v7470_v19, %s11591_s21 }
 0x43e   : > { %18280 = vst [vmem:[#allocation45_spill] sm:$0xff] %v15970_v29  ;;  %v7226_v45 = vrot.slane %v15968_v34, 1  ;;  %v5442_v61 = vsel %vm3365_vm3, %v5113_v15, %v5135_v8  ;;  %v6160_v3 = vsel %vm3413_vm6, %v15902_v5, %v15975_v17  ;;  %v7309_v23 = vmul.f32 %v15970_v29, %v7201_v16 }
 0x43f   : > { %v6773_v18 = vpop.f32.mrf.mxu3  ;;  %v6950_v44 = vadd.f32 %v15899_v20, %v6861_v22  ;;  %v15990_v30 = vsel %vm1538_vm4, %v15970_v29, %v7286_v37  ;;  %v6192_v11 = vor.u32 %v6191_v47, %v6188_v48  ;;  %v10281_v38 = vsel %vm1102_vm13, 1.0, %v18277_v53 }
 0x440   : > { %v6684_v62 = vpop.f32.mrf.mxu2  ;;  %18281 = vst [vmem:[#allocation59_spill] sm:$0xff] %v15990_v30  ;;  %v7310_v2 = vmul.f32 %v15990_v30, %v15973_v33  ;;  %v7228_v42 = vrot.slane %v10281_v38, 1  ;;  %v7318_v7 = vpack.c.bf16 %v7309_v23, %v7309_v23  ;;  %v6599_v39 = vadd.f32 %v15895_v9, %v18282_v0  ;;  %v18285_v38 = vld [vmem:[#allocation21_spill] sm:$0xff] }
 0x441   : > { %v7002_v58 = vmax.f32 %v6950_v44, 0.0  ;;  %v6685_v40 = vadd.f32 %v6684_v62, %v6596_v51  ;;  %v6194_v43 = vshrl.u32 %v5442_v61, 16  ;;  %v6197_v59 = vshll.u32 %v5442_v61, 16 }
 0x442   : > { %v7064_v21 = vld [vmem:[#allocation3 + $0x80] ss:$2 sm:$0xff]  ;;  %v7096_v20 = vld [vmem:[#allocation3 + $0x81] ss:$2 sm:$0xff]  ;;  %v7319_v6 = vpack.c.bf16 %v7310_v2, %v7310_v2  ;;  %v16010_v28 = vunpack.c.l.b16 %v7318_v7  ;;  %v6193_v52 = vsel %vm3413_vm6, %v15921_v14, %v6192_v11  ;;  %v1029_v51 = vand.u32 7, %v18283_v24  ;;  %v6956_v23 = vpop.f32.mrf.mxu1 }
 0x443   : > { %v6862_v50 = vpop.f32.mrf.mxu0  ;;  %v7119_v56 = vadd.f32 %v7096_v20, %v7064_v21  ;;  %7034 = vst.msk [vmem:[#allocation3 + $0x90] sm:$0xff] %vm3365_vm3, %v7002_v58  ;;  %v6774_v1 = vadd.f32 %v6773_v18, %v6685_v40  ;;  %v16020_v15 = vsel %vm1309_vm2, %v7226_v45, %v7228_v42  ;;  %v16023_v18 = vunpack.c.l.bf16 %v15915_v35 }
 0x444   : > { %v16012_v27 = vunpack.c.l.b16 %v7319_v6  ;;  %v7351_v14 = vmul.f32 %v15970_v29, %v15973_v33  ;;  %vm1103_vm15 = vcmp.ge.s32.totalorder %v1029_v51, 1  ;;  %v6196_v47 = vrot.slane %v6194_v43, 3 }
 0x445   : > { %6884 = vmatmul.bf16.gmra.mxu0 %v6160_v3  ;;  %7135 = vst.msk [vmem:[#allocation4 + $0x40] sm:$0xff] %vm3365_vm3, %v7119_v56  ;;  %v6863_v60 = vadd.f32 %v6862_v50, %v6774_v1  ;;  %v6199_v44 = vrot.slane %v6197_v59, 4  ;;  %v16032_v62 = vsel %vm1103_vm15, 1.0, %v18277_v53  ;;  %v7251_v50 = vmul.f32 %v16020_v15, %v15973_v33 }
 0x446   : > { %v7230_v61 = vrot.slane %v16032_v62, 1  ;;  %v7360_v20 = vpack.c.bf16 %v7351_v14, %v7351_v14  ;;  %v7352_v56 = vmul.f32 %v15990_v30, %v16023_v18  ;;  %vm1135_vm9 = vcmp.le.s32.totalorder %v1029_v51, 6 }
 0x447   : > { %v6776_v5 = vpop.f32.mrf.mxu3  ;;  %v6952_v63 = vadd.f32 %v6951_v26, %v6863_v60  ;;  %v7517_v26 = vpack.c.b16 %v16012_v27, %v16010_v28  ;;  %v6200_v2 = vor.u32 %v6199_v44, %v6196_v47  ;;  %v7260_v1 = vpack.c.bf16 %v7251_v50, %v7251_v50  ;;  %v18286_v50 = vld [vmem:[#allocation20_spill] sm:$0xff]  ;;  %v18294_v28 = vld [vmem:[#allocation23_spill] sm:$0xff] }
 0x448   : > { %v6687_v22 = vpop.f32.mrf.mxu2  ;;  %v16041_v3 = vsel %vm1309_vm2, %v7228_v42, %v7230_v61  ;;  %v16049_v43 = vunpack.c.l.b16 %v7360_v20  ;;  %v7333_v4 = vmul.f32 %v16020_v15, %v16023_v18  ;;  %v1036_v27 = vand.u32 7, %v18294_v28  ;;  %v18296_v44 = vld [vmem:[#allocation24_spill] sm:$0xff] }
 0x449   : > { %v7003_v8 = vmax.f32 %v6952_v63, 0.0  ;;  %v6688_v19 = vadd.f32 %v6687_v22, %v6599_v39  ;;  %18284 = vst [vmem:[#allocation41_spill] sm:$0xff] %v16041_v3  ;;  %v7252_v11 = vmul.f32 %v16041_v3, %v16023_v18  ;;  %v7361_v39 = vpack.c.bf16 %v7352_v56, %v7352_v56 }
 0x44a   : > { %6800 = vmatmul.bf16.gmra.mxu3 %v6193_v52  ;;  %v6201_v52 = vsel %vm3413_vm6, %v15975_v17, %v6200_v2  ;;  %v6959_v20 = vpop.f32.mrf.mxu1  ;;  %vm1104_vm8 = vcmp.ge.s32.totalorder %v1036_v27, 1  ;;  %vm1136_vm11 = vcmp.le.s32.totalorder %v1036_v27, 6 }
 0x44b   : > { %v6865_v48 = vpop.f32.mrf.mxu0  ;;  %7035 = vst.msk [vmem:[#allocation3 + $0x98] sm:$0xff] %vm3365_vm3, %v7003_v8  ;;  %v6777_v58 = vadd.f32 %v6776_v5, %v6688_v19  ;;  %v6601_v5 = vadd.f32 %v15895_v9, %v18285_v38  ;;  %v7261_v60 = vpack.c.bf16 %v7252_v11, %v7252_v11  ;;  %v16053_v22 = vunpack.c.l.b16 %v7361_v39 }
 0x44c   : > { %v16057_v8 = vunpack.c.l.b16 %v7260_v1  ;;  %v10291_v31 = vsel %vm1136_vm11, 1.0, %v18277_v53 }
 0x44d   : > { %v6866_v21 = vadd.f32 %v6865_v48, %v6777_v58  ;;  %v16055_v48 = vunpack.c.l.b16 %v7261_v60  ;;  %v7623_v47 = vpack.c.b16 %v16053_v22, %v16049_v43  ;;  %v6604_v58 = vadd.f32 %v15895_v9, %v18286_v50  ;;  %v7162_v50 = vld [vmem:[#allocation4 + $0x38] sm:$0xff] }
 0x44f   : > { %v6778_v40 = vpop.f32.mrf.mxu3  ;;  %v6955_v7 = vadd.f32 %v6954_v49, %v6866_v21 }
 0x450   : > { %v6689_v6 = vpop.f32.mrf.mxu2 }
 0x451   : > { %v7004_v32 = vmax.f32 %v6955_v7, 0.0  ;;  %v6690_v42 = vadd.f32 %v6689_v6, %v6601_v5  ;;  %v18287_v7 = vld [vmem:[#allocation105_spill] sm:$0xff] }
 0x452   : > { %v7066_v59 = vld [vmem:[#allocation3 + $0x90] ss:$2 sm:$0xff]  ;;  %v7098_v63 = vld [vmem:[#allocation3 + $0x91] ss:$2 sm:$0xff]  ;;  %v6606_v6 = vadd.f32 %v15895_v9, %v18287_v7 }
 0x453   : > { %v6867_v0 = vpop.f32.mrf.mxu0  ;;  %v7120_v49 = vadd.f32 %v7098_v63, %v7066_v59  ;;  %7036 = vst.msk [vmem:[#allocation3 + $0xa0] sm:$0xff] %vm3365_vm3, %v7004_v32  ;;  %v6779_v19 = vadd.f32 %v6778_v40, %v6690_v42  ;;  %v6961_v59 = vpop.f32.mrf.mxu1 }
 0x455   : > { %6889 = vmatmul.bf16.gmra.mxu0 %v6201_v52  ;;  %7136 = vst.msk [vmem:[#allocation4 + $0x48] sm:$0xff] %vm3365_vm3, %v7120_v49  ;;  %v6868_v17 = vadd.f32 %v6867_v0, %v6779_v19 }
 0x457   : > { %v6781_v14 = vpop.f32.mrf.mxu3  ;;  %v6957_v21 = vadd.f32 %v6956_v23, %v6868_v17  ;;  %v10289_v23 = vsel %vm1134_vm1, 1.0, %v18277_v53  ;;  %v7161_v17 = vld [vmem:[#allocation4 + $0x30] sm:$0xff] }
 0x458   : > { %v6692_v2 = vpop.f32.mrf.mxu2  ;;  %v7288_v10 = vrot.slane %v10289_v23, 7 }
 0x459   : > { %v7005_v56 = vmax.f32 %v6957_v21, 0.0  ;;  %v6693_v11 = vadd.f32 %v6692_v2, %v6604_v58  ;;  %v7163_v58 = vadd.f32 %v7162_v50, %v7161_v17  ;;  %v7167_v21 = vld [vmem:[#allocation4 + $0x40] sm:$0xff]  ;;  %v11150_v2 = vld [vmem:[%s17497_s5 + $0x28] sm:$0xff]  ;;  %v7342_v17 = vpack.c.bf16 %v7333_v4, %v7333_v4 }
 0x45a   : > { %8300 = vmatpush.bf16.msra.mxu2 %v11150_v2 }
 0x45b   : > { %v6870_v40 = vpop.f32.mrf.mxu0  ;;  %7037 = vst.msk [vmem:[#allocation3 + $0xa8] sm:$0xff] %vm3365_vm3, %v7005_v56  ;;  %v6782_v1 = vadd.f32 %v6781_v14, %v6693_v11  ;;  %v11160_v14 = vld [vmem:[%s17497_s5 + $0x78] sm:$0xff] }
 0x45c   : > { %v18288_v56 = vld [vmem:[#allocation18_spill] sm:$0xff]  ;;  %8327 = vmatpush.bf16.msrb.mxu3 %v11160_v14 }
 0x45d   : > { %v6871_v38 = vadd.f32 %v6870_v40, %v6782_v1  ;;  %v6609_v11 = vadd.f32 %v15895_v9, %v18288_v56 }
 0x45f   : > { %v6783_v5 = vpop.f32.mrf.mxu3  ;;  %v6960_v0 = vadd.f32 %v6959_v20, %v6871_v38  ;;  %v7168_v20 = vld [vmem:[#allocation4 + $0x48] sm:$0xff]  ;;  %v16086_v38 = vsel %vm1538_vm4, %v7286_v37, %v7288_v10 }
 0x460   : > { %v6694_v39 = vpop.f32.mrf.mxu2  ;;  %v7169_v1 = vadd.f32 %v7168_v20, %v7167_v21  ;;  %18289 = vst [vmem:[#allocation61_spill] sm:$0xff] %v16086_v38  ;;  %v18293_v21 = vld [vmem:[#allocation106_spill] sm:$0xff] }
 0x461   : > { %v7006_v60 = vmax.f32 %v6960_v0, 0.0  ;;  %v6695_v32 = vadd.f32 %v6694_v39, %v6606_v6  ;;  %v7164_v39 = vmul.f32 0.25, %v7163_v58  ;;  %v6611_v20 = vadd.f32 %v15895_v9, %v18293_v21 }
 0x462   : > { %v7068_v63 = vld [vmem:[#allocation3 + $0xa0] ss:$2 sm:$0xff]  ;;  %v7100_v52 = vld [vmem:[#allocation3 + $0xa1] ss:$2 sm:$0xff] }
 0x463   : > { %v6872_v42 = vpop.f32.mrf.mxu0  ;;  %v7121_v49 = vadd.f32 %v7100_v52, %v7068_v63  ;;  %7038 = vst.msk [vmem:[#allocation3 + $0xb0] sm:$0xff] %vm3365_vm3, %v7006_v60  ;;  %v6784_v19 = vadd.f32 %v6783_v5, %v6695_v32  ;;  %v16089_v5 = vunpack.c.l.bf16 %v15917_v55  ;;  %v7170_v60 = vmul.f32 0.25, %v7169_v1  ;;  %v6964_v52 = vpop.f32.mrf.mxu1  ;;  %v11149_v1 = vld [vmem:[%s17497_s5 + $0x20] sm:$0xff]  ;;  %v7191_v55 = vld [vmem:[#allocation5] sm:$0x8] }
 0x464   : > { %v16100_v32 = vsel %vm1135_vm9, 1.0, %v18277_v53  ;;  %v7393_v63 = vmul.f32 %v15970_v29, %v16023_v18  ;;  %8301 = vmatpush.bf16.msra.mxu2 %v11149_v1 }
 0x465   : > { %7137 = vst.msk [vmem:[#allocation4 + $0x50] sm:$0xff] %vm3365_vm3, %v7121_v49  ;;  %v6873_v12 = vadd.f32 %v6872_v42, %v6784_v19  ;;  %v7165_v42 = vpack.c.bf16 %v7164_v39, %v7164_v39  ;;  %v7290_v36 = vrot.slane %v16100_v32, 7  ;;  %v7171_v51 = vpack.c.bf16 %v7170_v60, %v7170_v60 }
 0x466   : > { %v10279_v19 = vsel %vm16093_vm5, 1.0, %v18277_v53  ;;  %v7334_v14 = vmul.f32 %v16041_v3, %v16089_v5  ;;  %v7394_v2 = vmul.f32 %v15990_v30, %v16089_v5  ;;  %v7402_v56 = vpack.c.bf16 %v7393_v63, %v7393_v63 }
 0x467   : > { %v6962_v40 = vadd.f32 %v6961_v59, %v6873_v12  ;;  %v6786_v6 = vpop.f32.mrf.mxu3  ;;  %v7311_v59 = vmul.f32 %v16086_v38, %v16023_v18  ;;  %7166 = vst.msk [vmem:[#allocation5 + $0x14] sm:$0xf] %vm1164_vm14, %v7165_v42  ;;  %v16114_v49 = vsel %vm1538_vm4, %v7288_v10, %v7290_v36 }
 0x468   : > { %v6697_v0 = vpop.f32.mrf.mxu2  ;;  %18292 = vst [vmem:[#allocation77_spill] sm:$0xff] %v16114_v49  ;;  %v7312_v50 = vmul.f32 %v16114_v49, %v16089_v5  ;;  %v7343_v7 = vpack.c.bf16 %v7334_v14, %v7334_v14  ;;  %v7327_v14 = vld [vmem:[#allocation5 + $0x4] sm:$0x8] }
 0x469   : > { %v7007_v46 = vmax.f32 %v6962_v40, 0.0  ;;  %v6698_v23 = vadd.f32 %v6697_v0, %v6609_v11  ;;  %7172 = vst.msk [vmem:[#allocation5 + $0x18] sm:$0xf] %vm1164_vm14, %v7171_v51  ;;  %v7320_v58 = vpack.c.bf16 %v7311_v59, %v7311_v59  ;;  %v11159_v40 = vld [vmem:[%s17497_s5 + $0x70] sm:$0xff]  ;;  %v16134_v0 = vrot.slane %v10279_v19, 1 }
 0x46a   : > { %8328 = vmatpush.bf16.msrb.mxu3 %v11159_v40  ;;  %v16136_v59 = vunpack.c.l.b16 %v7342_v17  ;;  %v7329_v1 = vunpack.c.l.bf16 %v7327_v14  ;;  %v7353_v14 = vmul.f32 %v16086_v38, %v16089_v5 }
 0x46b   : > { %v6875_v37 = vpop.f32.mrf.mxu0  ;;  %7039 = vst.msk [vmem:[#allocation3 + $0xb8] sm:$0xff] %vm3365_vm3, %v7007_v46  ;;  %v6787_v24 = vadd.f32 %v6786_v6, %v6698_v23  ;;  %v7321_v6 = vpack.c.bf16 %v7312_v50, %v7312_v50  ;;  %v7403_v23 = vpack.c.bf16 %v7394_v2, %v7394_v2  ;;  %v7510_v51 = vunpack.c.l.b16 %v7320_v58 }
 0x46c   : > { %v16143_v50 = vunpack.c.l.b16 %v7402_v56  ;;  %v6966_v56 = vpop.f32.mrf.mxu1 }
 0x46d   : > { %v6876_v12 = vadd.f32 %v6875_v37, %v6787_v24  ;;  %v16138_v24 = vunpack.c.l.b16 %v7343_v7  ;;  %v7511_v63 = vunpack.c.l.b16 %v7321_v6  ;;  %v16145_v21 = vunpack.c.l.b16 %v7403_v23 }
 0x46e   : > { %v16159_v7 = vrot.slane %v7517_v26, 5 }
 0x46f   : > { %v6965_v10 = vadd.f32 %v6964_v52, %v6876_v12  ;;  %v6788_v42 = vpop.f32.mrf.mxu3  ;;  %v16141_v12 = vld [vmem:[#allocation5 + $0x14] sm:$0xf] }
 0x470   : > { %v6699_v11 = vpop.f32.mrf.mxu2  ;;  %v7446_v2 = vunpack.c.l.b16 %v16141_v12  ;;  %v16170_v23 = vunpack.c.l.bf16 %v16141_v12 }
 0x471   : > { %v7008_v39 = vmax.f32 %v6965_v10, 0.0  ;;  %v6700_v46 = vadd.f32 %v6699_v11, %v6611_v20  ;;  %v16147_v20 = vld [vmem:[#allocation5 + $0x18] sm:$0xf]  ;;  %v7518_v10 = vpack.c.b16 %v7511_v63, %v7510_v51 }
 0x472   : > { %v7070_v37 = vld [vmem:[#allocation3 + $0xb0] ss:$2 sm:$0xff]  ;;  %v7102_v60 = vld [vmem:[#allocation3 + $0xb1] ss:$2 sm:$0xff]  ;;  %v17749_v11 = vunpack.c.l.b16 %v16147_v20  ;;  %v7567_v43 = vpack.c.b16 %v7446_v2, %v7445_v25 }
 0x473   : > { %v6877_v4 = vpop.f32.mrf.mxu0  ;;  %v7122_v52 = vadd.f32 %v7102_v60, %v7070_v37  ;;  %7040 = vst.msk [vmem:[#allocation3 + $0xc0] sm:$0xff] %vm3365_vm3, %v7008_v39  ;;  %v6789_v19 = vadd.f32 %v6788_v42, %v6700_v46  ;;  %v16161_v6 = vrot.slane %v7518_v10, 5  ;;  %v16167_v39 = vsel %vm1309_vm2, %v16134_v0, %v7226_v45 }
 0x474   : > { %v7452_v37 = vpack.c.b16 %v17749_v11, %v7446_v2  ;;  %v7331_v42 = vmul.f32 %v7329_v1, %v16134_v0  ;;  %v10283_v1 = vsel %vm1104_vm8, 1.0, %v18277_v53 }
 0x475   : > { %7138 = vst.msk [vmem:[#allocation4 + $0x58] sm:$0xff] %vm3365_vm3, %v7122_v52  ;;  %v6878_v58 = vadd.f32 %v6877_v4, %v6789_v19  ;;  %v16180_v26 = vsel %vm2405_vm7, %v16159_v7, %v16161_v6  ;;  %v7332_v4 = vmul.f32 %v16167_v39, %v15973_v33  ;;  %v7354_v52 = vmul.f32 %v16114_v49, %v16170_v23 }
 0x476   : > { %v7472_v60 = vshrl.u32 %v7452_v37, 16  ;;  %v7475_v45 = vshll.u32 %v7452_v37, 16  ;;  %v7340_v10 = vpack.c.bf16 %v7331_v42, %v7331_v42 }
 0x477   : > { %v6967_v46 = vadd.f32 %v6966_v56, %v6878_v58  ;;  %v7341_v58 = vpack.c.bf16 %v7332_v4, %v7332_v4  ;;  %v7363_v56 = vpack.c.bf16 %v7354_v52, %v7354_v52  ;;  %v6791_v27 = vpop.f32.mrf.mxu3 }
 0x478   : > { %v7474_v51 = vrot.slane %v7472_v60, 4  ;;  %v7477_v63 = vrot.slane %v7475_v45, 5  ;;  %v7540_v60 = vunpack.c.l.b16 %v7340_v10  ;;  %v11148_v10 = vld [vmem:[%s17497_s5 + $0x18] sm:$0xff] }
 0x479   : > { %v7009_v34 = vmax.f32 %v6967_v46, 0.0  ;;  %v7362_v46 = vpack.c.bf16 %v7353_v14, %v7353_v14  ;;  %v7541_v45 = vunpack.c.l.b16 %v7341_v58  ;;  %v7617_v17 = vunpack.c.l.b16 %v7363_v56  ;;  %8302 = vmatpush.bf16.msra.mxu2 %v11148_v10 }
 0x47a   : > { %v16190_v19 = vor.u32 %v7477_v63, %v7474_v51  ;;  %v7232_v51 = vrot.slane %v10283_v1, 1  ;;  %v7566_v14 = vpack.c.b16 %v7444_v54, %v7443_v13  ;;  %v16232_v56 = vrot.slane %v7623_v47, 5 }
 0x47b   : > { %7041 = vst.msk [vmem:[#allocation3 + $0xc8] sm:$0xff] %vm3365_vm3, %v7009_v34  ;;  %v7616_v42 = vunpack.c.l.b16 %v7362_v46  ;;  %v7549_v4 = vpack.c.b16 %v7541_v45, %v7540_v60 }
 0x47c   : > { %v7479_v33 = vsel %vm2144_vm0, %v15963_v41, %v16190_v19  ;;  %v16203_v52 = vsel %vm1309_vm2, %v7230_v61, %v7232_v51  ;;  %v7375_v61 = vmul.f32 %v16020_v15, %v16089_v5  ;;  %v7574_v58 = vshll.u32 %v7566_v14, 16 }
 0x47d   : > { %7493 = vrot.lane.b32.xlu1 %v7479_v33, %s11591_s21  ;;  %18295 = vst [vmem:[#allocation83_spill] sm:$0xff] %v16203_v52  ;;  %v7624_v11 = vpack.c.b16 %v7617_v17, %v7616_v42  ;;  %v1043_v33 = vand.u32 7, %v18296_v44  ;;  %v7253_v62 = vmul.f32 %v16203_v52, %v16089_v5  ;;  %v7571_v17 = vshrl.u32 %v7566_v14, 16  ;;  %8303 = vmatpush.bf16.msra.mxu2 %v11147_v57 }
 0x47e   : > { %v7384_v46 = vpack.c.bf16 %v7375_v61, %v7375_v61  ;;  %v7335_v32 = vmul.f32 %v16203_v52, %v16170_v23 }
 0x47f   : > { %vm1105_vm10 = vcmp.ge.s32.totalorder %v1043_v33, 1  ;;  %v16226_v35 = vrot.slane %v7624_v11, 5  ;;  %v7262_v1 = vpack.c.bf16 %v7253_v62, %v7253_v62  ;;  %v7573_v47 = vrot.slane %v7571_v17, 4 }
 0x480   : > { %v16224_v13 = vsel %vm1105_vm10, 1.0, %v18277_v53  ;;  %v7200_v17 = vunpack.c.l.bf16 %v7191_v55  ;;  %vm1137_vm12 = vcmp.le.s32.totalorder %v1043_v33, 6 }
 0x481   : > { %v17751_v54 = vrot.slane %v16224_v13, 1  ;;  %v7630_v22 = vsel %vm2405_vm7, %v16232_v56, %v16226_v35  ;;  %v16251_v42 = vunpack.c.l.b16 %v7262_v1  ;;  %v11146_v1 = vld [vmem:[%s17497_s5 + $0x8] sm:$0xff] }
 0x482   : > { %v7072_v37 = vld [vmem:[#allocation3 + $0xc0] ss:$2 sm:$0xff]  ;;  %v7104_v34 = vld [vmem:[#allocation3 + $0xc1] ss:$2 sm:$0xff]  ;;  %8304 = vmatpush.bf16.msra.mxu2 %v11146_v1  ;;  %v16299_v1 = vunpack.c.l.bf16 %v16147_v20 }
 0x483   : > { %v7123_v63 = vadd.f32 %v7104_v34, %v7072_v37  ;;  %v16237_v5 = vsel %vm1309_vm2, %v7232_v51, %v17751_v54  ;;  %v7376_v37 = vmul.f32 %v16041_v3, %v16170_v23  ;;  %v7576_v34 = vrot.slane %v7574_v58, 5 }
 0x484   : > { %18297 = vst [vmem:[#allocation76_spill] sm:$0xff] %v16237_v5  ;;  %v7254_v11 = vmul.f32 %v16237_v5, %v16170_v23  ;;  %v7579_v51 = vshrl.u32 %v7567_v43, 16 }
 0x485   : > { %7139 = vst.msk [vmem:[#allocation4 + $0x60] sm:$0xff] %vm3365_vm3, %v7123_v63  ;;  %7554 = vrot.lane.b32.xlu1 %v7549_v4, %s11591_s21  ;;  %v7385_v45 = vpack.c.bf16 %v7376_v37, %v7376_v37  ;;  %v7582_v63 = vshll.u32 %v7567_v43, 16  ;;  %v16253_v4 = vunpack.c.l.b16 %v7384_v46  ;;  %v16263_v61 = vor.u32 %v7576_v34, %v7573_v47  ;;  %v11145_v37 = vld [vmem:[%s17497_s5] sm:$0xff]  ;;  %v11158_v43 = vld [vmem:[%s17497_s5 + $0x68] sm:$0xff] }
 0x486   : > { %v7263_v60 = vpack.c.bf16 %v7254_v11, %v7254_v11  ;;  %v7581_v12 = vrot.slane %v7579_v51, 4  ;;  %v7249_v46 = vmul.f32 %v16134_v0, %v7200_v17  ;;  %v7250_v11 = vmul.f32 %v16167_v39, %v7201_v16  ;;  %8329 = vmatpush.bf16.msrb.mxu3 %v11158_v43  ;;  %8305 = vmatpush.bf16.msra.mxu2 %v11145_v37 }
 0x487   : > { %v16257_v25 = vunpack.c.l.b16 %v7385_v45  ;;  %v7584_v2 = vrot.slane %v7582_v63, 5  ;;  %v7292_v45 = vrot.slane %v10291_v31, 7  ;;  %v7490_v63 = vpop.permute.xlu2 %7489  ;;  %v7395_v43 = vmul.f32 %v16086_v38, %v16170_v23 }
 0x488   : > { %v16255_v14 = vunpack.c.l.b16 %v7263_v60  ;;  %v7259_v47 = vpack.c.bf16 %v7250_v11, %v7250_v11  ;;  %v6702_v60 = vpop.f32.mrf.mxu2  ;;  %v7336_v31 = vmul.f32 %v16237_v5, %v16299_v1 }
 0x489   : > { %v16265_v57 = vor.u32 %v7584_v2, %v7581_v12  ;;  %v16291_v55 = vsel %vm1538_vm4, %v7290_v36, %v7292_v45  ;;  %v6969_v12 = vpop.f32.mrf.mxu1  ;;  %v18298_v2 = vld [vmem:[#allocation39_spill] sm:$0xff] }
 0x48a   : > { %v7421_v16 = vunpack.c.l.b16 %v7259_v47  ;;  %v6614_v17 = vadd.f32 %v15895_v9, %v18298_v2  ;;  %v7313_v36 = vmul.f32 %v16291_v55, %v16170_v23  ;;  %v7396_v23 = vmul.f32 %v16114_v49, %v16299_v1  ;;  %v18299_v2 = vld [vmem:[#allocation104_spill] sm:$0xff] }
 0x48b   : > { %v16270_v58 = vsel %vm2144_vm0, %v16263_v61, %v16265_v57 }
 0x48c   : > { %v6703_v11 = vadd.f32 %v6702_v60, %v6614_v17  ;;  %v6616_v17 = vadd.f32 %v15895_v9, %v18299_v2  ;;  %v7405_v40 = vpack.c.bf16 %v7396_v23, %v7396_v23  ;;  %v6793_v2 = vpop.f32.mrf.mxu3 }
 0x48d   : > { %7639 = vrot.lane.b32.xlu1 %v7630_v22, %s11591_s21  ;;  %v7258_v22 = vpack.c.bf16 %v7249_v46, %v7249_v46  ;;  %v16302_v46 = vsel %vm1137_vm12, 1.0, %v18277_v53 }
 0x48e   : > { %v17750_v37 = vrot.slane %v16302_v46, 7 }
 0x48f   : > { %v7420_v34 = vunpack.c.l.b16 %v7258_v22 }
 0x490   : > { %v6704_v22 = vpop.f32.mrf.mxu2  ;;  %v16314_v47 = vsel %vm1538_vm4, %v7292_v45, %v17750_v37  ;;  %v7345_v37 = vpack.c.bf16 %v7336_v31, %v7336_v31 }
 0x491   : > { %v7429_v51 = vpack.c.b16 %v7421_v16, %v7420_v34  ;;  %v7344_v34 = vpack.c.bf16 %v7335_v32, %v7335_v32  ;;  %v7322_v16 = vpack.c.bf16 %v7313_v36, %v7313_v36  ;;  %v7314_v60 = vmul.f32 %v16314_v47, %v16299_v1  ;;  %v6971_v36 = vpop.f32.mrf.mxu1 }
 0x493   : > { %v7722_v28 = vsel %vm3365_vm3, %v7429_v51, %v7490_v63  ;;  %v6792_v51 = vadd.f32 %v6791_v27, %v6703_v11  ;;  %v7404_v63 = vpack.c.bf16 %v7395_v43, %v7395_v43  ;;  %v7323_v54 = vpack.c.bf16 %v7314_v60, %v7314_v60 }
 0x494   : > { %v7854_v44 = vshrl.u32 %v7722_v28, 16  ;;  %v7857_v33 = vshll.u32 %v7722_v28, 16  ;;  %v18300_v27 = vpack.c.b16 %v16145_v21, %v16143_v50  ;;  %v6705_v11 = vadd.f32 %v6704_v22, %v6616_v17 }
 0x495   : > { %v16327_v30 = vunpack.c.l.b16 %v7344_v34  ;;  %v16329_v43 = vunpack.c.l.b16 %v7345_v37  ;;  %v7512_v49 = vunpack.c.l.b16 %v7322_v16  ;;  %v7699_v60 = vunpack.c.l.b16 %v7404_v63 }
 0x496   : > { %v7856_v28 = vrot.slane %v7854_v44, 3  ;;  %v7859_v62 = vrot.slane %v7857_v33, 4  ;;  %v7711_v32 = vrot.slane %v18300_v27, 5  ;;  %v18301_v44 = vpack.c.b16 %v16055_v48, %v16057_v8 }
 0x497   : > { %v7700_v34 = vunpack.c.l.b16 %v7405_v40  ;;  %v6794_v48 = vadd.f32 %v6793_v2, %v6705_v11  ;;  %v18303_v2 = vld [vmem:[#allocation103_spill] sm:$0xff] }
 0x498   : > { %v7915_v29 = vshrl.u32 %v7711_v32, 16 }
 0x499   : > { %v7707_v27 = vpack.c.b16 %v7700_v34, %v7699_v60 }
 0x49b   : > { %v16342_v63 = vrot.slane %v7707_v27, 5  ;;  %v7174_v27 = vld [vmem:[#allocation4 + $0x58] sm:$0xff] }
 0x4a2   : > { %v6707_v23 = vpop.f32.mrf.mxu2 }
 0x4af   : > { %v7492_v38 = vpop.permute.xlu0 %7491 }
 0x4b0   : > { %v7725_v33 = vsel %vm3365_vm3, %v18301_v44, %v7492_v38  ;;  %v7918_v38 = vshll.u32 %v7711_v32, 16  ;;  %v18302_v44 = vld [vmem:[#allocation34_spill] sm:$0xff] }
 0x4b1   : > { %v7861_v50 = vshrl.u32 %v7725_v33, 16  ;;  %v7864_v21 = vshll.u32 %v7725_v33, 16  ;;  %v17760_v40 = vand.u32 7, %v18302_v44 }
 0x4b2   : > { %v6880_v45 = vpop.f32.mrf.mxu0 }
 0x4b3   : > { %v6881_v10 = vadd.f32 %v6880_v45, %v6792_v51  ;;  %v7513_v51 = vunpack.c.l.b16 %v7323_v54  ;;  %v7863_v45 = vrot.slane %v7861_v50, 3  ;;  %v7866_v16 = vrot.slane %v7864_v21, 4 }
 0x4b4   : > { %v7860_v54 = vor.u32 %v7859_v62, %v7856_v28  ;;  %v6619_v62 = vadd.f32 %v15895_v9, %v18303_v2  ;;  %v7920_v21 = vrot.slane %v7918_v38, 4  ;;  %vm1106_vm13 = vcmp.ge.s32.totalorder %v17760_v40, 1 }
 0x4b5   : > { %v6970_v31 = vadd.f32 %v6969_v12, %v6881_v10  ;;  %v7519_v37 = vpack.c.b16 %v7513_v51, %v7512_v49  ;;  %v16340_v10 = vor.u32 %v7866_v16, %v7863_v45  ;;  %v11157_v49 = vld [vmem:[%s17497_s5 + $0x60] sm:$0xff]  ;;  %v7917_v51 = vrot.slane %v7915_v29, 3  ;;  %v7173_v16 = vld [vmem:[#allocation4 + $0x50] sm:$0xff] }
 0x4b6   : > { %8330 = vmatpush.bf16.msrb.mxu3 %v11157_v49  ;;  %v18304_v29 = vld [vmem:[#allocation26_spill] sm:$0xff] }
 0x4b7   : > { %v7010_v17 = vmax.f32 %v6970_v31, 0.0  ;;  %v16338_v8 = vrot.slane %v7519_v37, 5  ;;  %v7868_v28 = vsel %vm3413_vm6, %v7860_v54, %v16340_v10  ;;  %v7713_v31 = vsel %vm2405_vm7, %v7711_v32, %v16342_v63  ;;  %v6974_v37 = vpop.f32.mrf.mxu1 }
 0x4b8   : > { %8306 = vmatmul.bf16.vlgmr.msra.gmra.mxu2 %v7868_v28  ;;  %v7923_v34 = vshrl.u32 %v7713_v31, 16  ;;  %v7175_v32 = vadd.f32 %v7174_v27, %v7173_v16  ;;  %v17761_v2 = vand.u32 7, %v18304_v29  ;;  %v7921_v38 = vor.u32 %v7920_v21, %v7917_v51 }
 0x4b9   : > { %7042 = vst.msk [vmem:[#allocation3 + $0xd0] sm:$0xff] %vm3365_vm3, %v7010_v17  ;;  %v16351_v11 = vsel %vm2405_vm7, %v16161_v6, %v16338_v8  ;;  %v7926_v17 = vshll.u32 %v7713_v31, 16  ;;  %v6708_v6 = vadd.f32 %v6707_v23, %v6619_v62  ;;  %v10285_v62 = vsel %vm1106_vm13, 1.0, %v18277_v53 }
 0x4ba   : > { %v6882_v12 = vpop.f32.mrf.mxu0  ;;  %v7176_v23 = vmul.f32 0.25, %v7175_v32  ;;  %vm1107_vm15 = vcmp.ge.s32.totalorder %v17761_v2, 1  ;;  %v7236_v21 = vrot.slane %v10285_v62, 1 }
 0x4bb   : > { %v6883_v33 = vadd.f32 %v6882_v12, %v6794_v48  ;;  %v7925_v48 = vrot.slane %v7923_v34, 3  ;;  %v7928_v54 = vrot.slane %v7926_v17, 4  ;;  %v6709_v12 = vpop.f32.mrf.mxu2  ;;  %v18305_v34 = vld [vmem:[#allocation109_spill] sm:$0xff]  ;;  %v10286_v16 = vsel %vm1107_vm15, 1.0, %v18277_v53 }
 0x4bc   : > { %v6621_v17 = vadd.f32 %v15895_v9, %v18305_v34  ;;  %v16382_v62 = vrot.slane %v10286_v16, 1  ;;  %v18307_v34 = vld [vmem:[#allocation108_spill] sm:$0xff] }
 0x4bd   : > { %v6972_v60 = vadd.f32 %v6971_v36, %v6883_v33  ;;  %v6796_v50 = vpop.f32.mrf.mxu3  ;;  %v16363_v33 = vor.u32 %v7928_v54, %v7925_v48 }
 0x4be   : > { %v6797_v36 = vadd.f32 %v6796_v50, %v6708_v6  ;;  %v6710_v6 = vadd.f32 %v6709_v12, %v6621_v17  ;;  %v6624_v17 = vadd.f32 %v15895_v9, %v18307_v34 }
 0x4bf   : > { %v7011_v45 = vmax.f32 %v6972_v60, 0.0  ;;  %v16368_v31 = vsel %vm3413_vm6, %v7921_v38, %v16363_v33  ;;  %v7177_v60 = vpack.c.bf16 %v7176_v23, %v7176_v23  ;;  %v6976_v27 = vpop.f32.mrf.mxu1  ;;  %v18306_v38 = vrot.slane %v16224_v13, 1 }
 0x4c1   : > { %7043 = vst.msk [vmem:[#allocation3 + $0xd8] sm:$0xff] %vm3365_vm3, %v7011_v45 }
 0x4c2   : > { %v6885_v49 = vpop.f32.mrf.mxu0  ;;  %7178 = vst.msk [vmem:[#allocation5 + $0x1c] sm:$0xf] %vm1164_vm14, %v7177_v60  ;;  %v7377_v60 = vmul.f32 %v16203_v52, %v16299_v1 }
 0x4c3   : > { %v6886_v28 = vadd.f32 %v6885_v49, %v6797_v36  ;;  %v16380_v49 = vsel %vm1309_vm2, %v18306_v38, %v7236_v21 }
 0x4c5   : > { %v6975_v50 = vadd.f32 %v6974_v37, %v6886_v28  ;;  %v6798_v51 = vpop.f32.mrf.mxu3  ;;  %v6712_v37 = vpop.f32.mrf.mxu2  ;;  %v7255_v28 = vmul.f32 %v16380_v49, %v16299_v1 }
 0x4c6   : > { %v6799_v36 = vadd.f32 %v6798_v51, %v6710_v6  ;;  %v6713_v16 = vadd.f32 %v6712_v37, %v6624_v17 }
 0x4c7   : > { %v7012_v45 = vmax.f32 %v6975_v50, 0.0 }
 0x4c8   : > { %v7074_v48 = vld [vmem:[#allocation3 + $0xd0] ss:$2 sm:$0xff]  ;;  %v7106_v54 = vld [vmem:[#allocation3 + $0xd1] ss:$2 sm:$0xff] }
 0x4c9   : > { %v7124_v32 = vadd.f32 %v7106_v54, %v7074_v48  ;;  %7044 = vst.msk [vmem:[#allocation3 + $0xe0] sm:$0xff] %vm3365_vm3, %v7012_v45  ;;  %v16391_v51 = vld [vmem:[#allocation5 + $0x1c] sm:$0xf]  ;;  %v16399_v54 = vsel %vm1309_vm2, %v7236_v21, %v16382_v62 }
 0x4ca   : > { %v6887_v23 = vpop.f32.mrf.mxu0  ;;  %v16394_v6 = vunpack.c.l.bf16 %v16391_v51  ;;  %v17764_v45 = vunpack.c.l.b16 %v16391_v51 }
 0x4cb   : > { %7140 = vst.msk [vmem:[#allocation4 + $0x68] sm:$0xff] %vm3365_vm3, %v7124_v32  ;;  %v6888_v12 = vadd.f32 %v6887_v23, %v6799_v36  ;;  %v7264_v36 = vpack.c.bf16 %v7255_v28, %v7255_v28  ;;  %v18308_v23 = vunpack.c.l.b16 %v16147_v20  ;;  %v11517_v20 = vld [vmem:[%s17496_s4] ss:$0 sm:$0xff] }
 0x4cc   : > { %v7256_v32 = vmul.f32 %v16399_v54, %v16394_v6  ;;  %v7378_v9 = vmul.f32 %v16237_v5, %v16394_v6 }
 0x4cd   : > { %v6977_v13 = vadd.f32 %v6976_v27, %v6888_v12  ;;  %v6801_v50 = vpop.f32.mrf.mxu3  ;;  %v7386_v27 = vpack.c.bf16 %v7377_v60, %v7377_v60  ;;  %v7568_v37 = vpack.c.b16 %v17764_v45, %v18308_v23  ;;  %v6979_v12 = vpop.f32.mrf.mxu1  ;;  %v16410_v2 = vunpack.c.l.b16 %v7264_v36 }
 0x4ce   : > { %v6802_v38 = vadd.f32 %v6801_v50, %v6713_v16  ;;  %v7265_v21 = vpack.c.bf16 %v7256_v32, %v7256_v32  ;;  %v7387_v17 = vpack.c.bf16 %v7378_v9, %v7378_v9  ;;  %v6714_v28 = vpop.f32.mrf.mxu2  ;;  %v18309_v16 = vld [vmem:[#allocation38_spill] sm:$0xff] }
 0x4cf   : > { %v7013_v48 = vmax.f32 %v6977_v13, 0.0  ;;  %v7588_v22 = vshrl.u32 %v7568_v37, 16  ;;  %v7591_v40 = vshll.u32 %v7568_v37, 16  ;;  %v16414_v60 = vunpack.c.l.b16 %v7386_v27 }
 0x4d0   : > { %v16412_v5 = vunpack.c.l.b16 %v7265_v21  ;;  %v16416_v50 = vunpack.c.l.b16 %v7387_v17 }
 0x4d1   : > { %7045 = vst.msk [vmem:[#allocation3 + $0xe8] sm:$0xff] %vm3365_vm3, %v7013_v48  ;;  %v6626_v48 = vadd.f32 %v11517_v20, %v18309_v16  ;;  %v7590_v9 = vrot.slane %v7588_v22, 4 }
 0x4d2   : > { %v6890_v34 = vpop.f32.mrf.mxu0 }
 0x4d3   : > { %v6891_v13 = vadd.f32 %v6890_v34, %v6802_v38  ;;  %v7593_v38 = vrot.slane %v7591_v40, 5  ;;  %v6715_v27 = vadd.f32 %v6714_v28, %v6626_v48 }
 0x4d5   : > { %v6980_v32 = vadd.f32 %v6979_v12, %v6891_v13  ;;  %v6803_v23 = vpop.f32.mrf.mxu3  ;;  %v16426_v21 = vor.u32 %v7593_v38, %v7590_v9  ;;  %v7179_v12 = vld [vmem:[#allocation4 + $0x60] sm:$0xff]  ;;  %v7180_v13 = vld [vmem:[#allocation4 + $0x68] sm:$0xff]  ;;  %v6981_v48 = vpop.f32.mrf.mxu1 }
 0x4d6   : > { %v6804_v20 = vadd.f32 %v6803_v23, %v6715_v27  ;;  %v7181_v16 = vadd.f32 %v7180_v13, %v7179_v12  ;;  %v18310_v12 = vunpack.c.l.b16 %v16391_v51 }
 0x4d7   : > { %v7014_v34 = vmax.f32 %v6980_v32, 0.0  ;;  %v16432_v22 = vsel %vm2144_vm0, %v16265_v57, %v16426_v21  ;;  %v11156_v57 = vld [vmem:[%s17497_s5 + $0x58] sm:$0xff] }
 0x4d8   : > { %v7076_v17 = vld [vmem:[#allocation3 + $0xe0] ss:$2 sm:$0xff]  ;;  %v7108_v45 = vld [vmem:[#allocation3 + $0xe1] ss:$2 sm:$0xff]  ;;  %v7182_v9 = vmul.f32 0.25, %v7181_v16  ;;  %8331 = vmatpush.bf16.msrb.mxu3 %v11156_v57 }
 0x4d9   : > { %v7125_v52 = vadd.f32 %v7108_v45, %v7076_v17  ;;  %7046 = vst.msk [vmem:[#allocation3 + $0xf0] sm:$0xff] %vm3365_vm3, %v7014_v34 }
 0x4da   : > { %v6892_v40 = vpop.f32.mrf.mxu0  ;;  %v7183_v45 = vpack.c.bf16 %v7182_v9, %v7182_v9 }
 0x4db   : > { %7141 = vst.msk [vmem:[#allocation4 + $0x70] sm:$0xff] %vm3365_vm3, %v7125_v52  ;;  %v6893_v28 = vadd.f32 %v6892_v40, %v6804_v20  ;;  %v7337_v52 = vmul.f32 %v16380_v49, %v16394_v6 }
 0x4dc   : > { %7184 = vst.msk [vmem:[#allocation5 + $0x20] sm:$0xf] %vm1164_vm14, %v7183_v45  ;;  %v7356_v45 = vmul.f32 %v16314_v47, %v16394_v6 }
 0x4dd   : > { %v6982_v32 = vadd.f32 %v6981_v48, %v6893_v28  ;;  %v7346_v16 = vpack.c.bf16 %v7337_v52, %v7337_v52 }
 0x4df   : > { %v7015_v38 = vmax.f32 %v6982_v32, 0.0 }
 0x4e1   : > { %7047 = vst.msk [vmem:[#allocation3 + $0xf8] sm:$0xff] %vm3365_vm3, %v7015_v38  ;;  %v7355_v38 = vmul.f32 %v16291_v55, %v16299_v1  ;;  %v18312_v1 = vand.u32 7, %v18302_v44  ;;  %v18313_v44 = vpack.c.b16 %v16255_v14, %v16251_v42 }
 0x4e2   : > { %v7185_v52 = vld [vmem:[#allocation4 + $0x70] sm:$0xff] }
 0x4e3   : > { %v16442_v17 = vld [vmem:[#allocation5 + $0x20] sm:$0xf]  ;;  %vm1138_vm1 = vcmp.le.s32.totalorder %v18312_v1, 6 }
 0x4e4   : > { %v16445_v20 = vunpack.c.l.bf16 %v16442_v17  ;;  %v17767_v40 = vunpack.c.l.b16 %v16442_v17 }
 0x4e6   : > { %v7453_v13 = vpack.c.b16 %v17767_v40, %v18310_v12  ;;  %v7338_v28 = vmul.f32 %v16399_v54, %v16445_v20 }
 0x4e8   : > { %v7078_v23 = vld [vmem:[#allocation3 + $0xf0] ss:$2 sm:$0xff]  ;;  %v7110_v27 = vld [vmem:[#allocation3 + $0xf1] ss:$2 sm:$0xff]  ;;  %v7481_v48 = vshrl.u32 %v7453_v13, 16  ;;  %v7484_v32 = vshll.u32 %v7453_v13, 16  ;;  %v7347_v9 = vpack.c.bf16 %v7338_v28, %v7338_v28  ;;  %v7365_v28 = vpack.c.bf16 %v7356_v45, %v7356_v45 }
 0x4e9   : > { %v7126_v34 = vadd.f32 %v7110_v27, %v7078_v23  ;;  %v7546_v27 = vunpack.c.l.b16 %v7346_v16  ;;  %v7349_v13 = vld [vmem:[#allocation5 + $0x28] sm:$0x1]  ;;  %v7364_v16 = vpack.c.bf16 %v7355_v38, %v7355_v38 }
 0x4ea   : > { %v7483_v57 = vrot.slane %v7481_v48, 4  ;;  %v7486_v23 = vrot.slane %v7484_v32, 5  ;;  %v7547_v51 = vunpack.c.l.b16 %v7347_v9  ;;  %v18314_v9 = vpack.c.b16 %v16257_v25, %v16253_v4 }
 0x4eb   : > { %7142 = vst.msk [vmem:[#allocation4 + $0x78] sm:$0xff] %vm3365_vm3, %v7126_v34  ;;  %v18311_v34 = vand.u32 7, %v18304_v29  ;;  %v7619_v42 = vunpack.c.l.b16 %v7365_v28  ;;  %v18316_v28 = vrot.slane %v16302_v46, 7 }
 0x4ec   : > { %v16461_v12 = vor.u32 %v7486_v23, %v7483_v57  ;;  %v7552_v40 = vpack.c.b16 %v7547_v51, %v7546_v27  ;;  %v10293_v23 = vsel %vm1138_vm1, 1.0, %v18277_v53 }
 0x4ed   : > { %vm1139_vm2 = vcmp.le.s32.totalorder %v18311_v34, 6  ;;  %v7296_v4 = vrot.slane %v10293_v23, 7 }
 0x4ee   : > { %v10294_v3 = vsel %vm1139_vm2, 1.0, %v18277_v53  ;;  %7497 = vrot.lane.b32.xlu0 %v16461_v12, %s11591_s21  ;;  %7560 = vrot.lane.b32.xlu1 %v7552_v40, %s11591_s21  ;;  %v7488_v29 = vsel %vm2144_vm0, %v16190_v19, %v16461_v12  ;;  %v7350_v19 = vunpack.c.l.bf16 %v7349_v13  ;;  %v18315_v13 = vpack.c.b16 %v16138_v24, %v16136_v59 }
 0x4ef   : > { %v7494_v48 = vpop.permute.xlu1 %7493  ;;  %7495 = vrot.lane.b32.xlu2 %v7488_v29, %s11591_s21  ;;  %v16487_v27 = vrot.slane %v10294_v3, 7  ;;  %v16498_v3 = vld [vmem:[#allocation5 + $0x28] sm:$0xf] }
 0x4f0   : > { %v7728_v32 = vsel %vm3365_vm3, %v18313_v44, %v7494_v48  ;;  %v16483_v45 = vsel %vm3365_vm3, %v18314_v9, %v7494_v48  ;;  %v16507_v48 = vsel %vm1538_vm4, %v18316_v28, %v7296_v4 }
 0x4f1   : > { %v7931_v38 = vshrl.u32 %v7728_v32, 16  ;;  %v7934_v57 = vshll.u32 %v7728_v32, 16  ;;  %v7359_v25 = vmul.f32 %v7350_v19, %v16487_v27  ;;  %v16520_v24 = vsel %vm1538_vm4, %v7296_v4, %v16487_v27 }
 0x4f2   : > { %v7186_v37 = vld [vmem:[#allocation4 + $0x78] sm:$0xff] }
 0x4f3   : > { %v7187_v36 = vadd.f32 %v7186_v37, %v7185_v52  ;;  %v11155_v37 = vld [vmem:[%s17497_s5 + $0x50] sm:$0xff]  ;;  %v7933_v51 = vrot.slane %v7931_v38, 3  ;;  %v7936_v34 = vrot.slane %v7934_v57, 4  ;;  %v7618_v52 = vunpack.c.l.b16 %v7364_v16 }
 0x4f4   : > { %8332 = vmatpush.bf16.msrb.mxu3 %v11155_v37  ;;  %v7368_v29 = vpack.c.bf16 %v7359_v25, %v7359_v25  ;;  %v18317_v57 = vpack.c.b16 %v16329_v43, %v16327_v30 }
 0x4f5   : > { %v7188_v40 = vmul.f32 0.25, %v7187_v36  ;;  %v16491_v1 = vor.u32 %v7936_v34, %v7933_v51  ;;  %v7625_v36 = vpack.c.b16 %v7619_v42, %v7618_v52 }
 0x4f6   : > { %7637 = vrot.lane.b32.xlu0 %v16232_v56, %s11591_s21  ;;  %v7671_v56 = vunpack.c.l.b16 %v16498_v3  ;;  %v7622_v32 = vunpack.c.l.b16 %v7368_v29 }
 0x4f7   : > { %v7189_v14 = vpack.c.bf16 %v7188_v40, %v7188_v40  ;;  %v7938_v53 = vsel %vm3413_vm6, %v16340_v10, %v16491_v1  ;;  %7556 = vrot.lane.b32.xlu2 %v18315_v13, %s11591_s21  ;;  %v7357_v10 = vmul.f32 %v16507_v48, %v16445_v20  ;;  %v7631_v16 = vrot.slane %v7625_v36, 5 }
 0x4f8   : > { %8311 = vmatmul.bf16.gmra.mxu2 %v7938_v53 }
 0x4f9   : > { %7190 = vst.msk [vmem:[#allocation5 + $0x24] sm:$0xf] %vm1164_vm14, %v7189_v14  ;;  %v7366_v46 = vpack.c.bf16 %v7357_v10, %v7357_v10  ;;  %v7632_v9 = vsel %vm2405_vm7, %v16226_v35, %v7631_v16  ;;  %v7627_v14 = vpack.c.b16 %v7622_v32, %v7622_v32  ;;  %v11168_v32 = vld [vmem:[%s17497_s5 + $0xb8] sm:$0xff] }
 0x4fa   : > { %8356 = vmatpush.bf16.msrb.mxu2 %v11168_v32 }
 0x4fb   : > { %v7620_v35 = vunpack.c.l.b16 %v7366_v46  ;;  %v7635_v53 = vrot.slane %v7627_v14, 5  ;;  %v7315_v46 = vmul.f32 %v16507_v48, %v16394_v6 }
 0x4fe   : > { %7641 = vrot.lane.b32.xlu0 %v7632_v9, %s11591_s21  ;;  %v7324_v9 = vpack.c.bf16 %v7315_v46, %v7315_v46 }
 0x4ff   : > { %7558 = vrot.lane.b32.xlu2 %v18317_v57, %s11591_s21 }
 0x500   : > { %v16512_v37 = vld [vmem:[#allocation5 + $0x24] sm:$0xf] }
 0x501   : > { %v16515_v44 = vunpack.c.l.bf16 %v16512_v37  ;;  %v7565_v59 = vunpack.c.l.b16 %v16512_v37  ;;  %v11180_v37 = vld [vmem:[%s17497_s5 + $0x118] sm:$0xff] }
 0x503   : > { %v7339_v40 = vmul.f32 %v16515_v44, %v16382_v62  ;;  %v7358_v19 = vmul.f32 %v16515_v44, %v16520_v24  ;;  %v7672_v38 = vpack.c.b16 %v7671_v56, %v7565_v59  ;;  %v7399_v32 = vmul.f32 %v16515_v44, %v16507_v48 }
 0x505   : > { %v7348_v23 = vpack.c.bf16 %v7339_v40, %v7339_v40  ;;  %v7367_v42 = vpack.c.bf16 %v7358_v19, %v7358_v19  ;;  %v7674_v52 = vshrl.u32 %v7672_v38, 16  ;;  %v7677_v4 = vshll.u32 %v7672_v38, 16 }
 0x506   : > { %v7398_v40 = vmul.f32 %v16314_v47, %v16445_v20  ;;  %v7408_v46 = vpack.c.bf16 %v7399_v32, %v7399_v32 }
 0x507   : > { %v7548_v51 = vunpack.c.l.b16 %v7348_v23  ;;  %v7621_v34 = vunpack.c.l.b16 %v7367_v42  ;;  %v7676_v28 = vrot.slane %v7674_v52, 4  ;;  %v7679_v29 = vrot.slane %v7677_v4, 5  ;;  %v11167_v23 = vld [vmem:[%s17497_s5 + $0xb0] sm:$0xff] }
 0x508   : > { %v7407_v57 = vpack.c.bf16 %v7398_v40, %v7398_v40  ;;  %v7514_v42 = vunpack.c.l.b16 %v7324_v9  ;;  %8357 = vmatpush.bf16.msrb.mxu2 %v11167_v23  ;;  %v11163_v40 = vld [vmem:[%s17497_s5 + $0x90] sm:$0xff] }
 0x509   : > { %v7553_v25 = vpack.c.b16 %v7548_v51, %v7548_v51  ;;  %v7626_v36 = vpack.c.b16 %v7621_v34, %v7620_v35  ;;  %v7680_v43 = vor.u32 %v7679_v29, %v7676_v28  ;;  %v11166_v51 = vld [vmem:[%s17497_s5 + $0xa8] sm:$0xff] }
 0x50b   : > { %v7633_v13 = vrot.slane %v7626_v36, 5  ;;  %7562 = vrot.lane.b32.xlu0 %v7553_v25, %s11591_s21  ;;  %v7681_v56 = vsel %vm2144_vm0, %v16461_v12, %v7680_v43  ;;  %v7397_v12 = vmul.f32 %v16291_v55, %v16394_v6  ;;  %v7702_v6 = vunpack.c.l.b16 %v7407_v57 }
 0x50c   : > { %8358 = vmatpush.bf16.msrb.mxu2 %v11166_v51 }
 0x50d   : > { %v7634_v10 = vsel %vm2405_vm7, %v7631_v16, %v7633_v13  ;;  %v7636_v30 = vsel %vm2405_vm7, %v7633_v13, %v7635_v53  ;;  %v11154_v16 = vld [vmem:[%s17497_s5 + $0x48] sm:$0xff]  ;;  %v7406_v19 = vpack.c.bf16 %v7397_v12, %v7397_v12 }
 0x50e   : > { %7643 = vrot.lane.b32.xlu2 %v7634_v10, %s11591_s21  ;;  %7645 = vrot.lane.b32.xlu1 %v7636_v30, %s11591_s21  ;;  %v11165_v30 = vld [vmem:[%s17497_s5 + $0xa0] sm:$0xff] }
 0x50f   : > { %8333 = vmatpush.bf16.msrb.mxu3 %v11154_v16  ;;  %v7701_v35 = vunpack.c.l.b16 %v7406_v19  ;;  %v7372_v16 = vunpack.c.l.bf16 %v16498_v3 }
 0x510   : > { %8359 = vmatpush.bf16.msrb.mxu2 %v11165_v30 }
 0x511   : > { %v7708_v52 = vpack.c.b16 %v7702_v6, %v7701_v35  ;;  %v18319_v35 = vpack.c.b16 %v16416_v50, %v16414_v60 }
 0x513   : > { %7684 = vrot.lane.b32.xlu0 %v7681_v56, %s11591_s21  ;;  %v7714_v25 = vrot.slane %v7708_v52, 5 }
 0x515   : > { %v7715_v53 = vsel %vm2405_vm7, %v16342_v63, %v7714_v25  ;;  %v11164_v63 = vld [vmem:[%s17497_s5 + $0x98] sm:$0xff] }
 0x516   : > { %7682 = vrot.lane.b32.xlu2 %v15963_v41, %s11591_s21  ;;  %7686 = vrot.lane.b32.xlu1 %v7680_v43, %s11591_s21  ;;  %v7316_v41 = vmul.f32 %v16520_v24, %v16445_v20  ;;  %v7964_v13 = vshrl.u32 %v7715_v53, 16  ;;  %v7967_v28 = vshll.u32 %v7715_v53, 16  ;;  %s324_s21 = scalar_lea.vmem [#allocation7], %s323_s24 }
 0x517   : > { %8360 = vmatpush.bf16.msrb.mxu2 %v11164_v63  ;;  %s10185_s26 = sshll.u32 %s324_s21, 4  ;;  %s10186_s26 = int_to_ptr.vmem [resolvable:$true] %s10185_s26 }
 0x518   : > { %v7325_v38 = vpack.c.bf16 %v7316_v41, %v7316_v41  ;;  %v7966_v29 = vrot.slane %v7964_v13, 3  ;;  %v7969_v10 = vrot.slane %v7967_v28, 4  ;;  %v7703_v41 = vunpack.c.l.b16 %v7408_v46 }
 0x51a   : > { %v7515_v14 = vunpack.c.l.b16 %v7325_v38  ;;  %v7970_v43 = vor.u32 %v7969_v10, %v7966_v29  ;;  %v7555_v38 = vpop.permute.xlu1 %7554 }
 0x51b   : > { %8361 = vmatpush.bf16.msrb.mxu2 %v11163_v40  ;;  %v7737_v51 = vsel %vm3365_vm3, %v16159_v7, %v7555_v38 }
 0x51c   : > { %v7520_v34 = vpack.c.b16 %v7515_v14, %v7514_v42  ;;  %v16580_v56 = vsel %vm3413_vm6, %v16363_v33, %v7970_v43  ;;  %v7400_v33 = vmul.f32 %v7372_v16, %v16520_v24  ;;  %v18318_v42 = vpack.c.b16 %v16412_v5, %v16410_v2  ;;  %v11162_v5 = vld [vmem:[%s17497_s5 + $0x88] sm:$0xff] }
 0x51d   : > { %v7869_v29 = vshrl.u32 %v7737_v51, 16  ;;  %v7872_v50 = vshll.u32 %v7737_v51, 16 }
 0x51e   : > { %v16566_v4 = vrot.slane %v7520_v34, 5  ;;  %v7409_v12 = vpack.c.bf16 %v7400_v33, %v7400_v33 }
 0x51f   : > { %8362 = vmatpush.bf16.msrb.mxu2 %v11162_v5  ;;  %v7871_v63 = vrot.slane %v7869_v29, 3  ;;  %v7874_v46 = vrot.slane %v7872_v50, 4 }
 0x520   : > { %v16571_v36 = vsel %vm2405_vm7, %v16338_v8, %v16566_v4  ;;  %v11153_v8 = vld [vmem:[%s17497_s5 + $0x40] sm:$0xff]  ;;  %v7704_v9 = vunpack.c.l.b16 %v7409_v12 }
 0x521   : > { %8334 = vmatpush.bf16.msrb.mxu3 %v11153_v8 }
 0x522   : > { %v7709_v19 = vpack.c.b16 %v7704_v9, %v7703_v41  ;;  %v7257_v9 = vmul.f32 %v16382_v62, %v16445_v20 }
 0x524   : > { %v16597_v23 = vrot.slane %v7709_v19, 5 }
 0x526   : > { %v7717_v53 = vsel %vm2405_vm7, %v7714_v25, %v16597_v23 }
 0x527   : > { %v8005_v2 = vshrl.u32 %v7717_v53, 16  ;;  %v8008_v60 = vshll.u32 %v7717_v53, 16 }
 0x529   : > { %v8007_v30 = vrot.slane %v8005_v2, 3  ;;  %v8010_v7 = vrot.slane %v8008_v60, 4  ;;  %v7374_v2 = vmul.f32 %v16167_v39, %v16023_v18  ;;  %v7267_v60 = vld [vmem:[#allocation5 + $0x24] sm:$0x1] }
 0x52b   : > { %v16623_v33 = vor.u32 %v8010_v7, %v8007_v30 }
 0x52d   : > { %v16629_v40 = vsel %vm3413_vm6, %v7970_v43, %v16623_v33 }
 0x549   : > { %v7496_v57 = vpop.permute.xlu2 %7495 }
 0x54a   : > { %v7731_v14 = vsel %vm3365_vm3, %v18318_v42, %v7496_v57  ;;  %v16607_v6 = vsel %vm3365_vm3, %v18319_v35, %v7496_v57  ;;  %v7266_v42 = vpack.c.bf16 %v7257_v9, %v7257_v9  ;;  %v18320_v35 = vunpack.c.l.b16 %v16442_v17  ;;  %v11176_v17 = vld [vmem:[%s17497_s5 + $0xf8] sm:$0xff] }
 0x54b   : > { %v7972_v34 = vshrl.u32 %v7731_v14, 16  ;;  %v7975_v52 = vshll.u32 %v7731_v14, 16  ;;  %v7640_v14 = vpop.permute.xlu1 %7639  ;;  %8385 = vmatpush.bf16.msra.mxu3 %v11176_v17  ;;  %v7383_v9 = vpack.c.bf16 %v7374_v2, %v7374_v2 }
 0x54c   : > { %v7569_v51 = vpack.c.b16 %v7565_v59, %v18320_v35  ;;  %v7428_v29 = vunpack.c.l.b16 %v7266_v42 }
 0x54d   : > { %v7974_v13 = vrot.slane %v7972_v34, 3  ;;  %v7977_v28 = vrot.slane %v7975_v52, 4  ;;  %v7369_v34 = vld [vmem:[#allocation5 + $0x8] sm:$0x8] }
 0x54e   : > { %v7371_v5 = vunpack.c.l.bf16 %v7369_v34  ;;  %v7597_v59 = vshrl.u32 %v7569_v51, 16  ;;  %v7600_v30 = vshll.u32 %v7569_v51, 16 }
 0x54f   : > { %v16616_v10 = vor.u32 %v7977_v28, %v7974_v13 }
 0x551   : > { %v7557_v8 = vpop.permute.xlu2 %7556  ;;  %v7979_v25 = vsel %vm3413_vm6, %v16491_v1, %v16616_v10  ;;  %v11161_v1 = vld [vmem:[%s17497_s5 + $0x80] sm:$0xff] }
 0x552   : > { %v7740_v32 = vsel %vm3365_vm3, %v16180_v26, %v7557_v8  ;;  %8316 = vmatmul.bf16.gmra.mxu2 %v7979_v25  ;;  %v7875_v26 = vor.u32 %v7874_v46, %v7871_v63  ;;  %v7433_v8 = vpack.c.b16 %v7428_v29, %v7428_v29  ;;  %v7373_v25 = vmul.f32 %v7371_v5, %v16134_v0 }
 0x553   : > { %v7876_v12 = vshrl.u32 %v7740_v32, 16  ;;  %v7879_v41 = vshll.u32 %v7740_v32, 16  ;;  %8363 = vmatpush.bf16.msrb.mxu2 %v11161_v1  ;;  %v7268_v63 = vunpack.c.l.bf16 %v7267_v60  ;;  %v7755_v32 = vsel %vm3365_vm3, %v16270_v58, %v7640_v14  ;;  %v11175_v58 = vld [vmem:[%s17497_s5 + $0xf0] sm:$0xff] }
 0x554   : > { %v7602_v1 = vrot.slane %v7600_v30, 5  ;;  %v7657_v29 = vunpack.c.l.b16 %v7383_v9  ;;  %8386 = vmatpush.bf16.msra.mxu3 %v11175_v58  ;;  %v7894_v5 = vshll.u32 %v7755_v32, 16 }
 0x555   : > { %v7878_v19 = vrot.slane %v7876_v12, 3  ;;  %v7881_v38 = vrot.slane %v7879_v41, 4  ;;  %v7599_v41 = vrot.slane %v7597_v59, 4  ;;  %v7317_v14 = vmul.f32 %v16487_v27, %v7268_v63 }
 0x557   : > { %v7882_v57 = vor.u32 %v7881_v38, %v7878_v19  ;;  %8418 = vmatpush.bf16.msra.mxu2 %v11180_v37  ;;  %v16665_v59 = vor.u32 %v7602_v1, %v7599_v41  ;;  %v7326_v30 = vpack.c.bf16 %v7317_v14, %v7317_v14  ;;  %v7906_v14 = vshrl.u32 %v16483_v45, 16 }
 0x559   : > { %v7559_v52 = vpop.permute.xlu2 %7558  ;;  %v7883_v43 = vsel %vm3413_vm6, %v7875_v26, %v7882_v57  ;;  %v7604_v41 = vsel %vm2144_vm0, %v16426_v21, %v16665_v59 }
 0x55a   : > { %v7743_v53 = vsel %vm3365_vm3, %v16351_v11, %v7559_v52  ;;  %8335 = vmatmul.bf16.vlgmr.msrb.gmra.mxu3 %v7883_v43  ;;  %v7382_v52 = vpack.c.bf16 %v7373_v25, %v7373_v25 }
 0x55b   : > { %v7939_v13 = vshrl.u32 %v7743_v53, 16  ;;  %v7942_v28 = vshll.u32 %v7743_v53, 16 }
 0x55c   : > { %v7656_v2 = vunpack.c.l.b16 %v7382_v52 }
 0x55d   : > { %v7941_v50 = vrot.slane %v7939_v13, 3  ;;  %v7944_v11 = vrot.slane %v7942_v28, 4 }
 0x55e   : > { %v7665_v63 = vpack.c.b16 %v7657_v29, %v7656_v2 }
 0x55f   : > { %v7945_v7 = vor.u32 %v7944_v11, %v7941_v50 }
 0x560   : > { %v7498_v46 = vpop.permute.xlu0 %7497  ;;  %v7561_v12 = vpop.permute.xlu1 %7560 }
 0x561   : > { %v7734_v18 = vsel %vm3365_vm3, %v7433_v8, %v7498_v46  ;;  %v7746_v19 = vsel %vm3365_vm3, %v16571_v36, %v7561_v12  ;;  %v7946_v38 = vsel %vm3413_vm6, %v7882_v57, %v7945_v7  ;;  %v7891_v36 = vshrl.u32 %v7755_v32, 16  ;;  %v11174_v57 = vld [vmem:[%s17497_s5 + $0xe8] sm:$0xff]  ;;  %v11173_v32 = vld [vmem:[%s17497_s5 + $0xe0] sm:$0xff] }
 0x562   : > { %v8013_v26 = vshrl.u32 %v7734_v18, 16  ;;  %v8016_v42 = vshll.u32 %v7734_v18, 16  ;;  %v7980_v35 = vshrl.u32 %v7746_v19, 16  ;;  %v7983_v51 = vshll.u32 %v7746_v19, 16  ;;  %8387 = vmatpush.bf16.msra.mxu3 %v11174_v57  ;;  %v11171_v57 = vld [vmem:[%s17497_s5 + $0xd0] sm:$0xff] }
 0x563   : > { %v7893_v8 = vrot.slane %v7891_v36, 3  ;;  %v7896_v46 = vrot.slane %v7894_v5, 4 }
 0x564   : > { %v8015_v43 = vrot.slane %v8013_v26, 3  ;;  %v8018_v53 = vrot.slane %v8016_v42, 4  ;;  %v7982_v13 = vrot.slane %v7980_v35, 3  ;;  %v7985_v28 = vrot.slane %v7983_v51, 4 }
 0x565   : > { %v7516_v26 = vunpack.c.l.b16 %v7326_v30  ;;  %v7897_v51 = vor.u32 %v7896_v46, %v7893_v8 }
 0x566   : > { %v8019_v17 = vor.u32 %v8018_v53, %v8015_v43  ;;  %v16663_v37 = vor.u32 %v7985_v28, %v7982_v13  ;;  %8388 = vmatpush.bf16.msra.mxu3 %v11173_v32 }
 0x567   : > { %v7521_v13 = vpack.c.b16 %v7516_v26, %v7516_v26 }
 0x568   : > { %v7644_v34 = vpop.permute.xlu2 %7643  ;;  %v7638_v60 = vpop.permute.xlu0 %7637  ;;  %v8020_v50 = vsel %vm3413_vm6, %v16616_v10, %v8019_v17  ;;  %v16671_v11 = vsel %vm3413_vm6, %v7945_v7, %v16663_v37  ;;  %v11179_v10 = vld [vmem:[%s17497_s5 + $0x110] sm:$0xff] }
 0x569   : > { %v7752_v25 = vsel %vm3365_vm3, %v16263_v61, %v7638_v60  ;;  %8321 = vmatmul.bf16.gmra.mxu2 %v8020_v50  ;;  %v7761_v9 = vsel %vm3365_vm3, %v7604_v41, %v7644_v34  ;;  %v7909_v34 = vshll.u32 %v16483_v45, 16  ;;  %v7908_v50 = vrot.slane %v7906_v14, 3 }
 0x56a   : > { %v7884_v12 = vshrl.u32 %v7752_v25, 16  ;;  %v7887_v7 = vshll.u32 %v7752_v25, 16  ;;  %8340 = vmatmul.bf16.gmra.mxu3 %v7946_v38  ;;  %8419 = vmatpush.bf16.msra.mxu2 %v11179_v10  ;;  %v11172_v38 = vld [vmem:[%s17497_s5 + $0xd8] sm:$0xff]  ;;  %v7988_v58 = vshrl.u32 %v7761_v9, 16  ;;  %v7991_v21 = vshll.u32 %v7761_v9, 16 }
 0x56b   : > { %8389 = vmatpush.bf16.msra.mxu3 %v11172_v38  ;;  %v7911_v45 = vrot.slane %v7909_v34, 4  ;;  %v7529_v25 = vrot.slane %v7521_v13, 5  ;;  %v7380_v38 = vmul.f32 %v16515_v44, %v16399_v54 }
 0x56c   : > { %v7886_v19 = vrot.slane %v7884_v12, 3  ;;  %v7889_v1 = vrot.slane %v7887_v7, 4  ;;  %v7990_v5 = vrot.slane %v7988_v58, 3  ;;  %v7993_v17 = vrot.slane %v7991_v21, 4 }
 0x56d   : > { %v7912_v46 = vor.u32 %v7911_v45, %v7908_v50  ;;  %v7530_v12 = vsel %vm2405_vm7, %v16566_v4, %v7529_v25  ;;  %v7379_v21 = vmul.f32 %v16380_v49, %v16445_v20  ;;  %v7389_v14 = vpack.c.bf16 %v7380_v38, %v7380_v38 }
 0x56e   : > { %v7890_v52 = vor.u32 %v7889_v1, %v7886_v19  ;;  %v7994_v32 = vor.u32 %v7993_v17, %v7990_v5  ;;  %v11178_v19 = vld [vmem:[%s17497_s5 + $0x108] sm:$0xff] }
 0x56f   : > { %8390 = vmatpush.bf16.msra.mxu3 %v11171_v57  ;;  %8420 = vmatpush.bf16.msra.mxu2 %v11178_v19  ;;  %v7663_v13 = vunpack.c.l.b16 %v7389_v14  ;;  %v11219_v14 = vld [vmem:[%s17499_s7 + $0x130] sm:$0xff] }
 0x570   : > { %v7683_v61 = vpop.permute.xlu2 %7682  ;;  %v7642_v43 = vpop.permute.xlu0 %7641  ;;  %v7898_v53 = vsel %vm3413_vm6, %v7890_v52, %v7897_v51  ;;  %v7958_v52 = vshll.u32 %v16607_v6, 16 }
 0x571   : > { %v7767_v18 = vsel %vm3365_vm3, %v7665_v63, %v7683_v61  ;;  %v7758_v28 = vsel %vm3365_vm3, %v16432_v22, %v7642_v43  ;;  %v11170_v22 = vld [vmem:[%s17497_s5 + $0xc8] sm:$0xff] }
 0x572   : > { %v7899_v42 = vshrl.u32 %v7767_v18, 16  ;;  %v7902_v35 = vshll.u32 %v7767_v18, 16  ;;  %v7947_v2 = vshrl.u32 %v7758_v28, 16  ;;  %v7950_v60 = vshll.u32 %v7758_v28, 16  ;;  %v11169_v18 = vld [vmem:[%s17497_s5 + $0xc0] sm:$0xff] }
 0x573   : > { %8391 = vmatpush.bf16.msra.mxu3 %v11170_v22  ;;  %v7960_v43 = vrot.slane %v7958_v52, 4 }
 0x574   : > { %v7901_v36 = vrot.slane %v7899_v42, 3  ;;  %v7904_v29 = vrot.slane %v7902_v35, 4  ;;  %v7949_v30 = vrot.slane %v7947_v2, 3  ;;  %v7952_v8 = vrot.slane %v7950_v60, 4 }
 0x576   : > { %v7905_v63 = vor.u32 %v7904_v29, %v7901_v36  ;;  %v7953_v10 = vor.u32 %v7952_v8, %v7949_v30 }
 0x577   : > { %8392 = vmatpush.bf16.msra.mxu3 %v11169_v18 }
 0x578   : > { %v7954_v41 = vsel %vm3413_vm6, %v7897_v51, %v7953_v10  ;;  %v7995_v61 = vsel %vm3413_vm6, %v7953_v10, %v7994_v32  ;;  %v7913_v1 = vsel %vm3413_vm6, %v7905_v63, %v7912_v46  ;;  %v7955_v51 = vshrl.u32 %v16607_v6, 16  ;;  %v11177_v6 = vld [vmem:[%s17497_s5 + $0x100] sm:$0xff] }
 0x579   : > { %8364 = vmatmul.bf16.vlgmr.msrb.gmra.mxu2 %v7898_v53  ;;  %v7388_v53 = vpack.c.bf16 %v7379_v21, %v7379_v21  ;;  %v16748_v21 = vld [vmem:[%s17499_s7 + $0xf8] sm:$0xff] }
 0x57a   : > { %8345 = vmatmul.bf16.gmra.mxu3 %v16671_v11  ;;  %v7957_v34 = vrot.slane %v7955_v51, 3  ;;  %8421 = vmatpush.bf16.msra.mxu2 %v11177_v6 }
 0x57b   : > { %v7662_v36 = vunpack.c.l.b16 %v7388_v53  ;;  %9977 = vmatpush.bf16.msra.mxu0 %v16748_v21 }
 0x57c   : > { %v7961_v28 = vor.u32 %v7960_v43, %v7957_v34  ;;  %v16759_v43 = vld [vmem:[%s17498_s6] ss:$0 sm:$0xff] }
 0x57d   : > { %v7563_v7 = vpop.permute.xlu0 %7562  ;;  %v7668_v29 = vpack.c.b16 %v7663_v13, %v7662_v36 }
 0x57e   : > { %v7749_v9 = vsel %vm3365_vm3, %v7530_v12, %v7563_v7  ;;  %v7962_v57 = vsel %vm3413_vm6, %v7912_v46, %v7961_v28  ;;  %v7381_v12 = vmul.f32 %v7372_v16, %v16382_v62  ;;  %v7391_v16 = vld [vmem:[#allocation5 + $0x2c] sm:$0x1] }
 0x57f   : > { %v8021_v4 = vshrl.u32 %v7749_v9, 16  ;;  %v8024_v26 = vshll.u32 %v7749_v9, 16 }
 0x580   : > { %v7646_v50 = vpop.permute.xlu1 %7645  ;;  %v7390_v7 = vpack.c.bf16 %v7381_v12, %v7381_v12 }
 0x581   : > { %v8023_v42 = vrot.slane %v8021_v4, 3  ;;  %v8026_v35 = vrot.slane %v8024_v26, 4  ;;  %v7764_v45 = vsel %vm3365_vm3, %v16665_v59, %v7646_v50  ;;  %v11220_v59 = vld [vmem:[%s17499_s7 + $0x138] sm:$0xff]  ;;  %v16777_v50 = vld [vmem:[%s17499_s7 + $0xf0] sm:$0xff] }
 0x582   : > { %v8029_v8 = vshrl.u32 %v7764_v45, 16  ;;  %v8032_v25 = vshll.u32 %v7764_v45, 16  ;;  %10006 = vmatpush.bf16.msra.mxu1 %v11220_v59  ;;  %9978 = vmatpush.bf16.msra.mxu0 %v16777_v50 }
 0x583   : > { %v8027_v58 = vor.u32 %v8026_v35, %v8023_v42  ;;  %v7392_v42 = vunpack.c.l.bf16 %v7391_v16  ;;  %v11217_v16 = vld [vmem:[%s17499_s7 + $0x120] sm:$0xff] }
 0x584   : > { %v8031_v63 = vrot.slane %v8029_v8, 3  ;;  %v8034_v22 = vrot.slane %v8032_v25, 4 }
 0x585   : > { %v8028_v11 = vsel %vm3413_vm6, %v16663_v37, %v8027_v58  ;;  %v7685_v44 = vpop.permute.xlu0 %7684  ;;  %v7401_v38 = vmul.f32 %v7392_v42, %v16487_v27 }
 0x586   : > { %v7774_v20 = vsel %vm3365_vm3, %v7668_v29, %v7685_v44  ;;  %v8035_v10 = vor.u32 %v8034_v22, %v8031_v63  ;;  %10007 = vmatpush.bf16.msra.mxu1 %v11219_v14  ;;  %v11184_v14 = vld [vmem:[%s17499_s7 + $0x18] sm:$0xff] }
 0x587   : > { %v7996_v37 = vshrl.u32 %v7774_v20, 16  ;;  %v7999_v5 = vshll.u32 %v7774_v20, 16  ;;  %v7410_v52 = vpack.c.bf16 %v7401_v38, %v7401_v38 }
 0x588   : > { %v8036_v46 = vsel %vm3413_vm6, %v7994_v32, %v8035_v10  ;;  %v7687_v18 = vpop.permute.xlu1 %7686 }
 0x589   : > { %8369 = vmatmul.bf16.gmra.mxu2 %v7954_v41  ;;  %v7998_v17 = vrot.slane %v7996_v37, 3  ;;  %v8001_v2 = vrot.slane %v7999_v5, 4  ;;  %v7664_v41 = vunpack.c.l.b16 %v7390_v7  ;;  %v7705_v58 = vunpack.c.l.b16 %v7410_v52  ;;  %v11188_v7 = vld [vmem:[%s17499_s7 + $0x38] sm:$0xff] }
 0x58a   : > { %8350 = vmatmul.bf16.gmra.mxu3 %v8028_v11 }
 0x58b   : > { %v8002_v60 = vor.u32 %v8001_v2, %v7998_v17  ;;  %v7669_v9 = vpack.c.b16 %v7664_v41, %v7664_v41  ;;  %v7710_v11 = vpack.c.b16 %v7705_v58, %v7705_v58  ;;  %9890 = vmatpush.bf16.msrb.mxu3 %v11188_v7 }
 0x58d   : > { %v8003_v30 = vsel %vm3413_vm6, %v7961_v28, %v8002_v60  ;;  %v7777_v32 = vsel %vm3365_vm3, %v7669_v9, %v7687_v18 }
 0x58e   : > { %v8037_v19 = vshrl.u32 %v7777_v32, 16  ;;  %v8040_v3 = vshll.u32 %v7777_v32, 16  ;;  %v11187_v32 = vld [vmem:[%s17499_s7 + $0x30] sm:$0xff] }
 0x58f   : > { %9891 = vmatpush.bf16.msrb.mxu3 %v11187_v32 }
 0x590   : > { %v8039_v4 = vrot.slane %v8037_v19, 3  ;;  %v8042_v26 = vrot.slane %v8040_v3, 4  ;;  %v16802_v19 = vld [vmem:[%s17499_s7 + $0xe8] sm:$0xff] }
 0x591   : > { %9979 = vmatpush.bf16.msra.mxu0 %v16802_v19 }
 0x592   : > { %v8043_v35 = vor.u32 %v8042_v26, %v8039_v4  ;;  %v11186_v26 = vld [vmem:[%s17499_s7 + $0x28] sm:$0xff] }
 0x593   : > { %9892 = vmatpush.bf16.msrb.mxu3 %v11186_v26  ;;  %v16873_v26 = vld [vmem:[%s17499_s7 + $0xd8] sm:$0xff] }
 0x599   : > { %8374 = vmatmul.bf16.gmra.mxu2 %v7995_v61  ;;  %v8307_v61 = vpop.f32.mrf.mxu2 }
 0x59a   : > { %8393 = vmatmul.bf16.vlgmr.msra.gmra.mxu3 %v7913_v1  ;;  %v8308_v28 = vadd.f32 %v16759_v43, %v8307_v61 }
 0x5a1   : > { %v16739_v1 = vpop.f32.mrf.mxu2 }
 0x5a9   : > { %8379 = vmatmul.bf16.gmra.mxu2 %v8036_v46  ;;  %v8312_v51 = vpop.f32.mrf.mxu2 }
 0x5aa   : > { %8398 = vmatmul.bf16.gmra.mxu3 %v7962_v57 }
 0x5b1   : > { %v16754_v34 = vpop.f32.mrf.mxu2 }
 0x5b9   : > { %10775 = vmatmul.msk.bf16.vlgmr.msra.gmra.mxu2 %vm3365_vm3, %v16368_v31  ;;  %v8044_v31 = vsel %vm3413_vm6, %v8002_v60, %v8043_v35 }
 0x5ba   : > { %8403 = vmatmul.bf16.gmra.mxu3 %v8003_v30  ;;  %v11218_v30 = vld [vmem:[%s17499_s7 + $0x128] sm:$0xff] }
 0x5bb   : > { %10008 = vmatpush.bf16.msra.mxu1 %v11218_v30 }
 0x5bf   : > { %10009 = vmatpush.bf16.msra.mxu1 %v11217_v16 }
 0x5c9   : > { %10776 = vmatmul.msk.bf16.gmra.mxu2 %vm3365_vm3, %v16580_v56  ;;  %v7718_v56 = vrot.slane %v7710_v11, 5 }
 0x5ca   : > { %8408 = vmatmul.bf16.gmra.mxu3 %v8044_v31 }
 0x5cb   : > { %v7719_v53 = vsel %vm2405_vm7, %v16597_v23, %v7718_v56  ;;  %v8313_v23 = vadd.f32 %v16759_v43, %v8312_v51  ;;  %v11185_v51 = vld [vmem:[%s17499_s7 + $0x20] sm:$0xff] }
 0x5cc   : > { %v8046_v36 = vshrl.u32 %v7719_v53, 16  ;;  %v8049_v44 = vshll.u32 %v7719_v53, 16  ;;  %9893 = vmatpush.bf16.msrb.mxu3 %v11185_v51  ;;  %v11183_v53 = vld [vmem:[%s17499_s7 + $0x10] sm:$0xff]  ;;  %v8315_v51 = vadd.f32 %v16759_v43, %v16754_v34 }
 0x5cd   : > { %v11191_v34 = vld [vmem:[%s17499_s7 + $0x50] sm:$0xff] }
 0x5ce   : > { %v8048_v57 = vrot.slane %v8046_v36, 3  ;;  %v8051_v20 = vrot.slane %v8049_v44, 4 }
 0x5d0   : > { %v8052_v5 = vor.u32 %v8051_v20, %v8048_v57  ;;  %9894 = vmatpush.bf16.msrb.mxu3 %v11184_v14  ;;  %v8310_v20 = vadd.f32 %v16759_v43, %v16739_v1  ;;  %v11194_v1 = vld [vmem:[%s17499_s7 + $0x68] sm:$0xff] }
 0x5d4   : > { %9895 = vmatpush.bf16.msrb.mxu3 %v11183_v53 }
 0x5d5   : > { %v8317_v13 = vpop.f32.mrf.mxu2 }
 0x5d6   : > { %v8318_v25 = vadd.f32 %v16759_v43, %v8317_v13  ;;  %v16833_v13 = vld [vmem:[%s17499_s7 + $0xe0] sm:$0xff] }
 0x5d7   : > { %9980 = vmatpush.bf16.msra.mxu0 %v16833_v13 }
 0x5d9   : > { %10777 = vmatmul.msk.bf16.gmra.mxu2 %vm3365_vm3, %v16629_v40  ;;  %v8053_v40 = vsel %vm3413_vm6, %v16623_v33, %v8052_v5  ;;  %v11195_v5 = vld [vmem:[%s17499_s7 + $0x70] sm:$0xff] }
 0x5db   : > { %9981 = vmatpush.bf16.msra.mxu0 %v16873_v26 }
 0x5dd   : > { %v8336_v29 = vpop.f32.mrf.mxu3  ;;  %v16766_v37 = vpop.f32.mrf.mxu2 }
 0x5de   : > { %v8337_v6 = vadd.f32 %v8336_v29, %v8308_v28  ;;  %v11216_v28 = vld [vmem:[%s17499_s7 + $0x118] sm:$0xff]  ;;  %v11182_v29 = vld [vmem:[%s17499_s7 + $0x8] sm:$0xff] }
 0x5df   : > { %10010 = vmatpush.bf16.msra.mxu1 %v11216_v28  ;;  %9896 = vmatpush.bf16.msrb.mxu3 %v11182_v29  ;;  %v11203_v28 = vld [vmem:[%s17499_s7 + $0xb0] sm:$0xff] }
 0x5e5   : > { %v16768_v17 = vpop.f32.mrf.mxu3 }
 0x5e9   : > { %10778 = vmatmul.msk.bf16.gmra.mxu2 %vm3365_vm3, %v8053_v40  ;;  %v8339_v40 = vadd.f32 %v16768_v17, %v8310_v20  ;;  %v11193_v17 = vld [vmem:[%s17499_s7 + $0x60] sm:$0xff] }
 0x5ec   : > { %v8322_v2 = vpop.f32.mrf.mxu2 }
 0x5ed   : > { %v8341_v60 = vpop.f32.mrf.mxu3  ;;  %v8323_v41 = vadd.f32 %v16759_v43, %v8322_v2  ;;  %v11181_v2 = vld [vmem:[%s17499_s7] sm:$0xff] }
 0x5ee   : > { %v8342_v45 = vadd.f32 %v8341_v60, %v8313_v23  ;;  %9897 = vmatpush.bf16.msrb.mxu3 %v11181_v2 }
 0x5f4   : > { %v16783_v33 = vpop.f32.mrf.mxu2 }
 0x5f5   : > { %v16785_v8 = vpop.f32.mrf.mxu3 }
 0x5f6   : > { %v8344_v53 = vadd.f32 %v16785_v8, %v8315_v51  ;;  %v16908_v8 = vld [vmem:[%s17499_s7 + $0xc8] sm:$0xff]  ;;  %v11189_v51 = vld [vmem:[%s17499_s7 + $0x40] sm:$0xff] }
 0x5fc   : > { %v8365_v63 = vpop.f32.mrf.mxu2 }
 0x5fd   : > { %v8366_v22 = vadd.f32 %v8365_v63, %v8337_v6  ;;  %v8346_v10 = vpop.f32.mrf.mxu3  ;;  %v11196_v6 = vld [vmem:[%s17499_s7 + $0x78] sm:$0xff] }
 0x5fe   : > { %v8347_v46 = vadd.f32 %v8346_v10, %v8318_v25  ;;  %9919 = vmatpush.bf16.msrb.mxu2 %v11196_v6 }
 0x602   : > { %9920 = vmatpush.bf16.msrb.mxu2 %v11195_v5 }
 0x604   : > { %v8367_v12 = vpop.f32.mrf.mxu2 }
 0x605   : > { %v16788_v59 = vpop.f32.mrf.mxu3  ;;  %v8368_v60 = vadd.f32 %v8367_v12, %v8339_v40  ;;  %v8467_v12 = vld [vmem:[#allocation6] sm:$0x8] }
 0x606   : > { %9921 = vmatpush.bf16.msrb.mxu2 %v11194_v1 }
 0x60a   : > { %9922 = vmatpush.bf16.msrb.mxu2 %v11193_v17 }
 0x60c   : > { %v8370_v61 = vpop.f32.mrf.mxu2 }
 0x60d   : > { %v16794_v9 = vadd.f32 %v8370_v61, %v8342_v45  ;;  %v8351_v18 = vpop.f32.mrf.mxu3  ;;  %v16864_v61 = vld [vmem:[#allocation6 + $0x4] sm:$0xf] }
 0x60e   : > { %v8352_v3 = vadd.f32 %v8351_v18, %v8323_v41  ;;  %v11204_v18 = vld [vmem:[%s17499_s7 + $0xb8] sm:$0xff]  ;;  %v8477_v16 = vunpack.c.l.bf16 %v16864_v61 }
 0x60f   : > { %9948 = vmatpush.bf16.msra.mxu3 %v11204_v18  ;;  %v8325_v18 = vadd.f32 %v16759_v43, %v16783_v33 }
 0x610   : > { %v8486_v14 = vmul.f32 %v8477_v16, %v16167_v39 }
 0x612   : > { %v8495_v6 = vpack.c.bf16 %v8486_v14, %v8486_v14 }
 0x613   : > { %9949 = vmatpush.bf16.msra.mxu3 %v11203_v28 }
 0x614   : > { %v16808_v4 = vpop.f32.mrf.mxu2 }
 0x615   : > { %v16813_v42 = vpop.f32.mrf.mxu3  ;;  %v8373_v20 = vadd.f32 %v16808_v4, %v8344_v53  ;;  %v11190_v4 = vld [vmem:[%s17499_s7 + $0x48] sm:$0xff] }
 0x616   : > { %v8354_v33 = vadd.f32 %v16813_v42, %v8325_v18  ;;  %v8523_v42 = vld [vmem:[#allocation6 + $0x4] sm:$0x8] }
 0x61c   : > { %v8375_v35 = vpop.f32.mrf.mxu2 }
 0x61d   : > { %v16815_v38 = vadd.f32 %v8375_v35, %v8347_v46  ;;  %v8394_v31 = vpop.f32.mrf.mxu3  ;;  %v11192_v35 = vld [vmem:[%s17499_s7 + $0x58] sm:$0xff] }
 0x61e   : > { %v8395_v45 = vadd.f32 %v8394_v31, %v8366_v22  ;;  %v11215_v31 = vld [vmem:[%s17499_s7 + $0x110] sm:$0xff]  ;;  %9923 = vmatpush.bf16.msrb.mxu2 %v11192_v35  ;;  %v16939_v35 = vld [vmem:[%s17499_s7 + $0xc0] sm:$0xff] }
 0x61f   : > { %10011 = vmatpush.bf16.msra.mxu1 %v11215_v31 }
 0x622   : > { %9924 = vmatpush.bf16.msrb.mxu2 %v11191_v34 }
 0x624   : > { %v16820_v52 = vpop.f32.mrf.mxu2 }
 0x625   : > { %v8396_v58 = vpop.f32.mrf.mxu3 }
 0x626   : > { %v8397_v30 = vadd.f32 %v8396_v58, %v8368_v60  ;;  %9925 = vmatpush.bf16.msrb.mxu2 %v11190_v4 }
 0x62a   : > { %9926 = vmatpush.bf16.msrb.mxu2 %v11189_v51 }
 0x62c   : > { %v8380_v11 = vpop.f32.mrf.mxu2 }
 0x62d   : > { %v16825_v56 = vadd.f32 %v8380_v11, %v8352_v3  ;;  %v8399_v44 = vpop.f32.mrf.mxu3  ;;  %v8476_v3 = vunpack.c.l.bf16 %v8467_v12  ;;  %v16891_v11 = vld [vmem:[%s17499_s7 + $0xd0] sm:$0xff]  ;;  %v8320_v12 = vadd.f32 %v16759_v43, %v16766_v37 }
 0x62e   : > { %v8400_v5 = vadd.f32 %v8399_v44, %v16794_v9  ;;  %9982 = vmatpush.bf16.msra.mxu0 %v16891_v11 }
 0x62f   : > { %v8485_v58 = vmul.f32 %v8476_v3, %v16134_v0  ;;  %v8349_v43 = vadd.f32 %v16788_v59, %v8320_v12  ;;  %v11202_v59 = vld [vmem:[%s17499_s7 + $0xa8] sm:$0xff] }
 0x630   : > { %9950 = vmatpush.bf16.msra.mxu3 %v11202_v59 }
 0x631   : > { %v8494_v29 = vpack.c.bf16 %v8485_v58, %v8485_v58 }
 0x632   : > { %9983 = vmatpush.bf16.msra.mxu0 %v16908_v8 }
 0x633   : > { %v8632_v60 = vunpack.c.l.b16 %v8494_v29 }
 0x634   : > { %v16839_v36 = vpop.f32.mrf.mxu2 }
 0x635   : > { %v8401_v23 = vpop.f32.mrf.mxu3  ;;  %v16960_v4 = vadd.f32 %v16839_v36, %v8354_v33 }
 0x636   : > { %v8402_v9 = vadd.f32 %v8401_v23, %v8373_v20  ;;  %v18321_v23 = vld [vmem:[#allocation41_spill] sm:$0xff]  ;;  %9984 = vmatpush.bf16.msra.mxu0 %v16939_v35 }
 0x63c   : > { %v8423_v57 = vpop.f32.mrf.mxu2 }
 0x63d   : > { %v8424_v25 = vadd.f32 %v8423_v57, %v8395_v45  ;;  %v16862_v41 = vpop.f32.mrf.mxu3  ;;  %v11214_v57 = vld [vmem:[%s17499_s7 + $0x108] sm:$0xff]  ;;  %v8633_v45 = vunpack.c.l.b16 %v8495_v6  ;;  %v8654_v6 = vunpack.c.l.b16 %v16864_v61 }
 0x63e   : > { %10012 = vmatpush.bf16.msra.mxu1 %v11214_v57  ;;  %v8405_v29 = vadd.f32 %v16862_v41, %v16815_v38 }
 0x63f   : > { %v8443_v46 = vmax.f32 %v8424_v25, 0.0  ;;  %v8641_v17 = vpack.c.b16 %v8633_v45, %v8632_v60  ;;  %v8378_v45 = vadd.f32 %v16820_v52, %v8349_v43 }
 0x641   : > { %v9048_v3 = vshll.u32 %v8641_v17, 16 }
 0x643   : > { %v9050_v20 = vrot.slane %v9048_v3, 4 }
 0x644   : > { %v8425_v63 = vpop.f32.mrf.mxu2 }
 0x645   : > { %v8426_v10 = vadd.f32 %v8425_v63, %v8397_v30  ;;  %v8406_v44 = vpop.f32.mrf.mxu3  ;;  %v11213_v63 = vld [vmem:[%s17499_s7 + $0x100] sm:$0xff] }
 0x646   : > { %10013 = vmatpush.bf16.msra.mxu1 %v11213_v63  ;;  %v8407_v52 = vadd.f32 %v8406_v44, %v8378_v45 }
 0x647   : > { %v8444_v7 = vmax.f32 %v8426_v10, 0.0 }
 0x649   : > { %v11376_v22 = vpack.c.bf16 %v8444_v7, %v8443_v46 }
 0x64b   : > { %11435 = vst [vmem:[#allocation6 + $0x8] sm:$0xff] %v11376_v22  }
 0x64c   : > { %v8428_v32 = vpop.f32.mrf.mxu2 }
 0x64d   : > { %v8429_v1 = vadd.f32 %v8428_v32, %v8400_v5  ;;  %v9045_v32 = vshrl.u32 %v8641_v17, 16 }
 0x64f   : > { %v8445_v31 = vmax.f32 %v8429_v1, 0.0  ;;  %v9047_v57 = vrot.slane %v9045_v32, 3  ;;  %v8525_v1 = vunpack.c.l.bf16 %v8523_v42 }
 0x651   : > { %v8527_v12 = vmul.f32 %v8525_v1, %v16134_v0  ;;  %v9051_v36 = vor.u32 %v9050_v20, %v9047_v57 }
 0x652   : > { %v16910_v40 = vld [vmem:[#allocation6 + $0x8] sm:$0xf]  ;;  %v16912_v2 = vld [vmem:[#allocation6 + $0xc] sm:$0xf] }
 0x653   : > { %v16919_v30 = vunpack.c.l.bf16 %v16910_v40  ;;  %v16922_v25 = vunpack.c.l.bf16 %v16912_v2  ;;  %v8655_v41 = vunpack.c.l.b16 %v16910_v40  ;;  %v8656_v63 = vunpack.c.l.b16 %v16912_v2  ;;  %v11244_v2 = vld [vmem:[%s17499_s7 + $0x1f8] sm:$0xff] }
 0x654   : > { %v8430_v10 = vpop.f32.mrf.mxu2  ;;  %10093 = vmatpush.bf16.msrb.mxu0 %v11244_v2 }
 0x655   : > { %v8431_v46 = vadd.f32 %v8430_v10, %v8402_v9  ;;  %v8487_v7 = vmul.f32 %v16919_v30, %v16020_v15  ;;  %v8488_v22 = vmul.f32 %v16922_v25, %v18321_v23  ;;  %v8528_v60 = vmul.f32 %v16919_v30, %v16167_v39  ;;  %v8409_v10 = vpop.f32.mrf.mxu3 }
 0x656   : > { %v8529_v38 = vmul.f32 %v16922_v25, %v16020_v15  ;;  %v8662_v40 = vpack.c.b16 %v8655_v41, %v8654_v6  ;;  %v16966_v32 = vpack.c.b16 %v8656_v63, %v8655_v41  ;;  %v16975_v33 = vadd.f32 %v8409_v10, %v16825_v56 }
 0x657   : > { %v8446_v58 = vmax.f32 %v8431_v46, 0.0  ;;  %v8496_v37 = vpack.c.bf16 %v8487_v7, %v8487_v7  ;;  %v8497_v14 = vpack.c.bf16 %v8488_v22, %v8488_v22  ;;  %v8537_v22 = vpack.c.bf16 %v8528_v60, %v8528_v60 }
 0x658   : > { %v8538_v18 = vpack.c.bf16 %v8529_v38, %v8529_v38  ;;  %v8670_v43 = vshll.u32 %v8662_v40, 16  ;;  %v8766_v10 = vshll.u32 %v16966_v32, 16 }
 0x659   : > { %v11381_v34 = vpack.c.bf16 %v8446_v58, %v8445_v31  ;;  %v8634_v53 = vunpack.c.l.b16 %v8496_v37  ;;  %v8635_v28 = vunpack.c.l.b16 %v8497_v14  ;;  %v11201_v31 = vld [vmem:[%s17499_s7 + $0xa0] sm:$0xff]  ;;  %v8536_v58 = vpack.c.bf16 %v8527_v12, %v8527_v12 }
 0x65a   : > { %v8743_v37 = vunpack.c.l.b16 %v8537_v22  ;;  %v8667_v14 = vshrl.u32 %v8662_v40, 16  ;;  %9951 = vmatpush.bf16.msra.mxu3 %v11201_v31  ;;  %v8744_v20 = vunpack.c.l.b16 %v8538_v18  ;;  %v8672_v56 = vrot.slane %v8670_v43, 5  ;;  %v18323_v22 = vld [vmem:[#allocation76_spill] sm:$0xff] }
 0x65b   : > { %11436 = vst [vmem:[#allocation6 + $0x10] sm:$0xff] %v11381_v34   ;;  %v8642_v5 = vpack.c.b16 %v8635_v28, %v8634_v53  ;;  %v8763_v53 = vshrl.u32 %v16966_v32, 16  ;;  %v11243_v28 = vld [vmem:[%s17499_s7 + $0x1f0] sm:$0xff]  ;;  %v8742_v57 = vunpack.c.l.b16 %v8536_v58  ;;  %v11242_v40 = vld [vmem:[%s17499_s7 + $0x1e8] sm:$0xff]  ;;  %v11200_v32 = vld [vmem:[%s17499_s7 + $0x98] sm:$0xff] }
 0x65c   : > { %v8433_v9 = vpop.f32.mrf.mxu2  ;;  %10094 = vmatpush.bf16.msrb.mxu0 %v11243_v28 }
 0x65d   : > { %v16963_v17 = vadd.f32 %v8433_v9, %v8405_v29  ;;  %v9053_v46 = vshrl.u32 %v8642_v5, 16  ;;  %v9056_v7 = vshll.u32 %v8642_v5, 16  ;;  %v8669_v5 = vrot.slane %v8667_v14, 4 }
 0x65e   : > { %v8751_v45 = vpack.c.b16 %v8743_v37, %v8742_v57  ;;  %9952 = vmatpush.bf16.msra.mxu3 %v11200_v32 }
 0x65f   : > { %v9055_v3 = vrot.slane %v9053_v46, 3  ;;  %v9058_v51 = vrot.slane %v9056_v7, 4  ;;  %v8447_v44 = vmax.f32 %v16963_v17, 0.0  ;;  %v8673_v9 = vor.u32 %v8672_v56, %v8669_v5  ;;  %v18322_v46 = vld [vmem:[#allocation83_spill] sm:$0xff] }
 0x660   : > { %10095 = vmatpush.bf16.msrb.mxu0 %v11242_v40 }
 0x661   : > { %v16978_v34 = vor.u32 %v9058_v51, %v9055_v3  ;;  %v9099_v3 = vshll.u32 %v8751_v45, 16  ;;  %v9062_v2 = vshrl.u32 %v8673_v9, 16 }
 0x662   : > { %v8471_v29 = vld [vmem:[#allocation6 + $0x10] sm:$0xf]  ;;  %v16984_v6 = vld [vmem:[#allocation6 + $0x14] sm:$0xf] }
 0x663   : > { %v9060_v59 = vsel %vm3413_vm6, %v9051_v36, %v16978_v34  ;;  %v16988_v42 = vunpack.c.l.bf16 %v8471_v29  ;;  %v16991_v60 = vunpack.c.l.bf16 %v16984_v6  ;;  %v8657_v38 = vunpack.c.l.b16 %v8471_v29 }
 0x664   : > { %v8435_v41 = vpop.f32.mrf.mxu2  ;;  %9898 = vmatmul.bf16.vlgmr.msrb.gmra.mxu3 %v9060_v59  ;;  %v8658_v1 = vunpack.c.l.b16 %v16984_v6  ;;  %v9096_v36 = vshrl.u32 %v8751_v45, 16  ;;  %v17009_v28 = vrot.slane %v9099_v3, 4  ;;  %v9064_v40 = vrot.slane %v9062_v2, 3 }
 0x665   : > { %v8436_v17 = vadd.f32 %v8435_v41, %v8407_v52  ;;  %v8489_v7 = vmul.f32 %v16988_v42, %v18322_v46  ;;  %v8490_v12 = vmul.f32 %v16991_v60, %v18323_v22  ;;  %v8530_v18 = vmul.f32 %v16988_v42, %v18321_v23  ;;  %v8411_v52 = vpop.f32.mrf.mxu3  ;;  %v11241_v41 = vld [vmem:[%s17499_s7 + $0x1e0] sm:$0xff] }
 0x666   : > { %v8663_v51 = vpack.c.b16 %v8657_v38, %v8656_v63  ;;  %v17007_v43 = vrot.slane %v9096_v36, 3  ;;  %v8412_v45 = vadd.f32 %v8411_v52, %v16960_v4  ;;  %10096 = vmatpush.bf16.msrb.mxu0 %v11241_v41 }
 0x667   : > { %v8448_v31 = vmax.f32 %v8436_v17, 0.0  ;;  %v8498_v58 = vpack.c.bf16 %v8489_v7, %v8489_v7  ;;  %v8499_v37 = vpack.c.bf16 %v8490_v12, %v8490_v12  ;;  %v8539_v14 = vpack.c.bf16 %v8530_v18, %v8530_v18 }
 0x668   : > { %v8675_v29 = vshrl.u32 %v8663_v51, 16  ;;  %v8678_v57 = vshll.u32 %v8663_v51, 16  ;;  %v8765_v12 = vrot.slane %v8763_v53, 4  ;;  %v9102_v3 = vor.u32 %v17009_v28, %v17007_v43 }
 0x669   : > { %v11386_v5 = vpack.c.bf16 %v8448_v31, %v8447_v44  ;;  %v8636_v56 = vunpack.c.l.b16 %v8498_v58  ;;  %v8637_v63 = vunpack.c.l.b16 %v8499_v37  ;;  %v8745_v59 = vunpack.c.l.b16 %v8539_v14 }
 0x66a   : > { %v8677_v17 = vrot.slane %v8675_v29, 4  ;;  %v8680_v7 = vrot.slane %v8678_v57, 5  ;;  %v9065_v44 = vshll.u32 %v8673_v9, 16  ;;  %v8759_v31 = vpack.c.b16 %v8658_v1, %v8657_v38 }
 0x66b   : > { %11437 = vst [vmem:[#allocation6 + $0x18] sm:$0xff] %v11386_v5   ;;  %v8643_v18 = vpack.c.b16 %v8637_v63, %v8636_v56  ;;  %v8752_v36 = vpack.c.b16 %v8745_v59, %v8744_v20  ;;  %v8768_v58 = vrot.slane %v8766_v10, 5  ;;  %v8531_v28 = vmul.f32 %v16991_v60, %v18322_v46 }
 0x66c   : > { %v8438_v51 = vpop.f32.mrf.mxu2  ;;  %v17017_v32 = vor.u32 %v8680_v7, %v8677_v17  ;;  %v9067_v38 = vrot.slane %v9065_v44, 4  ;;  %v8771_v41 = vshrl.u32 %v8759_v31, 16  ;;  %v8774_v17 = vshll.u32 %v8759_v31, 16 }
 0x66d   : > { %v17022_v4 = vadd.f32 %v8438_v51, %v16975_v33  ;;  %v9198_v52 = vshrl.u32 %v8643_v18, 16  ;;  %v9201_v53 = vshll.u32 %v8643_v18, 16  ;;  %v9104_v37 = vshrl.u32 %v8752_v36, 16  ;;  %v11240_v33 = vld [vmem:[%s17499_s7 + $0x1d8] sm:$0xff] }
 0x66e   : > { %v9107_v20 = vshll.u32 %v8752_v36, 16  ;;  %v8682_v14 = vsel %vm2144_vm0, %v8673_v9, %v17017_v32  ;;  %v8769_v43 = vor.u32 %v8768_v58, %v8765_v12  ;;  %v11199_v9 = vld [vmem:[%s17499_s7 + $0x90] sm:$0xff]  ;;  %10097 = vmatpush.bf16.msrb.mxu0 %v11240_v33  ;;  %v8776_v31 = vrot.slane %v8774_v17, 5 }
 0x66f   : > { %v9200_v2 = vrot.slane %v9198_v52, 3  ;;  %v9203_v29 = vrot.slane %v9201_v53, 4  ;;  %v9106_v57 = vrot.slane %v9104_v37, 3  ;;  %v8449_v10 = vmax.f32 %v17022_v4, 0.0  ;;  %v11239_v58 = vld [vmem:[%s17499_s7 + $0x1d0] sm:$0xff]  ;;  %9953 = vmatpush.bf16.msra.mxu3 %v11199_v9  ;;  %v11198_v9 = vld [vmem:[%s17499_s7 + $0x88] sm:$0xff] }
 0x670   : > { %v9109_v5 = vrot.slane %v9107_v20, 4  ;;  %v9070_v56 = vshrl.u32 %v8682_v14, 16  ;;  %v9073_v63 = vshll.u32 %v8682_v14, 16  ;;  %v9113_v7 = vshrl.u32 %v8769_v43, 16 }
 0x671   : > { %v17035_v59 = vor.u32 %v9203_v29, %v9200_v2  ;;  %v9116_v44 = vshll.u32 %v8769_v43, 16  ;;  %v9068_v52 = vor.u32 %v9067_v38, %v9064_v40  ;;  %v8773_v53 = vrot.slane %v8771_v41, 4 }
 0x672   : > { %v17037_v12 = vor.u32 %v9109_v5, %v9106_v57  ;;  %v9072_v18 = vrot.slane %v9070_v56, 3  ;;  %v9075_v36 = vrot.slane %v9073_v63, 4  ;;  %v8473_v51 = vld [vmem:[#allocation6 + $0x18] sm:$0xf]  ;;  %v17045_v37 = vld [vmem:[#allocation6 + $0x1c] sm:$0xf]  ;;  %v8540_v40 = vpack.c.bf16 %v8531_v28, %v8531_v28  ;;  %10098 = vmatpush.bf16.msrb.mxu0 %v11239_v58 }
 0x673   : > { %v9205_v4 = vsel %vm3413_vm6, %v16978_v34, %v17035_v59  ;;  %v9115_v29 = vrot.slane %v9113_v7, 3  ;;  %v17051_v57 = vunpack.c.l.bf16 %v8473_v51  ;;  %v17053_v5 = vor.u32 %v8776_v31, %v8773_v53  ;;  %9954 = vmatpush.bf16.msra.mxu3 %v11198_v9 }
 0x674   : > { %v8440_v20 = vpop.f32.mrf.mxu2  ;;  %9903 = vmatmul.bf16.gmra.mxu3 %v9205_v4  ;;  %v9111_v14 = vsel %vm3413_vm6, %v9102_v3, %v17037_v12  ;;  %v17049_v2 = vor.u32 %v9075_v36, %v9072_v18  ;;  %v17056_v34 = vunpack.c.l.bf16 %v17045_v37  ;;  %v9118_v56 = vrot.slane %v9116_v44, 4 }
 0x675   : > { %v8441_v33 = vadd.f32 %v8440_v20, %v8412_v45  ;;  %9985 = vmatmul.bf16.vlgmr.msra.gmra.mxu0 %v9111_v14  ;;  %v8491_v3 = vmul.f32 %v17051_v57, %v16380_v49  ;;  %v8532_v63 = vmul.f32 %v17051_v57, %v18323_v22  ;;  %v11238_v45 = vld [vmem:[%s17499_s7 + $0x1c8] sm:$0xff]  ;;  %v8778_v41 = vsel %vm2144_vm0, %v8769_v43, %v17053_v5  ;;  %v11237_v43 = vld [vmem:[%s17499_s7 + $0x1c0] sm:$0xff] }
 0x676   : > { %v9077_v38 = vsel %vm3413_vm6, %v9068_v52, %v17049_v2  ;;  %v8492_v17 = vmul.f32 %v17056_v34, %v16399_v54  ;;  %v8746_v7 = vunpack.c.l.b16 %v8540_v40  ;;  %v9121_v18 = vshrl.u32 %v8778_v41, 16  ;;  %10099 = vmatpush.bf16.msrb.mxu0 %v11238_v45 }
 0x677   : > { %v8450_v28 = vmax.f32 %v8441_v33, 0.0  ;;  %9927 = vmatmul.bf16.vlgmr.msrb.gmra.mxu2 %v9077_v38  ;;  %v9124_v36 = vshll.u32 %v8778_v41, 16  ;;  %v8500_v44 = vpack.c.bf16 %v8491_v3, %v8491_v3  ;;  %v8541_v58 = vpack.c.bf16 %v8532_v63, %v8532_v63 }
 0x678   : > { %v8501_v52 = vpack.c.bf16 %v8492_v17, %v8492_v17  ;;  %v8659_v53 = vunpack.c.l.b16 %v8473_v51  ;;  %v8660_v31 = vunpack.c.l.b16 %v17045_v37  ;;  %v9123_v20 = vrot.slane %v9121_v18, 3 }
 0x679   : > { %v11391_v4 = vpack.c.bf16 %v8450_v28, %v8449_v10  ;;  %v9126_v14 = vrot.slane %v9124_v36, 4  ;;  %v8638_v33 = vunpack.c.l.b16 %v8500_v44  ;;  %v8747_v38 = vunpack.c.l.b16 %v8541_v58 }
 0x67a   : > { %v9119_v40 = vor.u32 %v9118_v56, %v9115_v29  ;;  %v8639_v41 = vunpack.c.l.b16 %v8501_v52  ;;  %v8664_v3 = vpack.c.b16 %v8659_v53, %v8658_v1  ;;  %v8760_v10 = vpack.c.b16 %v8660_v31, %v8659_v53  ;;  %10100 = vmatpush.bf16.msrb.mxu0 %v11237_v43  ;;  %v11228_v52 = vld [vmem:[%s17499_s7 + $0x178] sm:$0xff] }
 0x67b   : > { %11438 = vst [vmem:[#allocation6 + $0x20] sm:$0xff] %v11391_v4   ;;  %v17082_v51 = vor.u32 %v9126_v14, %v9123_v20  ;;  %v8753_v63 = vpack.c.b16 %v8747_v38, %v8746_v7  ;;  %v9164_v9 = vshrl.u32 %v17017_v32, 16  ;;  %v9167_v45 = vshll.u32 %v17017_v32, 16  ;;  %v11252_v53 = vld [vmem:[%s17499_s7 + $0x238] sm:$0xff]  ;;  %10035 = vmatpush.bf16.msra.mxu2 %v11228_v52 }
 0x67c   : > { %v8644_v28 = vpack.c.b16 %v8639_v41, %v8638_v33  ;;  %v8684_v17 = vshrl.u32 %v8664_v3, 16  ;;  %v8687_v18 = vshll.u32 %v8664_v3, 16  ;;  %v8780_v36 = vshrl.u32 %v8760_v10, 16  ;;  %10122 = vmatpush.bf16.msrb.mxu1 %v11252_v53 }
 0x67d   : > { %v9128_v29 = vsel %vm3413_vm6, %v9119_v40, %v17082_v51  ;;  %v9217_v56 = vshrl.u32 %v8753_v63, 16  ;;  %v9220_v6 = vshll.u32 %v8753_v63, 16  ;;  %v8783_v1 = vshll.u32 %v8760_v10, 16  ;;  %v11227_v10 = vld [vmem:[%s17499_s7 + $0x170] sm:$0xff]  ;;  %v11197_v63 = vld [vmem:[%s17499_s7 + $0x80] sm:$0xff] }
 0x67e   : > { %10014 = vmatmul.bf16.vlgmr.msra.gmra.mxu1 %v9128_v29  ;;  %v9271_v44 = vshrl.u32 %v8644_v28, 16  ;;  %v9274_v58 = vshll.u32 %v8644_v28, 16  ;;  %v8686_v4 = vrot.slane %v8684_v17, 4  ;;  %v8689_v7 = vrot.slane %v8687_v18, 5  ;;  %v18324_v29 = vld [vmem:[#allocation45_spill] sm:$0xff]  ;;  %9955 = vmatpush.bf16.msra.mxu3 %v11197_v63 }
 0x67f   : > { %v9219_v20 = vrot.slane %v9217_v56, 3  ;;  %v9222_v14 = vrot.slane %v9220_v6, 4  ;;  %v8782_v33 = vrot.slane %v8780_v36, 4  ;;  %v8785_v38 = vrot.slane %v8783_v1, 5  ;;  %10036 = vmatpush.bf16.msra.mxu2 %v11227_v10 }
 0x680   : > { %v9273_v40 = vrot.slane %v9271_v44, 3  ;;  %v9276_v41 = vrot.slane %v9274_v58, 4  ;;  %v17094_v43 = vor.u32 %v8689_v7, %v8686_v4  ;;  %v9166_v3 = vrot.slane %v9164_v9, 3  ;;  %v11251_v9 = vld [vmem:[%s17499_s7 + $0x230] sm:$0xff] }
 0x681   : > { %v17102_v28 = vor.u32 %v9222_v14, %v9219_v20  ;;  %v17104_v17 = vor.u32 %v8785_v38, %v8782_v33  ;;  %v9169_v36 = vrot.slane %v9167_v45, 4  ;;  %v17112_v56 = vmul.f32 %v8477_v16, %v18324_v29  ;;  %v11226_v20 = vld [vmem:[%s17499_s7 + $0x168] sm:$0xff]  ;;  %10123 = vmatpush.bf16.msrb.mxu1 %v11251_v9  ;;  %v11225_v9 = vld [vmem:[%s17499_s7 + $0x160] sm:$0xff] }
 0x682   : > { %v8475_v18 = vld [vmem:[#allocation6 + $0x20] sm:$0xf]  ;;  %v17114_v6 = vor.u32 %v9276_v41, %v9273_v40  ;;  %v8691_v1 = vsel %vm2144_vm0, %v17017_v32, %v17094_v43  ;;  %v17127_v16 = vld [vmem:[#allocation6 + $0x24] sm:$0xf]  ;;  %11450 = vmatpush.bf16.msrb.mxu3 %v16748_v21 }
 0x683   : > { %v17119_v44 = vunpack.c.l.bf16 %v8475_v18  ;;  %v8661_v58 = vunpack.c.l.b16 %v8475_v18  ;;  %v9224_v45 = vsel %vm3413_vm6, %v17037_v12, %v17102_v28  ;;  %v9172_v4 = vshrl.u32 %v8691_v1, 16  ;;  %10037 = vmatpush.bf16.msra.mxu2 %v11226_v20 }
 0x684   : > { %v9175_v7 = vshll.u32 %v8691_v1, 16  ;;  %v8787_v61 = vsel %vm2144_vm0, %v17053_v5, %v17104_v17  ;;  %v9278_v32 = vsel %vm3413_vm6, %v17035_v59, %v17114_v6  ;;  %v9170_v33 = vor.u32 %v9169_v36, %v9166_v3  ;;  %v11250_v59 = vld [vmem:[%s17499_s7 + $0x228] sm:$0xff] }
 0x685   : > { %9990 = vmatmul.bf16.gmra.mxu0 %v9224_v45  ;;  %v9226_v52 = vshrl.u32 %v8787_v61, 16  ;;  %v9229_v53 = vshll.u32 %v8787_v61, 16  ;;  %v8493_v12 = vmul.f32 %v17119_v44, %v16382_v62  ;;  %9908 = vmatmul.bf16.gmra.mxu3 %v9278_v32  ;;  %v9174_v5 = vrot.slane %v9172_v4, 3  ;;  %v18325_v45 = vld [vmem:[#allocation59_spill] sm:$0xff]  ;;  %v18326_v4 = vld [vmem:[#allocation61_spill] sm:$0xff] }
 0x686   : > { %v9177_v14 = vrot.slane %v9175_v7, 4  ;;  %v8665_v21 = vpack.c.b16 %v8661_v58, %v8660_v31  ;;  %v8757_v10 = vunpack.c.l.b16 %v17127_v16  ;;  %v8506_v3 = vmul.f32 %v16919_v30, %v18325_v45  ;;  %11451 = vmatpush.bf16.msrb.mxu3 %v16777_v50  ;;  %10124 = vmatpush.bf16.msrb.mxu1 %v11250_v59 }
 0x687   : > { %v9228_v38 = vrot.slane %v9226_v52, 3  ;;  %v9231_v40 = vrot.slane %v9229_v53, 4  ;;  %v8502_v41 = vpack.c.bf16 %v8493_v12, %v8493_v12  ;;  %v8507_v7 = vmul.f32 %v16922_v25, %v18326_v4  ;;  %10038 = vmatpush.bf16.msra.mxu2 %v11225_v9  ;;  %v11248_v9 = vld [vmem:[%s17499_s7 + $0x218] sm:$0xff] }
 0x688   : > { %v17144_v63 = vor.u32 %v9177_v14, %v9174_v5  ;;  %v8693_v18 = vshrl.u32 %v8665_v21, 16  ;;  %v8696_v1 = vshll.u32 %v8665_v21, 16  ;;  %v8761_v36 = vpack.c.b16 %v8757_v10, %v8661_v58  ;;  %v11249_v58 = vld [vmem:[%s17499_s7 + $0x220] sm:$0xff] }
 0x689   : > { %v17149_v37 = vor.u32 %v9231_v40, %v9228_v38  ;;  %v8640_v31 = vunpack.c.l.b16 %v8502_v41  ;;  %v8514_v21 = vpack.c.bf16 %v17112_v56, %v17112_v56  ;;  %v8515_v59 = vpack.c.bf16 %v8506_v3, %v8506_v3 }
 0x68a   : > { %v9206_v61 = vsel %vm3413_vm6, %v17049_v2, %v17144_v63  ;;  %v9179_v50 = vsel %vm3413_vm6, %v9170_v33, %v17144_v63  ;;  %v8695_v32 = vrot.slane %v8693_v18, 4  ;;  %v8698_v52 = vrot.slane %v8696_v1, 5  ;;  %v18327_v2 = vld [vmem:[#allocation77_spill] sm:$0xff]  ;;  %11452 = vmatpush.bf16.msrb.mxu3 %v16802_v19  ;;  %10125 = vmatpush.bf16.msrb.mxu1 %v11249_v58 }
 0x68b   : > { %9932 = vmatmul.bf16.gmra.mxu2 %v9206_v61  ;;  %v9233_v53 = vsel %vm3413_vm6, %v17082_v51, %v17149_v37  ;;  %v8645_v12 = vpack.c.b16 %v8640_v31, %v8640_v31  ;;  %v8789_v20 = vshrl.u32 %v8761_v36, 16  ;;  %v8792_v5 = vshll.u32 %v8761_v36, 16  ;;  %v11224_v19 = vld [vmem:[%s17499_s7 + $0x158] sm:$0xff] }
 0x68c   : > { %v17169_v14 = vor.u32 %v8698_v52, %v8695_v32  ;;  %v8508_v33 = vmul.f32 %v16988_v42, %v18327_v2  ;;  %v8516_v1 = vpack.c.bf16 %v8507_v7, %v8507_v7  ;;  %v8710_v36 = vunpack.c.l.b16 %v8514_v21  ;;  %10039 = vmatpush.bf16.msra.mxu2 %v11224_v19 }
 0x68d   : > { %v9343_v38 = vshrl.u32 %v8645_v12, 16  ;;  %v9346_v40 = vshll.u32 %v8645_v12, 16  ;;  %v8791_v41 = vrot.slane %v8789_v20, 4  ;;  %v8794_v18 = vrot.slane %v8792_v5, 5 }
 0x68e   : > { %v8700_v51 = vsel %vm2144_vm0, %v17094_v43, %v17169_v14  ;;  %v8517_v31 = vpack.c.bf16 %v8508_v33, %v8508_v33  ;;  %10019 = vmatmul.bf16.gmra.mxu1 %v9233_v53  ;;  %v8711_v43 = vunpack.c.l.b16 %v8515_v59  ;;  %v8712_v58 = vunpack.c.l.b16 %v8516_v1  ;;  %11453 = vmatpush.bf16.msrb.mxu3 %v16833_v13  ;;  %v11223_v33 = vld [vmem:[%s17499_s7 + $0x150] sm:$0xff] }
 0x68f   : > { %v9345_v61 = vrot.slane %v9343_v38, 3  ;;  %v9348_v32 = vrot.slane %v9346_v40, 4  ;;  %v9253_v56 = vshrl.u32 %v8700_v51, 16  ;;  %v9256_v3 = vshll.u32 %v8700_v51, 16  ;;  %10126 = vmatpush.bf16.msrb.mxu1 %v11248_v9  ;;  %v11247_v13 = vld [vmem:[%s17499_s7 + $0x210] sm:$0xff] }
 0x690   : > { %v17185_v52 = vor.u32 %v8794_v18, %v8791_v41  ;;  %v8713_v7 = vunpack.c.l.b16 %v8517_v31  ;;  %v9352_v5 = vshrl.u32 %v17169_v14, 16  ;;  %v8719_v38 = vpack.c.b16 %v8711_v43, %v8710_v36  ;;  %10040 = vmatpush.bf16.msra.mxu2 %v11223_v33 }
 0x691   : > { %v9349_v53 = vor.u32 %v9348_v32, %v9345_v61  ;;  %v9255_v12 = vrot.slane %v9253_v56, 3  ;;  %v9258_v20 = vrot.slane %v9256_v3, 4  ;;  %v9355_v40 = vshll.u32 %v17169_v14, 16 }
 0x692   : > { %v8796_v21 = vsel %vm2144_vm0, %v17104_v17, %v17185_v52  ;;  %v8720_v59 = vpack.c.b16 %v8713_v7, %v8712_v58  ;;  %v8724_v31 = vrot.slane %v8719_v38, 5  ;;  %v17205_v17 = vrot.slane %v9352_v5, 3  ;;  %11454 = vmatpush.bf16.msrb.mxu3 %v16873_v26  ;;  %v11246_v26 = vld [vmem:[%s17499_s7 + $0x208] sm:$0xff] }
 0x693   : > { %v9350_v41 = vsel %vm3413_vm6, %v17114_v6, %v9349_v53  ;;  %v17201_v18 = vor.u32 %v9258_v20, %v9255_v12  ;;  %v9298_v51 = vshrl.u32 %v8796_v21, 16  ;;  %v9301_v1 = vshll.u32 %v8796_v21, 16  ;;  %v11222_v6 = vld [vmem:[%s17499_s7 + $0x148] sm:$0xff]  ;;  %10127 = vmatpush.bf16.msrb.mxu1 %v11247_v13  ;;  %v17224_v53 = vld [vmem:[#allocation6 + $0x28] sm:$0xf] }
 0x694   : > { %v17203_v61 = vrot.slane %v8720_v59, 5  ;;  %v17207_v36 = vrot.slane %v9355_v40, 4  ;;  %v9079_v19 = vshrl.u32 %v8724_v31, 16  ;;  %v9082_v9 = vshll.u32 %v8724_v31, 16  ;;  %18328 = vst [vmem:[#allocation82_spill] sm:$0xff] %v17224_v53  ;;  %10041 = vmatpush.bf16.msra.mxu2 %v11222_v6 }
 0x695   : > { %10101 = vmatmul.bf16.vlgmr.msrb.gmra.mxu0 %v9179_v50  ;;  %v9300_v32 = vrot.slane %v9298_v51, 3  ;;  %v9303_v56 = vrot.slane %v9301_v1, 4  ;;  %9913 = vmatmul.bf16.gmra.mxu3 %v9350_v41  ;;  %v9379_v43 = vshrl.u32 %v17185_v52, 16  ;;  %v17222_v50 = vsel %vm3413_vm6, %v17144_v63, %v17201_v18  ;;  %v11221_v63 = vld [vmem:[%s17499_s7 + $0x140] sm:$0xff] }
 0x696   : > { %v8726_v3 = vsel %vm2405_vm7, %v8724_v31, %v17203_v61  ;;  %v9081_v20 = vrot.slane %v9079_v19, 3  ;;  %v9084_v5 = vrot.slane %v9082_v9, 4  ;;  %11455 = vmatpush.bf16.msrb.mxu3 %v16891_v11  ;;  %v9382_v59 = vshll.u32 %v17185_v52, 16  ;;  %v11245_v11 = vld [vmem:[%s17499_s7 + $0x200] sm:$0xff] }
 0x697   : > { %v9087_v58 = vshrl.u32 %v8726_v3, 16  ;;  %v9090_v7 = vshll.u32 %v8726_v3, 16  ;;  %v17226_v12 = vor.u32 %v9303_v56, %v9300_v32  ;;  %v8509_v40 = vmul.f32 %v16991_v60, %v16291_v55  ;;  %10128 = vmatpush.bf16.msrb.mxu1 %v11246_v26 }
 0x698   : > { %v9085_v13 = vor.u32 %v9084_v5, %v9081_v20  ;;  %v17237_v41 = vrot.slane %v9379_v43, 3  ;;  %v8510_v51 = vmul.f32 %v17051_v57, %v16314_v47  ;;  %v8853_v52 = vunpack.c.l.b16 %v17224_v53  ;;  %10042 = vmatpush.bf16.msra.mxu2 %v11221_v63 }
 0x699   : > { %v9089_v21 = vrot.slane %v9087_v58, 3  ;;  %v9092_v38 = vrot.slane %v9090_v7, 4  ;;  %v8518_v31 = vpack.c.bf16 %v8509_v40, %v8509_v40  ;;  %v8547_v32 = vmul.f32 %v16919_v30, %v18324_v29 }
 0x69a   : > { %v8548_v56 = vmul.f32 %v16922_v25, %v18325_v45  ;;  %v9305_v6 = vsel %vm3413_vm6, %v17149_v37, %v17226_v12  ;;  %v8519_v3 = vpack.c.bf16 %v8510_v51, %v8510_v51  ;;  %v8854_v19 = vpack.c.b16 %v8853_v52, %v8757_v10  ;;  %11456 = vmatpush.bf16.msrb.mxu3 %v16908_v8  ;;  %v11439_v37 = vld [vmem:[#allocation6 + $0x10] sm:$0xff]   ;;  %v8587_v51 = vld [vmem:[#allocation6 + $0xc] sm:$0xf] }
 0x69b   : > { %9937 = vmatmul.bf16.gmra.mxu2 %v17222_v50  ;;  %v17246_v1 = vor.u32 %v9092_v38, %v9089_v21  ;;  %v8549_v9 = vmul.f32 %v16988_v42, %v18326_v4  ;;  %v17262_v30 = vrot.slane %v9382_v59, 4  ;;  %v8550_v26 = vmul.f32 %v16991_v60, %v18327_v2  ;;  %10129 = vmatpush.bf16.msrb.mxu1 %v11245_v11 }
 0x69c   : > { %v8556_v58 = vpack.c.bf16 %v8547_v32, %v8547_v32  ;;  %v8714_v7 = vunpack.c.l.b16 %v8518_v31  ;;  %v8715_v20 = vunpack.c.l.b16 %v8519_v3  ;;  %v8856_v10 = vshrl.u32 %v8854_v19, 16 }
 0x69d   : > { %v9094_v43 = vsel %vm3413_vm6, %v9085_v13, %v17246_v1  ;;  %v8859_v5 = vshll.u32 %v8854_v19, 16  ;;  %v8557_v21 = vpack.c.bf16 %v8548_v56, %v8548_v56  ;;  %v8558_v38 = vpack.c.bf16 %v8549_v9, %v8549_v9  ;;  %v17266_v13 = vld [vmem:[#allocation6 + $0x18] sm:$0xff]  }
 0x69e   : > { %10024 = vmatmul.bf16.gmra.mxu1 %v9305_v6  ;;  %v8559_v8 = vpack.c.bf16 %v8550_v26, %v8550_v26  ;;  %v8806_v40 = vunpack.c.l.b16 %v8556_v58  ;;  %v8721_v59 = vpack.c.b16 %v8715_v20, %v8714_v7  ;;  %v8858_v63 = vrot.slane %v8856_v10, 4  ;;  %11457 = vmatpush.bf16.msrb.mxu3 %v16939_v35 }
 0x69f   : > { %v8861_v52 = vrot.slane %v8859_v5, 5  ;;  %v11395_v33 = vunpack.c.l.bf16 %v11439_v37  ;;  %v8807_v32 = vunpack.c.l.b16 %v8557_v21  ;;  %v8808_v11 = vunpack.c.l.b16 %v8558_v38 }
 0x6a0   : > { %v8809_v31 = vunpack.c.l.b16 %v8559_v8  ;;  %v11396_v3 = vunpack.c.h.bf16 %v11439_v37  ;;  %v17269_v53 = vrot.slane %v8721_v59, 5  ;;  %v11399_v56 = vunpack.c.l.bf16 %v17266_v13 }
 0x6a1   : > { %v17271_v6 = vor.u32 %v8861_v52, %v8858_v63  ;;  %v8596_v19 = vunpack.c.l.bf16 %v8587_v51  ;;  %v8815_v9 = vpack.c.b16 %v8807_v32, %v8806_v40  ;;  %v8606_v58 = vmul.f32 %v11395_v33, %v18325_v45 }
 0x6a2   : > { %v8816_v26 = vpack.c.b16 %v8809_v31, %v8808_v11  ;;  %v8607_v7 = vmul.f32 %v11396_v3, %v18326_v4  ;;  %v8728_v35 = vsel %vm2405_vm7, %v17203_v61, %v17269_v53  ;;  %v8608_v10 = vmul.f32 %v11399_v56, %v18327_v2 }
 0x6a3   : > { %v8863_v37 = vsel %vm2144_vm0, %v17169_v14, %v17271_v6  ;;  %v8605_v20 = vmul.f32 %v8596_v19, %v18324_v29  ;;  %v9208_v5 = vshrl.u32 %v8728_v35, 16  ;;  %v9211_v21 = vshll.u32 %v8728_v35, 16 }
 0x6a4   : > { %v9325_v38 = vshrl.u32 %v8863_v37, 16  ;;  %v9328_v45 = vshll.u32 %v8863_v37, 16  ;;  %v8820_v4 = vrot.slane %v8815_v9, 5  ;;  %v17285_v33 = vrot.slane %v8816_v26, 5 }
 0x6a5   : > { %10106 = vmatmul.bf16.gmra.mxu0 %v17222_v50  ;;  %9956 = vmatmul.bf16.vlgmr.msra.gmra.mxu3 %v9094_v43  ;;  %v8614_v8 = vpack.c.bf16 %v8605_v20, %v8605_v20  ;;  %v8615_v61 = vpack.c.bf16 %v8606_v58, %v8606_v58  ;;  %v9210_v40 = vrot.slane %v9208_v5, 3  ;;  %v9213_v51 = vrot.slane %v9211_v21, 4 }
 0x6a6   : > { %v9327_v59 = vrot.slane %v9325_v38, 3  ;;  %v9330_v14 = vrot.slane %v9328_v45, 4  ;;  %v8822_v29 = vsel %vm2405_vm7, %v8820_v4, %v17285_v33  ;;  %v9130_v2 = vshrl.u32 %v8820_v4, 16 }
 0x6a7   : > { %v9133_v63 = vshll.u32 %v8820_v4, 16  ;;  %v8616_v50 = vpack.c.bf16 %v8607_v7, %v8607_v7  ;;  %v9138_v52 = vshrl.u32 %v8822_v29, 16  ;;  %v9141_v32 = vshll.u32 %v8822_v29, 16 }
 0x6a8   : > { %v18329_v43 = vor.u32 %v17207_v36, %v17205_v17  ;;  %v9385_v31 = vor.u32 %v17262_v30, %v17237_v41  ;;  %v8617_v3 = vpack.c.bf16 %v8608_v10, %v8608_v10  ;;  %v17296_v56 = vor.u32 %v9213_v51, %v9210_v40 }
 0x6a9   : > { %v17298_v19 = vor.u32 %v9330_v14, %v9327_v59  ;;  %v9132_v9 = vrot.slane %v9130_v2, 3  ;;  %v9135_v26 = vrot.slane %v9133_v63, 4  ;;  %v8873_v58 = vunpack.c.l.b16 %v8614_v8 }
 0x6aa   : > { %v9359_v11 = vsel %vm3413_vm6, %v17201_v18, %v18329_v43  ;;  %v8874_v7 = vunpack.c.l.b16 %v8615_v61  ;;  %v8875_v35 = vunpack.c.l.b16 %v8616_v50  ;;  %v8876_v37 = vunpack.c.l.b16 %v8617_v3  ;;  %v8503_v3 = vld [vmem:[#allocation6 + $0x24] sm:$0x1] }
 0x6ab   : > { %9942 = vmatmul.bf16.gmra.mxu2 %v9359_v11  ;;  %v9140_v20 = vrot.slane %v9138_v52, 3  ;;  %v9143_v17 = vrot.slane %v9141_v32, 4  ;;  %v8511_v36 = vmul.f32 %v17056_v34, %v16507_v48  ;;  %v8512_v41 = vmul.f32 %v17119_v44, %v16520_v24 }
 0x6ac   : > { %v9386_v30 = vsel %vm3413_vm6, %v17226_v12, %v9385_v31  ;;  %v8882_v10 = vpack.c.b16 %v8874_v7, %v8873_v58  ;;  %v8883_v5 = vpack.c.b16 %v8876_v37, %v8875_v35  ;;  %v8551_v21 = vmul.f32 %v17051_v57, %v16291_v55  ;;  %v11441_v31 = vld [vmem:[#allocation6 + $0x20] sm:$0xff]  }
 0x6ad   : > { %v9215_v38 = vsel %vm3413_vm6, %v17246_v1, %v17296_v56  ;;  %v9332_v45 = vsel %vm3413_vm6, %v17201_v18, %v17298_v19  ;;  %v8520_v4 = vpack.c.bf16 %v8511_v36, %v8511_v36  ;;  %v8521_v8 = vpack.c.bf16 %v8512_v41, %v8512_v41 }
 0x6ae   : > { %10029 = vmatmul.bf16.gmra.mxu1 %v9386_v30  ;;  %v9136_v61 = vor.u32 %v9135_v26, %v9132_v9  ;;  %v8887_v40 = vrot.slane %v8882_v10, 5  ;;  %v17314_v51 = vrot.slane %v8883_v5, 5  ;;  %v8552_v12 = vmul.f32 %v17056_v34, %v16314_v47 }
 0x6af   : > { %v17318_v59 = vor.u32 %v9143_v17, %v9140_v20  ;;  %v8716_v14 = vunpack.c.l.b16 %v8520_v4  ;;  %v8717_v29 = vunpack.c.l.b16 %v8521_v8  ;;  %v8560_v2 = vpack.c.bf16 %v8551_v21, %v8551_v21 }
 0x6b0   : > { %v8889_v1 = vsel %vm2405_vm7, %v8887_v40, %v17314_v51  ;;  %v9181_v63 = vshrl.u32 %v8887_v40, 16  ;;  %v9184_v50 = vshll.u32 %v8887_v40, 16  ;;  %v11400_v18 = vunpack.c.h.bf16 %v17266_v13 }
 0x6b1   : > { %v9189_v52 = vshrl.u32 %v8889_v1, 16  ;;  %v9192_v32 = vshll.u32 %v8889_v1, 16  ;;  %v8722_v43 = vpack.c.b16 %v8717_v29, %v8716_v14  ;;  %v8561_v11 = vpack.c.bf16 %v8552_v12, %v8552_v12 }
 0x6b2   : > { %v9183_v9 = vrot.slane %v9181_v63, 3  ;;  %v9406_v26 = vshrl.u32 %v17271_v6, 16  ;;  %v9409_v58 = vshll.u32 %v17271_v6, 16  ;;  %v8810_v7 = vunpack.c.l.b16 %v8560_v2 }
 0x6b3   : > { %v9191_v35 = vrot.slane %v9189_v52, 3  ;;  %v9194_v37 = vrot.slane %v9192_v32, 4  ;;  %v17325_v20 = vrot.slane %v8722_v43, 5  ;;  %v8811_v17 = vunpack.c.l.b16 %v8561_v11  ;;  %v8594_v43 = vld [vmem:[#allocation6 + $0x28] sm:$0xf] }
 0x6b4   : > { %v9186_v13 = vrot.slane %v9184_v50, 4  ;;  %v11403_v36 = vunpack.c.l.bf16 %v11441_v31  ;;  %v8609_v41 = vmul.f32 %v11400_v18, %v16291_v55  ;;  %v8504_v30 = vunpack.c.l.bf16 %v8503_v3 }
 0x6b5   : > { %10111 = vmatmul.bf16.gmra.mxu0 %v9332_v45  ;;  %9961 = vmatmul.bf16.gmra.mxu3 %v9215_v38  ;;  %v9145_v10 = vsel %vm3413_vm6, %v9136_v61, %v17318_v59  ;;  %v8730_v6 = vsel %vm2405_vm7, %v17269_v53, %v17325_v20  ;;  %v8817_v5 = vpack.c.b16 %v8811_v17, %v8810_v7  ;;  %v17334_v21 = vunpack.c.l.bf16 %v17127_v16 }
 0x6b6   : > { %v17336_v45 = vor.u32 %v9194_v37, %v9191_v35  ;;  %v9280_v4 = vshrl.u32 %v8730_v6, 16  ;;  %v8610_v38 = vmul.f32 %v11403_v36, %v16314_v47  ;;  %v8618_v8 = vpack.c.bf16 %v8609_v41, %v8609_v41 }
 0x6b7   : > { %v9283_v40 = vshll.u32 %v8730_v6, 16  ;;  %v17339_v55 = vrot.slane %v8817_v5, 5  ;;  %v8513_v12 = vmul.f32 %v8504_v30, %v16487_v27  ;;  %v8553_v61 = vmul.f32 %v17119_v44, %v16507_v48 }
 0x6b8   : > { %v9187_v14 = vor.u32 %v9186_v13, %v9183_v9  ;;  %v9408_v53 = vrot.slane %v9406_v26, 3  ;;  %v9411_v29 = vrot.slane %v9409_v58, 4  ;;  %v8619_v2 = vpack.c.bf16 %v8610_v38, %v8610_v38 }
 0x6b9   : > { %v8824_v16 = vsel %vm2405_vm7, %v17285_v33, %v17339_v55  ;;  %v8522_v1 = vpack.c.bf16 %v8513_v12, %v8513_v12  ;;  %v8554_v47 = vmul.f32 %v17334_v21, %v16520_v24  ;;  %v8562_v63 = vpack.c.bf16 %v8553_v61, %v8553_v61 }
 0x6ba   : > { %v9196_v50 = vsel %vm3413_vm6, %v9187_v14, %v17336_v45  ;;  %v9282_v18 = vrot.slane %v9280_v4, 3  ;;  %v8877_v52 = vunpack.c.l.b16 %v8618_v8  ;;  %v8878_v32 = vunpack.c.l.b16 %v8619_v2  ;;  %v8595_v2 = vld [vmem:[#allocation6 + $0x2c] sm:$0x1] }
 0x6bb   : > { %10043 = vmatmul.bf16.vlgmr.msra.gmra.mxu2 %v9145_v10  ;;  %v9285_v11 = vrot.slane %v9283_v40, 4  ;;  %v8718_v3 = vunpack.c.l.b16 %v8522_v1  ;;  %v8563_v9 = vpack.c.bf16 %v8554_v47, %v8554_v47  ;;  %v11404_v26 = vunpack.c.h.bf16 %v11441_v31 }
 0x6bc   : > { %v9235_v58 = vshrl.u32 %v8824_v16, 16  ;;  %v9238_v7 = vshll.u32 %v8824_v16, 16  ;;  %v8884_v35 = vpack.c.b16 %v8878_v32, %v8877_v52  ;;  %v8812_v33 = vunpack.c.l.b16 %v8562_v63 }
 0x6bd   : > { %v8723_v37 = vpack.c.b16 %v8718_v3, %v8718_v3  ;;  %v8813_v17 = vunpack.c.l.b16 %v8563_v9  ;;  %v8603_v13 = vunpack.c.l.bf16 %v8594_v43  ;;  %v8611_v36 = vmul.f32 %v11404_v26, %v16507_v48 }
 0x6be   : > { %10130 = vmatmul.bf16.vlgmr.msrb.gmra.mxu1 %v9196_v50  ;;  %v9412_v41 = vor.u32 %v9411_v29, %v9408_v53  ;;  %v8890_v30 = vrot.slane %v8884_v35, 5  ;;  %v17352_v10 = vor.u32 %v9285_v11, %v9282_v18  ;;  %v9237_v4 = vrot.slane %v9235_v58, 3  ;;  %v8545_v53 = vld [vmem:[#allocation6 + $0x28] sm:$0x1] }
 0x6bf   : > { %v8612_v6 = vmul.f32 %v8603_v13, %v16520_v24  ;;  %v8620_v5 = vpack.c.bf16 %v8611_v36, %v8611_v36  ;;  %v9240_v38 = vrot.slane %v9238_v7, 4  ;;  %v8731_v8 = vrot.slane %v8723_v37, 5 }
 0x6c0   : > { %v8891_v31 = vsel %vm2405_vm7, %v17314_v51, %v8890_v30  ;;  %v8818_v61 = vpack.c.b16 %v8813_v17, %v8812_v33  ;;  %v9413_v14 = vsel %vm3413_vm6, %v17298_v19, %v9412_v41  ;;  %v9287_v29 = vsel %vm3413_vm6, %v17296_v56, %v17352_v10  ;;  %v11236_v19 = vld [vmem:[%s17499_s7 + $0x1b8] sm:$0xff] }
 0x6c1   : > { %v9262_v40 = vshrl.u32 %v8891_v31, 16  ;;  %v9265_v12 = vshll.u32 %v8891_v31, 16  ;;  %v8621_v48 = vpack.c.bf16 %v8612_v6, %v8612_v6  ;;  %v8879_v24 = vunpack.c.l.b16 %v8620_v5  ;;  %10064 = vmatpush.bf16.msra.mxu3 %v11236_v19 }
 0x6c2   : > { %v9241_v16 = vor.u32 %v9240_v38, %v9237_v4  ;;  %v8732_v47 = vsel %vm2405_vm7, %v17325_v20, %v8731_v8  ;;  %v8825_v63 = vrot.slane %v8818_v61, 5  ;;  %v8546_v18 = vunpack.c.l.bf16 %v8545_v53  ;;  %v11234_v8 = vld [vmem:[%s17499_s7 + $0x1a8] sm:$0xff] }
 0x6c3   : > { %v9264_v1 = vrot.slane %v9262_v40, 3  ;;  %v9267_v51 = vrot.slane %v9265_v12, 4  ;;  %v8880_v50 = vunpack.c.l.b16 %v8621_v48  ;;  %v8534_v56 = vmul.f32 %v17119_v44, %v16399_v54 }
 0x6c4   : > { %v8604_v52 = vunpack.c.l.bf16 %v8595_v2  ;;  %v9361_v32 = vshrl.u32 %v8732_v47, 16  ;;  %v9364_v43 = vshll.u32 %v8732_v47, 16  ;;  %v8555_v3 = vmul.f32 %v8546_v18, %v16487_v27 }
 0x6c5   : > { %10116 = vmatmul.bf16.gmra.mxu0 %v9413_v14  ;;  %9966 = vmatmul.bf16.gmra.mxu3 %v9287_v29  ;;  %v8885_v11 = vpack.c.b16 %v8880_v50, %v8879_v24  ;;  %v9242_v20 = vsel %vm3413_vm6, %v17318_v59, %v9241_v16  ;;  %v9268_v9 = vor.u32 %v9267_v51, %v9264_v1  ;;  %v11233_v24 = vld [vmem:[%s17499_s7 + $0x1a0] sm:$0xff] }
 0x6c6   : > { %v8533_v26 = vmul.f32 %v17056_v34, %v16380_v49  ;;  %v8826_v58 = vsel %vm2405_vm7, %v17339_v55, %v8825_v63  ;;  %v8564_v35 = vpack.c.bf16 %v8555_v3, %v8555_v3  ;;  %v8613_v33 = vmul.f32 %v8604_v52, %v16487_v27  ;;  %v11235_v55 = vld [vmem:[%s17499_s7 + $0x1b0] sm:$0xff] }
 0x6c7   : > { %v8892_v7 = vrot.slane %v8885_v11, 5  ;;  %v9363_v37 = vrot.slane %v9361_v32, 3  ;;  %v9366_v17 = vrot.slane %v9364_v43, 4  ;;  %v8543_v13 = vpack.c.bf16 %v8534_v56, %v8534_v56  ;;  %10065 = vmatpush.bf16.msra.mxu3 %v11235_v55  ;;  %v11232_v11 = vld [vmem:[%s17499_s7 + $0x198] sm:$0xff] }
 0x6c8   : > { %v9269_v36 = vsel %vm3413_vm6, %v17336_v45, %v9268_v9  ;;  %v9307_v41 = vshrl.u32 %v8826_v58, 16  ;;  %v9310_v59 = vshll.u32 %v8826_v58, 16  ;;  %v8542_v5 = vpack.c.bf16 %v8533_v26, %v8533_v26 }
 0x6c9   : > { %v8893_v6 = vsel %vm2405_vm7, %v8890_v30, %v8892_v7  ;;  %v8814_v4 = vunpack.c.l.b16 %v8564_v35  ;;  %v8622_v38 = vpack.c.bf16 %v8613_v33, %v8613_v33  ;;  %v9367_v31 = vor.u32 %v9366_v17, %v9363_v37 }
 0x6ca   : > { %v8749_v27 = vunpack.c.l.b16 %v8543_v13  ;;  %v9309_v45 = vrot.slane %v9307_v41, 3  ;;  %v9312_v40 = vrot.slane %v9310_v59, 4  ;;  %v9334_v12 = vshrl.u32 %v8893_v6, 16 }
 0x6cb   : > { %10048 = vmatmul.bf16.gmra.mxu2 %v9242_v20  ;;  %v9337_v61 = vshll.u32 %v8893_v6, 16  ;;  %v8748_v14 = vunpack.c.l.b16 %v8542_v5  ;;  %v8819_v30 = vpack.c.b16 %v8814_v4, %v8814_v4  ;;  %v8881_v48 = vunpack.c.l.b16 %v8622_v38  ;;  %10066 = vmatpush.bf16.msra.mxu3 %v11234_v8  ;;  %v8565_v6 = vld [vmem:[#allocation6 + $0x8] sm:$0x8] }
 0x6cc   : > { %v9368_v53 = vsel %vm3413_vm6, %v17352_v10, %v9367_v31  ;;  %v9313_v2 = vor.u32 %v9312_v40, %v9309_v45  ;;  %v9336_v1 = vrot.slane %v9334_v12, 3  ;;  %v8535_v56 = vmul.f32 %v17334_v21, %v16382_v62 }
 0x6cd   : > { %v8754_v29 = vpack.c.b16 %v8749_v27, %v8748_v14  ;;  %v9339_v51 = vrot.slane %v9337_v61, 4  ;;  %v8827_v47 = vrot.slane %v8819_v30, 5  ;;  %v8886_v19 = vpack.c.b16 %v8881_v48, %v8881_v48  ;;  %v11229_v27 = vld [vmem:[%s17499_s7 + $0x180] sm:$0xff] }
 0x6ce   : > { %10135 = vmatmul.bf16.gmra.mxu1 %v9269_v36  ;;  %v9314_v10 = vsel %vm3413_vm6, %v9241_v16, %v9313_v2  ;;  %v8544_v26 = vpack.c.bf16 %v8535_v56, %v8535_v56  ;;  %v11231_v16 = vld [vmem:[%s17499_s7 + $0x190] sm:$0xff]  ;;  %v8567_v8 = vunpack.c.l.bf16 %v8565_v6  ;;  %v8571_v12 = vmul.f32 %v16988_v42, %v16020_v15 }
 0x6cf   : > { %v9289_v50 = vshrl.u32 %v8754_v29, 16  ;;  %v9292_v18 = vshll.u32 %v8754_v29, 16  ;;  %10067 = vmatpush.bf16.msra.mxu3 %v11233_v24  ;;  %v9340_v52 = vor.u32 %v9339_v51, %v9336_v1  ;;  %v8828_v32 = vsel %vm2405_vm7, %v8825_v63, %v8827_v47 }
 0x6d0   : > { %v8894_v43 = vrot.slane %v8886_v19, 5  ;;  %v9388_v35 = vshrl.u32 %v8828_v32, 16  ;;  %v9391_v33 = vshll.u32 %v8828_v32, 16  ;;  %v8750_v17 = vunpack.c.l.b16 %v8544_v26 }
 0x6d1   : > { %v9291_v3 = vrot.slane %v9289_v50, 3  ;;  %v9294_v20 = vrot.slane %v9292_v18, 4  ;;  %v9341_v58 = vsel %vm3413_vm6, %v9268_v9, %v9340_v52  ;;  %v11230_v9 = vld [vmem:[%s17499_s7 + $0x188] sm:$0xff]  ;;  %v8569_v30 = vmul.f32 %v8567_v8, %v16134_v0  ;;  %v17423_v0 = vld [vmem:[%s17500_s8] ss:$0 sm:$0xff] }
 0x6d2   : > { %v8895_v63 = vsel %vm2405_vm7, %v8892_v7, %v8894_v43  ;;  %v9390_v13 = vrot.slane %v9388_v35, 3  ;;  %v9393_v36 = vrot.slane %v9391_v33, 4  ;;  %v8755_v4 = vpack.c.b16 %v8750_v17, %v8750_v17 }
 0x6d3   : > { %10068 = vmatpush.bf16.msra.mxu3 %v11232_v11  ;;  %v9295_v37 = vor.u32 %v9294_v20, %v9291_v3  ;;  %v9415_v41 = vshrl.u32 %v8895_v63, 16  ;;  %v9418_v59 = vshll.u32 %v8895_v63, 16  ;;  %v8570_v48 = vmul.f32 %v16922_v25, %v16167_v39 }
 0x6d4   : > { %v9394_v38 = vor.u32 %v9393_v36, %v9390_v13  ;;  %v9370_v45 = vshrl.u32 %v8755_v4, 16  ;;  %v9373_v40 = vshll.u32 %v8755_v4, 16  ;;  %v8580_v24 = vpack.c.bf16 %v8571_v12, %v8571_v12 }
 0x6d5   : > { %9971 = vmatmul.bf16.gmra.mxu3 %v9368_v53  ;;  %v9296_v5 = vsel %vm3413_vm6, %v17102_v28, %v9295_v37  ;;  %v9417_v55 = vrot.slane %v9415_v41, 3  ;;  %v9420_v7 = vrot.slane %v9418_v59, 4  ;;  %v8572_v28 = vmul.f32 %v16991_v60, %v18321_v23 }
 0x6d6   : > { %v9395_v61 = vsel %vm3413_vm6, %v9313_v2, %v9394_v38  ;;  %v9372_v53 = vrot.slane %v9370_v45, 3  ;;  %v9375_v29 = vrot.slane %v9373_v40, 4  ;;  %v8578_v42 = vpack.c.bf16 %v8569_v30, %v8569_v30 }
 0x6d7   : > { %10069 = vmatpush.bf16.msra.mxu3 %v11231_v16  ;;  %v9421_v14 = vor.u32 %v9420_v7, %v9417_v55  ;;  %v8581_v1 = vpack.c.bf16 %v8572_v28, %v8572_v28  ;;  %v8579_v23 = vpack.c.bf16 %v8570_v48, %v8570_v48  ;;  %v8840_v2 = vunpack.c.l.b16 %v8580_v24 }
 0x6d8   : > { %v9376_v60 = vor.u32 %v9375_v29, %v9372_v53  ;;  %v8838_v19 = vunpack.c.l.b16 %v8578_v42  ;;  %v8575_v55 = vmul.f32 %v17119_v44, %v16380_v49  ;;  %v8576_v7 = vmul.f32 %v17334_v21, %v16399_v54  ;;  %v18330_v44 = vld [vmem:[#allocation82_spill] sm:$0xff] }
 0x6d9   : > { %v9422_v51 = vsel %vm3413_vm6, %v9340_v52, %v9421_v14  ;;  %v8841_v47 = vunpack.c.l.b16 %v8581_v1  ;;  %v8839_v50 = vunpack.c.l.b16 %v8579_v23  ;;  %v8574_v52 = vmul.f32 %v17056_v34, %v18323_v22 }
 0x6da   : > { %v9377_v39 = vsel %vm3413_vm6, %v9295_v37, %v9376_v60  ;;  %v8584_v45 = vpack.c.bf16 %v8575_v55, %v8575_v55  ;;  %v8585_v40 = vpack.c.bf16 %v8576_v7, %v8576_v7  ;;  %v8568_v24 = vunpack.c.l.bf16 %v18330_v44 }
 0x6db   : > { %10053 = vmatmul.bf16.gmra.mxu2 %v9314_v10  ;;  %10070 = vmatpush.bf16.msra.mxu3 %v11230_v9  ;;  %v8848_v25 = vpack.c.b16 %v8841_v47, %v8840_v2  ;;  %v8847_v56 = vpack.c.b16 %v8839_v50, %v8838_v19  ;;  %v8573_v10 = vmul.f32 %v17051_v57, %v18322_v46 }
 0x6dc   : > { %v8583_v33 = vpack.c.bf16 %v8574_v52, %v8574_v52  ;;  %v8844_v30 = vunpack.c.l.b16 %v8584_v45  ;;  %v8845_v48 = vunpack.c.l.b16 %v8585_v40  ;;  %v8577_v42 = vmul.f32 %v8568_v24, %v16382_v62 }
 0x6dd   : > { %v9155_v43 = vshrl.u32 %v8848_v25, 16  ;;  %v9158_v11 = vshll.u32 %v8848_v25, 16  ;;  %v9147_v26 = vshrl.u32 %v8847_v56, 16  ;;  %v8582_v35 = vpack.c.bf16 %v8573_v10, %v8573_v10 }
 0x6de   : > { %10140 = vmatmul.bf16.gmra.mxu1 %v9341_v58  ;;  %v9150_v58 = vshll.u32 %v8847_v56, 16  ;;  %v8843_v57 = vunpack.c.l.b16 %v8583_v33  ;;  %v8850_v49 = vpack.c.b16 %v8845_v48, %v8844_v30  ;;  %v8586_v47 = vpack.c.bf16 %v8577_v42, %v8577_v42 }
 0x6df   : > { %10071 = vmatpush.bf16.msra.mxu3 %v11229_v27  ;;  %v9157_v16 = vrot.slane %v9155_v43, 3  ;;  %v9160_v63 = vrot.slane %v9158_v11, 4  ;;  %v9149_v17 = vrot.slane %v9147_v26, 3  ;;  %v8842_v46 = vunpack.c.l.b16 %v8582_v35 }
 0x6e0   : > { %v9152_v13 = vrot.slane %v9150_v58, 4 }
 0x6e1   : > { %v9161_v34 = vor.u32 %v9160_v63, %v9157_v16  ;;  %v8849_v9 = vpack.c.b16 %v8843_v57, %v8842_v46 }
 0x6e2   : > { %v9153_v59 = vor.u32 %v9152_v13, %v9149_v17 }
 0x6e3   : > { %v9247_v38 = vshll.u32 %v8849_v9, 16 }
 0x6e4   : > { %v9162_v6 = vsel %vm3413_vm6, %v9153_v59, %v9161_v34 }
 0x6e5   : > { %9995 = vmatmul.bf16.vlgmr.msrb.gmra.mxu3 %v9296_v5  ;;  %v9244_v5 = vshrl.u32 %v8849_v9, 16  ;;  %v9249_v8 = vrot.slane %v9247_v38, 4 }
 0x6e7   : > { %v9899_v31 = vpop.f32.mrf.mxu3 }
 0x6e8   : > { %v9900_v32 = vadd.f32 %v17423_v0, %v9899_v31  ;;  %v9246_v31 = vrot.slane %v9244_v5, 3 }
 0x6ea   : > { %v9250_v14 = vor.u32 %v9249_v8, %v9246_v31 }
 0x6eb   : > { %10058 = vmatmul.bf16.gmra.mxu2 %v9395_v61 }
 0x6ec   : > { %v9251_v29 = vsel %vm3413_vm6, %v9161_v34, %v9250_v14 }
 0x6ee   : > { %10145 = vmatmul.bf16.gmra.mxu1 %v9422_v51  ;;  %v9316_v51 = vshrl.u32 %v8850_v49, 16 }
 0x6ef   : > { %v9901_v15 = vpop.f32.mrf.mxu3 }
 0x6f0   : > { %v9902_v22 = vadd.f32 %v17423_v0, %v9901_v15  ;;  %v9319_v15 = vshll.u32 %v8850_v49, 16  ;;  %v9318_v60 = vrot.slane %v9316_v51, 3 }
 0x6f2   : > { %v9321_v2 = vrot.slane %v9319_v15, 4  ;;  %v9986_v56 = vpop.f32.mrf.mxu0 }
 0x6f4   : > { %v9322_v25 = vor.u32 %v9321_v2, %v9318_v60 }
 0x6f5   : > { %10000 = vmatmul.bf16.gmra.mxu3 %v9377_v39 }
 0x6f6   : > { %v9323_v52 = vsel %vm3413_vm6, %v9250_v14, %v9322_v25 }
 0x6f7   : > { %v9904_v18 = vpop.f32.mrf.mxu3 }
 0x6f8   : > { %v9905_v27 = vadd.f32 %v17423_v0, %v9904_v18  ;;  %v8846_v18 = vunpack.c.l.b16 %v8586_v47 }
 0x6fa   : > { %v9928_v3 = vpop.f32.mrf.mxu2  ;;  %v9988_v17 = vpop.f32.mrf.mxu0 }
 0x6fb   : > { %v17431_v20 = vadd.f32 %v9928_v3, %v9900_v32  ;;  %v8851_v32 = vpack.c.b16 %v8846_v18, %v8846_v18  ;;  %v10015_v11 = vpop.f32.mrf.mxu1 }
 0x6fd   : > { %v9397_v26 = vshrl.u32 %v8851_v32, 16  ;;  %v9400_v58 = vshll.u32 %v8851_v32, 16 }
 0x6ff   : > { %v9906_v37 = vpop.f32.mrf.mxu3  ;;  %v9399_v16 = vrot.slane %v9397_v26, 3  ;;  %v9402_v63 = vrot.slane %v9400_v58, 4 }
 0x700   : > { %v9907_v53 = vadd.f32 %v17423_v0, %v9906_v37 }
 0x701   : > { %v9403_v57 = vor.u32 %v9402_v63, %v9399_v16 }
 0x702   : > { %v9930_v36 = vpop.f32.mrf.mxu2  ;;  %v9991_v9 = vpop.f32.mrf.mxu0 }
 0x703   : > { %v9931_v41 = vadd.f32 %v9930_v36, %v9902_v22  ;;  %v10017_v13 = vpop.f32.mrf.mxu1  ;;  %v9404_v36 = vsel %vm3413_vm6, %v9322_v25, %v9403_v57 }
 0x705   : > { %10072 = vmatmul.bf16.vlgmr.msra.gmra.mxu3 %v9162_v6 }
 0x708   : > { %v9909_v4 = vpop.f32.mrf.mxu3 }
 0x709   : > { %v9910_v23 = vadd.f32 %v17423_v0, %v9909_v4 }
 0x70a   : > { %v9993_v31 = vpop.f32.mrf.mxu0 }
 0x70b   : > { %v10020_v4 = vpop.f32.mrf.mxu1 }
 0x70e   : > { %v9933_v12 = vpop.f32.mrf.mxu2 }
 0x70f   : > { %v9934_v28 = vadd.f32 %v9933_v12, %v9905_v27 }
 0x710   : > { %v9911_v61 = vpop.f32.mrf.mxu3 }
 0x711   : > { %v9912_v10 = vadd.f32 %v17423_v0, %v9911_v61 }
 0x712   : > { %v10102_v18 = vpop.f32.mrf.mxu0 }
 0x713   : > { %v10022_v8 = vpop.f32.mrf.mxu1 }
 0x715   : > { %10077 = vmatmul.bf16.gmra.mxu3 %v9251_v29 }
 0x716   : > { %v9935_v54 = vpop.f32.mrf.mxu2 }
 0x717   : > { %v9936_v21 = vadd.f32 %v9935_v54, %v9907_v53 }
 0x718   : > { %v9914_v1 = vpop.f32.mrf.mxu3 }
 0x719   : > { %v9915_v30 = vadd.f32 %v17423_v0, %v9914_v1 }
 0x71b   : > { %v10025_v48 = vpop.f32.mrf.mxu1 }
 0x71e   : > { %v9938_v19 = vpop.f32.mrf.mxu2 }
 0x71f   : > { %v9939_v50 = vadd.f32 %v9938_v19, %v9910_v23 }
 0x720   : > { %v9916_v39 = vpop.f32.mrf.mxu3 }
 0x721   : > { %v9917_v44 = vadd.f32 %v17423_v0, %v9916_v39 }
 0x723   : > { %v10027_v54 = vpop.f32.mrf.mxu1 }
 0x725   : > { %10082 = vmatmul.bf16.gmra.mxu3 %v9323_v52 }
 0x726   : > { %v9940_v43 = vpop.f32.mrf.mxu2 }
 0x727   : > { %v9941_v62 = vadd.f32 %v9940_v43, %v9912_v10  ;;  %v10104_v10 = vpop.f32.mrf.mxu0 }
 0x728   : > { %v9957_v3 = vpop.f32.mrf.mxu3 }
 0x729   : > { %v9958_v35 = vadd.f32 %v9957_v3, %v17431_v20 }
 0x72b   : > { %v9987_v33 = vadd.f32 %v9986_v56, %v9958_v35  ;;  %v17453_v23 = vpop.f32.mrf.mxu1 }
 0x72d   : > { %v10016_v37 = vadd.f32 %v10015_v11, %v9987_v33 }
 0x72e   : > { %v9943_v14 = vpop.f32.mrf.mxu2 }
 0x72f   : > { %v9944_v53 = vadd.f32 %v9943_v14, %v9915_v30  ;;  %v10107_v58 = vpop.f32.mrf.mxu0 }
 0x730   : > { %v9959_v46 = vpop.f32.mrf.mxu3 }
 0x731   : > { %v9960_v22 = vadd.f32 %v9959_v46, %v9931_v41 }
 0x733   : > { %v9989_v34 = vadd.f32 %v9988_v17, %v9960_v22  ;;  %v17455_v1 = vpop.f32.mrf.mxu1 }
 0x735   : > { %10087 = vmatmul.bf16.gmra.mxu3 %v9404_v36  ;;  %v10018_v59 = vadd.f32 %v10017_v13, %v9989_v34 }
 0x736   : > { %v9945_v49 = vpop.f32.mrf.mxu2 }
 0x737   : > { %v9946_v24 = vadd.f32 %v9945_v49, %v9917_v44 }
 0x738   : > { %v9962_v6 = vpop.f32.mrf.mxu3 }
 0x739   : > { %v9963_v5 = vadd.f32 %v9962_v6, %v9934_v28 }
 0x73b   : > { %v9992_v38 = vadd.f32 %v9991_v9, %v9963_v5  ;;  %v10131_v56 = vpop.f32.mrf.mxu1  ;;  %v10109_v5 = vpop.f32.mrf.mxu0 }
 0x73d   : > { %v10021_v20 = vadd.f32 %v10020_v4, %v9992_v38 }
 0x73e   : > { %v10044_v19 = vpop.f32.mrf.mxu2 }
 0x73f   : > { %v10045_v43 = vadd.f32 %v10044_v19, %v10016_v37 }
 0x740   : > { %v9964_v55 = vpop.f32.mrf.mxu3 }
 0x741   : > { %v9965_v7 = vadd.f32 %v9964_v55, %v9936_v21 }
 0x743   : > { %v9994_v27 = vadd.f32 %v9993_v31, %v9965_v7  ;;  %v10133_v52 = vpop.f32.mrf.mxu1 }
 0x745   : > { %v10023_v45 = vadd.f32 %v10022_v8, %v9994_v27 }
 0x746   : > { %v10046_v39 = vpop.f32.mrf.mxu2 }
 0x747   : > { %v10047_v3 = vadd.f32 %v10046_v39, %v10018_v59 }
 0x748   : > { %v9967_v40 = vpop.f32.mrf.mxu3 }
 0x749   : > { %v9968_v12 = vadd.f32 %v9967_v40, %v9939_v50 }
 0x74b   : > { %v10136_v16 = vpop.f32.mrf.mxu1 }
 0x750   : > { %v9969_v41 = vpop.f32.mrf.mxu3 }
 0x751   : > { %v9970_v61 = vadd.f32 %v9969_v41, %v9941_v62  ;;  %v10049_v62 = vpop.f32.mrf.mxu2  ;;  %v10112_v41 = vpop.f32.mrf.mxu0 }
 0x752   : > { %v10050_v57 = vadd.f32 %v10049_v62, %v10021_v20 }
 0x753   : > { %v10138_v4 = vpop.f32.mrf.mxu1 }
 0x758   : > { %v9972_v29 = vpop.f32.mrf.mxu3 }
 0x759   : > { %v9973_v28 = vadd.f32 %v9972_v29, %v9944_v53  ;;  %v10051_v46 = vpop.f32.mrf.mxu2 }
 0x75a   : > { %v10052_v59 = vadd.f32 %v10051_v46, %v10023_v45 }
 0x75b   : > { %v10141_v20 = vpop.f32.mrf.mxu1 }
 0x760   : > { %v9974_v21 = vpop.f32.mrf.mxu3 }
 0x761   : > { %v17451_v51 = vadd.f32 %v9974_v21, %v9946_v24  ;;  %v10054_v7 = vpop.f32.mrf.mxu2 }
 0x768   : > { %v9996_v15 = vpop.f32.mrf.mxu3 }
 0x769   : > { %v9997_v42 = vadd.f32 %v9996_v15, %v9968_v12  ;;  %v10056_v49 = vpop.f32.mrf.mxu2  ;;  %v10143_v15 = vpop.f32.mrf.mxu1 }
 0x76b   : > { %v10026_v40 = vadd.f32 %v10025_v48, %v9997_v42 }
 0x76d   : > { %v10055_v30 = vadd.f32 %v10054_v7, %v10026_v40 }
 0x770   : > { %v9998_v60 = vpop.f32.mrf.mxu3 }
 0x771   : > { %v9999_v2 = vadd.f32 %v9998_v60, %v9970_v61  ;;  %v10146_v62 = vpop.f32.mrf.mxu1 }
 0x773   : > { %v10028_v47 = vadd.f32 %v10027_v54, %v9999_v2  ;;  %v10114_v54 = vpop.f32.mrf.mxu0 }
 0x775   : > { %v10057_v21 = vadd.f32 %v10056_v49, %v10028_v47 }
 0x778   : > { %v10001_v50 = vpop.f32.mrf.mxu3 }
 0x779   : > { %v10002_v25 = vadd.f32 %v10001_v50, %v9973_v28  ;;  %v10059_v50 = vpop.f32.mrf.mxu2 }
 0x77b   : > { %v10031_v48 = vadd.f32 %v17453_v23, %v10002_v25 }
 0x780   : > { %v10003_v0 = vpop.f32.mrf.mxu3 }
 0x788   : > { %v10073_v32 = vpop.f32.mrf.mxu3 }
 0x789   : > { %v10074_v11 = vadd.f32 %v10073_v32, %v10045_v43 }
 0x78b   : > { %v10103_v26 = vadd.f32 %v10102_v18, %v10074_v11 }
 0x78d   : > { %v10132_v63 = vadd.f32 %v10131_v56, %v10103_v26  ;;  %v10004_v56 = vadd.f32 %v10003_v0, %v17451_v51 }
 0x78f   : > { %v10151_v22 = vmax.f32 %v10132_v63, 0.0  ;;  %v10033_v47 = vadd.f32 %v17455_v1, %v10004_v56  ;;  %v10148_v63 = vpop.f32.mrf.mxu1 }
 0x790   : > { %v10075_v35 = vpop.f32.mrf.mxu3 }
 0x791   : > { %v10076_v33 = vadd.f32 %v10075_v35, %v10047_v3 }
 0x793   : > { %v10105_v17 = vadd.f32 %v10104_v10, %v10076_v33  ;;  %v10060_v10 = vadd.f32 %v10059_v50, %v10031_v48 }
 0x795   : > { %v10134_v13 = vadd.f32 %v10133_v52, %v10105_v17  ;;  %v10117_v52 = vpop.f32.mrf.mxu0 }
 0x797   : > { %v10152_v34 = vmax.f32 %v10134_v13, 0.0 }
 0x798   : > { %v10078_v36 = vpop.f32.mrf.mxu3 }
 0x799   : > { %v10159_v9 = vadd.f32 %v10152_v34, %v10151_v22  ;;  %v10079_v6 = vadd.f32 %v10078_v36, %v10050_v57 }
 0x79b   : > { %v10108_v37 = vadd.f32 %v10107_v58, %v10079_v6  ;;  %v10061_v58 = vpop.f32.mrf.mxu2 }
 0x79c   : > { %v10062_v23 = vadd.f32 %v10061_v58, %v10033_v47 }
 0x79d   : > { %v10137_v38 = vadd.f32 %v10136_v16, %v10108_v37  ;;  %v10119_v51 = vpop.f32.mrf.mxu0 }
 0x79f   : > { %v10153_v55 = vmax.f32 %v10137_v38, 0.0 }
 0x7a0   : > { %v10080_v31 = vpop.f32.mrf.mxu3 }
 0x7a1   : > { %v10160_v27 = vadd.f32 %v10159_v9, %v10153_v55  ;;  %v10081_v8 = vadd.f32 %v10080_v31, %v10052_v59 }
 0x7a3   : > { %v10110_v12 = vadd.f32 %v10109_v5, %v10081_v8 }
 0x7a5   : > { %v10139_v61 = vadd.f32 %v10138_v4, %v10110_v12 }
 0x7a7   : > { %v10154_v14 = vmax.f32 %v10139_v61, 0.0 }
 0x7a8   : > { %v10083_v53 = vpop.f32.mrf.mxu3 }
 0x7a9   : > { %v10161_v29 = vadd.f32 %v10160_v27, %v10154_v14  ;;  %v10084_v28 = vadd.f32 %v10083_v53, %v10055_v30 }
 0x7ab   : > { %v10113_v44 = vadd.f32 %v10112_v41, %v10084_v28 }
 0x7ad   : > { %v10142_v24 = vadd.f32 %v10141_v20, %v10113_v44 }
 0x7af   : > { %v10155_v45 = vmax.f32 %v10142_v24, 0.0 }
 0x7b0   : > { %v10085_v60 = vpop.f32.mrf.mxu3 }
 0x7b1   : > { %v10162_v2 = vadd.f32 %v10161_v29, %v10155_v45  ;;  %v10086_v19 = vadd.f32 %v10085_v60, %v10057_v21 }
 0x7b3   : > { %v10115_v42 = vadd.f32 %v10114_v54, %v10086_v19 }
 0x7b5   : > { %v10144_v18 = vadd.f32 %v10143_v15, %v10115_v42 }
 0x7b7   : > { %v10156_v39 = vmax.f32 %v10144_v18, 0.0 }
 0x7b8   : > { %v10088_v32 = vpop.f32.mrf.mxu3 }
 0x7b9   : > { %v10163_v43 = vadd.f32 %v10162_v2, %v10156_v39  ;;  %v10089_v11 = vadd.f32 %v10088_v32, %v10060_v10 }
 0x7bb   : > { %v10118_v3 = vadd.f32 %v10117_v52, %v10089_v11 }
 0x7bd   : > { %v10147_v26 = vadd.f32 %v10146_v62, %v10118_v3 }
 0x7bf   : > { %v10157_v35 = vmax.f32 %v10147_v26, 0.0 }
 0x7c0   : > { %v10090_v25 = vpop.f32.mrf.mxu3 }
 0x7c1   : > { %v10164_v33 = vadd.f32 %v10163_v43, %v10157_v35  ;;  %v10091_v16 = vadd.f32 %v10090_v25, %v10062_v23 }
 0x7c3   : > { %v10120_v0 = vadd.f32 %v10119_v51, %v10091_v16 }
 0x7c5   : > { %v10149_v17 = vadd.f32 %v10148_v63, %v10120_v0 }
 0x7c7   : > { %v10158_v13 = vmax.f32 %v10149_v17, 0.0 }
 0x7c9   : > { %v10165_v46 = vadd.f32 %v10164_v33, %v10158_v13 }
 0x7cb   : > { %v10166_v57 = vrot.slane %v10165_v46, 4 }
 0x7cd   : > { %v10167_v22 = vadd.f32 %v10166_v57, %v10165_v46 }
 0x7cf   : > { %v10168_v1 = vrot.slane %v10167_v22, 2 }
 0x7d1   : > { %v10169_v34 = vadd.f32 %v10168_v1, %v10167_v22 }
 0x7d3   : > { %v10170_v36 = vrot.slane %v10169_v34, 1 }
 0x7d5   : > { %v10171_v9 = vadd.f32 %v10170_v36, %v10169_v34 }
 0x7d7   : > { %v10172_v6 = vmul.f32 0.015625, %v10171_v9 }
 0x7d9   : > { %10173 = vst [vmem:[%s324_s21] sm:$0x1] %v10172_v6 }
 0x7da   : > { %11545 = shalt.err (!%p11542_p3)
}
 0x7db   : > { %11459 = dma.vmem_to_hbm [thread:$0]  (%p11681_p5), %s10186_s26, 16, %s10188_s27, %s10175_s28  }
 0x7dc PF: > { %p11465_p4 = scmp.ge.s32.totalorder %s11580_s12, 2  ;;  %s10199_s24 = sand.u32 1, %s11568_s30  }
 0x7dd   : > { %s10200_s16 = scalar_lea.sflag [#allocation8], %s10199_s24 }
 0x7de   : > { %p11462_p7 = pnand %p11465_p4, %p11685_p6 }
 0x7e0   : > { %p11463_p8 = pneg %p11462_p7 }
 0x7e2   : > { %11563 = dma.done.wait (%p11463_p8), %s10200_s16, 16  }
 0x7e3   : > { %11565 = vsyncadd (%p11463_p8), %s10200_s16, 4294967280  ;;  %p19_p9 = scmp.ge.s32.totalorder %s11668_s15, 4   ;;  %s18331_s30 = smov %s11572_s10 }
 0x7e4   : > { %s18332_s10 = smov %s11576_s11  ;;  %s18333_s11 = smov %s11679_s18 }
 0x7e5   : > { %s18334_s12 = smov %s11668_s15  ;;  %21 = sbr.rel (!%p19_p9) target bundleno = 3 (0x3), region = 122 }
 0x7ea   :  { %10205 = vsyncpa [#allocation8], 1 }
 0x7eb   :  { %10207 = vsyncpa [#allocation8 + $0x1], 1 }

</bundles_post_ra>
